<compile_context>
chip_gen: v7x
topology: tpu7x:2x2x1
jax: 0.10.0
libtpu: 0.0.40
codegen_flags: <defaults>
</compile_context>

<pallas_src>
import functools

import jax
import jax.numpy as jnp
from jax.experimental import pallas as pl
from jax.experimental.pallas import tpu as pltpu

# ----------------------- small, forward-consistent hyperparameters -----------------------
INPUT_DIM = 4          # image channels
DIM = 8                # base generator width
STYLE_DIM = 8
N_DOWN = 2             # content-encoder downsamples
N_RES = 2              # residual blocks
MLP_DIM = 16
CONTENT_DIM = DIM * (2 ** N_DOWN)            # 32
N_ADAIN = N_RES * 2 * 2 * CONTENT_DIM        # (mean,std) per AdaIN layer -> 256

_VMEM_SPEC = pl.BlockSpec(memory_space=pltpu.MemorySpace.VMEM)


# ----------------------------------- Pallas kernels --------------------------------------
def _conv_block_kernel(*refs, norm, act, has_res, eps=1e-5):
    """One fused conv layer for a single sample (grid is over the batch).

    refs, in order:
      patches [KKC, M], w [Cout, KKC], b [Cout, 1],
      (gamma [Cout,1], beta [Cout,1]   if norm in {"adain","ln"}),
      (residual [Cout, M]              if has_res),
      out [Cout, M].
    Computes out = (residual +) act(norm(w @ patches + b)).
    Channel-major layout -> the 128-lane axis carries M = H*W (lane-dense).
    """
    it = iter(refs)
    p_ref, w_ref, b_ref = next(it), next(it), next(it)
    g_ref = be_ref = r_ref = None
    if norm in ("adain", "ln"):
        g_ref, be_ref = next(it), next(it)
    if has_res:
        r_ref = next(it)
    o_ref = next(it)

    y = jnp.dot(w_ref[...], p_ref[...], preferred_element_type=jnp.float32)  # [Cout, M]
    y = y + b_ref[...]

    if norm in ("in", "adain"):
        m = y.shape[1]
        mu = jnp.sum(y, axis=1, keepdims=True) / m
        var = jnp.sum((y - mu) ** 2, axis=1, keepdims=True) / m              # biased (IN)
        y = (y - mu) * jax.lax.rsqrt(var + eps)
        if norm == "adain":                      # AdaIN affine from the style MLP
            y = y * g_ref[...] + be_ref[...]
        # plain InstanceNorm2d: affine=False (PyTorch default) -> no scale/shift
    elif norm == "ln":
        n_el = y.shape[0] * y.shape[1]
        mu = jnp.sum(y, axis=(0, 1), keepdims=True) / n_el
        var = jnp.sum((y - mu) ** 2, axis=(0, 1), keepdims=True) / (n_el - 1)  # torch .std()
        y = (y - mu) / (jnp.sqrt(var) + eps)     # MUNIT LayerNorm: (x-mean)/(std+eps)
        y = y * g_ref[...] + be_ref[...]

    if act == "relu":
        y = jnp.maximum(y, 0.0)
    elif act == "tanh":
        y = jnp.tanh(y)
    if has_res:                                  # residual add (after norm, act='none')
        y = y + r_ref[...]
    o_ref[...] = y


def _style_swap_adain_kernel(feat_ref, w1_ref, b1_ref, w2_ref, b2_ref,
                             m0w_ref, m0b_ref, m1w_ref, m1b_ref, m2w_ref, m2b_ref,
                             out_ref):
    """Fused style head + style swap + AdaIN MLP.

    feat [2, 512] -> (1x1 conv + relu) -> (global-pool is identity at 1x1) ->
    (1x1 conv) -> style [2, STYLE_DIM] -> swap rows (s1<->s2) ->
    MLP(relu, relu, none) -> AdaIN params [2, N_ADAIN].  One call, no grid.
    """
    f = feat_ref[...]
    h = jnp.dot(f, w1_ref[...], preferred_element_type=jnp.float32) + b1_ref[...]
    h = jnp.maximum(h, 0.0)
    s = jnp.dot(h, w2_ref[...], preferred_element_type=jnp.float32) + b2_ref[...]
    s_swapped = jnp.concatenate([s[1:2, :], s[0:1, :]], axis=0)   # [s2; s1]
    h = jnp.dot(s_swapped, m0w_ref[...], preferred_element_type=jnp.float32) + m0b_ref[...]
    h = jnp.maximum(h, 0.0)
    h = jnp.dot(h, m1w_ref[...], preferred_element_type=jnp.float32) + m1b_ref[...]
    h = jnp.maximum(h, 0.0)
    out_ref[...] = jnp.dot(h, m2w_ref[...], preferred_element_type=jnp.float32) + m2b_ref[...]


# --------------------------------------- glue --------------------------------------------
def _im2col_nchw(x, k, stride):
    """x: padded [N, C, H, W] -> (patches [N, k*k*C, OH*OW], OH, OW).  k is small."""
    N, C, H, W = x.shape
    oh = (H - k) // stride + 1
    ow = (W - k) // stride + 1
    cols = []
    for i in range(k):
        for j in range(k):
            cols.append(x[:, :, i:i + stride * oh:stride, j:j + stride * ow:stride])
    patches = jnp.concatenate(cols, axis=1)               # [N, k*k*C, OH, OW], (i,j,c) order
    return patches.reshape(N, k * k * C, oh * ow), oh, ow


def conv_block(x, p, k, stride, pad, *, norm="none", act="none",
               gamma=None, beta=None, residual=None, ln_gb=None):
    """Fused Conv2dBlock: reflect pad -> conv -> bias -> norm -> act (+ residual).

    x: [N, Cin, H, W] -> [N, Cout, OH, OW].  One pallas_call, grid over the batch.
    """
    N = x.shape[0]
    if pad > 0:
        assert pad < x.shape[2] and pad < x.shape[3], "reflection pad larger than spatial dim"
        x = jnp.pad(x, ((0, 0), (0, 0), (pad, pad), (pad, pad)), mode="reflect")
    patches, oh, ow = _im2col_nchw(x, k, stride)
    kkc, m = patches.shape[1], patches.shape[2]
    w, b = p["w"], p["b"]                                  # [Cout, KKC], [Cout, 1]
    cout = w.shape[0]

    inputs = [patches, w, b]
    in_specs = [
        pl.BlockSpec((None, kkc, m), lambda n: (n, 0, 0)),
        pl.BlockSpec((cout, kkc), lambda n: (0, 0)),
        pl.BlockSpec((cout, 1), lambda n: (0, 0)),
    ]
    if norm == "adain":
        inputs += [gamma.reshape(N, cout, 1), beta.reshape(N, cout, 1)]
        in_specs += [pl.BlockSpec((None, cout, 1), lambda n: (n, 0, 0))] * 2
    elif norm == "ln":
        g, bb = ln_gb                                      # [Cout, 1] each, shared
        inputs += [g, bb]
        in_specs += [pl.BlockSpec((cout, 1), lambda n: (0, 0))] * 2
    has_res = residual is not None
    if has_res:
        inputs.append(residual.reshape(N, cout, m))
        in_specs.append(pl.BlockSpec((None, cout, m), lambda n: (n, 0, 0)))

    kernel = functools.partial(_conv_block_kernel, norm=norm, act=act, has_res=has_res)
    out = pl.pallas_call(
        kernel,
        out_shape=jax.ShapeDtypeStruct((N, cout, m), jnp.float32),
        grid=(N,),
        in_specs=in_specs,
        out_specs=pl.BlockSpec((None, cout, m), lambda n: (n, 0, 0)),
        compiler_params=pltpu.CompilerParams(dimension_semantics=("parallel",)),
    )(*inputs)
    return out.reshape(N, cout, oh, ow)


def upsample2x(x):
    """Nearest-neighbor 2x upsample, NCHW."""
    return jnp.repeat(jnp.repeat(x, 2, axis=2), 2, axis=3)


# ------------------------------------ parameters -----------------------------------------
def init_params(key):
    kit = iter(jax.random.split(key, 32))

    def conv(cin, cout, k):                     # column form: out = w @ patches
        w = jax.random.normal(next(kit), (cout, k * k * cin), jnp.float32) * 0.05
        return {"w": w, "b": jnp.zeros((cout, 1), jnp.float32)}

    def linear(cin, cout):                      # row form: out = x @ w + b
        w = jax.random.normal(next(kit), (cin, cout), jnp.float32) * 0.05
        return {"w": w, "b": jnp.zeros((1, cout), jnp.float32)}

    p = {}
    # content encoder: 7x7 conv + 2 stride-2 convs + N_RES IN-resblocks
    p["ce_c0"] = conv(INPUT_DIM, DIM, 7)
    p["ce_c1"] = conv(DIM, 2 * DIM, 4)
    p["ce_c2"] = conv(2 * DIM, 4 * DIM, 4)
    for r in range(N_RES):
        p[f"ce_rb{r}_c1"] = conv(CONTENT_DIM, CONTENT_DIM, 3)
        p[f"ce_rb{r}_c2"] = conv(CONTENT_DIM, CONTENT_DIM, 3)
    # style encoder: 7x7 conv + 3 stride-2 convs + (1x1-spatial conv, relu,
    # AdaptiveAvgPool(1), 1x1 conv) -- the tail collapses to a dense chain and
    # is fused with the style swap + AdaIN MLP in one pallas_call.
    p["se_c0"] = conv(INPUT_DIM, DIM, 7)
    p["se_c1"] = conv(DIM, 2 * DIM, 4)
    p["se_c2"] = conv(2 * DIM, 4 * DIM, 4)
    p["se_c3"] = conv(4 * DIM, 4 * DIM, 4)
    p["se_c4"] = linear(4 * 4 * (4 * DIM), 4 * DIM)
    p["se_out"] = linear(4 * DIM, STYLE_DIM)
    # decoder: N_RES AdaIN-resblocks + 2 (upsample, 5x5 conv, LayerNorm) + 7x7 tanh conv
    for r in range(N_RES):
        p[f"dec_rb{r}_c1"] = conv(CONTENT_DIM, CONTENT_DIM, 3)
        p[f"dec_rb{r}_c2"] = conv(CONTENT_DIM, CONTENT_DIM, 3)
    p["dec_up0"] = conv(CONTENT_DIM, CONTENT_DIM // 2, 5)
    p["dec_up0_g"] = jnp.ones((CONTENT_DIM // 2, 1), jnp.float32)
    p["dec_up0_b"] = jnp.zeros((CONTENT_DIM // 2, 1), jnp.float32)
    p["dec_up1"] = conv(CONTENT_DIM // 2, CONTENT_DIM // 4, 5)
    p["dec_up1_g"] = jnp.ones((CONTENT_DIM // 4, 1), jnp.float32)
    p["dec_up1_b"] = jnp.zeros((CONTENT_DIM // 4, 1), jnp.float32)
    p["dec_out"] = conv(CONTENT_DIM // 4, INPUT_DIM, 7)
    # MLP: style -> AdaIN params
    p["mlp_l0"] = linear(STYLE_DIM, MLP_DIM)
    p["mlp_l1"] = linear(MLP_DIM, MLP_DIM)
    p["mlp_l2"] = linear(MLP_DIM, N_ADAIN)
    return p


# -------------------------------------- AdaINGen -----------------------------------------
def encode(p, x):
    """x: [N, INPUT_DIM, 16, 16] -> (content [N, 32, 4, 4], style-head feat [N, 512])."""
    # content encoder (norm='in', activ='relu')
    h = conv_block(x, p["ce_c0"], 7, 1, 3, norm="in", act="relu")
    h = conv_block(h, p["ce_c1"], 4, 2, 1, norm="in", act="relu")
    h = conv_block(h, p["ce_c2"], 4, 2, 1, norm="in", act="relu")
    for r in range(N_RES):
        y = conv_block(h, p[f"ce_rb{r}_c1"], 3, 1, 1, norm="in", act="relu")
        h = conv_block(y, p[f"ce_rb{r}_c2"], 3, 1, 1, norm="in", act="none", residual=h)
    c = h
    # style encoder conv trunk (norm='none', activ='relu')
    s = conv_block(x, p["se_c0"], 7, 1, 3, act="relu")
    s = conv_block(s, p["se_c1"], 4, 2, 1, act="relu")
    s = conv_block(s, p["se_c2"], 4, 2, 1, act="relu")
    s = conv_block(s, p["se_c3"], 4, 2, 1, act="relu")     # [N, 32, 2, 2]
    # The last style conv has 1x1 output, so its im2col vector is the feature
    # consumed by the fused style-head / swap / MLP kernel.
    sp = jnp.pad(s, ((0, 0), (0, 0), (1, 1), (1, 1)), mode="reflect")
    patches, _, _ = _im2col_nchw(sp, 4, 2)                 # [N, 512, 1]
    feat = patches.reshape(x.shape[0], -1)                 # [N, 512]
    return c, feat


def style_swap_adain(p, feat):
    """feat [2, 512] -> AdaIN params for swapped styles [2, N_ADAIN]; one pallas_call."""
    args = [feat,
            p["se_c4"]["w"], p["se_c4"]["b"],
            p["se_out"]["w"], p["se_out"]["b"],
            p["mlp_l0"]["w"], p["mlp_l0"]["b"],
            p["mlp_l1"]["w"], p["mlp_l1"]["b"],
            p["mlp_l2"]["w"], p["mlp_l2"]["b"]]
    return pl.pallas_call(
        _style_swap_adain_kernel,
        out_shape=jax.ShapeDtypeStruct((feat.shape[0], N_ADAIN), jnp.float32),
        in_specs=[_VMEM_SPEC] * len(args),
        out_specs=_VMEM_SPEC,
    )(*args)


def decode(p, c, adain):
    """c: [N, 32, 4, 4]; adain: [N, N_ADAIN] -> image [N, INPUT_DIM, 16, 16]."""
    C = CONTENT_DIM
    h = c
    idx = 0
    for r in range(N_RES):                                 # AdaIN resblocks (mean first, then std)
        beta, gamma = adain[:, idx:idx + C], adain[:, idx + C:idx + 2 * C]
        idx += 2 * C
        y = conv_block(h, p[f"dec_rb{r}_c1"], 3, 1, 1, norm="adain", act="relu",
                       gamma=gamma, beta=beta)
        beta, gamma = adain[:, idx:idx + C], adain[:, idx + C:idx + 2 * C]
        idx += 2 * C
        h = conv_block(y, p[f"dec_rb{r}_c2"], 3, 1, 1, norm="adain", act="none",
                       gamma=gamma, beta=beta, residual=h)
    for u in range(2):                                     # nearest 2x up + 5x5 conv + LN + relu
        h = upsample2x(h)
        h = conv_block(h, p[f"dec_up{u}"], 5, 1, 2, norm="ln", act="relu",
                       ln_gb=(p[f"dec_up{u}_g"], p[f"dec_up{u}_b"]))
    return conv_block(h, p["dec_out"], 7, 1, 3, act="tanh")   # 7x7 conv + tanh


# ----------------------------- HIT_Trainer.forward equivalent ----------------------------
@jax.jit
def hit_forward(params, x1, x2):
    # x1, x2: [C, H, W] (the PyTorch forward unsqueezes the batch dim itself).
    # Both images are batched into a single encode and a single decode chain.
    x = jnp.stack([x1, x2]).astype(jnp.float32)            # [2, C, H, W]
    c, feat = encode(params, x)                            # c = [c1; c2]
    adain = style_swap_adain(params, feat)                 # AdaIN params for [s2; s1]
    out = decode(params, c, adain)                         # [decode(c1,s2); decode(c2,s1)]
    return out[0:1], out[1:2]                              # (x_ab, x_ba), NCHW


if __name__ == "__main__":
    key = jax.random.PRNGKey(0)
    kp, k1, k2 = jax.random.split(key, 3)
    params = init_params(kp)
    x1 = jax.random.normal(k1, (INPUT_DIM, 16, 16), jnp.float32)
    x2 = jax.random.normal(k2, (INPUT_DIM, 16, 16), jnp.float32)

    x_ab, x_ba = hit_forward(params, x1, x2)
    jax.block_until_ready((x_ab, x_ba))

    assert x_ab.shape == (1, INPUT_DIM, 16, 16), x_ab.shape
    assert x_ba.shape == (1, INPUT_DIM, 16, 16), x_ba.shape
    assert bool(jnp.all(jnp.isfinite(x_ab))) and bool(jnp.all(jnp.isfinite(x_ba)))
    print("KERNEL_OK")
</pallas_src>

<mosaic_0001>
module attributes {stable_mosaic.version = 11 : i64} {
  func.func @_conv_block_kernel(%arg0: i32, %arg1: memref<1x196x256xf32, #tpu.memory_space<vmem>>, %arg2: memref<8x196xf32, #tpu.memory_space<vmem>>, %arg3: memref<8x1xf32, #tpu.memory_space<vmem>>, %arg4: memref<1x8x256xf32, #tpu.memory_space<vmem>>) attributes {dimension_semantics = [#tpu.dimension_semantics<parallel>], iteration_bounds = array<i64: 2>, scalar_prefetch = 0 : i64, scratch_operands = 0 : i64, tpu.core_type = #tpu.core_type<tc>, window_params = [{transform_indices = @transform_0, window_bounds = array<i64: 1, 196, 256>}, {pipeline_mode = #tpu.pipeline_mode<synchronous>, transform_indices = @transform_1, window_bounds = array<i64: 8, 196>}, {pipeline_mode = #tpu.pipeline_mode<synchronous>, transform_indices = @transform_2, window_bounds = array<i64: 8, 1>}, {transform_indices = @transform_3, window_bounds = array<i64: 1, 8, 256>}]} {
    %c0 = arith.constant 0 : index
    %c0_0 = arith.constant 0 : index
    %0 = vector.load %arg2[%c0, %c0_0] : memref<8x196xf32, #tpu.memory_space<vmem>>, vector<8x196xf32>
    %c0_1 = arith.constant 0 : index
    %c0_2 = arith.constant 0 : index
    %c0_3 = arith.constant 0 : index
    %1 = vector.load %arg1[%c0_1, %c0_2, %c0_3] : memref<1x196x256xf32, #tpu.memory_space<vmem>>, vector<1x196x256xf32>
    %2 = vector.shape_cast %1 : vector<1x196x256xf32> to vector<196x256xf32>
    %cst = arith.constant dense<0.000000e+00> : vector<8x256xf32>
    %3 = tpu.matmul %0, %2, %cst {dimension_numbers = #tpu.dot_dimension_numbers<[1], [0], [0], [1], [0, 0, 1, 1], [], []>} : vector<8x196xf32>, vector<196x256xf32>, vector<8x256xf32> -> vector<8x256xf32>
    %c0_4 = arith.constant 0 : index
    %c0_5 = arith.constant 0 : index
    %4 = vector.load %arg3[%c0_4, %c0_5] : memref<8x1xf32, #tpu.memory_space<vmem>>, vector<8x1xf32>
    %5 = vector.broadcast %4 : vector<8x1xf32> to vector<8x256xf32>
    %6 = arith.addf %3, %5 : vector<8x256xf32>
    %cst_6 = arith.constant 0.000000e+00 : f32
    %7 = vector.broadcast %cst_6 : f32 to vector<8x256xf32>
    %8 = arith.maximumf %6, %7 : vector<8x256xf32>
    %c0_7 = arith.constant 0 : index
    %c0_8 = arith.constant 0 : index
    %c0_9 = arith.constant 0 : index
    %9 = vector.load %arg4[%c0_7, %c0_8, %c0_9] : memref<1x8x256xf32, #tpu.memory_space<vmem>>, vector<1x8x256xf32>
    %10 = vector.shape_cast %9 : vector<1x8x256xf32> to vector<8x256xf32>
    %11 = vector.shape_cast %8 : vector<8x256xf32> to vector<1x8x256xf32>
    tpu.vector_store %arg4[%c0_7, %c0_8, %c0_9], %11 {strides = array<i32>} : memref<1x8x256xf32, #tpu.memory_space<vmem>>, vector<1x8x256xf32>,
    return
  }
  func.func @transform_0(%arg0: i32) -> (i32, i32, i32) {
    %c0_i32 = arith.constant 0 : i32
    %c0_i32_0 = arith.constant 0 : i32
    %c0_i32_1 = arith.constant 0 : i32
    return %arg0, %c0_i32, %c0_i32_0 : i32, i32, i32
  }
  func.func @transform_1(%arg0: i32) -> (i32, i32) {
    %c0_i32 = arith.constant 0 : i32
    %c0_i32_0 = arith.constant 0 : i32
    %c0_i32_1 = arith.constant 0 : i32
    return %c0_i32, %c0_i32_0 : i32, i32
  }
  func.func @transform_2(%arg0: i32) -> (i32, i32) {
    %c0_i32 = arith.constant 0 : i32
    %c0_i32_0 = arith.constant 0 : i32
    %c0_i32_1 = arith.constant 0 : i32
    return %c0_i32, %c0_i32_0 : i32, i32
  }
  func.func @transform_3(%arg0: i32) -> (i32, i32, i32) {
    %c0_i32 = arith.constant 0 : i32
    %c0_i32_0 = arith.constant 0 : i32
    %c0_i32_1 = arith.constant 0 : i32
    return %arg0, %c0_i32, %c0_i32_0 : i32, i32, i32
  }
}

module attributes {stable_mosaic.version = 11 : i64} {
  func.func @_conv_block_kernel(%arg0: i32, %arg1: memref<1x128x64xf32, #tpu.memory_space<vmem>>, %arg2: memref<16x128xf32, #tpu.memory_space<vmem>>, %arg3: memref<16x1xf32, #tpu.memory_space<vmem>>, %arg4: memref<1x16x64xf32, #tpu.memory_space<vmem>>) attributes {dimension_semantics = [#tpu.dimension_semantics<parallel>], iteration_bounds = array<i64: 2>, scalar_prefetch = 0 : i64, scratch_operands = 0 : i64, tpu.core_type = #tpu.core_type<tc>, window_params = [{transform_indices = @transform_0, window_bounds = array<i64: 1, 128, 64>}, {pipeline_mode = #tpu.pipeline_mode<synchronous>, transform_indices = @transform_1, window_bounds = array<i64: 16, 128>}, {pipeline_mode = #tpu.pipeline_mode<synchronous>, transform_indices = @transform_2, window_bounds = array<i64: 16, 1>}, {transform_indices = @transform_3, window_bounds = array<i64: 1, 16, 64>}]} {
    %c0 = arith.constant 0 : index
    %c0_0 = arith.constant 0 : index
    %0 = vector.load %arg2[%c0, %c0_0] : memref<16x128xf32, #tpu.memory_space<vmem>>, vector<16x128xf32>
    %c0_1 = arith.constant 0 : index
    %c0_2 = arith.constant 0 : index
    %c0_3 = arith.constant 0 : index
    %1 = vector.load %arg1[%c0_1, %c0_2, %c0_3] : memref<1x128x64xf32, #tpu.memory_space<vmem>>, vector<1x128x64xf32>
    %2 = vector.shape_cast %1 : vector<1x128x64xf32> to vector<128x64xf32>
    %cst = arith.constant dense<0.000000e+00> : vector<16x64xf32>
    %3 = tpu.matmul %0, %2, %cst {dimension_numbers = #tpu.dot_dimension_numbers<[1], [0], [0], [1], [0, 0, 1, 1], [], []>} : vector<16x128xf32>, vector<128x64xf32>, vector<16x64xf32> -> vector<16x64xf32>
    %c0_4 = arith.constant 0 : index
    %c0_5 = arith.constant 0 : index
    %4 = vector.load %arg3[%c0_4, %c0_5] : memref<16x1xf32, #tpu.memory_space<vmem>>, vector<16x1xf32>
    %5 = vector.broadcast %4 : vector<16x1xf32> to vector<16x64xf32>
    %6 = arith.addf %3, %5 : vector<16x64xf32>
    %cst_6 = arith.constant 0.000000e+00 : f32
    %7 = vector.broadcast %cst_6 : f32 to vector<16x64xf32>
    %8 = arith.maximumf %6, %7 : vector<16x64xf32>
    %c0_7 = arith.constant 0 : index
    %c0_8 = arith.constant 0 : index
    %c0_9 = arith.constant 0 : index
    %9 = vector.load %arg4[%c0_7, %c0_8, %c0_9] : memref<1x16x64xf32, #tpu.memory_space<vmem>>, vector<1x16x64xf32>
    %10 = vector.shape_cast %9 : vector<1x16x64xf32> to vector<16x64xf32>
    %11 = vector.shape_cast %8 : vector<16x64xf32> to vector<1x16x64xf32>
    tpu.vector_store %arg4[%c0_7, %c0_8, %c0_9], %11 {strides = array<i32>} : memref<1x16x64xf32, #tpu.memory_space<vmem>>, vector<1x16x64xf32>,
    return
  }
  func.func @transform_0(%arg0: i32) -> (i32, i32, i32) {
    %c0_i32 = arith.constant 0 : i32
    %c0_i32_0 = arith.constant 0 : i32
    %c0_i32_1 = arith.constant 0 : i32
    return %arg0, %c0_i32, %c0_i32_0 : i32, i32, i32
  }
  func.func @transform_1(%arg0: i32) -> (i32, i32) {
    %c0_i32 = arith.constant 0 : i32
    %c0_i32_0 = arith.constant 0 : i32
    %c0_i32_1 = arith.constant 0 : i32
    return %c0_i32, %c0_i32_0 : i32, i32
  }
  func.func @transform_2(%arg0: i32) -> (i32, i32) {
    %c0_i32 = arith.constant 0 : i32
    %c0_i32_0 = arith.constant 0 : i32
    %c0_i32_1 = arith.constant 0 : i32
    return %c0_i32, %c0_i32_0 : i32, i32
  }
  func.func @transform_3(%arg0: i32) -> (i32, i32, i32) {
    %c0_i32 = arith.constant 0 : i32
    %c0_i32_0 = arith.constant 0 : i32
    %c0_i32_1 = arith.constant 0 : i32
    return %arg0, %c0_i32, %c0_i32_0 : i32, i32, i32
  }
}

module attributes {stable_mosaic.version = 11 : i64} {
  func.func @_conv_block_kernel(%arg0: i32, %arg1: memref<1x256x16xf32, #tpu.memory_space<vmem>>, %arg2: memref<32x256xf32, #tpu.memory_space<vmem>>, %arg3: memref<32x1xf32, #tpu.memory_space<vmem>>, %arg4: memref<1x32x16xf32, #tpu.memory_space<vmem>>) attributes {dimension_semantics = [#tpu.dimension_semantics<parallel>], iteration_bounds = array<i64: 2>, scalar_prefetch = 0 : i64, scratch_operands = 0 : i64, tpu.core_type = #tpu.core_type<tc>, window_params = [{transform_indices = @transform_0, window_bounds = array<i64: 1, 256, 16>}, {pipeline_mode = #tpu.pipeline_mode<synchronous>, transform_indices = @transform_1, window_bounds = array<i64: 32, 256>}, {pipeline_mode = #tpu.pipeline_mode<synchronous>, transform_indices = @transform_2, window_bounds = array<i64: 32, 1>}, {transform_indices = @transform_3, window_bounds = array<i64: 1, 32, 16>}]} {
    %c0 = arith.constant 0 : index
    %c0_0 = arith.constant 0 : index
    %0 = vector.load %arg2[%c0, %c0_0] : memref<32x256xf32, #tpu.memory_space<vmem>>, vector<32x256xf32>
    %c0_1 = arith.constant 0 : index
    %c0_2 = arith.constant 0 : index
    %c0_3 = arith.constant 0 : index
    %1 = vector.load %arg1[%c0_1, %c0_2, %c0_3] : memref<1x256x16xf32, #tpu.memory_space<vmem>>, vector<1x256x16xf32>
    %2 = vector.shape_cast %1 : vector<1x256x16xf32> to vector<256x16xf32>
    %cst = arith.constant dense<0.000000e+00> : vector<32x16xf32>
    %3 = tpu.matmul %0, %2, %cst {dimension_numbers = #tpu.dot_dimension_numbers<[1], [0], [0], [1], [0, 0, 1, 1], [], []>} : vector<32x256xf32>, vector<256x16xf32>, vector<32x16xf32> -> vector<32x16xf32>
    %c0_4 = arith.constant 0 : index
    %c0_5 = arith.constant 0 : index
    %4 = vector.load %arg3[%c0_4, %c0_5] : memref<32x1xf32, #tpu.memory_space<vmem>>, vector<32x1xf32>
    %5 = vector.broadcast %4 : vector<32x1xf32> to vector<32x16xf32>
    %6 = arith.addf %3, %5 : vector<32x16xf32>
    %cst_6 = arith.constant 0.000000e+00 : f32
    %7 = vector.broadcast %cst_6 : f32 to vector<32x16xf32>
    %8 = arith.maximumf %6, %7 : vector<32x16xf32>
    %c0_7 = arith.constant 0 : index
    %c0_8 = arith.constant 0 : index
    %c0_9 = arith.constant 0 : index
    %9 = vector.load %arg4[%c0_7, %c0_8, %c0_9] : memref<1x32x16xf32, #tpu.memory_space<vmem>>, vector<1x32x16xf32>
    %10 = vector.shape_cast %9 : vector<1x32x16xf32> to vector<32x16xf32>
    %11 = vector.shape_cast %8 : vector<32x16xf32> to vector<1x32x16xf32>
    tpu.vector_store %arg4[%c0_7, %c0_8, %c0_9], %11 {strides = array<i32>} : memref<1x32x16xf32, #tpu.memory_space<vmem>>, vector<1x32x16xf32>,
    return
  }
  func.func @transform_0(%arg0: i32) -> (i32, i32, i32) {
    %c0_i32 = arith.constant 0 : i32
    %c0_i32_0 = arith.constant 0 : i32
    %c0_i32_1 = arith.constant 0 : i32
    return %arg0, %c0_i32, %c0_i32_0 : i32, i32, i32
  }
  func.func @transform_1(%arg0: i32) -> (i32, i32) {
    %c0_i32 = arith.constant 0 : i32
    %c0_i32_0 = arith.constant 0 : i32
    %c0_i32_1 = arith.constant 0 : i32
    return %c0_i32, %c0_i32_0 : i32, i32
  }
  func.func @transform_2(%arg0: i32) -> (i32, i32) {
    %c0_i32 = arith.constant 0 : i32
    %c0_i32_0 = arith.constant 0 : i32
    %c0_i32_1 = arith.constant 0 : i32
    return %c0_i32, %c0_i32_0 : i32, i32
  }
  func.func @transform_3(%arg0: i32) -> (i32, i32, i32) {
    %c0_i32 = arith.constant 0 : i32
    %c0_i32_0 = arith.constant 0 : i32
    %c0_i32_1 = arith.constant 0 : i32
    return %arg0, %c0_i32, %c0_i32_0 : i32, i32, i32
  }
}

module attributes {stable_mosaic.version = 11 : i64} {
  func.func @_conv_block_kernel(%arg0: i32, %arg1: memref<1x512x4xf32, #tpu.memory_space<vmem>>, %arg2: memref<32x512xf32, #tpu.memory_space<vmem>>, %arg3: memref<32x1xf32, #tpu.memory_space<vmem>>, %arg4: memref<1x32x4xf32, #tpu.memory_space<vmem>>) attributes {dimension_semantics = [#tpu.dimension_semantics<parallel>], iteration_bounds = array<i64: 2>, scalar_prefetch = 0 : i64, scratch_operands = 0 : i64, tpu.core_type = #tpu.core_type<tc>, window_params = [{transform_indices = @transform_0, window_bounds = array<i64: 1, 512, 4>}, {pipeline_mode = #tpu.pipeline_mode<synchronous>, transform_indices = @transform_1, window_bounds = array<i64: 32, 512>}, {pipeline_mode = #tpu.pipeline_mode<synchronous>, transform_indices = @transform_2, window_bounds = array<i64: 32, 1>}, {transform_indices = @transform_3, window_bounds = array<i64: 1, 32, 4>}]} {
    %c0 = arith.constant 0 : index
    %c0_0 = arith.constant 0 : index
    %0 = vector.load %arg2[%c0, %c0_0] : memref<32x512xf32, #tpu.memory_space<vmem>>, vector<32x512xf32>
    %c0_1 = arith.constant 0 : index
    %c0_2 = arith.constant 0 : index
    %c0_3 = arith.constant 0 : index
    %1 = vector.load %arg1[%c0_1, %c0_2, %c0_3] : memref<1x512x4xf32, #tpu.memory_space<vmem>>, vector<1x512x4xf32>
    %2 = vector.shape_cast %1 : vector<1x512x4xf32> to vector<512x4xf32>
    %cst = arith.constant dense<0.000000e+00> : vector<32x4xf32>
    %3 = tpu.matmul %0, %2, %cst {dimension_numbers = #tpu.dot_dimension_numbers<[1], [0], [0], [1], [0, 0, 1, 1], [], []>} : vector<32x512xf32>, vector<512x4xf32>, vector<32x4xf32> -> vector<32x4xf32>
    %c0_4 = arith.constant 0 : index
    %c0_5 = arith.constant 0 : index
    %4 = vector.load %arg3[%c0_4, %c0_5] : memref<32x1xf32, #tpu.memory_space<vmem>>, vector<32x1xf32>
    %5 = vector.broadcast %4 : vector<32x1xf32> to vector<32x4xf32>
    %6 = arith.addf %3, %5 : vector<32x4xf32>
    %cst_6 = arith.constant 0.000000e+00 : f32
    %7 = vector.broadcast %cst_6 : f32 to vector<32x4xf32>
    %8 = arith.maximumf %6, %7 : vector<32x4xf32>
    %c0_7 = arith.constant 0 : index
    %c0_8 = arith.constant 0 : index
    %c0_9 = arith.constant 0 : index
    %9 = vector.load %arg4[%c0_7, %c0_8, %c0_9] : memref<1x32x4xf32, #tpu.memory_space<vmem>>, vector<1x32x4xf32>
    %10 = vector.shape_cast %9 : vector<1x32x4xf32> to vector<32x4xf32>
    %11 = vector.shape_cast %8 : vector<32x4xf32> to vector<1x32x4xf32>
    tpu.vector_store %arg4[%c0_7, %c0_8, %c0_9], %11 {strides = array<i32>} : memref<1x32x4xf32, #tpu.memory_space<vmem>>, vector<1x32x4xf32>,
    return
  }
  func.func @transform_0(%arg0: i32) -> (i32, i32, i32) {
    %c0_i32 = arith.constant 0 : i32
    %c0_i32_0 = arith.constant 0 : i32
    %c0_i32_1 = arith.constant 0 : i32
    return %arg0, %c0_i32, %c0_i32_0 : i32, i32, i32
  }
  func.func @transform_1(%arg0: i32) -> (i32, i32) {
    %c0_i32 = arith.constant 0 : i32
    %c0_i32_0 = arith.constant 0 : i32
    %c0_i32_1 = arith.constant 0 : i32
    return %c0_i32, %c0_i32_0 : i32, i32
  }
  func.func @transform_2(%arg0: i32) -> (i32, i32) {
    %c0_i32 = arith.constant 0 : i32
    %c0_i32_0 = arith.constant 0 : i32
    %c0_i32_1 = arith.constant 0 : i32
    return %c0_i32, %c0_i32_0 : i32, i32
  }
  func.func @transform_3(%arg0: i32) -> (i32, i32, i32) {
    %c0_i32 = arith.constant 0 : i32
    %c0_i32_0 = arith.constant 0 : i32
    %c0_i32_1 = arith.constant 0 : i32
    return %arg0, %c0_i32, %c0_i32_0 : i32, i32, i32
  }
}

module attributes {stable_mosaic.version = 11 : i64} {
  func.func @_style_swap_adain_kernel(%arg0: memref<2x512xf32, #tpu.memory_space<vmem>>, %arg1: memref<512x32xf32, #tpu.memory_space<vmem>>, %arg2: memref<1x32xf32, #tpu.memory_space<vmem>>, %arg3: memref<32x8xf32, #tpu.memory_space<vmem>>, %arg4: memref<1x8xf32, #tpu.memory_space<vmem>>, %arg5: memref<8x16xf32, #tpu.memory_space<vmem>>, %arg6: memref<1x16xf32, #tpu.memory_space<vmem>>, %arg7: memref<16x16xf32, #tpu.memory_space<vmem>>, %arg8: memref<1x16xf32, #tpu.memory_space<vmem>>, %arg9: memref<16x256xf32, #tpu.memory_space<vmem>>, %arg10: memref<1x256xf32, #tpu.memory_space<vmem>>, %arg11: memref<2x256xf32, #tpu.memory_space<vmem>>) attributes {dimension_semantics = [], scalar_prefetch = 0 : i64, scratch_operands = 0 : i64, tpu.core_type = #tpu.core_type<tc>} {
    %c0 = arith.constant 0 : index
    %c0_0 = arith.constant 0 : index
    %0 = vector.load %arg0[%c0, %c0_0] : memref<2x512xf32, #tpu.memory_space<vmem>>, vector<2x512xf32>
    %c0_1 = arith.constant 0 : index
    %c0_2 = arith.constant 0 : index
    %1 = vector.load %arg1[%c0_1, %c0_2] : memref<512x32xf32, #tpu.memory_space<vmem>>, vector<512x32xf32>
    %cst = arith.constant dense<0.000000e+00> : vector<2x32xf32>
    %2 = tpu.matmul %0, %1, %cst {dimension_numbers = #tpu.dot_dimension_numbers<[1], [0], [0], [1], [0, 0, 1, 1], [], []>} : vector<2x512xf32>, vector<512x32xf32>, vector<2x32xf32> -> vector<2x32xf32>
    %c0_3 = arith.constant 0 : index
    %c0_4 = arith.constant 0 : index
    %3 = vector.load %arg2[%c0_3, %c0_4] : memref<1x32xf32, #tpu.memory_space<vmem>>, vector<1x32xf32>
    %4 = vector.broadcast %3 : vector<1x32xf32> to vector<2x32xf32>
    %5 = arith.addf %2, %4 : vector<2x32xf32>
    %cst_5 = arith.constant 0.000000e+00 : f32
    %6 = vector.broadcast %cst_5 : f32 to vector<2x32xf32>
    %7 = arith.maximumf %5, %6 : vector<2x32xf32>
    %c0_6 = arith.constant 0 : index
    %c0_7 = arith.constant 0 : index
    %8 = vector.load %arg3[%c0_6, %c0_7] : memref<32x8xf32, #tpu.memory_space<vmem>>, vector<32x8xf32>
    %cst_8 = arith.constant dense<0.000000e+00> : vector<2x8xf32>
    %9 = tpu.matmul %7, %8, %cst_8 {dimension_numbers = #tpu.dot_dimension_numbers<[1], [0], [0], [1], [0, 0, 1, 1], [], []>} : vector<2x32xf32>, vector<32x8xf32>, vector<2x8xf32> -> vector<2x8xf32>
    %c0_9 = arith.constant 0 : index
    %c0_10 = arith.constant 0 : index
    %10 = vector.load %arg4[%c0_9, %c0_10] : memref<1x8xf32, #tpu.memory_space<vmem>>, vector<1x8xf32>
    %11 = vector.broadcast %10 : vector<1x8xf32> to vector<2x8xf32>
    %12 = arith.addf %9, %11 : vector<2x8xf32>
    %13 = vector.extract_strided_slice %12 {offsets = [1, 0], sizes = [1, 8], strides = [1, 1]} : vector<2x8xf32> to vector<1x8xf32>
    %14 = vector.extract_strided_slice %12 {offsets = [0, 0], sizes = [1, 8], strides = [1, 1]} : vector<2x8xf32> to vector<1x8xf32>
    %15 = tpu.concatenate %13, %14 in 0 : vector<1x8xf32>, vector<1x8xf32> -> vector<2x8xf32>
    %c0_11 = arith.constant 0 : index
    %c0_12 = arith.constant 0 : index
    %16 = vector.load %arg5[%c0_11, %c0_12] : memref<8x16xf32, #tpu.memory_space<vmem>>, vector<8x16xf32>
    %cst_13 = arith.constant dense<0.000000e+00> : vector<2x16xf32>
    %17 = tpu.matmul %15, %16, %cst_13 {dimension_numbers = #tpu.dot_dimension_numbers<[1], [0], [0], [1], [0, 0, 1, 1], [], []>} : vector<2x8xf32>, vector<8x16xf32>, vector<2x16xf32> -> vector<2x16xf32>
    %c0_14 = arith.constant 0 : index
    %c0_15 = arith.constant 0 : index
    %18 = vector.load %arg6[%c0_14, %c0_15] : memref<1x16xf32, #tpu.memory_space<vmem>>, vector<1x16xf32>
    %19 = vector.broadcast %18 : vector<1x16xf32> to vector<2x16xf32>
    %20 = arith.addf %17, %19 : vector<2x16xf32>
    %cst_16 = arith.constant 0.000000e+00 : f32
    %21 = vector.broadcast %cst_16 : f32 to vector<2x16xf32>
    %22 = arith.maximumf %20, %21 : vector<2x16xf32>
    %c0_17 = arith.constant 0 : index
    %c0_18 = arith.constant 0 : index
    %23 = vector.load %arg7[%c0_17, %c0_18] : memref<16x16xf32, #tpu.memory_space<vmem>>, vector<16x16xf32>
    %cst_19 = arith.constant dense<0.000000e+00> : vector<2x16xf32>
    %24 = tpu.matmul %22, %23, %cst_19 {dimension_numbers = #tpu.dot_dimension_numbers<[1], [0], [0], [1], [0, 0, 1, 1], [], []>} : vector<2x16xf32>, vector<16x16xf32>, vector<2x16xf32> -> vector<2x16xf32>
    %c0_20 = arith.constant 0 : index
    %c0_21 = arith.constant 0 : index
    %25 = vector.load %arg8[%c0_20, %c0_21] : memref<1x16xf32, #tpu.memory_space<vmem>>, vector<1x16xf32>
    %26 = vector.broadcast %25 : vector<1x16xf32> to vector<2x16xf32>
    %27 = arith.addf %24, %26 : vector<2x16xf32>
    %cst_22 = arith.constant 0.000000e+00 : f32
    %28 = vector.broadcast %cst_22 : f32 to vector<2x16xf32>
    %29 = arith.maximumf %27, %28 : vector<2x16xf32>
    %c0_23 = arith.constant 0 : index
    %c0_24 = arith.constant 0 : index
    %30 = vector.load %arg9[%c0_23, %c0_24] : memref<16x256xf32, #tpu.memory_space<vmem>>, vector<16x256xf32>
    %cst_25 = arith.constant dense<0.000000e+00> : vector<2x256xf32>
    %31 = tpu.matmul %29, %30, %cst_25 {dimension_numbers = #tpu.dot_dimension_numbers<[1], [0], [0], [1], [0, 0, 1, 1], [], []>} : vector<2x16xf32>, vector<16x256xf32>, vector<2x256xf32> -> vector<2x256xf32>
    %c0_26 = arith.constant 0 : index
    %c0_27 = arith.constant 0 : index
    %32 = vector.load %arg10[%c0_26, %c0_27] : memref<1x256xf32, #tpu.memory_space<vmem>>, vector<1x256xf32>
    %33 = vector.broadcast %32 : vector<1x256xf32> to vector<2x256xf32>
    %34 = arith.addf %31, %33 : vector<2x256xf32>
    %c0_28 = arith.constant 0 : index
    %c0_29 = arith.constant 0 : index
    %35 = vector.load %arg11[%c0_28, %c0_29] : memref<2x256xf32, #tpu.memory_space<vmem>>, vector<2x256xf32>
    tpu.vector_store %arg11[%c0_28, %c0_29], %34 {strides = array<i32>} : memref<2x256xf32, #tpu.memory_space<vmem>>, vector<2x256xf32>,
    return
  }
}

module attributes {stable_mosaic.version = 11 : i64} {
  func.func @_conv_block_kernel(%arg0: i32, %arg1: memref<1x128x64xf32, #tpu.memory_space<vmem>>, %arg2: memref<16x128xf32, #tpu.memory_space<vmem>>, %arg3: memref<16x1xf32, #tpu.memory_space<vmem>>, %arg4: memref<1x16x64xf32, #tpu.memory_space<vmem>>) attributes {dimension_semantics = [#tpu.dimension_semantics<parallel>], iteration_bounds = array<i64: 2>, scalar_prefetch = 0 : i64, scratch_operands = 0 : i64, tpu.core_type = #tpu.core_type<tc>, window_params = [{transform_indices = @transform_0, window_bounds = array<i64: 1, 128, 64>}, {pipeline_mode = #tpu.pipeline_mode<synchronous>, transform_indices = @transform_1, window_bounds = array<i64: 16, 128>}, {pipeline_mode = #tpu.pipeline_mode<synchronous>, transform_indices = @transform_2, window_bounds = array<i64: 16, 1>}, {transform_indices = @transform_3, window_bounds = array<i64: 1, 16, 64>}]} {
    %c0 = arith.constant 0 : index
    %c0_0 = arith.constant 0 : index
    %0 = vector.load %arg2[%c0, %c0_0] : memref<16x128xf32, #tpu.memory_space<vmem>>, vector<16x128xf32>
    %c0_1 = arith.constant 0 : index
    %c0_2 = arith.constant 0 : index
    %c0_3 = arith.constant 0 : index
    %1 = vector.load %arg1[%c0_1, %c0_2, %c0_3] : memref<1x128x64xf32, #tpu.memory_space<vmem>>, vector<1x128x64xf32>
    %2 = vector.shape_cast %1 : vector<1x128x64xf32> to vector<128x64xf32>
    %cst = arith.constant dense<0.000000e+00> : vector<16x64xf32>
    %3 = tpu.matmul %0, %2, %cst {dimension_numbers = #tpu.dot_dimension_numbers<[1], [0], [0], [1], [0, 0, 1, 1], [], []>} : vector<16x128xf32>, vector<128x64xf32>, vector<16x64xf32> -> vector<16x64xf32>
    %c0_4 = arith.constant 0 : index
    %c0_5 = arith.constant 0 : index
    %4 = vector.load %arg3[%c0_4, %c0_5] : memref<16x1xf32, #tpu.memory_space<vmem>>, vector<16x1xf32>
    %5 = vector.broadcast %4 : vector<16x1xf32> to vector<16x64xf32>
    %6 = arith.addf %3, %5 : vector<16x64xf32>
    %cst_6 = arith.constant dense<0.000000e+00> : vector<16xf32>
    %7 = vector.multi_reduction <add>, %6, %cst_6 [1] : vector<16x64xf32> to vector<16xf32>
    %8 = vector.shape_cast %7 : vector<16xf32> to vector<16x1xf32>
    %cst_7 = arith.constant 6.400000e+01 : f32
    %9 = vector.broadcast %cst_7 : f32 to vector<16x1xf32>
    %10 = arith.divf %8, %9 : vector<16x1xf32>
    %11 = vector.broadcast %10 : vector<16x1xf32> to vector<16x64xf32>
    %12 = arith.subf %6, %11 : vector<16x64xf32>
    %13 = arith.mulf %12, %12 : vector<16x64xf32>
    %cst_8 = arith.constant dense<0.000000e+00> : vector<16xf32>
    %14 = vector.multi_reduction <add>, %13, %cst_8 [1] : vector<16x64xf32> to vector<16xf32>
    %15 = vector.shape_cast %14 : vector<16xf32> to vector<16x1xf32>
    %cst_9 = arith.constant 6.400000e+01 : f32
    %16 = vector.broadcast %cst_9 : f32 to vector<16x1xf32>
    %17 = arith.divf %15, %16 : vector<16x1xf32>
    %18 = vector.broadcast %10 : vector<16x1xf32> to vector<16x64xf32>
    %19 = arith.subf %6, %18 : vector<16x64xf32>
    %cst_10 = arith.constant 9.99999974E-6 : f32
    %20 = vector.broadcast %cst_10 : f32 to vector<16x1xf32>
    %21 = arith.addf %17, %20 : vector<16x1xf32>
    %22 = math.rsqrt %21 : vector<16x1xf32>
    %23 = vector.broadcast %22 : vector<16x1xf32> to vector<16x64xf32>
    %24 = arith.mulf %19, %23 : vector<16x64xf32>
    %cst_11 = arith.constant 0.000000e+00 : f32
    %25 = vector.broadcast %cst_11 : f32 to vector<16x64xf32>
    %26 = arith.maximumf %24, %25 : vector<16x64xf32>
    %c0_12 = arith.constant 0 : index
    %c0_13 = arith.constant 0 : index
    %c0_14 = arith.constant 0 : index
    %27 = vector.load %arg4[%c0_12, %c0_13, %c0_14] : memref<1x16x64xf32, #tpu.memory_space<vmem>>, vector<1x16x64xf32>
    %28 = vector.shape_cast %27 : vector<1x16x64xf32> to vector<16x64xf32>
    %29 = vector.shape_cast %26 : vector<16x64xf32> to vector<1x16x64xf32>
    tpu.vector_store %arg4[%c0_12, %c0_13, %c0_14], %29 {strides = array<i32>} : memref<1x16x64xf32, #tpu.memory_space<vmem>>, vector<1x16x64xf32>,
    return
  }
  func.func @transform_0(%arg0: i32) -> (i32, i32, i32) {
    %c0_i32 = arith.constant 0 : i32
    %c0_i32_0 = arith.constant 0 : i32
    %c0_i32_1 = arith.constant 0 : i32
    return %arg0, %c0_i32, %c0_i32_0 : i32, i32, i32
  }
  func.func @transform_1(%arg0: i32) -> (i32, i32) {
    %c0_i32 = arith.constant 0 : i32
    %c0_i32_0 = arith.constant 0 : i32
    %c0_i32_1 = arith.constant 0 : i32
    return %c0_i32, %c0_i32_0 : i32, i32
  }
  func.func @transform_2(%arg0: i32) -> (i32, i32) {
    %c0_i32 = arith.constant 0 : i32
    %c0_i32_0 = arith.constant 0 : i32
    %c0_i32_1 = arith.constant 0 : i32
    return %c0_i32, %c0_i32_0 : i32, i32
  }
  func.func @transform_3(%arg0: i32) -> (i32, i32, i32) {
    %c0_i32 = arith.constant 0 : i32
    %c0_i32_0 = arith.constant 0 : i32
    %c0_i32_1 = arith.constant 0 : i32
    return %arg0, %c0_i32, %c0_i32_0 : i32, i32, i32
  }
}

module attributes {stable_mosaic.version = 11 : i64} {
  func.func @_conv_block_kernel(%arg0: i32, %arg1: memref<1x196x256xf32, #tpu.memory_space<vmem>>, %arg2: memref<8x196xf32, #tpu.memory_space<vmem>>, %arg3: memref<8x1xf32, #tpu.memory_space<vmem>>, %arg4: memref<1x8x256xf32, #tpu.memory_space<vmem>>) attributes {dimension_semantics = [#tpu.dimension_semantics<parallel>], iteration_bounds = array<i64: 2>, scalar_prefetch = 0 : i64, scratch_operands = 0 : i64, tpu.core_type = #tpu.core_type<tc>, window_params = [{transform_indices = @transform_0, window_bounds = array<i64: 1, 196, 256>}, {pipeline_mode = #tpu.pipeline_mode<synchronous>, transform_indices = @transform_1, window_bounds = array<i64: 8, 196>}, {pipeline_mode = #tpu.pipeline_mode<synchronous>, transform_indices = @transform_2, window_bounds = array<i64: 8, 1>}, {transform_indices = @transform_3, window_bounds = array<i64: 1, 8, 256>}]} {
    %c0 = arith.constant 0 : index
    %c0_0 = arith.constant 0 : index
    %0 = vector.load %arg2[%c0, %c0_0] : memref<8x196xf32, #tpu.memory_space<vmem>>, vector<8x196xf32>
    %c0_1 = arith.constant 0 : index
    %c0_2 = arith.constant 0 : index
    %c0_3 = arith.constant 0 : index
    %1 = vector.load %arg1[%c0_1, %c0_2, %c0_3] : memref<1x196x256xf32, #tpu.memory_space<vmem>>, vector<1x196x256xf32>
    %2 = vector.shape_cast %1 : vector<1x196x256xf32> to vector<196x256xf32>
    %cst = arith.constant dense<0.000000e+00> : vector<8x256xf32>
    %3 = tpu.matmul %0, %2, %cst {dimension_numbers = #tpu.dot_dimension_numbers<[1], [0], [0], [1], [0, 0, 1, 1], [], []>} : vector<8x196xf32>, vector<196x256xf32>, vector<8x256xf32> -> vector<8x256xf32>
    %c0_4 = arith.constant 0 : index
    %c0_5 = arith.constant 0 : index
    %4 = vector.load %arg3[%c0_4, %c0_5] : memref<8x1xf32, #tpu.memory_space<vmem>>, vector<8x1xf32>
    %5 = vector.broadcast %4 : vector<8x1xf32> to vector<8x256xf32>
    %6 = arith.addf %3, %5 : vector<8x256xf32>
    %cst_6 = arith.constant dense<0.000000e+00> : vector<8xf32>
    %7 = vector.multi_reduction <add>, %6, %cst_6 [1] : vector<8x256xf32> to vector<8xf32>
    %8 = vector.shape_cast %7 : vector<8xf32> to vector<8x1xf32>
    %cst_7 = arith.constant 2.560000e+02 : f32
    %9 = vector.broadcast %cst_7 : f32 to vector<8x1xf32>
    %10 = arith.divf %8, %9 : vector<8x1xf32>
    %11 = vector.broadcast %10 : vector<8x1xf32> to vector<8x256xf32>
    %12 = arith.subf %6, %11 : vector<8x256xf32>
    %13 = arith.mulf %12, %12 : vector<8x256xf32>
    %cst_8 = arith.constant dense<0.000000e+00> : vector<8xf32>
    %14 = vector.multi_reduction <add>, %13, %cst_8 [1] : vector<8x256xf32> to vector<8xf32>
    %15 = vector.shape_cast %14 : vector<8xf32> to vector<8x1xf32>
    %cst_9 = arith.constant 2.560000e+02 : f32
    %16 = vector.broadcast %cst_9 : f32 to vector<8x1xf32>
    %17 = arith.divf %15, %16 : vector<8x1xf32>
    %18 = vector.broadcast %10 : vector<8x1xf32> to vector<8x256xf32>
    %19 = arith.subf %6, %18 : vector<8x256xf32>
    %cst_10 = arith.constant 9.99999974E-6 : f32
    %20 = vector.broadcast %cst_10 : f32 to vector<8x1xf32>
    %21 = arith.addf %17, %20 : vector<8x1xf32>
    %22 = math.rsqrt %21 : vector<8x1xf32>
    %23 = vector.broadcast %22 : vector<8x1xf32> to vector<8x256xf32>
    %24 = arith.mulf %19, %23 : vector<8x256xf32>
    %cst_11 = arith.constant 0.000000e+00 : f32
    %25 = vector.broadcast %cst_11 : f32 to vector<8x256xf32>
    %26 = arith.maximumf %24, %25 : vector<8x256xf32>
    %c0_12 = arith.constant 0 : index
    %c0_13 = arith.constant 0 : index
    %c0_14 = arith.constant 0 : index
    %27 = vector.load %arg4[%c0_12, %c0_13, %c0_14] : memref<1x8x256xf32, #tpu.memory_space<vmem>>, vector<1x8x256xf32>
    %28 = vector.shape_cast %27 : vector<1x8x256xf32> to vector<8x256xf32>
    %29 = vector.shape_cast %26 : vector<8x256xf32> to vector<1x8x256xf32>
    tpu.vector_store %arg4[%c0_12, %c0_13, %c0_14], %29 {strides = array<i32>} : memref<1x8x256xf32, #tpu.memory_space<vmem>>, vector<1x8x256xf32>,
    return
  }
  func.func @transform_0(%arg0: i32) -> (i32, i32, i32) {
    %c0_i32 = arith.constant 0 : i32
    %c0_i32_0 = arith.constant 0 : i32
    %c0_i32_1 = arith.constant 0 : i32
    return %arg0, %c0_i32, %c0_i32_0 : i32, i32, i32
  }
  func.func @transform_1(%arg0: i32) -> (i32, i32) {
    %c0_i32 = arith.constant 0 : i32
    %c0_i32_0 = arith.constant 0 : i32
    %c0_i32_1 = arith.constant 0 : i32
    return %c0_i32, %c0_i32_0 : i32, i32
  }
  func.func @transform_2(%arg0: i32) -> (i32, i32) {
    %c0_i32 = arith.constant 0 : i32
    %c0_i32_0 = arith.constant 0 : i32
    %c0_i32_1 = arith.constant 0 : i32
    return %c0_i32, %c0_i32_0 : i32, i32
  }
  func.func @transform_3(%arg0: i32) -> (i32, i32, i32) {
    %c0_i32 = arith.constant 0 : i32
    %c0_i32_0 = arith.constant 0 : i32
    %c0_i32_1 = arith.constant 0 : i32
    return %arg0, %c0_i32, %c0_i32_0 : i32, i32, i32
  }
}

module attributes {stable_mosaic.version = 11 : i64} {
  func.func @_conv_block_kernel(%arg0: i32, %arg1: memref<1x256x16xf32, #tpu.memory_space<vmem>>, %arg2: memref<32x256xf32, #tpu.memory_space<vmem>>, %arg3: memref<32x1xf32, #tpu.memory_space<vmem>>, %arg4: memref<1x32x16xf32, #tpu.memory_space<vmem>>) attributes {dimension_semantics = [#tpu.dimension_semantics<parallel>], iteration_bounds = array<i64: 2>, scalar_prefetch = 0 : i64, scratch_operands = 0 : i64, tpu.core_type = #tpu.core_type<tc>, window_params = [{transform_indices = @transform_0, window_bounds = array<i64: 1, 256, 16>}, {pipeline_mode = #tpu.pipeline_mode<synchronous>, transform_indices = @transform_1, window_bounds = array<i64: 32, 256>}, {pipeline_mode = #tpu.pipeline_mode<synchronous>, transform_indices = @transform_2, window_bounds = array<i64: 32, 1>}, {transform_indices = @transform_3, window_bounds = array<i64: 1, 32, 16>}]} {
    %c0 = arith.constant 0 : index
    %c0_0 = arith.constant 0 : index
    %0 = vector.load %arg2[%c0, %c0_0] : memref<32x256xf32, #tpu.memory_space<vmem>>, vector<32x256xf32>
    %c0_1 = arith.constant 0 : index
    %c0_2 = arith.constant 0 : index
    %c0_3 = arith.constant 0 : index
    %1 = vector.load %arg1[%c0_1, %c0_2, %c0_3] : memref<1x256x16xf32, #tpu.memory_space<vmem>>, vector<1x256x16xf32>
    %2 = vector.shape_cast %1 : vector<1x256x16xf32> to vector<256x16xf32>
    %cst = arith.constant dense<0.000000e+00> : vector<32x16xf32>
    %3 = tpu.matmul %0, %2, %cst {dimension_numbers = #tpu.dot_dimension_numbers<[1], [0], [0], [1], [0, 0, 1, 1], [], []>} : vector<32x256xf32>, vector<256x16xf32>, vector<32x16xf32> -> vector<32x16xf32>
    %c0_4 = arith.constant 0 : index
    %c0_5 = arith.constant 0 : index
    %4 = vector.load %arg3[%c0_4, %c0_5] : memref<32x1xf32, #tpu.memory_space<vmem>>, vector<32x1xf32>
    %5 = vector.broadcast %4 : vector<32x1xf32> to vector<32x16xf32>
    %6 = arith.addf %3, %5 : vector<32x16xf32>
    %cst_6 = arith.constant dense<0.000000e+00> : vector<32xf32>
    %7 = vector.multi_reduction <add>, %6, %cst_6 [1] : vector<32x16xf32> to vector<32xf32>
    %8 = vector.shape_cast %7 : vector<32xf32> to vector<32x1xf32>
    %cst_7 = arith.constant 1.600000e+01 : f32
    %9 = vector.broadcast %cst_7 : f32 to vector<32x1xf32>
    %10 = arith.divf %8, %9 : vector<32x1xf32>
    %11 = vector.broadcast %10 : vector<32x1xf32> to vector<32x16xf32>
    %12 = arith.subf %6, %11 : vector<32x16xf32>
    %13 = arith.mulf %12, %12 : vector<32x16xf32>
    %cst_8 = arith.constant dense<0.000000e+00> : vector<32xf32>
    %14 = vector.multi_reduction <add>, %13, %cst_8 [1] : vector<32x16xf32> to vector<32xf32>
    %15 = vector.shape_cast %14 : vector<32xf32> to vector<32x1xf32>
    %cst_9 = arith.constant 1.600000e+01 : f32
    %16 = vector.broadcast %cst_9 : f32 to vector<32x1xf32>
    %17 = arith.divf %15, %16 : vector<32x1xf32>
    %18 = vector.broadcast %10 : vector<32x1xf32> to vector<32x16xf32>
    %19 = arith.subf %6, %18 : vector<32x16xf32>
    %cst_10 = arith.constant 9.99999974E-6 : f32
    %20 = vector.broadcast %cst_10 : f32 to vector<32x1xf32>
    %21 = arith.addf %17, %20 : vector<32x1xf32>
    %22 = math.rsqrt %21 : vector<32x1xf32>
    %23 = vector.broadcast %22 : vector<32x1xf32> to vector<32x16xf32>
    %24 = arith.mulf %19, %23 : vector<32x16xf32>
    %cst_11 = arith.constant 0.000000e+00 : f32
    %25 = vector.broadcast %cst_11 : f32 to vector<32x16xf32>
    %26 = arith.maximumf %24, %25 : vector<32x16xf32>
    %c0_12 = arith.constant 0 : index
    %c0_13 = arith.constant 0 : index
    %c0_14 = arith.constant 0 : index
    %27 = vector.load %arg4[%c0_12, %c0_13, %c0_14] : memref<1x32x16xf32, #tpu.memory_space<vmem>>, vector<1x32x16xf32>
    %28 = vector.shape_cast %27 : vector<1x32x16xf32> to vector<32x16xf32>
    %29 = vector.shape_cast %26 : vector<32x16xf32> to vector<1x32x16xf32>
    tpu.vector_store %arg4[%c0_12, %c0_13, %c0_14], %29 {strides = array<i32>} : memref<1x32x16xf32, #tpu.memory_space<vmem>>, vector<1x32x16xf32>,
    return
  }
  func.func @transform_0(%arg0: i32) -> (i32, i32, i32) {
    %c0_i32 = arith.constant 0 : i32
    %c0_i32_0 = arith.constant 0 : i32
    %c0_i32_1 = arith.constant 0 : i32
    return %arg0, %c0_i32, %c0_i32_0 : i32, i32, i32
  }
  func.func @transform_1(%arg0: i32) -> (i32, i32) {
    %c0_i32 = arith.constant 0 : i32
    %c0_i32_0 = arith.constant 0 : i32
    %c0_i32_1 = arith.constant 0 : i32
    return %c0_i32, %c0_i32_0 : i32, i32
  }
  func.func @transform_2(%arg0: i32) -> (i32, i32) {
    %c0_i32 = arith.constant 0 : i32
    %c0_i32_0 = arith.constant 0 : i32
    %c0_i32_1 = arith.constant 0 : i32
    return %c0_i32, %c0_i32_0 : i32, i32
  }
  func.func @transform_3(%arg0: i32) -> (i32, i32, i32) {
    %c0_i32 = arith.constant 0 : i32
    %c0_i32_0 = arith.constant 0 : i32
    %c0_i32_1 = arith.constant 0 : i32
    return %arg0, %c0_i32, %c0_i32_0 : i32, i32, i32
  }
}

module attributes {stable_mosaic.version = 11 : i64} {
  func.func @_conv_block_kernel(%arg0: i32, %arg1: memref<1x288x16xf32, #tpu.memory_space<vmem>>, %arg2: memref<32x288xf32, #tpu.memory_space<vmem>>, %arg3: memref<32x1xf32, #tpu.memory_space<vmem>>, %arg4: memref<1x32x16xf32, #tpu.memory_space<vmem>>) attributes {dimension_semantics = [#tpu.dimension_semantics<parallel>], iteration_bounds = array<i64: 2>, scalar_prefetch = 0 : i64, scratch_operands = 0 : i64, tpu.core_type = #tpu.core_type<tc>, window_params = [{transform_indices = @transform_0, window_bounds = array<i64: 1, 288, 16>}, {pipeline_mode = #tpu.pipeline_mode<synchronous>, transform_indices = @transform_1, window_bounds = array<i64: 32, 288>}, {pipeline_mode = #tpu.pipeline_mode<synchronous>, transform_indices = @transform_2, window_bounds = array<i64: 32, 1>}, {transform_indices = @transform_3, window_bounds = array<i64: 1, 32, 16>}]} {
    %c0 = arith.constant 0 : index
    %c0_0 = arith.constant 0 : index
    %0 = vector.load %arg2[%c0, %c0_0] : memref<32x288xf32, #tpu.memory_space<vmem>>, vector<32x288xf32>
    %c0_1 = arith.constant 0 : index
    %c0_2 = arith.constant 0 : index
    %c0_3 = arith.constant 0 : index
    %1 = vector.load %arg1[%c0_1, %c0_2, %c0_3] : memref<1x288x16xf32, #tpu.memory_space<vmem>>, vector<1x288x16xf32>
    %2 = vector.shape_cast %1 : vector<1x288x16xf32> to vector<288x16xf32>
    %cst = arith.constant dense<0.000000e+00> : vector<32x16xf32>
    %3 = tpu.matmul %0, %2, %cst {dimension_numbers = #tpu.dot_dimension_numbers<[1], [0], [0], [1], [0, 0, 1, 1], [], []>} : vector<32x288xf32>, vector<288x16xf32>, vector<32x16xf32> -> vector<32x16xf32>
    %c0_4 = arith.constant 0 : index
    %c0_5 = arith.constant 0 : index
    %4 = vector.load %arg3[%c0_4, %c0_5] : memref<32x1xf32, #tpu.memory_space<vmem>>, vector<32x1xf32>
    %5 = vector.broadcast %4 : vector<32x1xf32> to vector<32x16xf32>
    %6 = arith.addf %3, %5 : vector<32x16xf32>
    %cst_6 = arith.constant dense<0.000000e+00> : vector<32xf32>
    %7 = vector.multi_reduction <add>, %6, %cst_6 [1] : vector<32x16xf32> to vector<32xf32>
    %8 = vector.shape_cast %7 : vector<32xf32> to vector<32x1xf32>
    %cst_7 = arith.constant 1.600000e+01 : f32
    %9 = vector.broadcast %cst_7 : f32 to vector<32x1xf32>
    %10 = arith.divf %8, %9 : vector<32x1xf32>
    %11 = vector.broadcast %10 : vector<32x1xf32> to vector<32x16xf32>
    %12 = arith.subf %6, %11 : vector<32x16xf32>
    %13 = arith.mulf %12, %12 : vector<32x16xf32>
    %cst_8 = arith.constant dense<0.000000e+00> : vector<32xf32>
    %14 = vector.multi_reduction <add>, %13, %cst_8 [1] : vector<32x16xf32> to vector<32xf32>
    %15 = vector.shape_cast %14 : vector<32xf32> to vector<32x1xf32>
    %cst_9 = arith.constant 1.600000e+01 : f32
    %16 = vector.broadcast %cst_9 : f32 to vector<32x1xf32>
    %17 = arith.divf %15, %16 : vector<32x1xf32>
    %18 = vector.broadcast %10 : vector<32x1xf32> to vector<32x16xf32>
    %19 = arith.subf %6, %18 : vector<32x16xf32>
    %cst_10 = arith.constant 9.99999974E-6 : f32
    %20 = vector.broadcast %cst_10 : f32 to vector<32x1xf32>
    %21 = arith.addf %17, %20 : vector<32x1xf32>
    %22 = math.rsqrt %21 : vector<32x1xf32>
    %23 = vector.broadcast %22 : vector<32x1xf32> to vector<32x16xf32>
    %24 = arith.mulf %19, %23 : vector<32x16xf32>
    %cst_11 = arith.constant 0.000000e+00 : f32
    %25 = vector.broadcast %cst_11 : f32 to vector<32x16xf32>
    %26 = arith.maximumf %24, %25 : vector<32x16xf32>
    %c0_12 = arith.constant 0 : index
    %c0_13 = arith.constant 0 : index
    %c0_14 = arith.constant 0 : index
    %27 = vector.load %arg4[%c0_12, %c0_13, %c0_14] : memref<1x32x16xf32, #tpu.memory_space<vmem>>, vector<1x32x16xf32>
    %28 = vector.shape_cast %27 : vector<1x32x16xf32> to vector<32x16xf32>
    %29 = vector.shape_cast %26 : vector<32x16xf32> to vector<1x32x16xf32>
    tpu.vector_store %arg4[%c0_12, %c0_13, %c0_14], %29 {strides = array<i32>} : memref<1x32x16xf32, #tpu.memory_space<vmem>>, vector<1x32x16xf32>,
    return
  }
  func.func @transform_0(%arg0: i32) -> (i32, i32, i32) {
    %c0_i32 = arith.constant 0 : i32
    %c0_i32_0 = arith.constant 0 : i32
    %c0_i32_1 = arith.constant 0 : i32
    return %arg0, %c0_i32, %c0_i32_0 : i32, i32, i32
  }
  func.func @transform_1(%arg0: i32) -> (i32, i32) {
    %c0_i32 = arith.constant 0 : i32
    %c0_i32_0 = arith.constant 0 : i32
    %c0_i32_1 = arith.constant 0 : i32
    return %c0_i32, %c0_i32_0 : i32, i32
  }
  func.func @transform_2(%arg0: i32) -> (i32, i32) {
    %c0_i32 = arith.constant 0 : i32
    %c0_i32_0 = arith.constant 0 : i32
    %c0_i32_1 = arith.constant 0 : i32
    return %c0_i32, %c0_i32_0 : i32, i32
  }
  func.func @transform_3(%arg0: i32) -> (i32, i32, i32) {
    %c0_i32 = arith.constant 0 : i32
    %c0_i32_0 = arith.constant 0 : i32
    %c0_i32_1 = arith.constant 0 : i32
    return %arg0, %c0_i32, %c0_i32_0 : i32, i32, i32
  }
}

module attributes {stable_mosaic.version = 11 : i64} {
  func.func @_conv_block_kernel(%arg0: i32, %arg1: memref<1x288x16xf32, #tpu.memory_space<vmem>>, %arg2: memref<32x288xf32, #tpu.memory_space<vmem>>, %arg3: memref<32x1xf32, #tpu.memory_space<vmem>>, %arg4: memref<1x32x16xf32, #tpu.memory_space<vmem>>, %arg5: memref<1x32x16xf32, #tpu.memory_space<vmem>>) attributes {dimension_semantics = [#tpu.dimension_semantics<parallel>], iteration_bounds = array<i64: 2>, scalar_prefetch = 0 : i64, scratch_operands = 0 : i64, tpu.core_type = #tpu.core_type<tc>, window_params = [{transform_indices = @transform_0, window_bounds = array<i64: 1, 288, 16>}, {pipeline_mode = #tpu.pipeline_mode<synchronous>, transform_indices = @transform_1, window_bounds = array<i64: 32, 288>}, {pipeline_mode = #tpu.pipeline_mode<synchronous>, transform_indices = @transform_2, window_bounds = array<i64: 32, 1>}, {transform_indices = @transform_3, window_bounds = array<i64: 1, 32, 16>}, {transform_indices = @transform_4, window_bounds = array<i64: 1, 32, 16>}]} {
    %c0 = arith.constant 0 : index
    %c0_0 = arith.constant 0 : index
    %0 = vector.load %arg2[%c0, %c0_0] : memref<32x288xf32, #tpu.memory_space<vmem>>, vector<32x288xf32>
    %c0_1 = arith.constant 0 : index
    %c0_2 = arith.constant 0 : index
    %c0_3 = arith.constant 0 : index
    %1 = vector.load %arg1[%c0_1, %c0_2, %c0_3] : memref<1x288x16xf32, #tpu.memory_space<vmem>>, vector<1x288x16xf32>
    %2 = vector.shape_cast %1 : vector<1x288x16xf32> to vector<288x16xf32>
    %cst = arith.constant dense<0.000000e+00> : vector<32x16xf32>
    %3 = tpu.matmul %0, %2, %cst {dimension_numbers = #tpu.dot_dimension_numbers<[1], [0], [0], [1], [0, 0, 1, 1], [], []>} : vector<32x288xf32>, vector<288x16xf32>, vector<32x16xf32> -> vector<32x16xf32>
    %c0_4 = arith.constant 0 : index
    %c0_5 = arith.constant 0 : index
    %4 = vector.load %arg3[%c0_4, %c0_5] : memref<32x1xf32, #tpu.memory_space<vmem>>, vector<32x1xf32>
    %5 = vector.broadcast %4 : vector<32x1xf32> to vector<32x16xf32>
    %6 = arith.addf %3, %5 : vector<32x16xf32>
    %cst_6 = arith.constant dense<0.000000e+00> : vector<32xf32>
    %7 = vector.multi_reduction <add>, %6, %cst_6 [1] : vector<32x16xf32> to vector<32xf32>
    %8 = vector.shape_cast %7 : vector<32xf32> to vector<32x1xf32>
    %cst_7 = arith.constant 1.600000e+01 : f32
    %9 = vector.broadcast %cst_7 : f32 to vector<32x1xf32>
    %10 = arith.divf %8, %9 : vector<32x1xf32>
    %11 = vector.broadcast %10 : vector<32x1xf32> to vector<32x16xf32>
    %12 = arith.subf %6, %11 : vector<32x16xf32>
    %13 = arith.mulf %12, %12 : vector<32x16xf32>
    %cst_8 = arith.constant dense<0.000000e+00> : vector<32xf32>
    %14 = vector.multi_reduction <add>, %13, %cst_8 [1] : vector<32x16xf32> to vector<32xf32>
    %15 = vector.shape_cast %14 : vector<32xf32> to vector<32x1xf32>
    %cst_9 = arith.constant 1.600000e+01 : f32
    %16 = vector.broadcast %cst_9 : f32 to vector<32x1xf32>
    %17 = arith.divf %15, %16 : vector<32x1xf32>
    %18 = vector.broadcast %10 : vector<32x1xf32> to vector<32x16xf32>
    %19 = arith.subf %6, %18 : vector<32x16xf32>
    %cst_10 = arith.constant 9.99999974E-6 : f32
    %20 = vector.broadcast %cst_10 : f32 to vector<32x1xf32>
    %21 = arith.addf %17, %20 : vector<32x1xf32>
    %22 = math.rsqrt %21 : vector<32x1xf32>
    %23 = vector.broadcast %22 : vector<32x1xf32> to vector<32x16xf32>
    %24 = arith.mulf %19, %23 : vector<32x16xf32>
    %c0_11 = arith.constant 0 : index
    %c0_12 = arith.constant 0 : index
    %c0_13 = arith.constant 0 : index
    %25 = vector.load %arg4[%c0_11, %c0_12, %c0_13] : memref<1x32x16xf32, #tpu.memory_space<vmem>>, vector<1x32x16xf32>
    %26 = vector.shape_cast %25 : vector<1x32x16xf32> to vector<32x16xf32>
    %27 = arith.addf %24, %26 : vector<32x16xf32>
    %c0_14 = arith.constant 0 : index
    %c0_15 = arith.constant 0 : index
    %c0_16 = arith.constant 0 : index
    %28 = vector.load %arg5[%c0_14, %c0_15, %c0_16] : memref<1x32x16xf32, #tpu.memory_space<vmem>>, vector<1x32x16xf32>
    %29 = vector.shape_cast %28 : vector<1x32x16xf32> to vector<32x16xf32>
    %30 = vector.shape_cast %27 : vector<32x16xf32> to vector<1x32x16xf32>
    tpu.vector_store %arg5[%c0_14, %c0_15, %c0_16], %30 {strides = array<i32>} : memref<1x32x16xf32, #tpu.memory_space<vmem>>, vector<1x32x16xf32>,
    return
  }
  func.func @transform_0(%arg0: i32) -> (i32, i32, i32) {
    %c0_i32 = arith.constant 0 : i32
    %c0_i32_0 = arith.constant 0 : i32
    %c0_i32_1 = arith.constant 0 : i32
    return %arg0, %c0_i32, %c0_i32_0 : i32, i32, i32
  }
  func.func @transform_1(%arg0: i32) -> (i32, i32) {
    %c0_i32 = arith.constant 0 : i32
    %c0_i32_0 = arith.constant 0 : i32
    %c0_i32_1 = arith.constant 0 : i32
    return %c0_i32, %c0_i32_0 : i32, i32
  }
  func.func @transform_2(%arg0: i32) -> (i32, i32) {
    %c0_i32 = arith.constant 0 : i32
    %c0_i32_0 = arith.constant 0 : i32
    %c0_i32_1 = arith.constant 0 : i32
    return %c0_i32, %c0_i32_0 : i32, i32
  }
  func.func @transform_3(%arg0: i32) -> (i32, i32, i32) {
    %c0_i32 = arith.constant 0 : i32
    %c0_i32_0 = arith.constant 0 : i32
    %c0_i32_1 = arith.constant 0 : i32
    return %arg0, %c0_i32, %c0_i32_0 : i32, i32, i32
  }
  func.func @transform_4(%arg0: i32) -> (i32, i32, i32) {
    %c0_i32 = arith.constant 0 : i32
    %c0_i32_0 = arith.constant 0 : i32
    %c0_i32_1 = arith.constant 0 : i32
    return %arg0, %c0_i32, %c0_i32_0 : i32, i32, i32
  }
}

module attributes {stable_mosaic.version = 11 : i64} {
  func.func @_conv_block_kernel(%arg0: i32, %arg1: memref<1x288x16xf32, #tpu.memory_space<vmem>>, %arg2: memref<32x288xf32, #tpu.memory_space<vmem>>, %arg3: memref<32x1xf32, #tpu.memory_space<vmem>>, %arg4: memref<1x32x1xf32, #tpu.memory_space<vmem>>, %arg5: memref<1x32x1xf32, #tpu.memory_space<vmem>>, %arg6: memref<1x32x16xf32, #tpu.memory_space<vmem>>, %arg7: memref<1x32x16xf32, #tpu.memory_space<vmem>>) attributes {dimension_semantics = [#tpu.dimension_semantics<parallel>], iteration_bounds = array<i64: 2>, scalar_prefetch = 0 : i64, scratch_operands = 0 : i64, tpu.core_type = #tpu.core_type<tc>, window_params = [{transform_indices = @transform_0, window_bounds = array<i64: 1, 288, 16>}, {pipeline_mode = #tpu.pipeline_mode<synchronous>, transform_indices = @transform_1, window_bounds = array<i64: 32, 288>}, {pipeline_mode = #tpu.pipeline_mode<synchronous>, transform_indices = @transform_2, window_bounds = array<i64: 32, 1>}, {transform_indices = @transform_3, window_bounds = array<i64: 1, 32, 1>}, {transform_indices = @transform_4, window_bounds = array<i64: 1, 32, 1>}, {transform_indices = @transform_5, window_bounds = array<i64: 1, 32, 16>}, {transform_indices = @transform_6, window_bounds = array<i64: 1, 32, 16>}]} {
    %c0 = arith.constant 0 : index
    %c0_0 = arith.constant 0 : index
    %0 = vector.load %arg2[%c0, %c0_0] : memref<32x288xf32, #tpu.memory_space<vmem>>, vector<32x288xf32>
    %c0_1 = arith.constant 0 : index
    %c0_2 = arith.constant 0 : index
    %c0_3 = arith.constant 0 : index
    %1 = vector.load %arg1[%c0_1, %c0_2, %c0_3] : memref<1x288x16xf32, #tpu.memory_space<vmem>>, vector<1x288x16xf32>
    %2 = vector.shape_cast %1 : vector<1x288x16xf32> to vector<288x16xf32>
    %cst = arith.constant dense<0.000000e+00> : vector<32x16xf32>
    %3 = tpu.matmul %0, %2, %cst {dimension_numbers = #tpu.dot_dimension_numbers<[1], [0], [0], [1], [0, 0, 1, 1], [], []>} : vector<32x288xf32>, vector<288x16xf32>, vector<32x16xf32> -> vector<32x16xf32>
    %c0_4 = arith.constant 0 : index
    %c0_5 = arith.constant 0 : index
    %4 = vector.load %arg3[%c0_4, %c0_5] : memref<32x1xf32, #tpu.memory_space<vmem>>, vector<32x1xf32>
    %5 = vector.broadcast %4 : vector<32x1xf32> to vector<32x16xf32>
    %6 = arith.addf %3, %5 : vector<32x16xf32>
    %cst_6 = arith.constant dense<0.000000e+00> : vector<32xf32>
    %7 = vector.multi_reduction <add>, %6, %cst_6 [1] : vector<32x16xf32> to vector<32xf32>
    %8 = vector.shape_cast %7 : vector<32xf32> to vector<32x1xf32>
    %cst_7 = arith.constant 1.600000e+01 : f32
    %9 = vector.broadcast %cst_7 : f32 to vector<32x1xf32>
    %10 = arith.divf %8, %9 : vector<32x1xf32>
    %11 = vector.broadcast %10 : vector<32x1xf32> to vector<32x16xf32>
    %12 = arith.subf %6, %11 : vector<32x16xf32>
    %13 = arith.mulf %12, %12 : vector<32x16xf32>
    %cst_8 = arith.constant dense<0.000000e+00> : vector<32xf32>
    %14 = vector.multi_reduction <add>, %13, %cst_8 [1] : vector<32x16xf32> to vector<32xf32>
    %15 = vector.shape_cast %14 : vector<32xf32> to vector<32x1xf32>
    %cst_9 = arith.constant 1.600000e+01 : f32
    %16 = vector.broadcast %cst_9 : f32 to vector<32x1xf32>
    %17 = arith.divf %15, %16 : vector<32x1xf32>
    %18 = vector.broadcast %10 : vector<32x1xf32> to vector<32x16xf32>
    %19 = arith.subf %6, %18 : vector<32x16xf32>
    %cst_10 = arith.constant 9.99999974E-6 : f32
    %20 = vector.broadcast %cst_10 : f32 to vector<32x1xf32>
    %21 = arith.addf %17, %20 : vector<32x1xf32>
    %22 = math.rsqrt %21 : vector<32x1xf32>
    %23 = vector.broadcast %22 : vector<32x1xf32> to vector<32x16xf32>
    %24 = arith.mulf %19, %23 : vector<32x16xf32>
    %c0_11 = arith.constant 0 : index
    %c0_12 = arith.constant 0 : index
    %c0_13 = arith.constant 0 : index
    %25 = vector.load %arg4[%c0_11, %c0_12, %c0_13] : memref<1x32x1xf32, #tpu.memory_space<vmem>>, vector<1x32x1xf32>
    %26 = vector.shape_cast %25 : vector<1x32x1xf32> to vector<32x1xf32>
    %27 = vector.broadcast %26 : vector<32x1xf32> to vector<32x16xf32>
    %28 = arith.mulf %24, %27 : vector<32x16xf32>
    %c0_14 = arith.constant 0 : index
    %c0_15 = arith.constant 0 : index
    %c0_16 = arith.constant 0 : index
    %29 = vector.load %arg5[%c0_14, %c0_15, %c0_16] : memref<1x32x1xf32, #tpu.memory_space<vmem>>, vector<1x32x1xf32>
    %30 = vector.shape_cast %29 : vector<1x32x1xf32> to vector<32x1xf32>
    %31 = vector.broadcast %30 : vector<32x1xf32> to vector<32x16xf32>
    %32 = arith.addf %28, %31 : vector<32x16xf32>
    %c0_17 = arith.constant 0 : index
    %c0_18 = arith.constant 0 : index
    %c0_19 = arith.constant 0 : index
    %33 = vector.load %arg6[%c0_17, %c0_18, %c0_19] : memref<1x32x16xf32, #tpu.memory_space<vmem>>, vector<1x32x16xf32>
    %34 = vector.shape_cast %33 : vector<1x32x16xf32> to vector<32x16xf32>
    %35 = arith.addf %32, %34 : vector<32x16xf32>
    %c0_20 = arith.constant 0 : index
    %c0_21 = arith.constant 0 : index
    %c0_22 = arith.constant 0 : index
    %36 = vector.load %arg7[%c0_20, %c0_21, %c0_22] : memref<1x32x16xf32, #tpu.memory_space<vmem>>, vector<1x32x16xf32>
    %37 = vector.shape_cast %36 : vector<1x32x16xf32> to vector<32x16xf32>
    %38 = vector.shape_cast %35 : vector<32x16xf32> to vector<1x32x16xf32>
    tpu.vector_store %arg7[%c0_20, %c0_21, %c0_22], %38 {strides = array<i32>} : memref<1x32x16xf32, #tpu.memory_space<vmem>>, vector<1x32x16xf32>,
    return
  }
  func.func @transform_0(%arg0: i32) -> (i32, i32, i32) {
    %c0_i32 = arith.constant 0 : i32
    %c0_i32_0 = arith.constant 0 : i32
    %c0_i32_1 = arith.constant 0 : i32
    return %arg0, %c0_i32, %c0_i32_0 : i32, i32, i32
  }
  func.func @transform_1(%arg0: i32) -> (i32, i32) {
    %c0_i32 = arith.constant 0 : i32
    %c0_i32_0 = arith.constant 0 : i32
    %c0_i32_1 = arith.constant 0 : i32
    return %c0_i32, %c0_i32_0 : i32, i32
  }
  func.func @transform_2(%arg0: i32) -> (i32, i32) {
    %c0_i32 = arith.constant 0 : i32
    %c0_i32_0 = arith.constant 0 : i32
    %c0_i32_1 = arith.constant 0 : i32
    return %c0_i32, %c0_i32_0 : i32, i32
  }
  func.func @transform_3(%arg0: i32) -> (i32, i32, i32) {
    %c0_i32 = arith.constant 0 : i32
    %c0_i32_0 = arith.constant 0 : i32
    %c0_i32_1 = arith.constant 0 : i32
    return %arg0, %c0_i32, %c0_i32_0 : i32, i32, i32
  }
  func.func @transform_4(%arg0: i32) -> (i32, i32, i32) {
    %c0_i32 = arith.constant 0 : i32
    %c0_i32_0 = arith.constant 0 : i32
    %c0_i32_1 = arith.constant 0 : i32
    return %arg0, %c0_i32, %c0_i32_0 : i32, i32, i32
  }
  func.func @transform_5(%arg0: i32) -> (i32, i32, i32) {
    %c0_i32 = arith.constant 0 : i32
    %c0_i32_0 = arith.constant 0 : i32
    %c0_i32_1 = arith.constant 0 : i32
    return %arg0, %c0_i32, %c0_i32_0 : i32, i32, i32
  }
  func.func @transform_6(%arg0: i32) -> (i32, i32, i32) {
    %c0_i32 = arith.constant 0 : i32
    %c0_i32_0 = arith.constant 0 : i32
    %c0_i32_1 = arith.constant 0 : i32
    return %arg0, %c0_i32, %c0_i32_0 : i32, i32, i32
  }
}

module attributes {stable_mosaic.version = 11 : i64} {
  func.func @_conv_block_kernel(%arg0: i32, %arg1: memref<1x288x16xf32, #tpu.memory_space<vmem>>, %arg2: memref<32x288xf32, #tpu.memory_space<vmem>>, %arg3: memref<32x1xf32, #tpu.memory_space<vmem>>, %arg4: memref<1x32x1xf32, #tpu.memory_space<vmem>>, %arg5: memref<1x32x1xf32, #tpu.memory_space<vmem>>, %arg6: memref<1x32x16xf32, #tpu.memory_space<vmem>>) attributes {dimension_semantics = [#tpu.dimension_semantics<parallel>], iteration_bounds = array<i64: 2>, scalar_prefetch = 0 : i64, scratch_operands = 0 : i64, tpu.core_type = #tpu.core_type<tc>, window_params = [{transform_indices = @transform_0, window_bounds = array<i64: 1, 288, 16>}, {pipeline_mode = #tpu.pipeline_mode<synchronous>, transform_indices = @transform_1, window_bounds = array<i64: 32, 288>}, {pipeline_mode = #tpu.pipeline_mode<synchronous>, transform_indices = @transform_2, window_bounds = array<i64: 32, 1>}, {transform_indices = @transform_3, window_bounds = array<i64: 1, 32, 1>}, {transform_indices = @transform_4, window_bounds = array<i64: 1, 32, 1>}, {transform_indices = @transform_5, window_bounds = array<i64: 1, 32, 16>}]} {
    %c0 = arith.constant 0 : index
    %c0_0 = arith.constant 0 : index
    %0 = vector.load %arg2[%c0, %c0_0] : memref<32x288xf32, #tpu.memory_space<vmem>>, vector<32x288xf32>
    %c0_1 = arith.constant 0 : index
    %c0_2 = arith.constant 0 : index
    %c0_3 = arith.constant 0 : index
    %1 = vector.load %arg1[%c0_1, %c0_2, %c0_3] : memref<1x288x16xf32, #tpu.memory_space<vmem>>, vector<1x288x16xf32>
    %2 = vector.shape_cast %1 : vector<1x288x16xf32> to vector<288x16xf32>
    %cst = arith.constant dense<0.000000e+00> : vector<32x16xf32>
    %3 = tpu.matmul %0, %2, %cst {dimension_numbers = #tpu.dot_dimension_numbers<[1], [0], [0], [1], [0, 0, 1, 1], [], []>} : vector<32x288xf32>, vector<288x16xf32>, vector<32x16xf32> -> vector<32x16xf32>
    %c0_4 = arith.constant 0 : index
    %c0_5 = arith.constant 0 : index
    %4 = vector.load %arg3[%c0_4, %c0_5] : memref<32x1xf32, #tpu.memory_space<vmem>>, vector<32x1xf32>
    %5 = vector.broadcast %4 : vector<32x1xf32> to vector<32x16xf32>
    %6 = arith.addf %3, %5 : vector<32x16xf32>
    %cst_6 = arith.constant dense<0.000000e+00> : vector<32xf32>
    %7 = vector.multi_reduction <add>, %6, %cst_6 [1] : vector<32x16xf32> to vector<32xf32>
    %8 = vector.shape_cast %7 : vector<32xf32> to vector<32x1xf32>
    %cst_7 = arith.constant 1.600000e+01 : f32
    %9 = vector.broadcast %cst_7 : f32 to vector<32x1xf32>
    %10 = arith.divf %8, %9 : vector<32x1xf32>
    %11 = vector.broadcast %10 : vector<32x1xf32> to vector<32x16xf32>
    %12 = arith.subf %6, %11 : vector<32x16xf32>
    %13 = arith.mulf %12, %12 : vector<32x16xf32>
    %cst_8 = arith.constant dense<0.000000e+00> : vector<32xf32>
    %14 = vector.multi_reduction <add>, %13, %cst_8 [1] : vector<32x16xf32> to vector<32xf32>
    %15 = vector.shape_cast %14 : vector<32xf32> to vector<32x1xf32>
    %cst_9 = arith.constant 1.600000e+01 : f32
    %16 = vector.broadcast %cst_9 : f32 to vector<32x1xf32>
    %17 = arith.divf %15, %16 : vector<32x1xf32>
    %18 = vector.broadcast %10 : vector<32x1xf32> to vector<32x16xf32>
    %19 = arith.subf %6, %18 : vector<32x16xf32>
    %cst_10 = arith.constant 9.99999974E-6 : f32
    %20 = vector.broadcast %cst_10 : f32 to vector<32x1xf32>
    %21 = arith.addf %17, %20 : vector<32x1xf32>
    %22 = math.rsqrt %21 : vector<32x1xf32>
    %23 = vector.broadcast %22 : vector<32x1xf32> to vector<32x16xf32>
    %24 = arith.mulf %19, %23 : vector<32x16xf32>
    %c0_11 = arith.constant 0 : index
    %c0_12 = arith.constant 0 : index
    %c0_13 = arith.constant 0 : index
    %25 = vector.load %arg4[%c0_11, %c0_12, %c0_13] : memref<1x32x1xf32, #tpu.memory_space<vmem>>, vector<1x32x1xf32>
    %26 = vector.shape_cast %25 : vector<1x32x1xf32> to vector<32x1xf32>
    %27 = vector.broadcast %26 : vector<32x1xf32> to vector<32x16xf32>
    %28 = arith.mulf %24, %27 : vector<32x16xf32>
    %c0_14 = arith.constant 0 : index
    %c0_15 = arith.constant 0 : index
    %c0_16 = arith.constant 0 : index
    %29 = vector.load %arg5[%c0_14, %c0_15, %c0_16] : memref<1x32x1xf32, #tpu.memory_space<vmem>>, vector<1x32x1xf32>
    %30 = vector.shape_cast %29 : vector<1x32x1xf32> to vector<32x1xf32>
    %31 = vector.broadcast %30 : vector<32x1xf32> to vector<32x16xf32>
    %32 = arith.addf %28, %31 : vector<32x16xf32>
    %cst_17 = arith.constant 0.000000e+00 : f32
    %33 = vector.broadcast %cst_17 : f32 to vector<32x16xf32>
    %34 = arith.maximumf %32, %33 : vector<32x16xf32>
    %c0_18 = arith.constant 0 : index
    %c0_19 = arith.constant 0 : index
    %c0_20 = arith.constant 0 : index
    %35 = vector.load %arg6[%c0_18, %c0_19, %c0_20] : memref<1x32x16xf32, #tpu.memory_space<vmem>>, vector<1x32x16xf32>
    %36 = vector.shape_cast %35 : vector<1x32x16xf32> to vector<32x16xf32>
    %37 = vector.shape_cast %34 : vector<32x16xf32> to vector<1x32x16xf32>
    tpu.vector_store %arg6[%c0_18, %c0_19, %c0_20], %37 {strides = array<i32>} : memref<1x32x16xf32, #tpu.memory_space<vmem>>, vector<1x32x16xf32>,
    return
  }
  func.func @transform_0(%arg0: i32) -> (i32, i32, i32) {
    %c0_i32 = arith.constant 0 : i32
    %c0_i32_0 = arith.constant 0 : i32
    %c0_i32_1 = arith.constant 0 : i32
    return %arg0, %c0_i32, %c0_i32_0 : i32, i32, i32
  }
  func.func @transform_1(%arg0: i32) -> (i32, i32) {
    %c0_i32 = arith.constant 0 : i32
    %c0_i32_0 = arith.constant 0 : i32
    %c0_i32_1 = arith.constant 0 : i32
    return %c0_i32, %c0_i32_0 : i32, i32
  }
  func.func @transform_2(%arg0: i32) -> (i32, i32) {
    %c0_i32 = arith.constant 0 : i32
    %c0_i32_0 = arith.constant 0 : i32
    %c0_i32_1 = arith.constant 0 : i32
    return %c0_i32, %c0_i32_0 : i32, i32
  }
  func.func @transform_3(%arg0: i32) -> (i32, i32, i32) {
    %c0_i32 = arith.constant 0 : i32
    %c0_i32_0 = arith.constant 0 : i32
    %c0_i32_1 = arith.constant 0 : i32
    return %arg0, %c0_i32, %c0_i32_0 : i32, i32, i32
  }
  func.func @transform_4(%arg0: i32) -> (i32, i32, i32) {
    %c0_i32 = arith.constant 0 : i32
    %c0_i32_0 = arith.constant 0 : i32
    %c0_i32_1 = arith.constant 0 : i32
    return %arg0, %c0_i32, %c0_i32_0 : i32, i32, i32
  }
  func.func @transform_5(%arg0: i32) -> (i32, i32, i32) {
    %c0_i32 = arith.constant 0 : i32
    %c0_i32_0 = arith.constant 0 : i32
    %c0_i32_1 = arith.constant 0 : i32
    return %arg0, %c0_i32, %c0_i32_0 : i32, i32, i32
  }
}

module attributes {stable_mosaic.version = 11 : i64} {
  func.func @_conv_block_kernel(%arg0: i32, %arg1: memref<1x800x64xf32, #tpu.memory_space<vmem>>, %arg2: memref<16x800xf32, #tpu.memory_space<vmem>>, %arg3: memref<16x1xf32, #tpu.memory_space<vmem>>, %arg4: memref<16x1xf32, #tpu.memory_space<vmem>>, %arg5: memref<16x1xf32, #tpu.memory_space<vmem>>, %arg6: memref<1x16x64xf32, #tpu.memory_space<vmem>>) attributes {dimension_semantics = [#tpu.dimension_semantics<parallel>], iteration_bounds = array<i64: 2>, scalar_prefetch = 0 : i64, scratch_operands = 0 : i64, tpu.core_type = #tpu.core_type<tc>, window_params = [{transform_indices = @transform_0, window_bounds = array<i64: 1, 800, 64>}, {pipeline_mode = #tpu.pipeline_mode<synchronous>, transform_indices = @transform_1, window_bounds = array<i64: 16, 800>}, {pipeline_mode = #tpu.pipeline_mode<synchronous>, transform_indices = @transform_2, window_bounds = array<i64: 16, 1>}, {pipeline_mode = #tpu.pipeline_mode<synchronous>, transform_indices = @transform_3, window_bounds = array<i64: 16, 1>}, {pipeline_mode = #tpu.pipeline_mode<synchronous>, transform_indices = @transform_4, window_bounds = array<i64: 16, 1>}, {transform_indices = @transform_5, window_bounds = array<i64: 1, 16, 64>}]} {
    %c0 = arith.constant 0 : index
    %c0_0 = arith.constant 0 : index
    %0 = vector.load %arg2[%c0, %c0_0] : memref<16x800xf32, #tpu.memory_space<vmem>>, vector<16x800xf32>
    %c0_1 = arith.constant 0 : index
    %c0_2 = arith.constant 0 : index
    %c0_3 = arith.constant 0 : index
    %1 = vector.load %arg1[%c0_1, %c0_2, %c0_3] : memref<1x800x64xf32, #tpu.memory_space<vmem>>, vector<1x800x64xf32>
    %2 = vector.shape_cast %1 : vector<1x800x64xf32> to vector<800x64xf32>
    %cst = arith.constant dense<0.000000e+00> : vector<16x64xf32>
    %3 = tpu.matmul %0, %2, %cst {dimension_numbers = #tpu.dot_dimension_numbers<[1], [0], [0], [1], [0, 0, 1, 1], [], []>} : vector<16x800xf32>, vector<800x64xf32>, vector<16x64xf32> -> vector<16x64xf32>
    %c0_4 = arith.constant 0 : index
    %c0_5 = arith.constant 0 : index
    %4 = vector.load %arg3[%c0_4, %c0_5] : memref<16x1xf32, #tpu.memory_space<vmem>>, vector<16x1xf32>
    %5 = vector.broadcast %4 : vector<16x1xf32> to vector<16x64xf32>
    %6 = arith.addf %3, %5 : vector<16x64xf32>
    %7 = vector.shape_cast %6 : vector<16x64xf32> to vector<1x16x64xf32>
    %cst_6 = arith.constant dense<0.000000e+00> : vector<1xf32>
    %8 = vector.multi_reduction <add>, %7, %cst_6 [1, 2] : vector<1x16x64xf32> to vector<1xf32>
    %9 = vector.shape_cast %8 : vector<1xf32> to vector<1x1x1xf32>
    %10 = vector.extract %9[0, 0, 0] : f32 from vector<1x1x1xf32>
    %11 = vector.broadcast %10 : f32 to vector<1x1xf32>
    %cst_7 = arith.constant 1.024000e+03 : f32
    %12 = vector.broadcast %cst_7 : f32 to vector<1x1xf32>
    %13 = arith.divf %11, %12 : vector<1x1xf32>
    %14 = vector.broadcast %13 : vector<1x1xf32> to vector<16x64xf32>
    %15 = arith.subf %6, %14 : vector<16x64xf32>
    %16 = arith.mulf %15, %15 : vector<16x64xf32>
    %17 = vector.shape_cast %16 : vector<16x64xf32> to vector<1x16x64xf32>
    %cst_8 = arith.constant dense<0.000000e+00> : vector<1xf32>
    %18 = vector.multi_reduction <add>, %17, %cst_8 [1, 2] : vector<1x16x64xf32> to vector<1xf32>
    %19 = vector.shape_cast %18 : vector<1xf32> to vector<1x1x1xf32>
    %20 = vector.extract %19[0, 0, 0] : f32 from vector<1x1x1xf32>
    %21 = vector.broadcast %20 : f32 to vector<1x1xf32>
    %cst_9 = arith.constant 1.023000e+03 : f32
    %22 = vector.broadcast %cst_9 : f32 to vector<1x1xf32>
    %23 = arith.divf %21, %22 : vector<1x1xf32>
    %24 = vector.broadcast %13 : vector<1x1xf32> to vector<16x64xf32>
    %25 = arith.subf %6, %24 : vector<16x64xf32>
    %26 = math.sqrt %23 : vector<1x1xf32>
    %cst_10 = arith.constant 9.99999974E-6 : f32
    %27 = vector.broadcast %cst_10 : f32 to vector<1x1xf32>
    %28 = arith.addf %26, %27 : vector<1x1xf32>
    %29 = vector.broadcast %28 : vector<1x1xf32> to vector<16x64xf32>
    %30 = arith.divf %25, %29 : vector<16x64xf32>
    %c0_11 = arith.constant 0 : index
    %c0_12 = arith.constant 0 : index
    %31 = vector.load %arg4[%c0_11, %c0_12] : memref<16x1xf32, #tpu.memory_space<vmem>>, vector<16x1xf32>
    %32 = vector.broadcast %31 : vector<16x1xf32> to vector<16x64xf32>
    %33 = arith.mulf %30, %32 : vector<16x64xf32>
    %c0_13 = arith.constant 0 : index
    %c0_14 = arith.constant 0 : index
    %34 = vector.load %arg5[%c0_13, %c0_14] : memref<16x1xf32, #tpu.memory_space<vmem>>, vector<16x1xf32>
    %35 = vector.broadcast %34 : vector<16x1xf32> to vector<16x64xf32>
    %36 = arith.addf %33, %35 : vector<16x64xf32>
    %cst_15 = arith.constant 0.000000e+00 : f32
    %37 = vector.broadcast %cst_15 : f32 to vector<16x64xf32>
    %38 = arith.maximumf %36, %37 : vector<16x64xf32>
    %c0_16 = arith.constant 0 : index
    %c0_17 = arith.constant 0 : index
    %c0_18 = arith.constant 0 : index
    %39 = vector.load %arg6[%c0_16, %c0_17, %c0_18] : memref<1x16x64xf32, #tpu.memory_space<vmem>>, vector<1x16x64xf32>
    %40 = vector.shape_cast %39 : vector<1x16x64xf32> to vector<16x64xf32>
    %41 = vector.shape_cast %38 : vector<16x64xf32> to vector<1x16x64xf32>
    tpu.vector_store %arg6[%c0_16, %c0_17, %c0_18], %41 {strides = array<i32>} : memref<1x16x64xf32, #tpu.memory_space<vmem>>, vector<1x16x64xf32>,
    return
  }
  func.func @transform_0(%arg0: i32) -> (i32, i32, i32) {
    %c0_i32 = arith.constant 0 : i32
    %c0_i32_0 = arith.constant 0 : i32
    %c0_i32_1 = arith.constant 0 : i32
    return %arg0, %c0_i32, %c0_i32_0 : i32, i32, i32
  }
  func.func @transform_1(%arg0: i32) -> (i32, i32) {
    %c0_i32 = arith.constant 0 : i32
    %c0_i32_0 = arith.constant 0 : i32
    %c0_i32_1 = arith.constant 0 : i32
    return %c0_i32, %c0_i32_0 : i32, i32
  }
  func.func @transform_2(%arg0: i32) -> (i32, i32) {
    %c0_i32 = arith.constant 0 : i32
    %c0_i32_0 = arith.constant 0 : i32
    %c0_i32_1 = arith.constant 0 : i32
    return %c0_i32, %c0_i32_0 : i32, i32
  }
  func.func @transform_3(%arg0: i32) -> (i32, i32) {
    %c0_i32 = arith.constant 0 : i32
    %c0_i32_0 = arith.constant 0 : i32
    %c0_i32_1 = arith.constant 0 : i32
    return %c0_i32, %c0_i32_0 : i32, i32
  }
  func.func @transform_4(%arg0: i32) -> (i32, i32) {
    %c0_i32 = arith.constant 0 : i32
    %c0_i32_0 = arith.constant 0 : i32
    %c0_i32_1 = arith.constant 0 : i32
    return %c0_i32, %c0_i32_0 : i32, i32
  }
  func.func @transform_5(%arg0: i32) -> (i32, i32, i32) {
    %c0_i32 = arith.constant 0 : i32
    %c0_i32_0 = arith.constant 0 : i32
    %c0_i32_1 = arith.constant 0 : i32
    return %arg0, %c0_i32, %c0_i32_0 : i32, i32, i32
  }
}

module attributes {stable_mosaic.version = 11 : i64} {
  func.func @_conv_block_kernel(%arg0: i32, %arg1: memref<1x400x256xf32, #tpu.memory_space<vmem>>, %arg2: memref<8x400xf32, #tpu.memory_space<vmem>>, %arg3: memref<8x1xf32, #tpu.memory_space<vmem>>, %arg4: memref<8x1xf32, #tpu.memory_space<vmem>>, %arg5: memref<8x1xf32, #tpu.memory_space<vmem>>, %arg6: memref<1x8x256xf32, #tpu.memory_space<vmem>>) attributes {dimension_semantics = [#tpu.dimension_semantics<parallel>], iteration_bounds = array<i64: 2>, scalar_prefetch = 0 : i64, scratch_operands = 0 : i64, tpu.core_type = #tpu.core_type<tc>, window_params = [{transform_indices = @transform_0, window_bounds = array<i64: 1, 400, 256>}, {pipeline_mode = #tpu.pipeline_mode<synchronous>, transform_indices = @transform_1, window_bounds = array<i64: 8, 400>}, {pipeline_mode = #tpu.pipeline_mode<synchronous>, transform_indices = @transform_2, window_bounds = array<i64: 8, 1>}, {pipeline_mode = #tpu.pipeline_mode<synchronous>, transform_indices = @transform_3, window_bounds = array<i64: 8, 1>}, {pipeline_mode = #tpu.pipeline_mode<synchronous>, transform_indices = @transform_4, window_bounds = array<i64: 8, 1>}, {transform_indices = @transform_5, window_bounds = array<i64: 1, 8, 256>}]} {
    %c0 = arith.constant 0 : index
    %c0_0 = arith.constant 0 : index
    %0 = vector.load %arg2[%c0, %c0_0] : memref<8x400xf32, #tpu.memory_space<vmem>>, vector<8x400xf32>
    %c0_1 = arith.constant 0 : index
    %c0_2 = arith.constant 0 : index
    %c0_3 = arith.constant 0 : index
    %1 = vector.load %arg1[%c0_1, %c0_2, %c0_3] : memref<1x400x256xf32, #tpu.memory_space<vmem>>, vector<1x400x256xf32>
    %2 = vector.shape_cast %1 : vector<1x400x256xf32> to vector<400x256xf32>
    %cst = arith.constant dense<0.000000e+00> : vector<8x256xf32>
    %3 = tpu.matmul %0, %2, %cst {dimension_numbers = #tpu.dot_dimension_numbers<[1], [0], [0], [1], [0, 0, 1, 1], [], []>} : vector<8x400xf32>, vector<400x256xf32>, vector<8x256xf32> -> vector<8x256xf32>
    %c0_4 = arith.constant 0 : index
    %c0_5 = arith.constant 0 : index
    %4 = vector.load %arg3[%c0_4, %c0_5] : memref<8x1xf32, #tpu.memory_space<vmem>>, vector<8x1xf32>
    %5 = vector.broadcast %4 : vector<8x1xf32> to vector<8x256xf32>
    %6 = arith.addf %3, %5 : vector<8x256xf32>
    %7 = vector.shape_cast %6 : vector<8x256xf32> to vector<1x8x256xf32>
    %cst_6 = arith.constant dense<0.000000e+00> : vector<1xf32>
    %8 = vector.multi_reduction <add>, %7, %cst_6 [1, 2] : vector<1x8x256xf32> to vector<1xf32>
    %9 = vector.shape_cast %8 : vector<1xf32> to vector<1x1x1xf32>
    %10 = vector.extract %9[0, 0, 0] : f32 from vector<1x1x1xf32>
    %11 = vector.broadcast %10 : f32 to vector<1x1xf32>
    %cst_7 = arith.constant 2.048000e+03 : f32
    %12 = vector.broadcast %cst_7 : f32 to vector<1x1xf32>
    %13 = arith.divf %11, %12 : vector<1x1xf32>
    %14 = vector.broadcast %13 : vector<1x1xf32> to vector<8x256xf32>
    %15 = arith.subf %6, %14 : vector<8x256xf32>
    %16 = arith.mulf %15, %15 : vector<8x256xf32>
    %17 = vector.shape_cast %16 : vector<8x256xf32> to vector<1x8x256xf32>
    %cst_8 = arith.constant dense<0.000000e+00> : vector<1xf32>
    %18 = vector.multi_reduction <add>, %17, %cst_8 [1, 2] : vector<1x8x256xf32> to vector<1xf32>
    %19 = vector.shape_cast %18 : vector<1xf32> to vector<1x1x1xf32>
    %20 = vector.extract %19[0, 0, 0] : f32 from vector<1x1x1xf32>
    %21 = vector.broadcast %20 : f32 to vector<1x1xf32>
    %cst_9 = arith.constant 2.047000e+03 : f32
    %22 = vector.broadcast %cst_9 : f32 to vector<1x1xf32>
    %23 = arith.divf %21, %22 : vector<1x1xf32>
    %24 = vector.broadcast %13 : vector<1x1xf32> to vector<8x256xf32>
    %25 = arith.subf %6, %24 : vector<8x256xf32>
    %26 = math.sqrt %23 : vector<1x1xf32>
    %cst_10 = arith.constant 9.99999974E-6 : f32
    %27 = vector.broadcast %cst_10 : f32 to vector<1x1xf32>
    %28 = arith.addf %26, %27 : vector<1x1xf32>
    %29 = vector.broadcast %28 : vector<1x1xf32> to vector<8x256xf32>
    %30 = arith.divf %25, %29 : vector<8x256xf32>
    %c0_11 = arith.constant 0 : index
    %c0_12 = arith.constant 0 : index
    %31 = vector.load %arg4[%c0_11, %c0_12] : memref<8x1xf32, #tpu.memory_space<vmem>>, vector<8x1xf32>
    %32 = vector.broadcast %31 : vector<8x1xf32> to vector<8x256xf32>
    %33 = arith.mulf %30, %32 : vector<8x256xf32>
    %c0_13 = arith.constant 0 : index
    %c0_14 = arith.constant 0 : index
    %34 = vector.load %arg5[%c0_13, %c0_14] : memref<8x1xf32, #tpu.memory_space<vmem>>, vector<8x1xf32>
    %35 = vector.broadcast %34 : vector<8x1xf32> to vector<8x256xf32>
    %36 = arith.addf %33, %35 : vector<8x256xf32>
    %cst_15 = arith.constant 0.000000e+00 : f32
    %37 = vector.broadcast %cst_15 : f32 to vector<8x256xf32>
    %38 = arith.maximumf %36, %37 : vector<8x256xf32>
    %c0_16 = arith.constant 0 : index
    %c0_17 = arith.constant 0 : index
    %c0_18 = arith.constant 0 : index
    %39 = vector.load %arg6[%c0_16, %c0_17, %c0_18] : memref<1x8x256xf32, #tpu.memory_space<vmem>>, vector<1x8x256xf32>
    %40 = vector.shape_cast %39 : vector<1x8x256xf32> to vector<8x256xf32>
    %41 = vector.shape_cast %38 : vector<8x256xf32> to vector<1x8x256xf32>
    tpu.vector_store %arg6[%c0_16, %c0_17, %c0_18], %41 {strides = array<i32>} : memref<1x8x256xf32, #tpu.memory_space<vmem>>, vector<1x8x256xf32>,
    return
  }
  func.func @transform_0(%arg0: i32) -> (i32, i32, i32) {
    %c0_i32 = arith.constant 0 : i32
    %c0_i32_0 = arith.constant 0 : i32
    %c0_i32_1 = arith.constant 0 : i32
    return %arg0, %c0_i32, %c0_i32_0 : i32, i32, i32
  }
  func.func @transform_1(%arg0: i32) -> (i32, i32) {
    %c0_i32 = arith.constant 0 : i32
    %c0_i32_0 = arith.constant 0 : i32
    %c0_i32_1 = arith.constant 0 : i32
    return %c0_i32, %c0_i32_0 : i32, i32
  }
  func.func @transform_2(%arg0: i32) -> (i32, i32) {
    %c0_i32 = arith.constant 0 : i32
    %c0_i32_0 = arith.constant 0 : i32
    %c0_i32_1 = arith.constant 0 : i32
    return %c0_i32, %c0_i32_0 : i32, i32
  }
  func.func @transform_3(%arg0: i32) -> (i32, i32) {
    %c0_i32 = arith.constant 0 : i32
    %c0_i32_0 = arith.constant 0 : i32
    %c0_i32_1 = arith.constant 0 : i32
    return %c0_i32, %c0_i32_0 : i32, i32
  }
  func.func @transform_4(%arg0: i32) -> (i32, i32) {
    %c0_i32 = arith.constant 0 : i32
    %c0_i32_0 = arith.constant 0 : i32
    %c0_i32_1 = arith.constant 0 : i32
    return %c0_i32, %c0_i32_0 : i32, i32
  }
  func.func @transform_5(%arg0: i32) -> (i32, i32, i32) {
    %c0_i32 = arith.constant 0 : i32
    %c0_i32_0 = arith.constant 0 : i32
    %c0_i32_1 = arith.constant 0 : i32
    return %arg0, %c0_i32, %c0_i32_0 : i32, i32, i32
  }
}

module attributes {stable_mosaic.version = 11 : i64} {
  func.func @_conv_block_kernel(%arg0: i32, %arg1: memref<1x392x256xf32, #tpu.memory_space<vmem>>, %arg2: memref<4x392xf32, #tpu.memory_space<vmem>>, %arg3: memref<4x1xf32, #tpu.memory_space<vmem>>, %arg4: memref<1x4x256xf32, #tpu.memory_space<vmem>>) attributes {dimension_semantics = [#tpu.dimension_semantics<parallel>], iteration_bounds = array<i64: 2>, scalar_prefetch = 0 : i64, scratch_operands = 0 : i64, tpu.core_type = #tpu.core_type<tc>, window_params = [{transform_indices = @transform_0, window_bounds = array<i64: 1, 392, 256>}, {pipeline_mode = #tpu.pipeline_mode<synchronous>, transform_indices = @transform_1, window_bounds = array<i64: 4, 392>}, {pipeline_mode = #tpu.pipeline_mode<synchronous>, transform_indices = @transform_2, window_bounds = array<i64: 4, 1>}, {transform_indices = @transform_3, window_bounds = array<i64: 1, 4, 256>}]} {
    %c0 = arith.constant 0 : index
    %c0_0 = arith.constant 0 : index
    %0 = vector.load %arg2[%c0, %c0_0] : memref<4x392xf32, #tpu.memory_space<vmem>>, vector<4x392xf32>
    %c0_1 = arith.constant 0 : index
    %c0_2 = arith.constant 0 : index
    %c0_3 = arith.constant 0 : index
    %1 = vector.load %arg1[%c0_1, %c0_2, %c0_3] : memref<1x392x256xf32, #tpu.memory_space<vmem>>, vector<1x392x256xf32>
    %2 = vector.shape_cast %1 : vector<1x392x256xf32> to vector<392x256xf32>
    %cst = arith.constant dense<0.000000e+00> : vector<4x256xf32>
    %3 = tpu.matmul %0, %2, %cst {dimension_numbers = #tpu.dot_dimension_numbers<[1], [0], [0], [1], [0, 0, 1, 1], [], []>} : vector<4x392xf32>, vector<392x256xf32>, vector<4x256xf32> -> vector<4x256xf32>
    %c0_4 = arith.constant 0 : index
    %c0_5 = arith.constant 0 : index
    %4 = vector.load %arg3[%c0_4, %c0_5] : memref<4x1xf32, #tpu.memory_space<vmem>>, vector<4x1xf32>
    %5 = vector.broadcast %4 : vector<4x1xf32> to vector<4x256xf32>
    %6 = arith.addf %3, %5 : vector<4x256xf32>
    %7 = math.tanh %6 : vector<4x256xf32>
    %c0_6 = arith.constant 0 : index
    %c0_7 = arith.constant 0 : index
    %c0_8 = arith.constant 0 : index
    %8 = vector.load %arg4[%c0_6, %c0_7, %c0_8] : memref<1x4x256xf32, #tpu.memory_space<vmem>>, vector<1x4x256xf32>
    %9 = vector.shape_cast %8 : vector<1x4x256xf32> to vector<4x256xf32>
    %10 = vector.shape_cast %7 : vector<4x256xf32> to vector<1x4x256xf32>
    tpu.vector_store %arg4[%c0_6, %c0_7, %c0_8], %10 {strides = array<i32>} : memref<1x4x256xf32, #tpu.memory_space<vmem>>, vector<1x4x256xf32>,
    return
  }
  func.func @transform_0(%arg0: i32) -> (i32, i32, i32) {
    %c0_i32 = arith.constant 0 : i32
    %c0_i32_0 = arith.constant 0 : i32
    %c0_i32_1 = arith.constant 0 : i32
    return %arg0, %c0_i32, %c0_i32_0 : i32, i32, i32
  }
  func.func @transform_1(%arg0: i32) -> (i32, i32) {
    %c0_i32 = arith.constant 0 : i32
    %c0_i32_0 = arith.constant 0 : i32
    %c0_i32_1 = arith.constant 0 : i32
    return %c0_i32, %c0_i32_0 : i32, i32
  }
  func.func @transform_2(%arg0: i32) -> (i32, i32) {
    %c0_i32 = arith.constant 0 : i32
    %c0_i32_0 = arith.constant 0 : i32
    %c0_i32_1 = arith.constant 0 : i32
    return %c0_i32, %c0_i32_0 : i32, i32
  }
  func.func @transform_3(%arg0: i32) -> (i32, i32, i32) {
    %c0_i32 = arith.constant 0 : i32
    %c0_i32_0 = arith.constant 0 : i32
    %c0_i32_1 = arith.constant 0 : i32
    return %arg0, %c0_i32, %c0_i32_0 : i32, i32, i32
  }
}

</mosaic_0001>

<bundles_post_ra>
// kernel: hit_forward.26
= control target key start
LH: loop header
LB: loop body
LE: loop exit
PB: predicated region body
PF: predicated region fallthrough
CT: control target
= control target key end

     0   :  { %s472_s12 = smov 0   ;;  %s554_s0 = inlined_call_operand.vmem [shape: f32[2,196,256], index: 0, kind: input, shape index: {}]   ;;  %s555_s1 = inlined_call_operand.vmem [shape: f32[8,196], index: 1, kind: input, shape index: {}]   ;;  %s556_s2 = inlined_call_operand.vmem [shape: f32[8,1], index: 2, kind: input, shape index: {}]   ;;  %s557_s3 = inlined_call_operand.vmem [shape: f32[2,8,256], index: 3, kind: output, shape index: {}]  }
   0x1 LB: > { %s370_s13 = sadd.s32 4294967295, %s449_s12   ;;  %p374_p0 = scmp.ge.s32.totalorder %s449_s12, 1  ;;  %s449_s12 = sphi %s472_s12, %s13_s12  }
   0x2   : > { %p137_p1 = scmp.lt.s32.totalorder %s449_s12, 3 }
   0x4   : > { %p138_p2 = pnand %p374_p0, %p137_p1 }
   0x5   : > { %p161_p3 = scmp.lt.s32.totalorder (!%p138_p2), %s370_s13, 1  ;;  %v172_v0 = vld [vmem:[%s555_s1 + $0x8] sm:$0xff] (!%p138_p2)  ;;  %vm229_vm0 = vcmask (!%p138_p2), 556032   ;;  %v451_v1 = vmov (!%p138_p2), 0   ;;  %v223_v2 = vld [vmem:[%s556_s2] sm:$0xff] (!%p138_p2)  ;;  %vm233_vm1 = vcmask (!%p138_p2), 1043456  }
   0x6   : > { %141 = sbr.rel (%p138_p2) target bundleno = 288 (0x120), region = 32  ;;  %380 = vmatprep.mubr.msk.f32.mxu0 (!%p138_p2), %vm229_vm0, %v172_v0  ;;  %442 = vset.pattern.permute.xlu0 (!%p138_p2), %v451_v1 }
   0x7   : > { %226 = vperm.xlu0 (!%p138_p2), %442, %v223_v2  }
   0xd   : > { %s559_s13 = smov (!%p161_p3, %s370_s13), 1 }
   0xe   : > { %s432_s18 = smul.u32 400, %s559_s13  ;;  %s383_s24 = sshll.u32 %s559_s13, 4 }
   0xf   : > { %s170_s27 = scalar_lea.vmem %s557_s3, %s383_s24 }
  0x10   : > { %s492_s21 = scalar_lea.vmem %s554_s0, %s432_s18 }
  0x11   : > { %v174_v3 = vld [vmem:[%s492_s21 + $0x8] sm:$0xff]  ;;  %v176_v4 = vld [vmem:[%s492_s21 + $0x18] sm:$0xff]  ;;  %v173_v5 = vld [vmem:[%s492_s21] sm:$0xff] }
  0x12   : > { %v384_v6 = vpack.c.bf16 %v176_v4, %v174_v3  ;;  %v175_v7 = vld [vmem:[%s492_s21 + $0x10] sm:$0xff]  ;;  %v178_v8 = vld [vmem:[%s492_s21 + $0x28] sm:$0xff]  ;;  %v180_v9 = vld [vmem:[%s492_s21 + $0x38] sm:$0xff] }
  0x13   : > { %v386_v10 = vpack.c.bf16 %v175_v7, %v173_v5  ;;  %v388_v11 = vpack.c.bf16 %v180_v9, %v178_v8  ;;  %v177_v12 = vld [vmem:[%s492_s21 + $0x20] sm:$0xff]  ;;  %v179_v13 = vld [vmem:[%s492_s21 + $0x30] sm:$0xff]  ;;  %v182_v14 = vld [vmem:[%s492_s21 + $0x48] sm:$0xff] }
  0x14   : > { %385 = vmatprep.subr.bf16.mxu0 %v384_v6  ;;  %v184_v15 = vld [vmem:[%s492_s21 + $0x58] sm:$0xff]  ;;  %v390_v16 = vpack.c.bf16 %v179_v13, %v177_v12  ;;  %v181_v18 = vld [vmem:[%s492_s21 + $0x40] sm:$0xff]  ;;  %v183_v19 = vld [vmem:[%s492_s21 + $0x50] sm:$0xff] }
  0x15   : > { %387 = vmatpush1.bf16.msra.mxu0 %v386_v10  ;;  %v392_v17 = vpack.c.bf16 %v184_v15, %v182_v14  ;;  %v186_v20 = vld [vmem:[%s492_s21 + $0x68] sm:$0xff]  ;;  %v188_v21 = vld [vmem:[%s492_s21 + $0x78] sm:$0xff]  ;;  %v394_v22 = vpack.c.bf16 %v183_v19, %v181_v18  ;;  %v185_v24 = vld [vmem:[%s492_s21 + $0x60] sm:$0xff] }
  0x16   : > { %389 = vmatprep.subr.bf16.mxu0 %v388_v11  ;;  %v396_v23 = vpack.c.bf16 %v188_v21, %v186_v20  ;;  %v187_v25 = vld [vmem:[%s492_s21 + $0x70] sm:$0xff]  ;;  %v190_v26 = vld [vmem:[%s492_s21 + $0x88] sm:$0xff]  ;;  %v192_v27 = vld [vmem:[%s492_s21 + $0x98] sm:$0xff] }
  0x17   : > { %v398_v28 = vpack.c.bf16 %v187_v25, %v185_v24  ;;  %v400_v29 = vpack.c.bf16 %v192_v27, %v190_v26  ;;  %v189_v30 = vld [vmem:[%s492_s21 + $0x80] sm:$0xff]  ;;  %v191_v31 = vld [vmem:[%s492_s21 + $0x90] sm:$0xff]  ;;  %v194_v32 = vld [vmem:[%s492_s21 + $0xa8] sm:$0xff] }
  0x18   : > { %v196_v33 = vld [vmem:[%s492_s21 + $0xb8] sm:$0xff]  ;;  %v402_v34 = vpack.c.bf16 %v191_v31, %v189_v30  ;;  %v193_v36 = vld [vmem:[%s492_s21 + $0xa0] sm:$0xff]  ;;  %v195_v37 = vld [vmem:[%s492_s21 + $0xb0] sm:$0xff] }
  0x19   : > { %391 = vmatpush1.bf16.msra.mxu0 %v390_v16  ;;  %v404_v35 = vpack.c.bf16 %v196_v33, %v194_v32  ;;  %v198_v38 = vld [vmem:[%s492_s21 + $0xc8] sm:$0xff]  ;;  %v200_v39 = vld [vmem:[%s492_s21 + $0xd8] sm:$0xff]  ;;  %v406_v40 = vpack.c.bf16 %v195_v37, %v193_v36  ;;  %v197_v42 = vld [vmem:[%s492_s21 + $0xc0] sm:$0xff] }
  0x1a   : > { %393 = vmatprep.subr.bf16.mxu0 %v392_v17  ;;  %v408_v41 = vpack.c.bf16 %v200_v39, %v198_v38  ;;  %v199_v43 = vld [vmem:[%s492_s21 + $0xd0] sm:$0xff]  ;;  %v202_v44 = vld [vmem:[%s492_s21 + $0xe8] sm:$0xff]  ;;  %v204_v45 = vld [vmem:[%s492_s21 + $0xf8] sm:$0xff] }
  0x1b   : > { %v410_v46 = vpack.c.bf16 %v199_v43, %v197_v42  ;;  %v412_v47 = vpack.c.bf16 %v204_v45, %v202_v44  ;;  %v201_v48 = vld [vmem:[%s492_s21 + $0xe0] sm:$0xff]  ;;  %v203_v49 = vld [vmem:[%s492_s21 + $0xf0] sm:$0xff]  ;;  %v206_v50 = vld [vmem:[%s492_s21 + $0x108] sm:$0xff] }
  0x1c   : > { %v208_v51 = vld [vmem:[%s492_s21 + $0x118] sm:$0xff]  ;;  %v414_v52 = vpack.c.bf16 %v203_v49, %v201_v48  ;;  %v205_v54 = vld [vmem:[%s492_s21 + $0x100] sm:$0xff]  ;;  %v207_v55 = vld [vmem:[%s492_s21 + $0x110] sm:$0xff] }
  0x1d   : > { %395 = vmatpush1.bf16.msra.mxu0 %v394_v22  ;;  %v416_v53 = vpack.c.bf16 %v208_v51, %v206_v50  ;;  %v210_v56 = vld [vmem:[%s492_s21 + $0x128] sm:$0xff]  ;;  %v212_v57 = vld [vmem:[%s492_s21 + $0x138] sm:$0xff]  ;;  %v418_v58 = vpack.c.bf16 %v207_v55, %v205_v54  ;;  %v209_v60 = vld [vmem:[%s492_s21 + $0x120] sm:$0xff] }
  0x1e   : > { %397 = vmatprep.subr.bf16.mxu0 %v396_v23  ;;  %v420_v59 = vpack.c.bf16 %v212_v57, %v210_v56  ;;  %v211_v61 = vld [vmem:[%s492_s21 + $0x130] sm:$0xff]  ;;  %v214_v62 = vld [vmem:[%s492_s21 + $0x148] sm:$0xff]  ;;  %v216_v63 = vld [vmem:[%s492_s21 + $0x158] sm:$0xff] }
  0x1f   : > { %v422_v0 = vpack.c.bf16 %v211_v61, %v209_v60  ;;  %v424_v1 = vpack.c.bf16 %v216_v63, %v214_v62  ;;  %v213_v2 = vld [vmem:[%s492_s21 + $0x140] sm:$0xff]  ;;  %v215_v3 = vld [vmem:[%s492_s21 + $0x150] sm:$0xff]  ;;  %v218_v4 = vld [vmem:[%s492_s21 + $0x168] sm:$0xff] }
  0x20   : > { %v220_v5 = vld [vmem:[%s492_s21 + $0x178] sm:$0xff]  ;;  %v426_v6 = vpack.c.bf16 %v215_v3, %v213_v2  ;;  %v217_v8 = vld [vmem:[%s492_s21 + $0x160] sm:$0xff]  ;;  %v219_v9 = vld [vmem:[%s492_s21 + $0x170] sm:$0xff] }
  0x21   : > { %399 = vmatpush1.bf16.msra.mxu0 %v398_v28  ;;  %v428_v7 = vpack.c.bf16 %v220_v5, %v218_v4  ;;  %v430_v10 = vpack.c.bf16 %v219_v9, %v217_v8  ;;  %v222_v11 = vld [vmem:[%s492_s21 + $0x188] sm:$0xf]  ;;  %v221_v12 = vld [vmem:[%s492_s21 + $0x180] sm:$0xf] }
  0x22   : > { %401 = vmatprep.subr.bf16.mxu0 %v400_v29  ;;  %v171_v13 = vld [vmem:[%s555_s1] sm:$0xff] }
  0x25   : > { %403 = vmatpush1.bf16.msra.mxu0 %v402_v34 }
  0x26   : > { %405 = vmatprep.subr.bf16.mxu0 %v404_v35 }
  0x29   : > { %407 = vmatpush1.bf16.msra.mxu0 %v406_v40 }
  0x2a   : > { %409 = vmatprep.subr.bf16.mxu0 %v408_v41 }
  0x2d   : > { %411 = vmatpush1.bf16.msra.mxu0 %v410_v46 }
  0x2e   : > { %413 = vmatprep.subr.bf16.mxu0 %v412_v47 }
  0x31   : > { %415 = vmatpush1.bf16.msra.mxu0 %v414_v52 }
  0x32   : > { %417 = vmatprep.subr.bf16.mxu0 %v416_v53 }
  0x35   : > { %419 = vmatpush1.bf16.msra.mxu0 %v418_v58 }
  0x36   : > { %421 = vmatprep.subr.bf16.mxu0 %v420_v59 }
  0x39   : > { %423 = vmatpush1.bf16.msra.mxu0 %v422_v0 }
  0x3a   : > { %425 = vmatprep.subr.bf16.mxu0 %v424_v1 }
  0x3d   : > { %427 = vmatpush1.bf16.msra.mxu0 %v426_v6 }
  0x3e   : > { %429 = vmatprep.subr.bf16.mxu0 %v428_v7 }
  0x41   : > { %431 = vmatpush1.bf16.msra.mxu0 %v430_v10 }
  0x42   : > { %378 = vmatprep.subr.msk.mxu0 %vm233_vm1, %v222_v11 }
  0x45   : > { %379 = vmatpush1.msk.msra.mxu0 %vm233_vm1, %v221_v12 }
  0x46   : > { %305 = vmatmul.mubr.f32.vlgmr.msra.gmra.mrb[0].mxu0 %v171_v13 }
  0x86   : > { %v227_v14 = vpop.permute.xlu0 %226 }
 0x119   : > { %v306_v15 = vpop.f32.mrb[0].mxu0 }
 0x11a   : > { %v307_v16 = vadd.f32 %v306_v15, %v227_v14  ;;  %v308_v17 = vpop.f32.mrb[1].mxu0 }
 0x11b   : > { %v309_v18 = vadd.f32 %v308_v17, %v227_v14 }
 0x11c   : > { %v311_v19 = vmax.f32 %v307_v16, 0.0 }
 0x11d   : > { %v312_v20 = vmax.f32 %v309_v18, 0.0 }
 0x11e   : > { %313 = vst [vmem:[%s170_s27] sm:$0xff] %v311_v19 }
 0x11f   : > { %314 = vst [vmem:[%s170_s27 + $0x8] sm:$0xff] %v312_v20 }
 0x120 PF: > { %s13_s12 = sadd.s32 1, %s449_s12  }
 0x121   : > { %p10_p4 = scmp.ge.s32.totalorder %s13_s12, 4  }
 0x123   :  { %12 = sbr.rel (!%p10_p4) target bundleno = 1 (0x1), region = 62 }

// kernel: hit_forward.27
= control target key start
LH: loop header
LB: loop body
LE: loop exit
PB: predicated region body
PF: predicated region fallthrough
CT: control target
= control target key end

     0   :  { %s473_s12 = smov 0   ;;  %s524_s0 = inlined_call_operand.vmem [shape: f32[2,128,64], index: 0, kind: input, shape index: {}]   ;;  %s525_s1 = inlined_call_operand.vmem [shape: f32[16,128], index: 1, kind: input, shape index: {}]   ;;  %s526_s2 = inlined_call_operand.vmem [shape: f32[16,1], index: 2, kind: input, shape index: {}]   ;;  %s527_s3 = inlined_call_operand.vmem [shape: f32[2,16,64], index: 3, kind: output, shape index: {}]  }
   0x1 LB: > { %s336_s13 = sadd.s32 4294967295, %s450_s12   ;;  %p340_p0 = scmp.ge.s32.totalorder %s450_s12, 1  ;;  %s450_s12 = sphi %s473_s12, %s13_s12  }
   0x2   : > { %p137_p1 = scmp.lt.s32.totalorder %s450_s12, 3 }
   0x4   : > { %p138_p2 = pnand %p340_p0, %p137_p1 }
   0x5   : > { %p161_p3 = scmp.lt.s32.totalorder (!%p138_p2), %s336_s13, 1  ;;  %v171_v0 = vld [vmem:[%s525_s1] sm:$0xff] (!%p138_p2)  ;;  %v452_v2 = vmov (!%p138_p2), 0   ;;  %v190_v3 = vld [vmem:[%s526_s2 + $0x8] sm:$0xff] (!%p138_p2)  ;;  %vm278_vm0 = vcmask (!%p138_p2), 523264  }
   0x6   : > { %141 = sbr.rel (%p138_p2) target bundleno = 269 (0x10d), region = 32  ;;  %v189_v1 = vld [vmem:[%s526_s2] sm:$0xff] (!%p138_p2)  ;;  %399 = vmatprep.mubr.f32.mxu0 (!%p138_p2), %v171_v0  ;;  %443 = vset.pattern.permute.xlu0 (!%p138_p2), %v452_v2  ;;  %v172_v28 = vld [vmem:[%s525_s1 + $0x8] sm:$0xff] (!%p138_p2) }
   0x7   : > { %193 = vperm.xlu0 (!%p138_p2), %443, %v189_v1  }
   0xb   : > { %198 = vperm.xlu0 (!%p138_p2), %443, %v190_v3  }
   0xd   : > { %s529_s13 = smov (!%p161_p3, %s336_s13), 1 }
   0xe   : > { %s347_s20 = sshll.u32 %s529_s13, 7  ;;  %s348_s26 = sshll.u32 %s529_s13, 4 }
   0xf   : > { %s496_s23 = scalar_lea.vmem %s524_s0, %s347_s20  ;;  %s170_s29 = scalar_lea.vmem %s527_s3, %s348_s26 }
  0x10   : > { %v173_v4 = vld [vmem:[%s496_s23] sm:$0xff]  ;;  %v174_v5 = vld [vmem:[%s496_s23 + $0x8] sm:$0xff]  ;;  %v175_v6 = vld [vmem:[%s496_s23 + $0x10] sm:$0xff] }
  0x11   : > { %v402_v7 = vpack.c.bf16 %v174_v5, %v173_v4  ;;  %v176_v8 = vld [vmem:[%s496_s23 + $0x18] sm:$0xff]  ;;  %v177_v10 = vld [vmem:[%s496_s23 + $0x20] sm:$0xff]  ;;  %v178_v11 = vld [vmem:[%s496_s23 + $0x28] sm:$0xff] }
  0x12   : > { %v406_v9 = vpack.c.bf16 %v176_v8, %v175_v6  ;;  %v410_v12 = vpack.c.bf16 %v178_v11, %v177_v10  ;;  %v179_v13 = vld [vmem:[%s496_s23 + $0x30] sm:$0xff]  ;;  %v180_v14 = vld [vmem:[%s496_s23 + $0x38] sm:$0xff]  ;;  %v181_v16 = vld [vmem:[%s496_s23 + $0x40] sm:$0xff] }
  0x13   : > { %403 = vmatprep.subr.bf16.mxu0 %v402_v7  ;;  %v414_v15 = vpack.c.bf16 %v180_v14, %v179_v13  ;;  %v182_v17 = vld [vmem:[%s496_s23 + $0x48] sm:$0xff]  ;;  %v183_v19 = vld [vmem:[%s496_s23 + $0x50] sm:$0xff]  ;;  %v184_v20 = vld [vmem:[%s496_s23 + $0x58] sm:$0xff] }
  0x14   : > { %405 = vmatpush3.bf16.msra.mxu0 %v402_v7  ;;  %v418_v18 = vpack.c.bf16 %v182_v17, %v181_v16  ;;  %v422_v21 = vpack.c.bf16 %v184_v20, %v183_v19  ;;  %v185_v22 = vld [vmem:[%s496_s23 + $0x60] sm:$0xff]  ;;  %v186_v23 = vld [vmem:[%s496_s23 + $0x68] sm:$0xff]  ;;  %v187_v25 = vld [vmem:[%s496_s23 + $0x70] sm:$0xff] }
  0x15   : > { %407 = vmatprep.subr.bf16.mxu0 %v406_v9  ;;  %v426_v24 = vpack.c.bf16 %v186_v23, %v185_v22  ;;  %v188_v26 = vld [vmem:[%s496_s23 + $0x78] sm:$0xff] }
  0x16   : > { %v430_v27 = vpack.c.bf16 %v188_v26, %v187_v25 }
  0x18   : > { %409 = vmatpush3.bf16.msra.mxu0 %v406_v9 }
  0x19   : > { %411 = vmatprep.subr.bf16.mxu0 %v410_v12 }
  0x1c   : > { %413 = vmatpush3.bf16.msra.mxu0 %v410_v12 }
  0x1d   : > { %415 = vmatprep.subr.bf16.mxu0 %v414_v15 }
  0x20   : > { %417 = vmatpush3.bf16.msra.mxu0 %v414_v15 }
  0x21   : > { %419 = vmatprep.subr.bf16.mxu0 %v418_v18 }
  0x24   : > { %421 = vmatpush3.bf16.msra.mxu0 %v418_v18 }
  0x25   : > { %423 = vmatprep.subr.bf16.mxu0 %v422_v21 }
  0x28   : > { %425 = vmatpush3.bf16.msra.mxu0 %v422_v21 }
  0x29   : > { %427 = vmatprep.subr.bf16.mxu0 %v426_v24 }
  0x2c   : > { %429 = vmatpush3.bf16.msra.mxu0 %v426_v24 }
  0x2d   : > { %431 = vmatprep.subr.bf16.mxu0 %v430_v27 }
  0x30   : > { %433 = vmatpush3.bf16.msra.mxu0 %v430_v27 }
  0x33   : > { %400 = vmatmul.mubr.f32.vlgmr.msra.gmra.mrb[0].mxu0 %v172_v28 }
  0x86   : > { %v194_v29 = vpop.permute.xlu0 %193 }
  0x8a   : > { %v199_v30 = vpop.permute.xlu0 %198 }
 0x106   : > { %v401_v31 = vpop.f32.mrb[0].mxu0 }
 0x107   : > { %v273_v32 = vadd.f32 %v401_v31, %v199_v30  ;;  %v267_v33 = vpop.f32.mrb[1].mxu0 }
 0x108   : > { %v268_v34 = vadd.f32 %v267_v33, %v194_v29 }
 0x109   : > { %v277_v35 = vmax.f32 %v273_v32, 0.0 }
 0x10a   : > { %v276_v36 = vmax.f32 %v268_v34, 0.0 }
 0x10b   : > { %280 = vst.msk [vmem:[%s170_s29 + $0x8] sm:$0xff] %vm278_vm0, %v277_v35 }
 0x10c   : > { %279 = vst.msk [vmem:[%s170_s29] sm:$0xff] %vm278_vm0, %v276_v36 }
 0x10d PF: > { %s13_s12 = sadd.s32 1, %s450_s12  }
 0x10e   : > { %p10_p4 = scmp.ge.s32.totalorder %s13_s12, 4  }
 0x110   :  { %12 = sbr.rel (!%p10_p4) target bundleno = 1 (0x1), region = 62 }

// kernel: hit_forward.28
= control target key start
LH: loop header
LB: loop body
LE: loop exit
PB: predicated region body
PF: predicated region fallthrough
CT: control target
= control target key end

     0   :  { %s529_s12 = smov 0   ;;  %s624_s0 = inlined_call_operand.vmem [shape: f32[2,256,16], index: 0, kind: input, shape index: {}]   ;;  %s625_s1 = inlined_call_operand.vmem [shape: f32[32,256], index: 1, kind: input, shape index: {}]   ;;  %s626_s2 = inlined_call_operand.vmem [shape: f32[32,1], index: 2, kind: input, shape index: {}]   ;;  %s627_s3 = inlined_call_operand.vmem [shape: f32[2,32,16], index: 3, kind: output, shape index: {}]  }
   0x1 LB: > { %s384_s13 = sadd.s32 4294967295, %s506_s12   ;;  %p388_p0 = scmp.ge.s32.totalorder %s506_s12, 1  ;;  %s506_s12 = sphi %s529_s12, %s13_s12  }
   0x2   : > { %p137_p1 = scmp.lt.s32.totalorder %s506_s12, 3 }
   0x4   : > { %p138_p2 = pnand %p388_p0, %p137_p1 }
   0x5   : > { %p161_p3 = scmp.lt.s32.totalorder (!%p138_p2), %s384_s13, 1  ;;  %v172_v0 = vld [vmem:[%s625_s1 + $0x8] sm:$0xff] (!%p138_p2)  ;;  %v508_v2 = vmov (!%p138_p2), 0   ;;  %v213_v3 = vld [vmem:[%s626_s2 + $0x10] sm:$0xff] (!%p138_p2)  ;;  %v211_v4 = vld [vmem:[%s626_s2] sm:$0xff] (!%p138_p2)  ;;  %vm324_vm0 = vcmask (!%p138_p2), 130048  }
   0x6   : > { %141 = sbr.rel (%p138_p2) target bundleno = 275 (0x113), region = 32  ;;  %v176_v1 = vld [vmem:[%s625_s1 + $0x28] sm:$0xff] (!%p138_p2)  ;;  %299 = vmatprep.mubr.f32.mxu0 (!%p138_p2), %v172_v0  ;;  %499 = vset.pattern.permute.xlu1 (!%p138_p2), %v508_v2  ;;  %v214_v5 = vld [vmem:[%s626_s2 + $0x18] sm:$0xff] (!%p138_p2)  ;;  %v171_v55 = vld [vmem:[%s625_s1] sm:$0xff] (!%p138_p2) }
   0x7   : > { %309 = vmatprep.mubr.f32.mxu1 (!%p138_p2), %v176_v1  ;;  %498 = vset.pattern.permute.xlu0 (!%p138_p2), %v508_v2  ;;  %v212_v6 = vld [vmem:[%s626_s2 + $0x8] sm:$0xff] (!%p138_p2)  ;;  %v175_v56 = vld [vmem:[%s625_s1 + $0x20] sm:$0xff] (!%p138_p2)  ;;  %v174_v57 = vld [vmem:[%s625_s1 + $0x18] sm:$0xff] (!%p138_p2) }
   0x8   : > { %227 = vperm.xlu1 (!%p138_p2), %499, %v213_v3   ;;  %217 = vperm.xlu0 (!%p138_p2), %498, %v211_v4   ;;  %v178_v58 = vld [vmem:[%s625_s1 + $0x38] sm:$0xff] (!%p138_p2)  ;;  %v173_v59 = vld [vmem:[%s625_s1 + $0x10] sm:$0xff] (!%p138_p2) }
   0x9   : > { %v177_v60 = vld [vmem:[%s625_s1 + $0x30] sm:$0xff] (!%p138_p2) }
   0xc   : > { %232 = vperm.xlu1 (!%p138_p2), %499, %v214_v5   ;;  %222 = vperm.xlu0 (!%p138_p2), %498, %v212_v6  }
   0xd   : > { %s629_s13 = smov (!%p161_p3, %s384_s13), 1 }
   0xe   : > { %s395_s22 = sshll.u32 %s629_s13, 8  ;;  %s396_s17 = sshll.u32 %s629_s13, 5 }
   0xf   : > { %s558_s27 = scalar_lea.vmem %s624_s0, %s395_s22  ;;  %s170_s20 = scalar_lea.vmem %s627_s3, %s396_s17 }
  0x10   : > { %v195_v7 = vld [vmem:[%s558_s27 + $0x80] sm:$0xff]  ;;  %v196_v8 = vld [vmem:[%s558_s27 + $0x88] sm:$0xff]  ;;  %v197_v12 = vld [vmem:[%s558_s27 + $0x90] sm:$0xff] }
  0x11   : > { %v179_v9 = vld [vmem:[%s558_s27] sm:$0xff]  ;;  %v441_v10 = vpack.c.bf16 %v196_v8, %v195_v7  ;;  %v180_v11 = vld [vmem:[%s558_s27 + $0x8] sm:$0xff]  ;;  %v198_v13 = vld [vmem:[%s558_s27 + $0x98] sm:$0xff] }
  0x12   : > { %v443_v14 = vpack.c.bf16 %v180_v11, %v179_v9  ;;  %v445_v15 = vpack.c.bf16 %v198_v13, %v197_v12  ;;  %v181_v16 = vld [vmem:[%s558_s27 + $0x10] sm:$0xff]  ;;  %v182_v17 = vld [vmem:[%s558_s27 + $0x18] sm:$0xff]  ;;  %v199_v18 = vld [vmem:[%s558_s27 + $0xa0] sm:$0xff] }
  0x13   : > { %442 = vmatprep.subr.bf16.mxu0 %v441_v10  ;;  %473 = vmatprep.subr.bf16.mxu1 %v441_v10  ;;  %v200_v19 = vld [vmem:[%s558_s27 + $0xa8] sm:$0xff]  ;;  %v447_v20 = vpack.c.bf16 %v182_v17, %v181_v16  ;;  %v183_v22 = vld [vmem:[%s558_s27 + $0x20] sm:$0xff]  ;;  %v201_v24 = vld [vmem:[%s558_s27 + $0xb0] sm:$0xff] }
  0x14   : > { %444 = vmatpush3.bf16.msra.mxu0 %v443_v14  ;;  %481 = vmatpush3.bf16.msra.mxu1 %v443_v14  ;;  %v449_v21 = vpack.c.bf16 %v200_v19, %v199_v18  ;;  %v184_v23 = vld [vmem:[%s558_s27 + $0x28] sm:$0xff]  ;;  %v202_v25 = vld [vmem:[%s558_s27 + $0xb8] sm:$0xff]  ;;  %v185_v28 = vld [vmem:[%s558_s27 + $0x30] sm:$0xff] }
  0x15   : > { %446 = vmatprep.subr.bf16.mxu0 %v445_v15  ;;  %474 = vmatprep.subr.bf16.mxu1 %v445_v15  ;;  %v451_v26 = vpack.c.bf16 %v184_v23, %v183_v22  ;;  %v453_v27 = vpack.c.bf16 %v202_v25, %v201_v24  ;;  %v186_v29 = vld [vmem:[%s558_s27 + $0x38] sm:$0xff]  ;;  %v203_v30 = vld [vmem:[%s558_s27 + $0xc0] sm:$0xff]  ;;  %v204_v31 = vld [vmem:[%s558_s27 + $0xc8] sm:$0xff] }
  0x16   : > { %v455_v32 = vpack.c.bf16 %v186_v29, %v185_v28  ;;  %v457_v33 = vpack.c.bf16 %v204_v31, %v203_v30  ;;  %v187_v34 = vld [vmem:[%s558_s27 + $0x40] sm:$0xff]  ;;  %v188_v35 = vld [vmem:[%s558_s27 + $0x48] sm:$0xff]  ;;  %v205_v36 = vld [vmem:[%s558_s27 + $0xd0] sm:$0xff] }
  0x17   : > { %v206_v37 = vld [vmem:[%s558_s27 + $0xd8] sm:$0xff]  ;;  %v459_v38 = vpack.c.bf16 %v188_v35, %v187_v34  ;;  %v189_v40 = vld [vmem:[%s558_s27 + $0x50] sm:$0xff]  ;;  %v207_v42 = vld [vmem:[%s558_s27 + $0xe0] sm:$0xff] }
  0x18   : > { %448 = vmatpush3.bf16.msra.mxu0 %v447_v20  ;;  %482 = vmatpush3.bf16.msra.mxu1 %v447_v20  ;;  %v461_v39 = vpack.c.bf16 %v206_v37, %v205_v36  ;;  %v190_v41 = vld [vmem:[%s558_s27 + $0x58] sm:$0xff]  ;;  %v208_v43 = vld [vmem:[%s558_s27 + $0xe8] sm:$0xff]  ;;  %v191_v46 = vld [vmem:[%s558_s27 + $0x60] sm:$0xff] }
  0x19   : > { %450 = vmatprep.subr.bf16.mxu0 %v449_v21  ;;  %475 = vmatprep.subr.bf16.mxu1 %v449_v21  ;;  %v463_v44 = vpack.c.bf16 %v190_v41, %v189_v40  ;;  %v465_v45 = vpack.c.bf16 %v208_v43, %v207_v42  ;;  %v192_v47 = vld [vmem:[%s558_s27 + $0x68] sm:$0xff]  ;;  %v209_v48 = vld [vmem:[%s558_s27 + $0xf0] sm:$0xff]  ;;  %v210_v49 = vld [vmem:[%s558_s27 + $0xf8] sm:$0xff] }
  0x1a   : > { %v467_v50 = vpack.c.bf16 %v192_v47, %v191_v46  ;;  %v469_v51 = vpack.c.bf16 %v210_v49, %v209_v48  ;;  %v193_v52 = vld [vmem:[%s558_s27 + $0x70] sm:$0xff]  ;;  %v194_v53 = vld [vmem:[%s558_s27 + $0x78] sm:$0xff] }
  0x1b   : > { %v471_v54 = vpack.c.bf16 %v194_v53, %v193_v52 }
  0x1c   : > { %452 = vmatpush3.bf16.msra.mxu0 %v451_v26  ;;  %483 = vmatpush3.bf16.msra.mxu1 %v451_v26 }
  0x1d   : > { %454 = vmatprep.subr.bf16.mxu0 %v453_v27  ;;  %476 = vmatprep.subr.bf16.mxu1 %v453_v27 }
  0x20   : > { %456 = vmatpush3.bf16.msra.mxu0 %v455_v32  ;;  %484 = vmatpush3.bf16.msra.mxu1 %v455_v32 }
  0x21   : > { %458 = vmatprep.subr.bf16.mxu0 %v457_v33  ;;  %477 = vmatprep.subr.bf16.mxu1 %v457_v33 }
  0x24   : > { %460 = vmatpush3.bf16.msra.mxu0 %v459_v38  ;;  %485 = vmatpush3.bf16.msra.mxu1 %v459_v38 }
  0x25   : > { %462 = vmatprep.subr.bf16.mxu0 %v461_v39  ;;  %478 = vmatprep.subr.bf16.mxu1 %v461_v39 }
  0x28   : > { %464 = vmatpush3.bf16.msra.mxu0 %v463_v44  ;;  %486 = vmatpush3.bf16.msra.mxu1 %v463_v44 }
  0x29   : > { %466 = vmatprep.subr.bf16.mxu0 %v465_v45  ;;  %479 = vmatprep.subr.bf16.mxu1 %v465_v45 }
  0x2c   : > { %468 = vmatpush3.bf16.msra.mxu0 %v467_v50  ;;  %487 = vmatpush3.bf16.msra.mxu1 %v467_v50 }
  0x2d   : > { %470 = vmatprep.subr.bf16.mxu0 %v469_v51  ;;  %480 = vmatprep.subr.bf16.mxu1 %v469_v51 }
  0x30   : > { %472 = vmatpush3.bf16.msra.mxu0 %v471_v54  ;;  %488 = vmatpush3.bf16.msra.mxu1 %v471_v54 }
  0x33   : > { %300 = vmatmul.mubr.f32.vlgmr.msra.gmra.mrb[0].mxu0 %v171_v55  ;;  %310 = vmatmul.mubr.f32.vlgmr.msra.gmra.mrb[0].mxu1 %v175_v56 }
  0x34   : > { %304 = vmatprep.mubr.f32.mxu0 %v174_v57  ;;  %314 = vmatprep.mubr.f32.mxu1 %v178_v58 }
  0x37   : > { %305 = vmatmul.mubr.f32.gmra.mrb[2].mxu0 %v173_v59  ;;  %315 = vmatmul.mubr.f32.gmra.mrb[2].mxu1 %v177_v60 }
  0x87   : > { %v228_v61 = vpop.permute.xlu1 %227  ;;  %v218_v62 = vpop.permute.xlu0 %217 }
  0x8b   : > { %v233_v15 = vpop.permute.xlu1 %232  ;;  %v223_v16 = vpop.permute.xlu0 %222 }
 0x106   : > { %v429_v63 = vpop.f32.mrb[0].mxu0  ;;  %v435_v0 = vpop.f32.mrb[0].mxu1 }
 0x107   : > { %v430_v1 = vpop.f32.mrb[1].mxu0  ;;  %v436_v2 = vpop.f32.mrb[1].mxu1 }
 0x108   : > { %v431_v3 = vadd.f32 %v430_v1, %v429_v63  ;;  %v437_v4 = vadd.f32 %v436_v2, %v435_v0 }
 0x10a   : > { %v302_v5 = vadd.f32 %v431_v3, %v218_v62  ;;  %v312_v6 = vadd.f32 %v437_v4, %v228_v61  ;;  %v432_v7 = vpop.f32.mrb[2].mxu0  ;;  %v438_v8 = vpop.f32.mrb[2].mxu1 }
 0x10b   : > { %v433_v9 = vpop.f32.mrb[3].mxu0  ;;  %v439_v10 = vpop.f32.mrb[3].mxu1 }
 0x10c   : > { %v320_v11 = vmax.f32 %v302_v5, 0.0  ;;  %v322_v12 = vmax.f32 %v312_v6, 0.0  ;;  %v434_v13 = vadd.f32 %v433_v9, %v432_v7  ;;  %v440_v14 = vadd.f32 %v439_v10, %v438_v8 }
 0x10e   : > { %325 = vst.msk [vmem:[%s170_s20] sm:$0xff] %vm324_vm0, %v320_v11  ;;  %327 = vst.msk [vmem:[%s170_s20 + $0x10] sm:$0xff] %vm324_vm0, %v322_v12  ;;  %v307_v17 = vadd.f32 %v434_v13, %v223_v16  ;;  %v317_v18 = vadd.f32 %v440_v14, %v233_v15 }
 0x110   : > { %v321_v19 = vmax.f32 %v307_v17, 0.0  ;;  %v323_v20 = vmax.f32 %v317_v18, 0.0 }
 0x112   : > { %326 = vst.msk [vmem:[%s170_s20 + $0x8] sm:$0xff] %vm324_vm0, %v321_v19  ;;  %328 = vst.msk [vmem:[%s170_s20 + $0x18] sm:$0xff] %vm324_vm0, %v323_v20 }
 0x113 PF: > { %s13_s12 = sadd.s32 1, %s506_s12  }
 0x114   : > { %p10_p4 = scmp.ge.s32.totalorder %s13_s12, 4  }
 0x116   :  { %12 = sbr.rel (!%p10_p4) target bundleno = 1 (0x1), region = 62 }

// kernel: hit_forward.29
= control target key start
LH: loop header
LB: loop body
LE: loop exit
PB: predicated region body
PF: predicated region fallthrough
CT: control target
= control target key end

     0   :  { %s714_s12 = smov 0   ;;  %s865_s0 = inlined_call_operand.vmem [shape: f32[2,512,4], index: 0, kind: input, shape index: {}]   ;;  %s866_s1 = inlined_call_operand.vmem [shape: f32[32,512], index: 1, kind: input, shape index: {}]   ;;  %s867_s2 = inlined_call_operand.vmem [shape: f32[32,1], index: 2, kind: input, shape index: {}]   ;;  %s868_s3 = inlined_call_operand.vmem [shape: f32[2,32,4], index: 3, kind: output, shape index: {}]  }
   0x1 LB: > { %s509_s13 = sadd.s32 4294967295, %s691_s12   ;;  %p513_p0 = scmp.ge.s32.totalorder %s691_s12, 1  ;;  %s691_s12 = sphi %s714_s12, %s13_s12  }
   0x2   : > { %p137_p1 = scmp.lt.s32.totalorder %s691_s12, 3 }
   0x4   : > { %p138_p2 = pnand %p513_p0, %p137_p1 }
   0x5   : > { %p161_p3 = scmp.lt.s32.totalorder (!%p138_p2), %s509_s13, 1  ;;  %v172_v0 = vld [vmem:[%s866_s1 + $0x8] sm:$0xff] (!%p138_p2)  ;;  %v174_v1 = vld [vmem:[%s866_s1 + $0x18] sm:$0xff] (!%p138_p2)  ;;  %v693_v2 = vmov (!%p138_p2), 0   ;;  %v251_v3 = vld [vmem:[%s867_s2] sm:$0xff] (!%p138_p2)  ;;  %vm449_vm0 = vcmask (!%p138_p2), 31744  }
   0x6   : > { %141 = sbr.rel (%p138_p2) target bundleno = 285 (0x11d), region = 32  ;;  %339 = vmatprep.mubr.f32.mxu0 (!%p138_p2), %v172_v0  ;;  %424 = vmatprep.mubr.f32.mxu1 (!%p138_p2), %v174_v1  ;;  %v253_v4 = vld [vmem:[%s867_s2 + $0x10] sm:$0xff] (!%p138_p2) }
   0x7   : > { %683 = vset.pattern.permute.xlu0 (!%p138_p2), %v693_v2  ;;  %684 = vset.pattern.permute.xlu1 (!%p138_p2), %v693_v2 }
   0x8   : > { %257 = vperm.xlu0 (!%p138_p2), %683, %v251_v3   ;;  %267 = vperm.xlu1 (!%p138_p2), %684, %v253_v4  }
   0xd   : > { %s870_s13 = smov (!%p161_p3, %s509_s13), 1 }
   0xe   : > { %s520_s18 = sshll.u32 %s870_s13, 9  ;;  %s521_s6 = sshll.u32 %s870_s13, 5 }
   0xf   : > { %s734_s21 = scalar_lea.vmem %s865_s0, %s520_s18  ;;  %s170_s9 = scalar_lea.vmem %s868_s3, %s521_s6 }
  0x10   : > { %v203_v5 = vld [vmem:[%s734_s21 + $0x80] sm:$0xff]  ;;  %v204_v6 = vld [vmem:[%s734_s21 + $0x88] sm:$0xff]  ;;  %v205_v16 = vld [vmem:[%s734_s21 + $0x90] sm:$0xff] }
  0x11   : > { %v187_v7 = vld [vmem:[%s734_s21] sm:$0xff]  ;;  %v610_v8 = vpack.c.bf16 %v204_v6, %v203_v5  ;;  %v188_v9 = vld [vmem:[%s734_s21 + $0x8] sm:$0xff]  ;;  %v206_v18 = vld [vmem:[%s734_s21 + $0x98] sm:$0xff] }
  0x12   : > { %v235_v10 = vld [vmem:[%s734_s21 + $0x180] sm:$0xff]  ;;  %v236_v11 = vld [vmem:[%s734_s21 + $0x188] sm:$0xff]  ;;  %v612_v12 = vpack.c.bf16 %v188_v9, %v187_v7  ;;  %v189_v19 = vld [vmem:[%s734_s21 + $0x10] sm:$0xff]  ;;  %v614_v21 = vpack.c.bf16 %v206_v18, %v205_v16 }
  0x13   : > { %v642_v13 = vpack.c.bf16 %v236_v11, %v235_v10  ;;  %v219_v14 = vld [vmem:[%s734_s21 + $0x100] sm:$0xff]  ;;  %v220_v15 = vld [vmem:[%s734_s21 + $0x108] sm:$0xff]  ;;  %611 = vmatprep.subr.bf16.mxu0 %v610_v8  ;;  %v190_v20 = vld [vmem:[%s734_s21 + $0x18] sm:$0xff] }
  0x14   : > { %v644_v17 = vpack.c.bf16 %v220_v15, %v219_v14  ;;  %613 = vmatpush3.bf16.msra.mxu0 %v612_v12  ;;  %v616_v22 = vpack.c.bf16 %v190_v20, %v189_v19  ;;  %v237_v23 = vld [vmem:[%s734_s21 + $0x190] sm:$0xff]  ;;  %v238_v24 = vld [vmem:[%s734_s21 + $0x198] sm:$0xff]  ;;  %v207_v28 = vld [vmem:[%s734_s21 + $0xa0] sm:$0xff] }
  0x15   : > { %643 = vmatprep.subr.bf16.mxu1 %v642_v13  ;;  %v221_v25 = vld [vmem:[%s734_s21 + $0x110] sm:$0xff]  ;;  %v646_v26 = vpack.c.bf16 %v238_v24, %v237_v23  ;;  %v222_v27 = vld [vmem:[%s734_s21 + $0x118] sm:$0xff]  ;;  %v208_v29 = vld [vmem:[%s734_s21 + $0xa8] sm:$0xff]  ;;  %615 = vmatprep.subr.bf16.mxu0 %v614_v21 }
  0x16   : > { %645 = vmatpush3.bf16.msra.mxu1 %v644_v17  ;;  %v648_v30 = vpack.c.bf16 %v222_v27, %v221_v25  ;;  %v618_v31 = vpack.c.bf16 %v208_v29, %v207_v28  ;;  %v191_v32 = vld [vmem:[%s734_s21 + $0x20] sm:$0xff]  ;;  %v192_v33 = vld [vmem:[%s734_s21 + $0x28] sm:$0xff]  ;;  %v209_v40 = vld [vmem:[%s734_s21 + $0xb0] sm:$0xff] }
  0x17   : > { %v239_v34 = vld [vmem:[%s734_s21 + $0x1a0] sm:$0xff]  ;;  %647 = vmatprep.subr.bf16.mxu1 %v646_v26  ;;  %v240_v35 = vld [vmem:[%s734_s21 + $0x1a8] sm:$0xff]  ;;  %v620_v38 = vpack.c.bf16 %v192_v33, %v191_v32  ;;  %v210_v41 = vld [vmem:[%s734_s21 + $0xb8] sm:$0xff] }
  0x18   : > { %v223_v36 = vld [vmem:[%s734_s21 + $0x120] sm:$0xff]  ;;  %v224_v37 = vld [vmem:[%s734_s21 + $0x128] sm:$0xff]  ;;  %617 = vmatpush3.bf16.msra.mxu0 %v616_v22  ;;  %v650_v39 = vpack.c.bf16 %v240_v35, %v239_v34  ;;  %v193_v42 = vld [vmem:[%s734_s21 + $0x30] sm:$0xff]  ;;  %v622_v44 = vpack.c.bf16 %v210_v41, %v209_v40 }
  0x19   : > { %619 = vmatprep.subr.bf16.mxu0 %v618_v31  ;;  %v652_v43 = vpack.c.bf16 %v224_v37, %v223_v36  ;;  %v194_v45 = vld [vmem:[%s734_s21 + $0x38] sm:$0xff]  ;;  %v241_v46 = vld [vmem:[%s734_s21 + $0x1b0] sm:$0xff]  ;;  %v211_v51 = vld [vmem:[%s734_s21 + $0xc0] sm:$0xff] }
  0x1a   : > { %649 = vmatpush3.bf16.msra.mxu1 %v648_v30  ;;  %v242_v47 = vld [vmem:[%s734_s21 + $0x1b8] sm:$0xff]  ;;  %v225_v49 = vld [vmem:[%s734_s21 + $0x130] sm:$0xff]  ;;  %v212_v52 = vld [vmem:[%s734_s21 + $0xc8] sm:$0xff]  ;;  %v624_v53 = vpack.c.bf16 %v194_v45, %v193_v42 }
  0x1b   : > { %651 = vmatprep.subr.bf16.mxu1 %v650_v39  ;;  %v654_v48 = vpack.c.bf16 %v242_v47, %v241_v46  ;;  %v226_v50 = vld [vmem:[%s734_s21 + $0x138] sm:$0xff]  ;;  %v243_v54 = vld [vmem:[%s734_s21 + $0x1c0] sm:$0xff]  ;;  %v244_v55 = vld [vmem:[%s734_s21 + $0x1c8] sm:$0xff]  ;;  %v626_v57 = vpack.c.bf16 %v212_v52, %v211_v51 }
  0x1c   : > { %621 = vmatpush3.bf16.msra.mxu0 %v620_v38  ;;  %v656_v56 = vpack.c.bf16 %v226_v50, %v225_v49  ;;  %v195_v58 = vld [vmem:[%s734_s21 + $0x40] sm:$0xff]  ;;  %v196_v59 = vld [vmem:[%s734_s21 + $0x48] sm:$0xff]  ;;  %v658_v61 = vpack.c.bf16 %v244_v55, %v243_v54  ;;  %v213_v63 = vld [vmem:[%s734_s21 + $0xd0] sm:$0xff] }
  0x1d   : > { %623 = vmatprep.subr.bf16.mxu0 %v622_v44  ;;  %v227_v60 = vld [vmem:[%s734_s21 + $0x140] sm:$0xff]  ;;  %v228_v62 = vld [vmem:[%s734_s21 + $0x148] sm:$0xff]  ;;  %v214_v0 = vld [vmem:[%s734_s21 + $0xd8] sm:$0xff]  ;;  %v628_v3 = vpack.c.bf16 %v196_v59, %v195_v58 }
  0x1e   : > { %653 = vmatpush3.bf16.msra.mxu1 %v652_v43  ;;  %v245_v1 = vld [vmem:[%s734_s21 + $0x1d0] sm:$0xff]  ;;  %v246_v2 = vld [vmem:[%s734_s21 + $0x1d8] sm:$0xff]  ;;  %v660_v4 = vpack.c.bf16 %v228_v62, %v227_v60  ;;  %v630_v5 = vpack.c.bf16 %v214_v0, %v213_v63  ;;  %v215_v11 = vld [vmem:[%s734_s21 + $0xe0] sm:$0xff] }
  0x1f   : > { %655 = vmatprep.subr.bf16.mxu1 %v654_v48  ;;  %v197_v6 = vld [vmem:[%s734_s21 + $0x50] sm:$0xff]  ;;  %v198_v7 = vld [vmem:[%s734_s21 + $0x58] sm:$0xff]  ;;  %v662_v9 = vpack.c.bf16 %v246_v2, %v245_v1  ;;  %v216_v12 = vld [vmem:[%s734_s21 + $0xe8] sm:$0xff] }
  0x20   : > { %625 = vmatpush3.bf16.msra.mxu0 %v624_v53  ;;  %v229_v8 = vld [vmem:[%s734_s21 + $0x150] sm:$0xff]  ;;  %v230_v10 = vld [vmem:[%s734_s21 + $0x158] sm:$0xff]  ;;  %v247_v13 = vld [vmem:[%s734_s21 + $0x1e0] sm:$0xff]  ;;  %v632_v15 = vpack.c.bf16 %v198_v7, %v197_v6  ;;  %v634_v19 = vpack.c.bf16 %v216_v12, %v215_v11 }
  0x21   : > { %627 = vmatprep.subr.bf16.mxu0 %v626_v57  ;;  %v248_v14 = vld [vmem:[%s734_s21 + $0x1e8] sm:$0xff]  ;;  %v199_v16 = vld [vmem:[%s734_s21 + $0x60] sm:$0xff]  ;;  %v664_v18 = vpack.c.bf16 %v230_v10, %v229_v8  ;;  %v254_v22 = vld [vmem:[%s867_s2 + $0x18] sm:$0xff] }
  0x22   : > { %657 = vmatpush3.bf16.msra.mxu1 %v656_v56  ;;  %v200_v17 = vld [vmem:[%s734_s21 + $0x68] sm:$0xff]  ;;  %v231_v20 = vld [vmem:[%s734_s21 + $0x160] sm:$0xff]  ;;  %v666_v23 = vpack.c.bf16 %v248_v14, %v247_v13  ;;  %v217_v25 = vld [vmem:[%s734_s21 + $0xf0] sm:$0xff]  ;;  %272 = vperm.xlu1 %684, %v254_v22  }
  0x23   : > { %659 = vmatprep.subr.bf16.mxu1 %v658_v61  ;;  %v252_v21 = vld [vmem:[%s867_s2 + $0x8] sm:$0xff]  ;;  %v218_v26 = vld [vmem:[%s734_s21 + $0xf8] sm:$0xff]  ;;  %v249_v27 = vld [vmem:[%s734_s21 + $0x1f0] sm:$0xff]  ;;  %v636_v29 = vpack.c.bf16 %v200_v17, %v199_v16 }
  0x24   : > { %629 = vmatpush3.bf16.msra.mxu0 %v628_v3  ;;  %v232_v24 = vld [vmem:[%s734_s21 + $0x168] sm:$0xff]  ;;  %262 = vperm.xlu0 %683, %v252_v21   ;;  %v250_v28 = vld [vmem:[%s734_s21 + $0x1f8] sm:$0xff]  ;;  %v638_v31 = vpack.c.bf16 %v218_v26, %v217_v25  ;;  %v201_v32 = vld [vmem:[%s734_s21 + $0x70] sm:$0xff] }
  0x25   : > { %631 = vmatprep.subr.bf16.mxu0 %v630_v5  ;;  %v668_v30 = vpack.c.bf16 %v232_v24, %v231_v20  ;;  %v202_v33 = vld [vmem:[%s734_s21 + $0x78] sm:$0xff]  ;;  %v670_v34 = vpack.c.bf16 %v250_v28, %v249_v27  ;;  %v233_v35 = vld [vmem:[%s734_s21 + $0x170] sm:$0xff]  ;;  %v171_v39 = vld [vmem:[%s866_s1] sm:$0xff] }
  0x26   : > { %661 = vmatpush3.bf16.msra.mxu1 %v660_v4  ;;  %v234_v36 = vld [vmem:[%s734_s21 + $0x178] sm:$0xff]  ;;  %v640_v37 = vpack.c.bf16 %v202_v33, %v201_v32  ;;  %v173_v40 = vld [vmem:[%s866_s1 + $0x10] sm:$0xff]  ;;  %v176_v41 = vld [vmem:[%s866_s1 + $0x28] sm:$0xff] }
  0x27   : > { %663 = vmatprep.subr.bf16.mxu1 %v662_v9  ;;  %v672_v38 = vpack.c.bf16 %v234_v36, %v233_v35  ;;  %v178_v42 = vld [vmem:[%s866_s1 + $0x38] sm:$0xff]  ;;  %v175_v43 = vld [vmem:[%s866_s1 + $0x20] sm:$0xff]  ;;  %v177_v44 = vld [vmem:[%s866_s1 + $0x30] sm:$0xff] }
  0x28   : > { %633 = vmatpush3.bf16.msra.mxu0 %v632_v15  ;;  %v180_v45 = vld [vmem:[%s866_s1 + $0x48] sm:$0xff]  ;;  %v182_v46 = vld [vmem:[%s866_s1 + $0x58] sm:$0xff]  ;;  %v179_v47 = vld [vmem:[%s866_s1 + $0x40] sm:$0xff] }
  0x29   : > { %635 = vmatprep.subr.bf16.mxu0 %v634_v19  ;;  %v181_v48 = vld [vmem:[%s866_s1 + $0x50] sm:$0xff]  ;;  %v184_v49 = vld [vmem:[%s866_s1 + $0x68] sm:$0xff]  ;;  %v186_v50 = vld [vmem:[%s866_s1 + $0x78] sm:$0xff] }
  0x2a   : > { %665 = vmatpush3.bf16.msra.mxu1 %v664_v18  ;;  %v183_v51 = vld [vmem:[%s866_s1 + $0x60] sm:$0xff]  ;;  %v185_v52 = vld [vmem:[%s866_s1 + $0x70] sm:$0xff] }
  0x2b   : > { %667 = vmatprep.subr.bf16.mxu1 %v666_v23 }
  0x2c   : > { %637 = vmatpush3.bf16.msra.mxu0 %v636_v29 }
  0x2d   : > { %639 = vmatprep.subr.bf16.mxu0 %v638_v31 }
  0x2e   : > { %669 = vmatpush3.bf16.msra.mxu1 %v668_v30 }
  0x2f   : > { %671 = vmatprep.subr.bf16.mxu1 %v670_v34 }
  0x30   : > { %641 = vmatpush3.bf16.msra.mxu0 %v640_v37 }
  0x32   : > { %673 = vmatpush3.bf16.msra.mxu1 %v672_v38 }
  0x33   : > { %340 = vmatmul.mubr.f32.vlgmr.msra.gmra.mrb[0].mxu0 %v171_v39 }
  0x34   : > { %344 = vmatprep.mubr.f32.mxu0 %v176_v41 }
  0x35   : > { %425 = vmatmul.mubr.f32.vlgmr.msra.gmra.mrb[0].mxu1 %v173_v40 }
  0x36   : > { %429 = vmatprep.mubr.f32.mxu1 %v178_v42 }
  0x37   : > { %345 = vmatmul.mubr.f32.gmra.mrb[2].mxu0 %v175_v43 }
  0x38   : > { %349 = vmatprep.mubr.f32.mxu0 %v180_v45 }
  0x39   : > { %430 = vmatmul.mubr.f32.gmra.mrb[2].mxu1 %v177_v44 }
  0x3a   : > { %434 = vmatprep.mubr.f32.mxu1 %v182_v46 }
  0x3b   : > { %350 = vmatmul.mubr.f32.gmra.mrb[4].mxu0 %v179_v47 }
  0x3c   : > { %354 = vmatprep.mubr.f32.mxu0 %v184_v49 }
  0x3d   : > { %435 = vmatmul.mubr.f32.gmra.mrb[4].mxu1 %v181_v48 }
  0x3e   : > { %439 = vmatprep.mubr.f32.mxu1 %v186_v50 }
  0x3f   : > { %355 = vmatmul.mubr.f32.gmra.mrb[6].mxu0 %v183_v51 }
  0x41   : > { %440 = vmatmul.mubr.f32.gmra.mrb[6].mxu1 %v185_v52 }
  0x87   : > { %v258_v53 = vpop.permute.xlu0 %257  ;;  %v268_v6 = vpop.permute.xlu1 %267 }
  0xa1   : > { %v273_v23 = vpop.permute.xlu1 %272 }
  0xa3   : > { %v263_v62 = vpop.permute.xlu0 %262 }
 0x106   : > { %v554_v54 = vpop.f32.mrb[0].mxu0 }
 0x107   : > { %v555_v55 = vpop.f32.mrb[1].mxu0 }
 0x108   : > { %v598_v56 = vpop.f32.mrb[0].mxu1  ;;  %v556_v57 = vadd.f32 %v555_v55, %v554_v54 }
 0x109   : > { %v599_v58 = vpop.f32.mrb[1].mxu1 }
 0x10a   : > { %v600_v59 = vadd.f32 %v599_v58, %v598_v56  ;;  %v342_v60 = vadd.f32 %v556_v57, %v258_v53  ;;  %v557_v61 = vpop.f32.mrb[2].mxu0 }
 0x10b   : > { %v558_v63 = vpop.f32.mrb[3].mxu0 }
 0x10c   : > { %v601_v0 = vpop.f32.mrb[2].mxu1  ;;  %v427_v1 = vadd.f32 %v600_v59, %v342_v60  ;;  %v559_v2 = vadd.f32 %v558_v63, %v557_v61 }
 0x10d   : > { %v602_v3 = vpop.f32.mrb[3].mxu1 }
 0x10e   : > { %v603_v4 = vadd.f32 %v602_v3, %v601_v0  ;;  %v445_v5 = vmax.f32 %v427_v1, 0.0  ;;  %v347_v7 = vadd.f32 %v559_v2, %v263_v62  ;;  %v560_v8 = vpop.f32.mrb[4].mxu0 }
 0x10f   : > { %v561_v9 = vpop.f32.mrb[5].mxu0 }
 0x110   : > { %v604_v10 = vpop.f32.mrb[4].mxu1  ;;  %450 = vst.msk [vmem:[%s170_s9] sm:$0xff] %vm449_vm0, %v445_v5  ;;  %v432_v11 = vadd.f32 %v603_v4, %v347_v7  ;;  %v562_v12 = vadd.f32 %v561_v9, %v560_v8 }
 0x111   : > { %v605_v13 = vpop.f32.mrb[5].mxu1 }
 0x112   : > { %v606_v14 = vadd.f32 %v605_v13, %v604_v10  ;;  %v446_v15 = vmax.f32 %v432_v11, 0.0  ;;  %v352_v16 = vadd.f32 %v562_v12, %v268_v6  ;;  %v563_v17 = vpop.f32.mrb[6].mxu0 }
 0x113   : > { %v564_v18 = vpop.f32.mrb[7].mxu0 }
 0x114   : > { %v607_v19 = vpop.f32.mrb[6].mxu1  ;;  %451 = vst.msk [vmem:[%s170_s9 + $0x8] sm:$0xff] %vm449_vm0, %v446_v15  ;;  %v437_v20 = vadd.f32 %v606_v14, %v352_v16  ;;  %v565_v21 = vadd.f32 %v564_v18, %v563_v17 }
 0x115   : > { %v608_v22 = vpop.f32.mrb[7].mxu1 }
 0x116   : > { %v609_v24 = vadd.f32 %v608_v22, %v607_v19  ;;  %v447_v25 = vmax.f32 %v437_v20, 0.0  ;;  %v357_v26 = vadd.f32 %v565_v21, %v273_v23 }
 0x118   : > { %452 = vst.msk [vmem:[%s170_s9 + $0x10] sm:$0xff] %vm449_vm0, %v447_v25  ;;  %v442_v27 = vadd.f32 %v609_v24, %v357_v26 }
 0x11a   : > { %v448_v28 = vmax.f32 %v442_v27, 0.0 }
 0x11c   : > { %453 = vst.msk [vmem:[%s170_s9 + $0x18] sm:$0xff] %vm449_vm0, %v448_v28 }
 0x11d PF: > { %s13_s12 = sadd.s32 1, %s691_s12  }
 0x11e   : > { %p10_p4 = scmp.ge.s32.totalorder %s13_s12, 4  }
 0x120   :  { %12 = sbr.rel (!%p10_p4) target bundleno = 1 (0x1), region = 62 }

// kernel: hit_forward.20
= control target key start
LH: loop header
LB: loop body
LE: loop exit
PB: predicated region body
PF: predicated region fallthrough
CT: control target
= control target key end

     0   :  { %s504_s12 = smov 0   ;;  %s561_s0 = inlined_call_operand.vmem [shape: f32[2,128,64], index: 0, kind: input, shape index: {}]   ;;  %s562_s1 = inlined_call_operand.vmem [shape: f32[16,128], index: 1, kind: input, shape index: {}]   ;;  %s563_s2 = inlined_call_operand.vmem [shape: f32[16,1], index: 2, kind: input, shape index: {}]   ;;  %s564_s3 = inlined_call_operand.vmem [shape: f32[2,16,64], index: 3, kind: output, shape index: {}]  }
   0x1 LB: > { %s363_s13 = sadd.s32 4294967295, %s481_s12   ;;  %p367_p0 = scmp.ge.s32.totalorder %s481_s12, 1  ;;  %s481_s12 = sphi %s504_s12, %s13_s12  }
   0x2   : > { %p137_p1 = scmp.lt.s32.totalorder %s481_s12, 3 }
   0x4   : > { %p138_p2 = pnand %p367_p0, %p137_p1 }
   0x5   : > { %p161_p3 = scmp.lt.s32.totalorder (!%p138_p2), %s363_s13, 1  ;;  %v171_v0 = vld [vmem:[%s562_s1] sm:$0xff] (!%p138_p2)  ;;  %v483_v2 = vmov (!%p138_p2), 0   ;;  %v190_v3 = vld [vmem:[%s563_s2 + $0x8] sm:$0xff] (!%p138_p2)  ;;  %vm276_vm0 = vcmask (!%p138_p2), 523264  }
   0x6   : > { %141 = sbr.rel (%p138_p2) target bundleno = 582 (0x246), region = 32  ;;  %v189_v1 = vld [vmem:[%s563_s2] sm:$0xff] (!%p138_p2)  ;;  %426 = vmatprep.mubr.f32.mxu0 (!%p138_p2), %v171_v0  ;;  %470 = vset.pattern.permute.xlu0 (!%p138_p2), %v483_v2  ;;  %v172_v28 = vld [vmem:[%s562_s1 + $0x8] sm:$0xff] (!%p138_p2) }
   0x7   : > { %193 = vperm.xlu0 (!%p138_p2), %470, %v189_v1  }
   0xb   : > { %198 = vperm.xlu0 (!%p138_p2), %470, %v190_v3  }
   0xd   : > { %s566_s13 = smov (!%p161_p3, %s363_s13), 1 }
   0xe   : > { %s374_s20 = sshll.u32 %s566_s13, 7  ;;  %s375_s26 = sshll.u32 %s566_s13, 4 }
   0xf   : > { %s527_s23 = scalar_lea.vmem %s561_s0, %s374_s20  ;;  %s170_s29 = scalar_lea.vmem %s564_s3, %s375_s26 }
  0x10   : > { %v173_v4 = vld [vmem:[%s527_s23] sm:$0xff]  ;;  %v174_v5 = vld [vmem:[%s527_s23 + $0x8] sm:$0xff]  ;;  %v175_v6 = vld [vmem:[%s527_s23 + $0x10] sm:$0xff] }
  0x11   : > { %v429_v7 = vpack.c.bf16 %v174_v5, %v173_v4  ;;  %v176_v8 = vld [vmem:[%s527_s23 + $0x18] sm:$0xff]  ;;  %v177_v10 = vld [vmem:[%s527_s23 + $0x20] sm:$0xff]  ;;  %v178_v11 = vld [vmem:[%s527_s23 + $0x28] sm:$0xff] }
  0x12   : > { %v433_v9 = vpack.c.bf16 %v176_v8, %v175_v6  ;;  %v437_v12 = vpack.c.bf16 %v178_v11, %v177_v10  ;;  %v179_v13 = vld [vmem:[%s527_s23 + $0x30] sm:$0xff]  ;;  %v180_v14 = vld [vmem:[%s527_s23 + $0x38] sm:$0xff]  ;;  %v181_v16 = vld [vmem:[%s527_s23 + $0x40] sm:$0xff] }
  0x13   : > { %430 = vmatprep.subr.bf16.mxu0 %v429_v7  ;;  %v441_v15 = vpack.c.bf16 %v180_v14, %v179_v13  ;;  %v182_v17 = vld [vmem:[%s527_s23 + $0x48] sm:$0xff]  ;;  %v183_v19 = vld [vmem:[%s527_s23 + $0x50] sm:$0xff]  ;;  %v184_v20 = vld [vmem:[%s527_s23 + $0x58] sm:$0xff] }
  0x14   : > { %432 = vmatpush3.bf16.msra.mxu0 %v429_v7  ;;  %v445_v18 = vpack.c.bf16 %v182_v17, %v181_v16  ;;  %v449_v21 = vpack.c.bf16 %v184_v20, %v183_v19  ;;  %v185_v22 = vld [vmem:[%s527_s23 + $0x60] sm:$0xff]  ;;  %v186_v23 = vld [vmem:[%s527_s23 + $0x68] sm:$0xff]  ;;  %v187_v25 = vld [vmem:[%s527_s23 + $0x70] sm:$0xff] }
  0x15   : > { %434 = vmatprep.subr.bf16.mxu0 %v433_v9  ;;  %v453_v24 = vpack.c.bf16 %v186_v23, %v185_v22  ;;  %v188_v26 = vld [vmem:[%s527_s23 + $0x78] sm:$0xff] }
  0x16   : > { %v457_v27 = vpack.c.bf16 %v188_v26, %v187_v25 }
  0x18   : > { %436 = vmatpush3.bf16.msra.mxu0 %v433_v9 }
  0x19   : > { %438 = vmatprep.subr.bf16.mxu0 %v437_v12 }
  0x1c   : > { %440 = vmatpush3.bf16.msra.mxu0 %v437_v12 }
  0x1d   : > { %442 = vmatprep.subr.bf16.mxu0 %v441_v15 }
  0x20   : > { %444 = vmatpush3.bf16.msra.mxu0 %v441_v15 }
  0x21   : > { %446 = vmatprep.subr.bf16.mxu0 %v445_v18 }
  0x24   : > { %448 = vmatpush3.bf16.msra.mxu0 %v445_v18 }
  0x25   : > { %450 = vmatprep.subr.bf16.mxu0 %v449_v21 }
  0x28   : > { %452 = vmatpush3.bf16.msra.mxu0 %v449_v21 }
  0x29   : > { %454 = vmatprep.subr.bf16.mxu0 %v453_v24 }
  0x2c   : > { %456 = vmatpush3.bf16.msra.mxu0 %v453_v24 }
  0x2d   : > { %458 = vmatprep.subr.bf16.mxu0 %v457_v27 }
  0x30   : > { %460 = vmatpush3.bf16.msra.mxu0 %v457_v27 }
  0x33   : > { %427 = vmatmul.mubr.f32.vlgmr.msra.gmra.mrb[0].mxu0 %v172_v28 }
  0x86   : > { %v194_v29 = vpop.permute.xlu0 %193 }
  0x8a   : > { %v199_v31 = vpop.permute.xlu0 %198 }
 0x106   : > { %v428_v30 = vpop.f32.mrb[0].mxu0 }
 0x107   : > { %v267_v32 = vpop.f32.mrb[1].mxu0  ;;  %v273_v34 = vadd.f32 %v428_v30, %v199_v31 }
 0x108   : > { %v268_v33 = vadd.f32 %v267_v32, %v194_v29 }
 0x109   : > { %v280_v36 = vsel %vm276_vm0, %v273_v34, 0.0 }
 0x10a   : > { %v277_v35 = vsel %vm276_vm0, %v268_v33, 0.0 }
 0x10b   : > { %278 = vadd.xlane.f32.xlu1 %v277_v35 }
 0x10f   : > { %281 = vadd.xlane.f32.xlu1 %v280_v36 }
 0x198   : > { %v279_v37 = vpop.xlane.xlu1 %278 }
 0x199   : > { %v284_v38 = vmul.f32 0.015625, %v279_v37 }
 0x19b   : > { %v286_v39 = vsub.f32 %v268_v33, %v284_v38 }
 0x19c   : > { %v282_v40 = vpop.xlane.xlu1 %281 }
 0x19d   : > { %v285_v41 = vmul.f32 0.015625, %v282_v40  ;;  %v288_v42 = vmul.f32 %v286_v39, %v286_v39 }
 0x19f   : > { %v287_v43 = vsub.f32 %v273_v34, %v285_v41  ;;  %v290_v44 = vsel %vm276_vm0, %v288_v42, 0.0 }
 0x1a0   : > { %291 = vadd.xlane.f32.xlu0 %v290_v44 }
 0x1a1   : > { %v289_v45 = vmul.f32 %v287_v43, %v287_v43 }
 0x1a3   : > { %v293_v46 = vsel %vm276_vm0, %v289_v45, 0.0 }
 0x1a4   : > { %294 = vadd.xlane.f32.xlu1 %v293_v46 }
 0x22d   : > { %v292_v47 = vpop.xlane.xlu0 %291 }
 0x22e   : > { %v296_v48 = vmul.f32 0.015625, %v292_v47 }
 0x230   : > { %v298_v49 = vadd.f32 1e-05, %v296_v48 }
 0x231   : > { %v295_v50 = vpop.xlane.xlu1 %294 }
 0x232   : > { %471 = vrsqrt.f32 %v298_v49  ;;  %v297_v51 = vmul.f32 0.015625, %v295_v50 }
 0x234   : > { %v299_v52 = vadd.f32 1e-05, %v297_v51 }
 0x236   : > { %473 = vrsqrt.f32 %v299_v52 }
 0x23c   : > { %v472_v53 = vpop.eup %471 }
 0x23d   : > { %v302_v54 = vmul.f32 %v472_v53, %v286_v39 }
 0x23f   : > { %v304_v55 = vmax.f32 %v302_v54, 0.0 }
 0x240   : > { %v474_v56 = vpop.eup %473 }
 0x241   : > { %306 = vst.msk [vmem:[%s170_s29] sm:$0xff] %vm276_vm0, %v304_v55  ;;  %v303_v57 = vmul.f32 %v474_v56, %v287_v43 }
 0x243   : > { %v305_v58 = vmax.f32 %v303_v57, 0.0 }
 0x245   : > { %307 = vst.msk [vmem:[%s170_s29 + $0x8] sm:$0xff] %vm276_vm0, %v305_v58 }
 0x246 PF: > { %s13_s12 = sadd.s32 1, %s481_s12  }
 0x247   : > { %p10_p4 = scmp.ge.s32.totalorder %s13_s12, 4  }
 0x249   :  { %12 = sbr.rel (!%p10_p4) target bundleno = 1 (0x1), region = 62 }

// kernel: hit_forward.30
= control target key start
LH: loop header
LB: loop body
LE: loop exit
PB: predicated region body
PF: predicated region fallthrough
CT: control target
= control target key end

     0   :  { %v832_v47 = vmov 1983009808   ;;  %v115_v49 = vlaneseq  ;;  %vm834_vm0 = vmmov 0   ;;  %vm284_vm1 = vcmask 261120   ;;  %s1152_s1 = inlined_call_operand.vmem [shape: f32[512,32], index: 1, kind: input, shape index: {}]   ;;  %s1153_s0 = inlined_call_operand.vmem [shape: f32[2,512], index: 0, kind: input, shape index: {}]   ;;  %s1154_s3 = inlined_call_operand.vmem [shape: f32[32,8], index: 3, kind: input, shape index: {}]   ;;  %s1155_s2 = inlined_call_operand.vmem [shape: f32[1,32], index: 2, kind: input, shape index: {}]   ;;  %s1156_s5 = inlined_call_operand.vmem [shape: f32[8,16], index: 5, kind: input, shape index: {}]   ;;  %s1157_s4 = inlined_call_operand.vmem [shape: f32[1,8], index: 4, kind: input, shape index: {}]   ;;  %s1158_s7 = inlined_call_operand.vmem [shape: f32[16,16], index: 7, kind: input, shape index: {}]   ;;  %s1159_s6 = inlined_call_operand.vmem [shape: f32[1,16], index: 6, kind: input, shape index: {}]   ;;  %s1160_s9 = inlined_call_operand.vmem [shape: f32[16,256], index: 9, kind: input, shape index: {}]   ;;  %s1161_s8 = inlined_call_operand.vmem [shape: f32[1,16], index: 8, kind: input, shape index: {}]   ;;  %s1162_s10 = inlined_call_operand.vmem [shape: f32[1,256], index: 10, kind: input, shape index: {}]   ;;  %s1163_s11 = inlined_call_operand.vmem [shape: f32[2,256], index: 11, kind: output, shape index: {}]  }
   0x1   :  { %v55_v0 = vld [vmem:[%s1152_s1 + $0x80] sm:$0xff]  ;;  %v56_v1 = vld [vmem:[%s1152_s1 + $0x88] sm:$0xff]  ;;  %v57_v11 = vld [vmem:[%s1152_s1 + $0x90] sm:$0xff]  ;;  %v113_v48 = vunpack.c.l.s4 %v832_v47  ;;  %v833_v47 = vmov 0.0|0.0   ;;  %vm363_vm2 = vcmask 1040384   ;;  %vm373_vm3 = vcmask 64512  }
   0x2   :  { %v39_v2 = vld [vmem:[%s1152_s1] sm:$0xff]  ;;  %v750_v3 = vpack.c.bf16 %v56_v1, %v55_v0  ;;  %v40_v4 = vld [vmem:[%s1152_s1 + $0x8] sm:$0xff]  ;;  %v58_v13 = vld [vmem:[%s1152_s1 + $0x98] sm:$0xff]  ;;  %v1022_v0 = vshrl.u32 %v115_v49, 7  ;;  %vm457_vm4 = vcmask 130048  }
   0x3   :  { %v87_v5 = vld [vmem:[%s1152_s1 + $0x180] sm:$0xff]  ;;  %v88_v6 = vld [vmem:[%s1152_s1 + $0x188] sm:$0xff]  ;;  %v752_v7 = vpack.c.bf16 %v40_v4, %v39_v2  ;;  %v41_v14 = vld [vmem:[%s1152_s1 + $0x10] sm:$0xff]  ;;  %v754_v16 = vpack.c.bf16 %v58_v13, %v57_v11  ;;  %v114_v63 = vunpack.c.0.s8 %v113_v48 }
   0x4   :  { %v782_v8 = vpack.c.bf16 %v88_v6, %v87_v5  ;;  %v71_v9 = vld [vmem:[%s1152_s1 + $0x100] sm:$0xff]  ;;  %v72_v10 = vld [vmem:[%s1152_s1 + $0x108] sm:$0xff]  ;;  %751 = vmatprep.subr.bf16.mxu0 %v750_v3  ;;  %v42_v15 = vld [vmem:[%s1152_s1 + $0x18] sm:$0xff] }
   0x5   :  { %v784_v12 = vpack.c.bf16 %v72_v10, %v71_v9  ;;  %753 = vmatpush3.bf16.msra.mxu0 %v752_v7  ;;  %v756_v17 = vpack.c.bf16 %v42_v15, %v41_v14  ;;  %v89_v18 = vld [vmem:[%s1152_s1 + $0x190] sm:$0xff]  ;;  %v90_v19 = vld [vmem:[%s1152_s1 + $0x198] sm:$0xff]  ;;  %v59_v23 = vld [vmem:[%s1152_s1 + $0xa0] sm:$0xff]  ;;  %v117_v13 = vsub.s32 %v114_v63, %v1022_v0 }
   0x6   :  { %783 = vmatprep.subr.bf16.mxu1 %v782_v8  ;;  %v73_v20 = vld [vmem:[%s1152_s1 + $0x110] sm:$0xff]  ;;  %v786_v21 = vpack.c.bf16 %v90_v19, %v89_v18  ;;  %v74_v22 = vld [vmem:[%s1152_s1 + $0x118] sm:$0xff]  ;;  %v60_v24 = vld [vmem:[%s1152_s1 + $0xa8] sm:$0xff]  ;;  %755 = vmatprep.subr.bf16.mxu0 %v754_v16 }
   0x7   :  { %785 = vmatpush3.bf16.msra.mxu1 %v784_v12  ;;  %v788_v25 = vpack.c.bf16 %v74_v22, %v73_v20  ;;  %v758_v26 = vpack.c.bf16 %v60_v24, %v59_v23  ;;  %v43_v27 = vld [vmem:[%s1152_s1 + $0x20] sm:$0xff]  ;;  %v44_v28 = vld [vmem:[%s1152_s1 + $0x28] sm:$0xff]  ;;  %v61_v35 = vld [vmem:[%s1152_s1 + $0xb0] sm:$0xff] }
   0x8   :  { %v91_v29 = vld [vmem:[%s1152_s1 + $0x1a0] sm:$0xff]  ;;  %787 = vmatprep.subr.bf16.mxu1 %v786_v21  ;;  %v92_v30 = vld [vmem:[%s1152_s1 + $0x1a8] sm:$0xff]  ;;  %v760_v33 = vpack.c.bf16 %v44_v28, %v43_v27  ;;  %v62_v36 = vld [vmem:[%s1152_s1 + $0xb8] sm:$0xff] }
   0x9   :  { %v75_v31 = vld [vmem:[%s1152_s1 + $0x120] sm:$0xff]  ;;  %v76_v32 = vld [vmem:[%s1152_s1 + $0x128] sm:$0xff]  ;;  %757 = vmatpush3.bf16.msra.mxu0 %v756_v17  ;;  %v790_v34 = vpack.c.bf16 %v92_v30, %v91_v29  ;;  %v45_v37 = vld [vmem:[%s1152_s1 + $0x30] sm:$0xff]  ;;  %v762_v39 = vpack.c.bf16 %v62_v36, %v61_v35 }
   0xa   :  { %759 = vmatprep.subr.bf16.mxu0 %v758_v26  ;;  %v792_v38 = vpack.c.bf16 %v76_v32, %v75_v31  ;;  %v46_v40 = vld [vmem:[%s1152_s1 + $0x38] sm:$0xff]  ;;  %v93_v41 = vld [vmem:[%s1152_s1 + $0x1b0] sm:$0xff]  ;;  %v63_v46 = vld [vmem:[%s1152_s1 + $0xc0] sm:$0xff] }
   0xb   :  { %789 = vmatpush3.bf16.msra.mxu1 %v788_v25  ;;  %v94_v42 = vld [vmem:[%s1152_s1 + $0x1b8] sm:$0xff]  ;;  %v77_v44 = vld [vmem:[%s1152_s1 + $0x130] sm:$0xff]  ;;  %v64_v50 = vld [vmem:[%s1152_s1 + $0xc8] sm:$0xff]  ;;  %v764_v51 = vpack.c.bf16 %v46_v40, %v45_v37 }
   0xc   :  { %791 = vmatprep.subr.bf16.mxu1 %v790_v34  ;;  %v794_v43 = vpack.c.bf16 %v94_v42, %v93_v41  ;;  %v78_v45 = vld [vmem:[%s1152_s1 + $0x138] sm:$0xff]  ;;  %v95_v52 = vld [vmem:[%s1152_s1 + $0x1c0] sm:$0xff]  ;;  %v96_v53 = vld [vmem:[%s1152_s1 + $0x1c8] sm:$0xff]  ;;  %v766_v55 = vpack.c.bf16 %v64_v50, %v63_v46 }
   0xd   :  { %761 = vmatpush3.bf16.msra.mxu0 %v760_v33  ;;  %v796_v54 = vpack.c.bf16 %v78_v45, %v77_v44  ;;  %v47_v56 = vld [vmem:[%s1152_s1 + $0x40] sm:$0xff]  ;;  %v48_v57 = vld [vmem:[%s1152_s1 + $0x48] sm:$0xff]  ;;  %v798_v59 = vpack.c.bf16 %v96_v53, %v95_v52  ;;  %v65_v61 = vld [vmem:[%s1152_s1 + $0xd0] sm:$0xff] }
   0xe   :  { %763 = vmatprep.subr.bf16.mxu0 %v762_v39  ;;  %v79_v58 = vld [vmem:[%s1152_s1 + $0x140] sm:$0xff]  ;;  %v80_v60 = vld [vmem:[%s1152_s1 + $0x148] sm:$0xff]  ;;  %v66_v62 = vld [vmem:[%s1152_s1 + $0xd8] sm:$0xff]  ;;  %v768_v3 = vpack.c.bf16 %v48_v57, %v47_v56 }
   0xf   :  { %793 = vmatpush3.bf16.msra.mxu1 %v792_v38  ;;  %v97_v1 = vld [vmem:[%s1152_s1 + $0x1d0] sm:$0xff]  ;;  %v98_v2 = vld [vmem:[%s1152_s1 + $0x1d8] sm:$0xff]  ;;  %v800_v4 = vpack.c.bf16 %v80_v60, %v79_v58  ;;  %v770_v5 = vpack.c.bf16 %v66_v62, %v65_v61  ;;  %v67_v11 = vld [vmem:[%s1152_s1 + $0xe0] sm:$0xff] }
  0x10   :  { %795 = vmatprep.subr.bf16.mxu1 %v794_v43  ;;  %v49_v6 = vld [vmem:[%s1152_s1 + $0x50] sm:$0xff]  ;;  %v50_v7 = vld [vmem:[%s1152_s1 + $0x58] sm:$0xff]  ;;  %v802_v9 = vpack.c.bf16 %v98_v2, %v97_v1  ;;  %v68_v12 = vld [vmem:[%s1152_s1 + $0xe8] sm:$0xff] }
  0x11   :  { %765 = vmatpush3.bf16.msra.mxu0 %v764_v51  ;;  %v81_v8 = vld [vmem:[%s1152_s1 + $0x150] sm:$0xff]  ;;  %v82_v10 = vld [vmem:[%s1152_s1 + $0x158] sm:$0xff]  ;;  %v99_v14 = vld [vmem:[%s1152_s1 + $0x1e0] sm:$0xff]  ;;  %v772_v16 = vpack.c.bf16 %v50_v7, %v49_v6  ;;  %v774_v19 = vpack.c.bf16 %v68_v12, %v67_v11  ;;  %v835_v51 = vmov 0.0  }
  0x12   :  { %767 = vmatprep.subr.bf16.mxu0 %v766_v55  ;;  %v100_v15 = vld [vmem:[%s1152_s1 + $0x1e8] sm:$0xff]  ;;  %v51_v17 = vld [vmem:[%s1152_s1 + $0x60] sm:$0xff]  ;;  %v804_v18 = vpack.c.bf16 %v82_v10, %v81_v8  ;;  %v69_v25 = vld [vmem:[%s1152_s1 + $0xf0] sm:$0xff] }
  0x13   :  { %797 = vmatpush3.bf16.msra.mxu1 %v796_v54  ;;  %v52_v20 = vld [vmem:[%s1152_s1 + $0x68] sm:$0xff]  ;;  %v83_v21 = vld [vmem:[%s1152_s1 + $0x160] sm:$0xff]  ;;  %v806_v23 = vpack.c.bf16 %v100_v15, %v99_v14  ;;  %v70_v26 = vld [vmem:[%s1152_s1 + $0xf8] sm:$0xff] }
  0x14   :  { %799 = vmatprep.subr.bf16.mxu1 %v798_v59  ;;  %v38_v22 = vld [vmem:[%s1153_s0] sm:$0xff]  ;;  %v84_v24 = vld [vmem:[%s1152_s1 + $0x168] sm:$0xff]  ;;  %v101_v29 = vld [vmem:[%s1152_s1 + $0x1f0] sm:$0xff]  ;;  %v776_v31 = vpack.c.bf16 %v52_v20, %v51_v17  ;;  %v778_v35 = vpack.c.bf16 %v70_v26, %v69_v25  ;;  %v540_v26 = vsub.s32 0, %v1022_v0 }
  0x15   :  { %769 = vmatpush3.bf16.msra.mxu0 %v768_v3  ;;  %v118_v27 = vrot.slane %v38_v22, %v117_v13  ;;  %v111_v28 = vcombine.high %v38_v22, %v38_v22  ;;  %v102_v30 = vld [vmem:[%s1152_s1 + $0x1f8] sm:$0xff]  ;;  %v808_v34 = vpack.c.bf16 %v84_v24, %v83_v21  ;;  %v53_v36 = vld [vmem:[%s1152_s1 + $0x70] sm:$0xff]  ;;  %v273_v44 = vld [vmem:[%s1154_s3] sm:$0xff] }
  0x16   :  { %771 = vmatprep.subr.bf16.mxu0 %v770_v5  ;;  %v54_v37 = vld [vmem:[%s1152_s1 + $0x78] sm:$0xff]  ;;  %v810_v38 = vpack.c.bf16 %v102_v30, %v101_v29  ;;  %v85_v39 = vld [vmem:[%s1152_s1 + $0x170] sm:$0xff]  ;;  %v274_v45 = vld [vmem:[%s1154_s3 + $0x8] sm:$0xff] }
  0x17   :  { %801 = vmatpush3.bf16.msra.mxu1 %v800_v4  ;;  %v126_v32 = vcombine.high %v118_v27, %v118_v27  ;;  %v125_v33 = vrot.slane %v111_v28, %v117_v13  ;;  %v86_v40 = vld [vmem:[%s1152_s1 + $0x178] sm:$0xff]  ;;  %v780_v42 = vpack.c.bf16 %v54_v37, %v53_v36  ;;  %v815_v46 = vpack.c.bf16 %v274_v45, %v273_v44  ;;  %v275_v48 = vld [vmem:[%s1154_s3 + $0x10] sm:$0xff]  ;;  %v638_v53 = vld [vmem:[%s1155_s2] ss:$0 sm:$0xff] }
  0x18   :  { %803 = vmatprep.subr.bf16.mxu1 %v802_v9  ;;  %v812_v43 = vpack.c.bf16 %v86_v40, %v85_v39  ;;  %v276_v49 = vld [vmem:[%s1154_s3 + $0x18] sm:$0xff]  ;;  %v365_v62 = vld [vmem:[%s1156_s5] sm:$0xff]  ;;  %v449_v8 = vld [vmem:[%s1158_s7 + $0x8] sm:$0xff]  ;;  %v544_v28 = vsub.s32 1, %v1022_v0 }
  0x19   :  { %773 = vmatpush3.bf16.msra.mxu0 %v772_v16  ;;  %196 = vmatprep.mubr.f32.mxu0 %v126_v32  ;;  %v127_v41 = vcombine.high %v125_v33, %v125_v33  ;;  %v818_v50 = vpack.c.bf16 %v276_v49, %v275_v48  ;;  %v639_v63 = vld [vmem:[%s1157_s4] ss:$0 sm:$0xff]  ;;  %v533_v15 = vld [vmem:[%s1160_s9 + $0x8] sm:$0xff]  ;;  %v535_v16 = vld [vmem:[%s1160_s9 + $0x18] sm:$0xff] }
  0x1a   :  { %775 = vmatprep.subr.bf16.mxu0 %v774_v19  ;;  %v448_v7 = vld [vmem:[%s1158_s7] sm:$0xff]  ;;  %v823_v17 = vpack.c.bf16 %v535_v16, %v533_v15  ;;  %v534_v19 = vld [vmem:[%s1160_s9 + $0x10] sm:$0xff] }
  0x1b   :  { %805 = vmatpush3.bf16.msra.mxu1 %v804_v18  ;;  %266 = vmatprep.mubr.f32.mxu1 %v127_v41  ;;  %v821_v9 = vpack.c.bf16 %v449_v8, %v448_v7  ;;  %v641_v10 = vld [vmem:[%s1159_s6] ss:$0 sm:$0xff] }
  0x1c   :  { %807 = vmatprep.subr.bf16.mxu1 %v806_v23  ;;  %v532_v18 = vld [vmem:[%s1160_s9] sm:$0xff] }
  0x1d   :  { %777 = vmatpush3.bf16.msra.mxu0 %v776_v31  ;;  %v825_v20 = vpack.c.bf16 %v534_v19, %v532_v18  ;;  %v643_v21 = vld [vmem:[%s1161_s8] ss:$0 sm:$0xff] }
  0x1e   :  { %779 = vmatprep.subr.bf16.mxu0 %v778_v35 }
  0x1f   :  { %809 = vmatpush3.bf16.msra.mxu1 %v808_v34 }
  0x20   :  { %811 = vmatprep.subr.bf16.mxu1 %v810_v38 }
  0x21   :  { %781 = vmatpush3.bf16.msra.mxu0 %v780_v42 }
  0x22   :  { %814 = vmatprep.subr.bf16.mxu0 %v833_v47 }
  0x23   :  { %813 = vmatpush3.bf16.msra.mxu1 %v812_v43 }
  0x24   :  { %197 = vmatmul.mubr.f32.vlgmr.msra.gmra.mrb[0].mxu0 %v118_v27  ;;  %738 = vmatprep.subr.mxu1 %v835_v51  ;;  %v536_v27 = vld [vmem:[%s1162_s10] sm:$0x3] }
  0x25   :  { %816 = vmatpush3.bf16.msra.mxu0 %v815_v46  ;;  %735 = vmatprep.mubr.msk.f32.mxu0 %vm834_vm0, %v835_v51  ;;  %v541_v29 = vrot.slane %v536_v27, %v540_v26  ;;  %v545_v30 = vrot.slane %v536_v27, %v544_v28 }
  0x26   :  { %267 = vmatmul.mubr.f32.vlgmr.msra.gmra.mrb[0].mxu1 %v125_v33  ;;  %817 = vmatprep.subr.bf16.mxu0 %v833_v47 }
  0x27   :  { %740 = vmatprep.mubr.msk.f32.mxu1 %vm834_vm0, %v835_v51  ;;  %739 = vmatpush3.msra.mxu1 %v365_v62 }
  0x28   :  { %820 = vmatprep.subr.bf16.mxu1 %v833_v47 }
  0x29   :  { %819 = vmatpush3.bf16.msra.mxu0 %v818_v50 }
  0x2a   :  { %824 = vmatprep.subr.bf16.mxu0 %v823_v17 }
  0xf7   :  { %v679_v52 = vpop.f32.mrb[0].mxu0 }
  0xf8   :  { %v680_v54 = vpop.f32.mrb[1].mxu0 }
  0xf9   :  { %v714_v55 = vpop.f32.mrb[0].mxu1  ;;  %v681_v56 = vadd.f32 %v680_v54, %v679_v52 }
  0xfa   :  { %v715_v57 = vpop.f32.mrb[1].mxu1 }
  0xfb   :  { %v716_v58 = vadd.f32 %v715_v57, %v714_v55  ;;  %v199_v59 = vadd.f32 %v681_v56, %v638_v53 }
  0xfd   :  { %v269_v60 = vadd.f32 %v716_v58, %v199_v59 }
  0xff   :  { %v272_v61 = vmax.f32 %v269_v60, 0.0 }
 0x101   :  { %736 = vmatmul.mubr.msk.f32.vlgmr.msra.gmra.mrb[2].mxu0 %vm284_vm1, %v272_v61 }
 0x102   :  { %615 = vmatprep.mubr.f32.mxu0 %v835_v51  ;;  %826 = vmatpush1.bf16.msra.mxu0 %v825_v20 }
 0x1d4   :  { %v354_v1 = vpop.f32.mrb[2].mxu0 }
 0x1d5   :  { %v355_v2 = vadd.f32 %v639_v63, %v354_v1  ;;  %v737_v3 = vpop.f32.mrb[3].mxu0 }
 0x1d7   :  { %v359_v4 = vrot.slane %v355_v2, 1  ;;  %v361_v5 = vrot.slane %v355_v2, 7 }
 0x1d9   :  { %v364_v6 = vsel %vm363_vm2, %v359_v4, %v361_v5 }
 0x1da   :  { %741 = vmatmul.mubr.msk.f32.vlgmr.msra.gmra.mrb[2].mxu1 %vm373_vm3, %v364_v6 }
 0x1db   :  { %747 = vmatprep.mubr.msk.f32.mxu1 %vm834_vm0, %v835_v51  ;;  %822 = vmatpush3.bf16.msra.mxu1 %v821_v9 }
 0x2ad   :  { %v443_v11 = vpop.f32.mrb[2].mxu1 }
 0x2ae   :  { %v444_v12 = vadd.f32 %v641_v10, %v443_v11  ;;  %v742_v13 = vpop.f32.mrb[3].mxu1 }
 0x2b0   :  { %v447_v14 = vmax.f32 %v444_v12, 0.0 }
 0x2b2   :  { %748 = vmatmul.mubr.msk.f32.vlgmr.msra.gmra.mrb[4].mxu1 %vm457_vm4, %v447_v14 }
 0x385   :  { %v527_v22 = vpop.f32.mrb[4].mxu1 }
 0x386   :  { %v528_v23 = vadd.f32 %v643_v21, %v527_v22  ;;  %v749_v24 = vpop.f32.mrb[5].mxu1 }
 0x388   :  { %v531_v25 = vmax.f32 %v528_v23, 0.0 }
 0x38a   :  { %645 = vmatmul.mubr.msk.f32.vlgmr.msra.gmra.mrb[4].mxu0 %vm457_vm4, %v531_v25 }
 0x45d   :  { %v617_v31 = vpop.f32.mrb[4].mxu0 }
 0x45e   :  { %v618_v32 = vadd.f32 %v617_v31, %v541_v29  ;;  %v619_v33 = vpop.f32.mrb[5].mxu0 }
 0x45f   :  { %v620_v34 = vadd.f32 %v619_v33, %v545_v30 }
 0x461   :  { %v624_v35 = vcombine.low %v618_v32, %v620_v34 }
 0x463   :  { %646 = vst.sshfl [vmem:[%s1163_s11] sm:$0x33 pattern:$0x76325410] %v624_v35 }

// kernel: hit_forward.19
= control target key start
LH: loop header
LB: loop body
LE: loop exit
PB: predicated region body
PF: predicated region fallthrough
CT: control target
= control target key end

     0   :  { %s491_s12 = smov 0   ;;  %s573_s0 = inlined_call_operand.vmem [shape: f32[2,196,256], index: 0, kind: input, shape index: {}]   ;;  %s574_s1 = inlined_call_operand.vmem [shape: f32[8,196], index: 1, kind: input, shape index: {}]   ;;  %s575_s2 = inlined_call_operand.vmem [shape: f32[8,1], index: 2, kind: input, shape index: {}]   ;;  %s576_s3 = inlined_call_operand.vmem [shape: f32[2,8,256], index: 3, kind: output, shape index: {}]  }
   0x1 LB: > { %s387_s13 = sadd.s32 4294967295, %s468_s12   ;;  %p391_p0 = scmp.ge.s32.totalorder %s468_s12, 1  ;;  %s468_s12 = sphi %s491_s12, %s13_s12  }
   0x2   : > { %p137_p1 = scmp.lt.s32.totalorder %s468_s12, 3 }
   0x4   : > { %p138_p2 = pnand %p391_p0, %p137_p1 }
   0x5   : > { %p161_p3 = scmp.lt.s32.totalorder (!%p138_p2), %s387_s13, 1  ;;  %v172_v0 = vld [vmem:[%s574_s1 + $0x8] sm:$0xff] (!%p138_p2)  ;;  %vm229_vm0 = vcmask (!%p138_p2), 556032   ;;  %v470_v1 = vmov (!%p138_p2), 0   ;;  %v223_v2 = vld [vmem:[%s575_s2] sm:$0xff] (!%p138_p2)  ;;  %vm233_vm1 = vcmask (!%p138_p2), 1043456  }
   0x6   : > { %141 = sbr.rel (%p138_p2) target bundleno = 599 (0x257), region = 32  ;;  %397 = vmatprep.mubr.msk.f32.mxu0 (!%p138_p2), %vm229_vm0, %v172_v0  ;;  %459 = vset.pattern.permute.xlu0 (!%p138_p2), %v470_v1 }
   0x7   : > { %226 = vperm.xlu0 (!%p138_p2), %459, %v223_v2  }
   0xd   : > { %s578_s13 = smov (!%p161_p3, %s387_s13), 1 }
   0xe   : > { %s449_s18 = smul.u32 400, %s578_s13  ;;  %s400_s24 = sshll.u32 %s578_s13, 4 }
   0xf   : > { %s170_s27 = scalar_lea.vmem %s576_s3, %s400_s24 }
  0x10   : > { %s511_s21 = scalar_lea.vmem %s573_s0, %s449_s18 }
  0x11   : > { %v174_v3 = vld [vmem:[%s511_s21 + $0x8] sm:$0xff]  ;;  %v176_v4 = vld [vmem:[%s511_s21 + $0x18] sm:$0xff]  ;;  %v173_v5 = vld [vmem:[%s511_s21] sm:$0xff] }
  0x12   : > { %v401_v6 = vpack.c.bf16 %v176_v4, %v174_v3  ;;  %v175_v7 = vld [vmem:[%s511_s21 + $0x10] sm:$0xff]  ;;  %v178_v8 = vld [vmem:[%s511_s21 + $0x28] sm:$0xff]  ;;  %v180_v9 = vld [vmem:[%s511_s21 + $0x38] sm:$0xff] }
  0x13   : > { %v403_v10 = vpack.c.bf16 %v175_v7, %v173_v5  ;;  %v405_v11 = vpack.c.bf16 %v180_v9, %v178_v8  ;;  %v177_v12 = vld [vmem:[%s511_s21 + $0x20] sm:$0xff]  ;;  %v179_v13 = vld [vmem:[%s511_s21 + $0x30] sm:$0xff]  ;;  %v182_v14 = vld [vmem:[%s511_s21 + $0x48] sm:$0xff] }
  0x14   : > { %402 = vmatprep.subr.bf16.mxu0 %v401_v6  ;;  %v184_v15 = vld [vmem:[%s511_s21 + $0x58] sm:$0xff]  ;;  %v407_v16 = vpack.c.bf16 %v179_v13, %v177_v12  ;;  %v181_v18 = vld [vmem:[%s511_s21 + $0x40] sm:$0xff]  ;;  %v183_v19 = vld [vmem:[%s511_s21 + $0x50] sm:$0xff] }
  0x15   : > { %404 = vmatpush1.bf16.msra.mxu0 %v403_v10  ;;  %v409_v17 = vpack.c.bf16 %v184_v15, %v182_v14  ;;  %v186_v20 = vld [vmem:[%s511_s21 + $0x68] sm:$0xff]  ;;  %v188_v21 = vld [vmem:[%s511_s21 + $0x78] sm:$0xff]  ;;  %v411_v22 = vpack.c.bf16 %v183_v19, %v181_v18  ;;  %v185_v24 = vld [vmem:[%s511_s21 + $0x60] sm:$0xff] }
  0x16   : > { %406 = vmatprep.subr.bf16.mxu0 %v405_v11  ;;  %v413_v23 = vpack.c.bf16 %v188_v21, %v186_v20  ;;  %v187_v25 = vld [vmem:[%s511_s21 + $0x70] sm:$0xff]  ;;  %v190_v26 = vld [vmem:[%s511_s21 + $0x88] sm:$0xff]  ;;  %v192_v27 = vld [vmem:[%s511_s21 + $0x98] sm:$0xff] }
  0x17   : > { %v415_v28 = vpack.c.bf16 %v187_v25, %v185_v24  ;;  %v417_v29 = vpack.c.bf16 %v192_v27, %v190_v26  ;;  %v189_v30 = vld [vmem:[%s511_s21 + $0x80] sm:$0xff]  ;;  %v191_v31 = vld [vmem:[%s511_s21 + $0x90] sm:$0xff]  ;;  %v194_v32 = vld [vmem:[%s511_s21 + $0xa8] sm:$0xff] }
  0x18   : > { %v196_v33 = vld [vmem:[%s511_s21 + $0xb8] sm:$0xff]  ;;  %v419_v34 = vpack.c.bf16 %v191_v31, %v189_v30  ;;  %v193_v36 = vld [vmem:[%s511_s21 + $0xa0] sm:$0xff]  ;;  %v195_v37 = vld [vmem:[%s511_s21 + $0xb0] sm:$0xff] }
  0x19   : > { %408 = vmatpush1.bf16.msra.mxu0 %v407_v16  ;;  %v421_v35 = vpack.c.bf16 %v196_v33, %v194_v32  ;;  %v198_v38 = vld [vmem:[%s511_s21 + $0xc8] sm:$0xff]  ;;  %v200_v39 = vld [vmem:[%s511_s21 + $0xd8] sm:$0xff]  ;;  %v423_v40 = vpack.c.bf16 %v195_v37, %v193_v36  ;;  %v197_v42 = vld [vmem:[%s511_s21 + $0xc0] sm:$0xff] }
  0x1a   : > { %410 = vmatprep.subr.bf16.mxu0 %v409_v17  ;;  %v425_v41 = vpack.c.bf16 %v200_v39, %v198_v38  ;;  %v199_v43 = vld [vmem:[%s511_s21 + $0xd0] sm:$0xff]  ;;  %v202_v44 = vld [vmem:[%s511_s21 + $0xe8] sm:$0xff]  ;;  %v204_v45 = vld [vmem:[%s511_s21 + $0xf8] sm:$0xff] }
  0x1b   : > { %v427_v46 = vpack.c.bf16 %v199_v43, %v197_v42  ;;  %v429_v47 = vpack.c.bf16 %v204_v45, %v202_v44  ;;  %v201_v48 = vld [vmem:[%s511_s21 + $0xe0] sm:$0xff]  ;;  %v203_v49 = vld [vmem:[%s511_s21 + $0xf0] sm:$0xff]  ;;  %v206_v50 = vld [vmem:[%s511_s21 + $0x108] sm:$0xff] }
  0x1c   : > { %v208_v51 = vld [vmem:[%s511_s21 + $0x118] sm:$0xff]  ;;  %v431_v52 = vpack.c.bf16 %v203_v49, %v201_v48  ;;  %v205_v54 = vld [vmem:[%s511_s21 + $0x100] sm:$0xff]  ;;  %v207_v55 = vld [vmem:[%s511_s21 + $0x110] sm:$0xff] }
  0x1d   : > { %412 = vmatpush1.bf16.msra.mxu0 %v411_v22  ;;  %v433_v53 = vpack.c.bf16 %v208_v51, %v206_v50  ;;  %v210_v56 = vld [vmem:[%s511_s21 + $0x128] sm:$0xff]  ;;  %v212_v57 = vld [vmem:[%s511_s21 + $0x138] sm:$0xff]  ;;  %v435_v58 = vpack.c.bf16 %v207_v55, %v205_v54  ;;  %v209_v60 = vld [vmem:[%s511_s21 + $0x120] sm:$0xff] }
  0x1e   : > { %414 = vmatprep.subr.bf16.mxu0 %v413_v23  ;;  %v437_v59 = vpack.c.bf16 %v212_v57, %v210_v56  ;;  %v211_v61 = vld [vmem:[%s511_s21 + $0x130] sm:$0xff]  ;;  %v214_v62 = vld [vmem:[%s511_s21 + $0x148] sm:$0xff]  ;;  %v216_v63 = vld [vmem:[%s511_s21 + $0x158] sm:$0xff] }
  0x1f   : > { %v439_v0 = vpack.c.bf16 %v211_v61, %v209_v60  ;;  %v441_v1 = vpack.c.bf16 %v216_v63, %v214_v62  ;;  %v213_v2 = vld [vmem:[%s511_s21 + $0x140] sm:$0xff]  ;;  %v215_v3 = vld [vmem:[%s511_s21 + $0x150] sm:$0xff]  ;;  %v218_v4 = vld [vmem:[%s511_s21 + $0x168] sm:$0xff] }
  0x20   : > { %v220_v5 = vld [vmem:[%s511_s21 + $0x178] sm:$0xff]  ;;  %v443_v6 = vpack.c.bf16 %v215_v3, %v213_v2  ;;  %v217_v8 = vld [vmem:[%s511_s21 + $0x160] sm:$0xff]  ;;  %v219_v9 = vld [vmem:[%s511_s21 + $0x170] sm:$0xff] }
  0x21   : > { %416 = vmatpush1.bf16.msra.mxu0 %v415_v28  ;;  %v445_v7 = vpack.c.bf16 %v220_v5, %v218_v4  ;;  %v447_v10 = vpack.c.bf16 %v219_v9, %v217_v8  ;;  %v222_v11 = vld [vmem:[%s511_s21 + $0x188] sm:$0xf]  ;;  %v221_v12 = vld [vmem:[%s511_s21 + $0x180] sm:$0xf] }
  0x22   : > { %418 = vmatprep.subr.bf16.mxu0 %v417_v29  ;;  %v171_v13 = vld [vmem:[%s574_s1] sm:$0xff] }
  0x25   : > { %420 = vmatpush1.bf16.msra.mxu0 %v419_v34 }
  0x26   : > { %422 = vmatprep.subr.bf16.mxu0 %v421_v35 }
  0x29   : > { %424 = vmatpush1.bf16.msra.mxu0 %v423_v40 }
  0x2a   : > { %426 = vmatprep.subr.bf16.mxu0 %v425_v41 }
  0x2d   : > { %428 = vmatpush1.bf16.msra.mxu0 %v427_v46 }
  0x2e   : > { %430 = vmatprep.subr.bf16.mxu0 %v429_v47 }
  0x31   : > { %432 = vmatpush1.bf16.msra.mxu0 %v431_v52 }
  0x32   : > { %434 = vmatprep.subr.bf16.mxu0 %v433_v53 }
  0x35   : > { %436 = vmatpush1.bf16.msra.mxu0 %v435_v58 }
  0x36   : > { %438 = vmatprep.subr.bf16.mxu0 %v437_v59 }
  0x39   : > { %440 = vmatpush1.bf16.msra.mxu0 %v439_v0 }
  0x3a   : > { %442 = vmatprep.subr.bf16.mxu0 %v441_v1 }
  0x3d   : > { %444 = vmatpush1.bf16.msra.mxu0 %v443_v6 }
  0x3e   : > { %446 = vmatprep.subr.bf16.mxu0 %v445_v7 }
  0x41   : > { %448 = vmatpush1.bf16.msra.mxu0 %v447_v10 }
  0x42   : > { %395 = vmatprep.subr.msk.mxu0 %vm233_vm1, %v222_v11 }
  0x45   : > { %396 = vmatpush1.msk.msra.mxu0 %vm233_vm1, %v221_v12 }
  0x46   : > { %305 = vmatmul.mubr.f32.vlgmr.msra.gmra.mrb[0].mxu0 %v171_v13 }
  0x86   : > { %v227_v14 = vpop.permute.xlu0 %226 }
 0x119   : > { %v306_v15 = vpop.f32.mrb[0].mxu0 }
 0x11a   : > { %v307_v16 = vadd.f32 %v306_v15, %v227_v14  ;;  %v308_v17 = vpop.f32.mrb[1].mxu0 }
 0x11b   : > { %v309_v18 = vadd.f32 %v308_v17, %v227_v14 }
 0x11d   : > { %v311_v19 = vadd.f32 %v309_v18, %v307_v16 }
 0x11f   : > { %312 = vadd.xlane.f32.xlu0 %v311_v19 }
 0x1ac   : > { %v313_v20 = vpop.xlane.xlu0 %312 }
 0x1ad   : > { %v315_v21 = vmul.f32 0.00390625, %v313_v20 }
 0x1af   : > { %v316_v22 = vsub.f32 %v307_v16, %v315_v21  ;;  %v317_v23 = vsub.f32 %v309_v18, %v315_v21 }
 0x1b1   : > { %v318_v24 = vmul.f32 %v316_v22, %v316_v22  ;;  %v319_v25 = vmul.f32 %v317_v23, %v317_v23 }
 0x1b3   : > { %v320_v26 = vadd.f32 %v319_v25, %v318_v24 }
 0x1b5   : > { %321 = vadd.xlane.f32.xlu1 %v320_v26 }
 0x242   : > { %v322_v27 = vpop.xlane.xlu1 %321 }
 0x243   : > { %v323_v28 = vmul.f32 0.00390625, %v322_v27 }
 0x245   : > { %v324_v29 = vadd.f32 1e-05, %v323_v28 }
 0x247   : > { %460 = vrsqrt.f32 %v324_v29 }
 0x251   : > { %v461_v30 = vpop.eup %460 }
 0x252   : > { %v326_v31 = vmul.f32 %v461_v30, %v316_v22  ;;  %v327_v32 = vmul.f32 %v461_v30, %v317_v23 }
 0x254   : > { %v328_v33 = vmax.f32 %v326_v31, 0.0  ;;  %v329_v34 = vmax.f32 %v327_v32, 0.0 }
 0x256   : > { %330 = vst [vmem:[%s170_s27] sm:$0xff] %v328_v33  ;;  %331 = vst [vmem:[%s170_s27 + $0x8] sm:$0xff] %v329_v34 }
 0x257 PF: > { %s13_s12 = sadd.s32 1, %s468_s12  }
 0x258   : > { %p10_p4 = scmp.ge.s32.totalorder %s13_s12, 4  }
 0x25a   :  { %12 = sbr.rel (!%p10_p4) target bundleno = 1 (0x1), region = 62 }

// kernel: hit_forward.21
= control target key start
LH: loop header
LB: loop body
LE: loop exit
PB: predicated region body
PF: predicated region fallthrough
CT: control target
= control target key end

     0   :  { %s590_s12 = smov 0   ;;  %s693_s0 = inlined_call_operand.vmem [shape: f32[2,256,16], index: 0, kind: input, shape index: {}]   ;;  %s694_s1 = inlined_call_operand.vmem [shape: f32[32,256], index: 1, kind: input, shape index: {}]   ;;  %s695_s2 = inlined_call_operand.vmem [shape: f32[32,1], index: 2, kind: input, shape index: {}]   ;;  %s696_s3 = inlined_call_operand.vmem [shape: f32[2,32,16], index: 3, kind: output, shape index: {}]  }
   0x1 LB: > { %s437_s13 = sadd.s32 4294967295, %s567_s12   ;;  %p441_p0 = scmp.ge.s32.totalorder %s567_s12, 1  ;;  %s567_s12 = sphi %s590_s12, %s13_s12  }
   0x2   : > { %p137_p1 = scmp.lt.s32.totalorder %s567_s12, 3 }
   0x4   : > { %p138_p2 = pnand %p441_p0, %p137_p1 }
   0x5   : > { %p161_p3 = scmp.lt.s32.totalorder (!%p138_p2), %s437_s13, 1  ;;  %v172_v0 = vld [vmem:[%s694_s1 + $0x8] sm:$0xff] (!%p138_p2)  ;;  %v569_v2 = vmov (!%p138_p2), 0   ;;  %v211_v3 = vld [vmem:[%s695_s2] sm:$0xff] (!%p138_p2)  ;;  %v213_v4 = vld [vmem:[%s695_s2 + $0x10] sm:$0xff] (!%p138_p2)  ;;  %vm320_vm0 = vcmask (!%p138_p2), 130048  }
   0x6   : > { %141 = sbr.rel (%p138_p2) target bundleno = 588 (0x24c), region = 32  ;;  %v176_v1 = vld [vmem:[%s694_s1 + $0x28] sm:$0xff] (!%p138_p2)  ;;  %299 = vmatprep.mubr.f32.mxu0 (!%p138_p2), %v172_v0  ;;  %551 = vset.pattern.permute.xlu0 (!%p138_p2), %v569_v2  ;;  %v214_v6 = vld [vmem:[%s695_s2 + $0x18] sm:$0xff] (!%p138_p2)  ;;  %v171_v55 = vld [vmem:[%s694_s1] sm:$0xff] (!%p138_p2) }
   0x7   : > { %309 = vmatprep.mubr.f32.mxu1 (!%p138_p2), %v176_v1  ;;  %552 = vset.pattern.permute.xlu1 (!%p138_p2), %v569_v2  ;;  %v212_v5 = vld [vmem:[%s695_s2 + $0x8] sm:$0xff] (!%p138_p2)  ;;  %v175_v56 = vld [vmem:[%s694_s1 + $0x20] sm:$0xff] (!%p138_p2)  ;;  %v174_v57 = vld [vmem:[%s694_s1 + $0x18] sm:$0xff] (!%p138_p2) }
   0x8   : > { %217 = vperm.xlu0 (!%p138_p2), %551, %v211_v3   ;;  %227 = vperm.xlu1 (!%p138_p2), %552, %v213_v4   ;;  %v178_v58 = vld [vmem:[%s694_s1 + $0x38] sm:$0xff] (!%p138_p2)  ;;  %v173_v59 = vld [vmem:[%s694_s1 + $0x10] sm:$0xff] (!%p138_p2) }
   0x9   : > { %v177_v60 = vld [vmem:[%s694_s1 + $0x30] sm:$0xff] (!%p138_p2) }
   0xc   : > { %222 = vperm.xlu0 (!%p138_p2), %551, %v212_v5   ;;  %232 = vperm.xlu1 (!%p138_p2), %552, %v214_v6  }
   0xd   : > { %s698_s13 = smov (!%p161_p3, %s437_s13), 1 }
   0xe   : > { %s448_s22 = sshll.u32 %s698_s13, 8  ;;  %s449_s17 = sshll.u32 %s698_s13, 5 }
   0xf   : > { %s619_s27 = scalar_lea.vmem %s693_s0, %s448_s22  ;;  %s170_s20 = scalar_lea.vmem %s696_s3, %s449_s17 }
  0x10   : > { %v195_v7 = vld [vmem:[%s619_s27 + $0x80] sm:$0xff]  ;;  %v196_v8 = vld [vmem:[%s619_s27 + $0x88] sm:$0xff]  ;;  %v197_v12 = vld [vmem:[%s619_s27 + $0x90] sm:$0xff] }
  0x11   : > { %v179_v9 = vld [vmem:[%s619_s27] sm:$0xff]  ;;  %v494_v10 = vpack.c.bf16 %v196_v8, %v195_v7  ;;  %v180_v11 = vld [vmem:[%s619_s27 + $0x8] sm:$0xff]  ;;  %v198_v13 = vld [vmem:[%s619_s27 + $0x98] sm:$0xff] }
  0x12   : > { %v496_v14 = vpack.c.bf16 %v180_v11, %v179_v9  ;;  %v498_v15 = vpack.c.bf16 %v198_v13, %v197_v12  ;;  %v181_v16 = vld [vmem:[%s619_s27 + $0x10] sm:$0xff]  ;;  %v182_v17 = vld [vmem:[%s619_s27 + $0x18] sm:$0xff]  ;;  %v199_v18 = vld [vmem:[%s619_s27 + $0xa0] sm:$0xff] }
  0x13   : > { %495 = vmatprep.subr.bf16.mxu0 %v494_v10  ;;  %526 = vmatprep.subr.bf16.mxu1 %v494_v10  ;;  %v200_v19 = vld [vmem:[%s619_s27 + $0xa8] sm:$0xff]  ;;  %v500_v20 = vpack.c.bf16 %v182_v17, %v181_v16  ;;  %v183_v22 = vld [vmem:[%s619_s27 + $0x20] sm:$0xff]  ;;  %v201_v24 = vld [vmem:[%s619_s27 + $0xb0] sm:$0xff] }
  0x14   : > { %497 = vmatpush3.bf16.msra.mxu0 %v496_v14  ;;  %534 = vmatpush3.bf16.msra.mxu1 %v496_v14  ;;  %v502_v21 = vpack.c.bf16 %v200_v19, %v199_v18  ;;  %v184_v23 = vld [vmem:[%s619_s27 + $0x28] sm:$0xff]  ;;  %v202_v25 = vld [vmem:[%s619_s27 + $0xb8] sm:$0xff]  ;;  %v185_v28 = vld [vmem:[%s619_s27 + $0x30] sm:$0xff] }
  0x15   : > { %499 = vmatprep.subr.bf16.mxu0 %v498_v15  ;;  %527 = vmatprep.subr.bf16.mxu1 %v498_v15  ;;  %v504_v26 = vpack.c.bf16 %v184_v23, %v183_v22  ;;  %v506_v27 = vpack.c.bf16 %v202_v25, %v201_v24  ;;  %v186_v29 = vld [vmem:[%s619_s27 + $0x38] sm:$0xff]  ;;  %v203_v30 = vld [vmem:[%s619_s27 + $0xc0] sm:$0xff]  ;;  %v204_v31 = vld [vmem:[%s619_s27 + $0xc8] sm:$0xff] }
  0x16   : > { %v508_v32 = vpack.c.bf16 %v186_v29, %v185_v28  ;;  %v510_v33 = vpack.c.bf16 %v204_v31, %v203_v30  ;;  %v187_v34 = vld [vmem:[%s619_s27 + $0x40] sm:$0xff]  ;;  %v188_v35 = vld [vmem:[%s619_s27 + $0x48] sm:$0xff]  ;;  %v205_v36 = vld [vmem:[%s619_s27 + $0xd0] sm:$0xff] }
  0x17   : > { %v206_v37 = vld [vmem:[%s619_s27 + $0xd8] sm:$0xff]  ;;  %v512_v38 = vpack.c.bf16 %v188_v35, %v187_v34  ;;  %v189_v40 = vld [vmem:[%s619_s27 + $0x50] sm:$0xff]  ;;  %v207_v42 = vld [vmem:[%s619_s27 + $0xe0] sm:$0xff] }
  0x18   : > { %501 = vmatpush3.bf16.msra.mxu0 %v500_v20  ;;  %535 = vmatpush3.bf16.msra.mxu1 %v500_v20  ;;  %v514_v39 = vpack.c.bf16 %v206_v37, %v205_v36  ;;  %v190_v41 = vld [vmem:[%s619_s27 + $0x58] sm:$0xff]  ;;  %v208_v43 = vld [vmem:[%s619_s27 + $0xe8] sm:$0xff]  ;;  %v191_v46 = vld [vmem:[%s619_s27 + $0x60] sm:$0xff] }
  0x19   : > { %503 = vmatprep.subr.bf16.mxu0 %v502_v21  ;;  %528 = vmatprep.subr.bf16.mxu1 %v502_v21  ;;  %v516_v44 = vpack.c.bf16 %v190_v41, %v189_v40  ;;  %v518_v45 = vpack.c.bf16 %v208_v43, %v207_v42  ;;  %v192_v47 = vld [vmem:[%s619_s27 + $0x68] sm:$0xff]  ;;  %v209_v48 = vld [vmem:[%s619_s27 + $0xf0] sm:$0xff]  ;;  %v210_v49 = vld [vmem:[%s619_s27 + $0xf8] sm:$0xff] }
  0x1a   : > { %v520_v50 = vpack.c.bf16 %v192_v47, %v191_v46  ;;  %v522_v51 = vpack.c.bf16 %v210_v49, %v209_v48  ;;  %v193_v52 = vld [vmem:[%s619_s27 + $0x70] sm:$0xff]  ;;  %v194_v53 = vld [vmem:[%s619_s27 + $0x78] sm:$0xff] }
  0x1b   : > { %v524_v54 = vpack.c.bf16 %v194_v53, %v193_v52 }
  0x1c   : > { %505 = vmatpush3.bf16.msra.mxu0 %v504_v26  ;;  %536 = vmatpush3.bf16.msra.mxu1 %v504_v26 }
  0x1d   : > { %507 = vmatprep.subr.bf16.mxu0 %v506_v27  ;;  %529 = vmatprep.subr.bf16.mxu1 %v506_v27 }
  0x20   : > { %509 = vmatpush3.bf16.msra.mxu0 %v508_v32  ;;  %537 = vmatpush3.bf16.msra.mxu1 %v508_v32 }
  0x21   : > { %511 = vmatprep.subr.bf16.mxu0 %v510_v33  ;;  %530 = vmatprep.subr.bf16.mxu1 %v510_v33 }
  0x24   : > { %513 = vmatpush3.bf16.msra.mxu0 %v512_v38  ;;  %538 = vmatpush3.bf16.msra.mxu1 %v512_v38 }
  0x25   : > { %515 = vmatprep.subr.bf16.mxu0 %v514_v39  ;;  %531 = vmatprep.subr.bf16.mxu1 %v514_v39 }
  0x28   : > { %517 = vmatpush3.bf16.msra.mxu0 %v516_v44  ;;  %539 = vmatpush3.bf16.msra.mxu1 %v516_v44 }
  0x29   : > { %519 = vmatprep.subr.bf16.mxu0 %v518_v45  ;;  %532 = vmatprep.subr.bf16.mxu1 %v518_v45 }
  0x2c   : > { %521 = vmatpush3.bf16.msra.mxu0 %v520_v50  ;;  %540 = vmatpush3.bf16.msra.mxu1 %v520_v50 }
  0x2d   : > { %523 = vmatprep.subr.bf16.mxu0 %v522_v51  ;;  %533 = vmatprep.subr.bf16.mxu1 %v522_v51 }
  0x30   : > { %525 = vmatpush3.bf16.msra.mxu0 %v524_v54  ;;  %541 = vmatpush3.bf16.msra.mxu1 %v524_v54 }
  0x33   : > { %300 = vmatmul.mubr.f32.vlgmr.msra.gmra.mrb[0].mxu0 %v171_v55  ;;  %310 = vmatmul.mubr.f32.vlgmr.msra.gmra.mrb[0].mxu1 %v175_v56 }
  0x34   : > { %304 = vmatprep.mubr.f32.mxu0 %v174_v57  ;;  %314 = vmatprep.mubr.f32.mxu1 %v178_v58 }
  0x37   : > { %305 = vmatmul.mubr.f32.gmra.mrb[2].mxu0 %v173_v59  ;;  %315 = vmatmul.mubr.f32.gmra.mrb[2].mxu1 %v177_v60 }
  0x87   : > { %v218_v61 = vpop.permute.xlu0 %217  ;;  %v228_v62 = vpop.permute.xlu1 %227 }
  0x8b   : > { %v223_v14 = vpop.permute.xlu0 %222  ;;  %v233_v15 = vpop.permute.xlu1 %232 }
 0x106   : > { %v482_v63 = vpop.f32.mrb[0].mxu0  ;;  %v488_v0 = vpop.f32.mrb[0].mxu1 }
 0x107   : > { %v483_v1 = vpop.f32.mrb[1].mxu0  ;;  %v489_v2 = vpop.f32.mrb[1].mxu1 }
 0x108   : > { %v484_v3 = vadd.f32 %v483_v1, %v482_v63  ;;  %v490_v4 = vadd.f32 %v489_v2, %v488_v0 }
 0x10a   : > { %v485_v5 = vpop.f32.mrb[2].mxu0  ;;  %v491_v6 = vpop.f32.mrb[2].mxu1  ;;  %v302_v7 = vadd.f32 %v484_v3, %v218_v61  ;;  %v312_v8 = vadd.f32 %v490_v4, %v228_v62 }
 0x10b   : > { %v486_v9 = vpop.f32.mrb[3].mxu0  ;;  %v492_v10 = vpop.f32.mrb[3].mxu1 }
 0x10c   : > { %v487_v11 = vadd.f32 %v486_v9, %v485_v5  ;;  %v493_v12 = vadd.f32 %v492_v10, %v491_v6  ;;  %v321_v13 = vsel %vm320_vm0, %v302_v7, 0.0  ;;  %v327_v17 = vsel %vm320_vm0, %v312_v8, 0.0 }
 0x10d   : > { %322 = vadd.xlane.f32.xlu0 %v321_v13 }
 0x10e   : > { %v307_v16 = vadd.f32 %v487_v11, %v223_v14  ;;  %v317_v18 = vadd.f32 %v493_v12, %v233_v15 }
 0x110   : > { %v324_v19 = vsel %vm320_vm0, %v307_v16, 0.0  ;;  %v330_v20 = vsel %vm320_vm0, %v317_v18, 0.0 }
 0x111   : > { %325 = vadd.xlane.f32.xlu1 %v324_v19  ;;  %328 = vadd.xlane.f32.xlu0 %v327_v17 }
 0x115   : > { %331 = vadd.xlane.f32.xlu0 %v330_v20 }
 0x19a   : > { %v323_v21 = vpop.xlane.xlu0 %322 }
 0x19b   : > { %v334_v22 = vmul.f32 0.0625, %v323_v21 }
 0x19d   : > { %v338_v23 = vsub.f32 %v302_v7, %v334_v22 }
 0x19e   : > { %v326_v24 = vpop.xlane.xlu1 %325  ;;  %v329_v25 = vpop.xlane.xlu0 %328 }
 0x19f   : > { %v335_v26 = vmul.f32 0.0625, %v326_v24  ;;  %v336_v27 = vmul.f32 0.0625, %v329_v25  ;;  %v342_v28 = vmul.f32 %v338_v23, %v338_v23 }
 0x1a1   : > { %v339_v29 = vsub.f32 %v307_v16, %v335_v26  ;;  %v340_v30 = vsub.f32 %v312_v8, %v336_v27  ;;  %v346_v31 = vsel %vm320_vm0, %v342_v28, 0.0 }
 0x1a2   : > { %347 = vadd.xlane.f32.xlu1 %v346_v31  ;;  %v332_v32 = vpop.xlane.xlu0 %331 }
 0x1a3   : > { %v337_v33 = vmul.f32 0.0625, %v332_v32  ;;  %v343_v34 = vmul.f32 %v339_v29, %v339_v29  ;;  %v344_v35 = vmul.f32 %v340_v30, %v340_v30 }
 0x1a5   : > { %v341_v36 = vsub.f32 %v317_v18, %v337_v33  ;;  %v349_v37 = vsel %vm320_vm0, %v343_v34, 0.0  ;;  %v352_v38 = vsel %vm320_vm0, %v344_v35, 0.0 }
 0x1a6   : > { %350 = vadd.xlane.f32.xlu0 %v349_v37  ;;  %353 = vadd.xlane.f32.xlu1 %v352_v38 }
 0x1a7   : > { %v345_v39 = vmul.f32 %v341_v36, %v341_v36 }
 0x1a9   : > { %v355_v40 = vsel %vm320_vm0, %v345_v39, 0.0 }
 0x1aa   : > { %356 = vadd.xlane.f32.xlu0 %v355_v40 }
 0x22f   : > { %v348_v41 = vpop.xlane.xlu1 %347 }
 0x230   : > { %v358_v42 = vmul.f32 0.0625, %v348_v41 }
 0x232   : > { %v362_v43 = vadd.f32 1e-05, %v358_v42 }
 0x233   : > { %v354_v44 = vpop.xlane.xlu1 %353  ;;  %v351_v45 = vpop.xlane.xlu0 %350 }
 0x234   : > { %553 = vrsqrt.f32 %v362_v43  ;;  %v360_v46 = vmul.f32 0.0625, %v354_v44  ;;  %v359_v47 = vmul.f32 0.0625, %v351_v45 }
 0x236   : > { %v364_v48 = vadd.f32 1e-05, %v360_v46  ;;  %v363_v49 = vadd.f32 1e-05, %v359_v47 }
 0x237   : > { %v357_v50 = vpop.xlane.xlu0 %356 }
 0x238   : > { %555 = vrsqrt.f32 %v364_v48  ;;  %v361_v51 = vmul.f32 0.0625, %v357_v50 }
 0x239   : > { %557 = vrsqrt.f32 %v363_v49 }
 0x23a   : > { %v365_v52 = vadd.f32 1e-05, %v361_v51 }
 0x23c   : > { %559 = vrsqrt.f32 %v365_v52 }
 0x23e   : > { %v554_v53 = vpop.eup %553 }
 0x23f   : > { %v370_v54 = vmul.f32 %v554_v53, %v338_v23 }
 0x241   : > { %v374_v55 = vmax.f32 %v370_v54, 0.0 }
 0x242   : > { %v556_v56 = vpop.eup %555 }
 0x243   : > { %v558_v57 = vpop.eup %557  ;;  %378 = vst.msk [vmem:[%s170_s20] sm:$0xff] %vm320_vm0, %v374_v55  ;;  %v372_v58 = vmul.f32 %v556_v56, %v340_v30 }
 0x244   : > { %v371_v59 = vmul.f32 %v558_v57, %v339_v29 }
 0x245   : > { %v376_v60 = vmax.f32 %v372_v58, 0.0 }
 0x246   : > { %v560_v61 = vpop.eup %559  ;;  %v375_v62 = vmax.f32 %v371_v59, 0.0 }
 0x247   : > { %380 = vst.msk [vmem:[%s170_s20 + $0x10] sm:$0xff] %vm320_vm0, %v376_v60  ;;  %v373_v63 = vmul.f32 %v560_v61, %v341_v36 }
 0x248   : > { %379 = vst.msk [vmem:[%s170_s20 + $0x8] sm:$0xff] %vm320_vm0, %v375_v62 }
 0x249   : > { %v377_v0 = vmax.f32 %v373_v63, 0.0 }
 0x24b   : > { %381 = vst.msk [vmem:[%s170_s20 + $0x18] sm:$0xff] %vm320_vm0, %v377_v0 }
 0x24c PF: > { %s13_s12 = sadd.s32 1, %s567_s12  }
 0x24d   : > { %p10_p4 = scmp.ge.s32.totalorder %s13_s12, 4  }
 0x24f   :  { %12 = sbr.rel (!%p10_p4) target bundleno = 1 (0x1), region = 62 }

// kernel: hit_forward.22
= control target key start
LH: loop header
LB: loop body
LE: loop exit
PB: predicated region body
PF: predicated region fallthrough
CT: control target
= control target key end

     0   :  { %s713_s12 = smov 0   ;;  %s836_s0 = inlined_call_operand.vmem [shape: f32[2,288,16], index: 0, kind: input, shape index: {}]   ;;  %s837_s1 = inlined_call_operand.vmem [shape: f32[32,288], index: 1, kind: input, shape index: {}]   ;;  %s838_s2 = inlined_call_operand.vmem [shape: f32[32,1], index: 2, kind: input, shape index: {}]   ;;  %s839_s3 = inlined_call_operand.vmem [shape: f32[2,32,16], index: 3, kind: output, shape index: {}]  }
   0x1 LB: > { %s543_s13 = sadd.s32 4294967295, %s690_s12   ;;  %p547_p0 = scmp.ge.s32.totalorder %s690_s12, 1  ;;  %s690_s12 = sphi %s713_s12, %s13_s12  }
   0x2   : > { %p137_p1 = scmp.lt.s32.totalorder %s690_s12, 3 }
   0x4   : > { %p138_p2 = pnand %p547_p0, %p137_p1 }
   0x5   : > { %p161_p3 = scmp.lt.s32.totalorder (!%p138_p2), %s543_s13, 1  ;;  %v172_v0 = vld [vmem:[%s837_s1 + $0x8] sm:$0xff] (!%p138_p2)  ;;  %vm243_vm0 = vcmask (!%p138_p2), 261120   ;;  %v173_v1 = vld [vmem:[%s837_s1 + $0x10] sm:$0xff] (!%p138_p2)  ;;  %v692_v2 = vmov (!%p138_p2), 0   ;;  %v219_v3 = vld [vmem:[%s838_s2] sm:$0xff] (!%p138_p2) }
   0x6   : > { %141 = sbr.rel (%p138_p2) target bundleno = 595 (0x253), region = 32  ;;  %320 = vmatprep.mubr.f32.mxu0 (!%p138_p2), %v172_v0  ;;  %674 = vset.pattern.permute.xlu0 (!%p138_p2), %v692_v2  ;;  %v221_v4 = vld [vmem:[%s838_s2 + $0x10] sm:$0xff] (!%p138_p2)  ;;  %v220_v5 = vld [vmem:[%s838_s2 + $0x8] sm:$0xff] (!%p138_p2)  ;;  %v222_v6 = vld [vmem:[%s838_s2 + $0x18] sm:$0xff] (!%p138_p2)  ;;  %vm426_vm1 = vcmask (!%p138_p2), 130048  }
   0x7   : > { %618 = vmatprep.mubr.msk.f32.mxu1 (!%p138_p2), %vm243_vm0, %v173_v1  ;;  %675 = vset.pattern.permute.xlu1 (!%p138_p2), %v692_v2  ;;  %v176_v50 = vld [vmem:[%s837_s1 + $0x28] sm:$0xff] (!%p138_p2)  ;;  %v179_v51 = vld [vmem:[%s837_s1 + $0x40] sm:$0xff] (!%p138_p2)  ;;  %v182_v58 = vld [vmem:[%s837_s1 + $0x58] sm:$0xff] (!%p138_p2) }
   0x8   : > { %225 = vperm.xlu0 (!%p138_p2), %674, %v219_v3   ;;  %235 = vperm.xlu1 (!%p138_p2), %675, %v221_v4   ;;  %v171_v0 = vld [vmem:[%s837_s1] sm:$0xff] (!%p138_p2)  ;;  %v174_v2 = vld [vmem:[%s837_s1 + $0x18] sm:$0xff] (!%p138_p2)  ;;  %v177_v4 = vld [vmem:[%s837_s1 + $0x30] sm:$0xff] (!%p138_p2) }
   0x9   : > { %v175_v1 = vld [vmem:[%s837_s1 + $0x20] sm:$0xff] (!%p138_p2)  ;;  %v178_v3 = vld [vmem:[%s837_s1 + $0x38] sm:$0xff] (!%p138_p2) }
   0xc   : > { %230 = vperm.xlu0 (!%p138_p2), %674, %v220_v5   ;;  %240 = vperm.xlu1 (!%p138_p2), %675, %v222_v6   ;;  %v181_v5 = vld [vmem:[%s837_s1 + $0x50] sm:$0xff] (!%p138_p2)  ;;  %v180_v6 = vld [vmem:[%s837_s1 + $0x48] sm:$0xff] (!%p138_p2) }
   0xd   : > { %s841_s13 = smov (!%p161_p3, %s543_s13), 1 }
   0xe   : > { %s664_s18 = smul.u32 288, %s841_s13 }
  0x10   : > { %s740_s25 = scalar_lea.vmem %s836_s0, %s664_s18 }
  0x11   : > { %v199_v7 = vld [vmem:[%s740_s25 + $0x80] sm:$0xff]  ;;  %v200_v8 = vld [vmem:[%s740_s25 + $0x88] sm:$0xff]  ;;  %v201_v12 = vld [vmem:[%s740_s25 + $0x90] sm:$0xff] }
  0x12   : > { %v183_v9 = vld [vmem:[%s740_s25] sm:$0xff]  ;;  %v624_v10 = vpack.c.bf16 %v200_v8, %v199_v7  ;;  %v184_v11 = vld [vmem:[%s740_s25 + $0x8] sm:$0xff]  ;;  %v202_v13 = vld [vmem:[%s740_s25 + $0x98] sm:$0xff] }
  0x13   : > { %v626_v14 = vpack.c.bf16 %v184_v11, %v183_v9  ;;  %v628_v15 = vpack.c.bf16 %v202_v13, %v201_v12  ;;  %v185_v16 = vld [vmem:[%s740_s25 + $0x10] sm:$0xff]  ;;  %v186_v17 = vld [vmem:[%s740_s25 + $0x18] sm:$0xff]  ;;  %v203_v18 = vld [vmem:[%s740_s25 + $0xa0] sm:$0xff] }
  0x14   : > { %625 = vmatprep.subr.bf16.mxu0 %v624_v10  ;;  %v204_v19 = vld [vmem:[%s740_s25 + $0xa8] sm:$0xff]  ;;  %v630_v20 = vpack.c.bf16 %v186_v17, %v185_v16  ;;  %v187_v22 = vld [vmem:[%s740_s25 + $0x20] sm:$0xff]  ;;  %v205_v24 = vld [vmem:[%s740_s25 + $0xb0] sm:$0xff] }
  0x15   : > { %627 = vmatpush3.bf16.msra.mxu0 %v626_v14  ;;  %v632_v21 = vpack.c.bf16 %v204_v19, %v203_v18  ;;  %v188_v23 = vld [vmem:[%s740_s25 + $0x28] sm:$0xff]  ;;  %v206_v25 = vld [vmem:[%s740_s25 + $0xb8] sm:$0xff]  ;;  %v189_v28 = vld [vmem:[%s740_s25 + $0x30] sm:$0xff] }
  0x16   : > { %629 = vmatprep.subr.bf16.mxu0 %v628_v15  ;;  %v634_v26 = vpack.c.bf16 %v188_v23, %v187_v22  ;;  %v636_v27 = vpack.c.bf16 %v206_v25, %v205_v24  ;;  %v190_v29 = vld [vmem:[%s740_s25 + $0x38] sm:$0xff]  ;;  %v207_v30 = vld [vmem:[%s740_s25 + $0xc0] sm:$0xff]  ;;  %v208_v31 = vld [vmem:[%s740_s25 + $0xc8] sm:$0xff] }
  0x17   : > { %v215_v32 = vld [vmem:[%s740_s25 + $0x100] sm:$0xff]  ;;  %v216_v33 = vld [vmem:[%s740_s25 + $0x108] sm:$0xff]  ;;  %v217_v35 = vld [vmem:[%s740_s25 + $0x110] sm:$0xff]  ;;  %v638_v37 = vpack.c.bf16 %v190_v29, %v189_v28  ;;  %v640_v39 = vpack.c.bf16 %v208_v31, %v207_v30 }
  0x18   : > { %v656_v34 = vpack.c.bf16 %v216_v33, %v215_v32  ;;  %v218_v36 = vld [vmem:[%s740_s25 + $0x118] sm:$0xff]  ;;  %v191_v40 = vld [vmem:[%s740_s25 + $0x40] sm:$0xff]  ;;  %v192_v41 = vld [vmem:[%s740_s25 + $0x48] sm:$0xff] }
  0x19   : > { %631 = vmatpush3.bf16.msra.mxu0 %v630_v20  ;;  %v660_v38 = vpack.c.bf16 %v218_v36, %v217_v35  ;;  %v209_v42 = vld [vmem:[%s740_s25 + $0xd0] sm:$0xff]  ;;  %v210_v43 = vld [vmem:[%s740_s25 + $0xd8] sm:$0xff]  ;;  %v642_v44 = vpack.c.bf16 %v192_v41, %v191_v40  ;;  %v211_v48 = vld [vmem:[%s740_s25 + $0xe0] sm:$0xff] }
  0x1a   : > { %633 = vmatprep.subr.bf16.mxu0 %v632_v21  ;;  %657 = vmatprep.subr.bf16.mxu1 %v656_v34  ;;  %v644_v45 = vpack.c.bf16 %v210_v43, %v209_v42  ;;  %v193_v46 = vld [vmem:[%s740_s25 + $0x50] sm:$0xff]  ;;  %v194_v47 = vld [vmem:[%s740_s25 + $0x58] sm:$0xff]  ;;  %v212_v49 = vld [vmem:[%s740_s25 + $0xe8] sm:$0xff] }
  0x1b   : > { %659 = vmatpush3.bf16.msra.mxu1 %v656_v34  ;;  %v646_v52 = vpack.c.bf16 %v194_v47, %v193_v46  ;;  %v648_v53 = vpack.c.bf16 %v212_v49, %v211_v48  ;;  %v195_v54 = vld [vmem:[%s740_s25 + $0x60] sm:$0xff]  ;;  %v196_v55 = vld [vmem:[%s740_s25 + $0x68] sm:$0xff]  ;;  %v213_v56 = vld [vmem:[%s740_s25 + $0xf0] sm:$0xff] }
  0x1c   : > { %661 = vmatprep.subr.bf16.mxu1 %v660_v38  ;;  %v214_v57 = vld [vmem:[%s740_s25 + $0xf8] sm:$0xff]  ;;  %v650_v59 = vpack.c.bf16 %v196_v55, %v195_v54  ;;  %v197_v61 = vld [vmem:[%s740_s25 + $0x70] sm:$0xff] }
  0x1d   : > { %635 = vmatpush3.bf16.msra.mxu0 %v634_v26  ;;  %v652_v60 = vpack.c.bf16 %v214_v57, %v213_v56  ;;  %v198_v62 = vld [vmem:[%s740_s25 + $0x78] sm:$0xff]  ;;  %s557_s25 = sshll.u32 %s841_s13, 5 }
  0x1e   : > { %637 = vmatprep.subr.bf16.mxu0 %v636_v27  ;;  %v654_v63 = vpack.c.bf16 %v198_v62, %v197_v61  ;;  %s170_s28 = scalar_lea.vmem %s839_s3, %s557_s25 }
  0x1f   : > { %663 = vmatpush3.bf16.msra.mxu1 %v660_v38 }
  0x21   : > { %639 = vmatpush3.bf16.msra.mxu0 %v638_v37 }
  0x22   : > { %641 = vmatprep.subr.bf16.mxu0 %v640_v39  ;;  %619 = vmatmul.mubr.msk.f32.vlgmr.msra.gmra.mrb[0].mxu1 %vm243_vm0, %v176_v50 }
  0x23   : > { %621 = vmatprep.mubr.msk.f32.mxu1 %vm243_vm0, %v179_v51 }
  0x25   : > { %643 = vmatpush3.bf16.msra.mxu0 %v642_v44 }
  0x26   : > { %645 = vmatprep.subr.bf16.mxu0 %v644_v45  ;;  %622 = vmatmul.mubr.msk.f32.gmra.mrb[2].mxu1 %vm243_vm0, %v182_v58 }
  0x29   : > { %647 = vmatpush3.bf16.msra.mxu0 %v646_v52 }
  0x2a   : > { %649 = vmatprep.subr.bf16.mxu0 %v648_v53 }
  0x2d   : > { %651 = vmatpush3.bf16.msra.mxu0 %v650_v59 }
  0x2e   : > { %653 = vmatprep.subr.bf16.mxu0 %v652_v60 }
  0x31   : > { %655 = vmatpush3.bf16.msra.mxu0 %v654_v63 }
  0x34   : > { %321 = vmatmul.mubr.f32.vlgmr.msra.gmra.mrb[0].mxu0 %v171_v0 }
  0x35   : > { %325 = vmatprep.mubr.f32.mxu0 %v175_v1 }
  0x38   : > { %326 = vmatmul.mubr.f32.gmra.mrb[2].mxu0 %v174_v2 }
  0x39   : > { %330 = vmatprep.mubr.f32.mxu0 %v178_v3 }
  0x3c   : > { %331 = vmatmul.mubr.f32.gmra.mrb[4].mxu0 %v177_v4 }
  0x3d   : > { %335 = vmatprep.mubr.f32.mxu0 %v181_v5 }
  0x40   : > { %336 = vmatmul.mubr.f32.gmra.mrb[6].mxu0 %v180_v6 }
  0x87   : > { %v226_v11 = vpop.permute.xlu0 %225  ;;  %v236_v24 = vpop.permute.xlu1 %235 }
  0x8b   : > { %v231_v18 = vpop.permute.xlu0 %230  ;;  %v241_v34 = vpop.permute.xlu1 %240 }
  0xf5   : > { %v620_v7 = vpop.f32.mrb[0].mxu1 }
  0xf6   : > { %v407_v8 = vpop.f32.mrb[1].mxu1 }
  0xf9   : > { %v623_v9 = vpop.f32.mrb[2].mxu1 }
  0xfa   : > { %v417_v10 = vpop.f32.mrb[3].mxu1 }
 0x107   : > { %v590_v12 = vpop.f32.mrb[0].mxu0 }
 0x108   : > { %v591_v13 = vpop.f32.mrb[1].mxu0 }
 0x109   : > { %v592_v14 = vadd.f32 %v591_v13, %v590_v12 }
 0x10b   : > { %v323_v15 = vadd.f32 %v592_v14, %v226_v11  ;;  %v593_v16 = vpop.f32.mrb[2].mxu0 }
 0x10c   : > { %v594_v17 = vpop.f32.mrb[3].mxu0 }
 0x10d   : > { %v595_v19 = vadd.f32 %v594_v17, %v593_v16  ;;  %v408_v20 = vadd.f32 %v407_v8, %v323_v15 }
 0x10f   : > { %v328_v21 = vadd.f32 %v595_v19, %v231_v18  ;;  %v596_v22 = vpop.f32.mrb[4].mxu0  ;;  %v427_v23 = vsel %vm426_vm1, %v408_v20, 0.0 }
 0x110   : > { %v597_v25 = vpop.f32.mrb[5].mxu0  ;;  %428 = vadd.xlane.f32.xlu0 %v427_v23 }
 0x111   : > { %v598_v26 = vadd.f32 %v597_v25, %v596_v22  ;;  %v413_v27 = vadd.f32 %v620_v7, %v328_v21 }
 0x113   : > { %v599_v28 = vpop.f32.mrb[6].mxu0  ;;  %v333_v29 = vadd.f32 %v598_v26, %v236_v24  ;;  %v430_v30 = vsel %vm426_vm1, %v413_v27, 0.0 }
 0x114   : > { %v600_v31 = vpop.f32.mrb[7].mxu0  ;;  %431 = vadd.xlane.f32.xlu1 %v430_v30 }
 0x115   : > { %v418_v32 = vadd.f32 %v417_v10, %v333_v29  ;;  %v601_v33 = vadd.f32 %v600_v31, %v599_v28 }
 0x117   : > { %v338_v35 = vadd.f32 %v601_v33, %v241_v34  ;;  %v433_v36 = vsel %vm426_vm1, %v418_v32, 0.0 }
 0x118   : > { %434 = vadd.xlane.f32.xlu0 %v433_v36 }
 0x119   : > { %v423_v37 = vadd.f32 %v623_v9, %v338_v35 }
 0x11b   : > { %v436_v38 = vsel %vm426_vm1, %v423_v37, 0.0 }
 0x11c   : > { %437 = vadd.xlane.f32.xlu0 %v436_v38 }
 0x19d   : > { %v429_v39 = vpop.xlane.xlu0 %428 }
 0x19e   : > { %v440_v40 = vmul.f32 0.0625, %v429_v39 }
 0x1a0   : > { %v444_v41 = vsub.f32 %v408_v20, %v440_v40 }
 0x1a1   : > { %v432_v42 = vpop.xlane.xlu1 %431 }
 0x1a2   : > { %v441_v43 = vmul.f32 0.0625, %v432_v42  ;;  %v448_v44 = vmul.f32 %v444_v41, %v444_v41 }
 0x1a4   : > { %v445_v45 = vsub.f32 %v413_v27, %v441_v43  ;;  %v452_v46 = vsel %vm426_vm1, %v448_v44, 0.0 }
 0x1a5   : > { %453 = vadd.xlane.f32.xlu1 %v452_v46  ;;  %v435_v47 = vpop.xlane.xlu0 %434 }
 0x1a6   : > { %v442_v48 = vmul.f32 0.0625, %v435_v47  ;;  %v449_v49 = vmul.f32 %v445_v45, %v445_v45 }
 0x1a8   : > { %v446_v50 = vsub.f32 %v418_v32, %v442_v48  ;;  %v455_v51 = vsel %vm426_vm1, %v449_v49, 0.0 }
 0x1a9   : > { %456 = vadd.xlane.f32.xlu0 %v455_v51  ;;  %v438_v52 = vpop.xlane.xlu0 %437 }
 0x1aa   : > { %v443_v53 = vmul.f32 0.0625, %v438_v52  ;;  %v450_v54 = vmul.f32 %v446_v50, %v446_v50 }
 0x1ac   : > { %v447_v55 = vsub.f32 %v423_v37, %v443_v53  ;;  %v458_v56 = vsel %vm426_vm1, %v450_v54, 0.0 }
 0x1ad   : > { %459 = vadd.xlane.f32.xlu1 %v458_v56 }
 0x1ae   : > { %v451_v57 = vmul.f32 %v447_v55, %v447_v55 }
 0x1b0   : > { %v461_v58 = vsel %vm426_vm1, %v451_v57, 0.0 }
 0x1b1   : > { %462 = vadd.xlane.f32.xlu0 %v461_v58 }
 0x232   : > { %v454_v59 = vpop.xlane.xlu1 %453 }
 0x233   : > { %v464_v60 = vmul.f32 0.0625, %v454_v59 }
 0x235   : > { %v468_v61 = vadd.f32 1e-05, %v464_v60 }
 0x236   : > { %v457_v62 = vpop.xlane.xlu0 %456 }
 0x237   : > { %676 = vrsqrt.f32 %v468_v61  ;;  %v465_v63 = vmul.f32 0.0625, %v457_v62 }
 0x239   : > { %v469_v0 = vadd.f32 1e-05, %v465_v63 }
 0x23a   : > { %v460_v1 = vpop.xlane.xlu1 %459 }
 0x23b   : > { %678 = vrsqrt.f32 %v469_v0  ;;  %v466_v2 = vmul.f32 0.0625, %v460_v1 }
 0x23d   : > { %v470_v3 = vadd.f32 1e-05, %v466_v2 }
 0x23e   : > { %v463_v4 = vpop.xlane.xlu0 %462 }
 0x23f   : > { %680 = vrsqrt.f32 %v470_v3  ;;  %v467_v5 = vmul.f32 0.0625, %v463_v4 }
 0x241   : > { %v677_v6 = vpop.eup %676  ;;  %v471_v7 = vadd.f32 1e-05, %v467_v5 }
 0x242   : > { %v476_v8 = vmul.f32 %v677_v6, %v444_v41 }
 0x243   : > { %682 = vrsqrt.f32 %v471_v7 }
 0x244   : > { %v480_v9 = vmax.f32 %v476_v8, 0.0 }
 0x245   : > { %v679_v10 = vpop.eup %678 }
 0x246   : > { %484 = vst.msk [vmem:[%s170_s28] sm:$0xff] %vm426_vm1, %v480_v9  ;;  %v477_v11 = vmul.f32 %v679_v10, %v445_v45 }
 0x248   : > { %v481_v12 = vmax.f32 %v477_v11, 0.0 }
 0x249   : > { %v681_v13 = vpop.eup %680 }
 0x24a   : > { %485 = vst.msk [vmem:[%s170_s28 + $0x8] sm:$0xff] %vm426_vm1, %v481_v12  ;;  %v478_v14 = vmul.f32 %v681_v13, %v446_v50 }
 0x24c   : > { %v482_v15 = vmax.f32 %v478_v14, 0.0 }
 0x24d   : > { %v683_v16 = vpop.eup %682 }
 0x24e   : > { %486 = vst.msk [vmem:[%s170_s28 + $0x10] sm:$0xff] %vm426_vm1, %v482_v15  ;;  %v479_v17 = vmul.f32 %v683_v16, %v447_v55 }
 0x250   : > { %v483_v18 = vmax.f32 %v479_v17, 0.0 }
 0x252   : > { %487 = vst.msk [vmem:[%s170_s28 + $0x18] sm:$0xff] %vm426_vm1, %v483_v18 }
 0x253 PF: > { %s13_s12 = sadd.s32 1, %s690_s12  }
 0x254   : > { %p10_p4 = scmp.ge.s32.totalorder %s13_s12, 4  }
 0x256   :  { %12 = sbr.rel (!%p10_p4) target bundleno = 1 (0x1), region = 62 }

// kernel: hit_forward.23
= control target key start
LH: loop header
LB: loop body
LE: loop exit
PB: predicated region body
PF: predicated region fallthrough
CT: control target
= control target key end

     0   :  { %s784_s15 = smov 0   ;;  %s910_s0 = inlined_call_operand.vmem [shape: f32[2,288,16], index: 0, kind: input, shape index: {}]   ;;  %s911_s1 = inlined_call_operand.vmem [shape: f32[32,288], index: 1, kind: input, shape index: {}]   ;;  %s912_s2 = inlined_call_operand.vmem [shape: f32[32,1], index: 2, kind: input, shape index: {}]   ;;  %s913_s3 = inlined_call_operand.vmem [shape: f32[2,32,16], index: 3, kind: input, shape index: {}]   ;;  %s914_s4 = inlined_call_operand.vmem [shape: f32[2,32,16], index: 4, kind: output, shape index: {}]  }
   0x1 LB: > { %s606_s16 = sadd.s32 4294967295, %s756_s15   ;;  %p610_p0 = scmp.ge.s32.totalorder %s756_s15, 1  ;;  %s756_s15 = sphi %s784_s15, %s14_s15  }
   0x2   : > { %p172_p1 = scmp.lt.s32.totalorder %s756_s15, 3 }
   0x4   : > { %p173_p2 = pnand %p610_p0, %p172_p1 }
   0x5   : > { %p203_p3 = scmp.lt.s32.totalorder (!%p173_p2), %s606_s16, 1  ;;  %v219_v0 = vld [vmem:[%s911_s1 + $0x8] sm:$0xff] (!%p173_p2)  ;;  %vm290_vm0 = vcmask (!%p173_p2), 261120   ;;  %v220_v1 = vld [vmem:[%s911_s1 + $0x10] sm:$0xff] (!%p173_p2)  ;;  %v758_v2 = vmov (!%p173_p2), 0   ;;  %v266_v3 = vld [vmem:[%s912_s2] sm:$0xff] (!%p173_p2) }
   0x6   : > { %176 = sbr.rel (%p173_p2) target bundleno = 595 (0x253), region = 36  ;;  %367 = vmatprep.mubr.f32.mxu0 (!%p173_p2), %v219_v0  ;;  %740 = vset.pattern.permute.xlu0 (!%p173_p2), %v758_v2  ;;  %v268_v4 = vld [vmem:[%s912_s2 + $0x10] sm:$0xff] (!%p173_p2)  ;;  %v267_v5 = vld [vmem:[%s912_s2 + $0x8] sm:$0xff] (!%p173_p2)  ;;  %v269_v6 = vld [vmem:[%s912_s2 + $0x18] sm:$0xff] (!%p173_p2)  ;;  %vm473_vm1 = vcmask (!%p173_p2), 130048  }
   0x7   : > { %684 = vmatprep.mubr.msk.f32.mxu1 (!%p173_p2), %vm290_vm0, %v220_v1  ;;  %741 = vset.pattern.permute.xlu1 (!%p173_p2), %v758_v2  ;;  %v223_v50 = vld [vmem:[%s911_s1 + $0x28] sm:$0xff] (!%p173_p2)  ;;  %v226_v51 = vld [vmem:[%s911_s1 + $0x40] sm:$0xff] (!%p173_p2)  ;;  %v229_v58 = vld [vmem:[%s911_s1 + $0x58] sm:$0xff] (!%p173_p2) }
   0x8   : > { %272 = vperm.xlu0 (!%p173_p2), %740, %v266_v3   ;;  %282 = vperm.xlu1 (!%p173_p2), %741, %v268_v4   ;;  %v218_v0 = vld [vmem:[%s911_s1] sm:$0xff] (!%p173_p2)  ;;  %v221_v2 = vld [vmem:[%s911_s1 + $0x18] sm:$0xff] (!%p173_p2)  ;;  %v224_v4 = vld [vmem:[%s911_s1 + $0x30] sm:$0xff] (!%p173_p2) }
   0x9   : > { %v222_v1 = vld [vmem:[%s911_s1 + $0x20] sm:$0xff] (!%p173_p2)  ;;  %v225_v3 = vld [vmem:[%s911_s1 + $0x38] sm:$0xff] (!%p173_p2) }
   0xc   : > { %277 = vperm.xlu0 (!%p173_p2), %740, %v267_v5   ;;  %287 = vperm.xlu1 (!%p173_p2), %741, %v269_v6   ;;  %v228_v5 = vld [vmem:[%s911_s1 + $0x50] sm:$0xff] (!%p173_p2)  ;;  %v227_v6 = vld [vmem:[%s911_s1 + $0x48] sm:$0xff] (!%p173_p2) }
   0xd   : > { %s916_s16 = smov (!%p203_p3, %s606_s16), 1 }
   0xe   : > { %s730_s21 = smul.u32 288, %s916_s16  ;;  %s622_s29 = sshll.u32 %s916_s16, 5 }
   0xf   : > { %s212_s6 = scalar_lea.vmem %s913_s3, %s622_s29  ;;  %s217_s9 = scalar_lea.vmem %s914_s4, %s622_s29 }
  0x10   : > { %s811_s28 = scalar_lea.vmem %s910_s0, %s730_s21 }
  0x11   : > { %v246_v7 = vld [vmem:[%s811_s28 + $0x80] sm:$0xff]  ;;  %v247_v8 = vld [vmem:[%s811_s28 + $0x88] sm:$0xff]  ;;  %v248_v12 = vld [vmem:[%s811_s28 + $0x90] sm:$0xff] }
  0x12   : > { %v230_v9 = vld [vmem:[%s811_s28] sm:$0xff]  ;;  %v690_v10 = vpack.c.bf16 %v247_v8, %v246_v7  ;;  %v231_v11 = vld [vmem:[%s811_s28 + $0x8] sm:$0xff]  ;;  %v249_v13 = vld [vmem:[%s811_s28 + $0x98] sm:$0xff] }
  0x13   : > { %v692_v14 = vpack.c.bf16 %v231_v11, %v230_v9  ;;  %v694_v15 = vpack.c.bf16 %v249_v13, %v248_v12  ;;  %v232_v16 = vld [vmem:[%s811_s28 + $0x10] sm:$0xff]  ;;  %v233_v17 = vld [vmem:[%s811_s28 + $0x18] sm:$0xff]  ;;  %v250_v18 = vld [vmem:[%s811_s28 + $0xa0] sm:$0xff] }
  0x14   : > { %691 = vmatprep.subr.bf16.mxu0 %v690_v10  ;;  %v251_v19 = vld [vmem:[%s811_s28 + $0xa8] sm:$0xff]  ;;  %v696_v20 = vpack.c.bf16 %v233_v17, %v232_v16  ;;  %v234_v22 = vld [vmem:[%s811_s28 + $0x20] sm:$0xff]  ;;  %v252_v24 = vld [vmem:[%s811_s28 + $0xb0] sm:$0xff] }
  0x15   : > { %693 = vmatpush3.bf16.msra.mxu0 %v692_v14  ;;  %v698_v21 = vpack.c.bf16 %v251_v19, %v250_v18  ;;  %v235_v23 = vld [vmem:[%s811_s28 + $0x28] sm:$0xff]  ;;  %v253_v25 = vld [vmem:[%s811_s28 + $0xb8] sm:$0xff]  ;;  %v236_v28 = vld [vmem:[%s811_s28 + $0x30] sm:$0xff] }
  0x16   : > { %695 = vmatprep.subr.bf16.mxu0 %v694_v15  ;;  %v700_v26 = vpack.c.bf16 %v235_v23, %v234_v22  ;;  %v702_v27 = vpack.c.bf16 %v253_v25, %v252_v24  ;;  %v237_v29 = vld [vmem:[%s811_s28 + $0x38] sm:$0xff]  ;;  %v254_v30 = vld [vmem:[%s811_s28 + $0xc0] sm:$0xff]  ;;  %v255_v31 = vld [vmem:[%s811_s28 + $0xc8] sm:$0xff] }
  0x17   : > { %v262_v32 = vld [vmem:[%s811_s28 + $0x100] sm:$0xff]  ;;  %v263_v33 = vld [vmem:[%s811_s28 + $0x108] sm:$0xff]  ;;  %v264_v35 = vld [vmem:[%s811_s28 + $0x110] sm:$0xff]  ;;  %v704_v37 = vpack.c.bf16 %v237_v29, %v236_v28  ;;  %v706_v39 = vpack.c.bf16 %v255_v31, %v254_v30 }
  0x18   : > { %v722_v34 = vpack.c.bf16 %v263_v33, %v262_v32  ;;  %v265_v36 = vld [vmem:[%s811_s28 + $0x118] sm:$0xff]  ;;  %v238_v40 = vld [vmem:[%s811_s28 + $0x40] sm:$0xff]  ;;  %v239_v41 = vld [vmem:[%s811_s28 + $0x48] sm:$0xff] }
  0x19   : > { %697 = vmatpush3.bf16.msra.mxu0 %v696_v20  ;;  %v726_v38 = vpack.c.bf16 %v265_v36, %v264_v35  ;;  %v256_v42 = vld [vmem:[%s811_s28 + $0xd0] sm:$0xff]  ;;  %v257_v43 = vld [vmem:[%s811_s28 + $0xd8] sm:$0xff]  ;;  %v708_v44 = vpack.c.bf16 %v239_v41, %v238_v40  ;;  %v258_v48 = vld [vmem:[%s811_s28 + $0xe0] sm:$0xff] }
  0x1a   : > { %699 = vmatprep.subr.bf16.mxu0 %v698_v21  ;;  %723 = vmatprep.subr.bf16.mxu1 %v722_v34  ;;  %v710_v45 = vpack.c.bf16 %v257_v43, %v256_v42  ;;  %v240_v46 = vld [vmem:[%s811_s28 + $0x50] sm:$0xff]  ;;  %v241_v47 = vld [vmem:[%s811_s28 + $0x58] sm:$0xff]  ;;  %v259_v49 = vld [vmem:[%s811_s28 + $0xe8] sm:$0xff] }
  0x1b   : > { %725 = vmatpush3.bf16.msra.mxu1 %v722_v34  ;;  %v712_v52 = vpack.c.bf16 %v241_v47, %v240_v46  ;;  %v714_v53 = vpack.c.bf16 %v259_v49, %v258_v48  ;;  %v242_v54 = vld [vmem:[%s811_s28 + $0x60] sm:$0xff]  ;;  %v243_v55 = vld [vmem:[%s811_s28 + $0x68] sm:$0xff]  ;;  %v260_v56 = vld [vmem:[%s811_s28 + $0xf0] sm:$0xff] }
  0x1c   : > { %727 = vmatprep.subr.bf16.mxu1 %v726_v38  ;;  %v261_v57 = vld [vmem:[%s811_s28 + $0xf8] sm:$0xff]  ;;  %v716_v59 = vpack.c.bf16 %v243_v55, %v242_v54  ;;  %v244_v61 = vld [vmem:[%s811_s28 + $0x70] sm:$0xff] }
  0x1d   : > { %701 = vmatpush3.bf16.msra.mxu0 %v700_v26  ;;  %v718_v60 = vpack.c.bf16 %v261_v57, %v260_v56  ;;  %v245_v62 = vld [vmem:[%s811_s28 + $0x78] sm:$0xff] }
  0x1e   : > { %703 = vmatprep.subr.bf16.mxu0 %v702_v27  ;;  %v720_v63 = vpack.c.bf16 %v245_v62, %v244_v61 }
  0x1f   : > { %729 = vmatpush3.bf16.msra.mxu1 %v726_v38 }
  0x21   : > { %705 = vmatpush3.bf16.msra.mxu0 %v704_v37 }
  0x22   : > { %707 = vmatprep.subr.bf16.mxu0 %v706_v39  ;;  %685 = vmatmul.mubr.msk.f32.vlgmr.msra.gmra.mrb[0].mxu1 %vm290_vm0, %v223_v50 }
  0x23   : > { %687 = vmatprep.mubr.msk.f32.mxu1 %vm290_vm0, %v226_v51 }
  0x25   : > { %709 = vmatpush3.bf16.msra.mxu0 %v708_v44 }
  0x26   : > { %711 = vmatprep.subr.bf16.mxu0 %v710_v45  ;;  %688 = vmatmul.mubr.msk.f32.gmra.mrb[2].mxu1 %vm290_vm0, %v229_v58 }
  0x29   : > { %713 = vmatpush3.bf16.msra.mxu0 %v712_v52 }
  0x2a   : > { %715 = vmatprep.subr.bf16.mxu0 %v714_v53 }
  0x2d   : > { %717 = vmatpush3.bf16.msra.mxu0 %v716_v59 }
  0x2e   : > { %719 = vmatprep.subr.bf16.mxu0 %v718_v60 }
  0x31   : > { %721 = vmatpush3.bf16.msra.mxu0 %v720_v63 }
  0x34   : > { %368 = vmatmul.mubr.f32.vlgmr.msra.gmra.mrb[0].mxu0 %v218_v0 }
  0x35   : > { %372 = vmatprep.mubr.f32.mxu0 %v222_v1 }
  0x38   : > { %373 = vmatmul.mubr.f32.gmra.mrb[2].mxu0 %v221_v2 }
  0x39   : > { %377 = vmatprep.mubr.f32.mxu0 %v225_v3 }
  0x3c   : > { %378 = vmatmul.mubr.f32.gmra.mrb[4].mxu0 %v224_v4 }
  0x3d   : > { %382 = vmatprep.mubr.f32.mxu0 %v228_v5 }
  0x40   : > { %383 = vmatmul.mubr.f32.gmra.mrb[6].mxu0 %v227_v6 }
  0x87   : > { %v273_v11 = vpop.permute.xlu0 %272  ;;  %v283_v24 = vpop.permute.xlu1 %282 }
  0x8b   : > { %v278_v18 = vpop.permute.xlu0 %277  ;;  %v288_v34 = vpop.permute.xlu1 %287 }
  0xf5   : > { %v686_v7 = vpop.f32.mrb[0].mxu1 }
  0xf6   : > { %v454_v8 = vpop.f32.mrb[1].mxu1 }
  0xf9   : > { %v689_v9 = vpop.f32.mrb[2].mxu1 }
  0xfa   : > { %v464_v10 = vpop.f32.mrb[3].mxu1 }
 0x107   : > { %v656_v12 = vpop.f32.mrb[0].mxu0 }
 0x108   : > { %v657_v13 = vpop.f32.mrb[1].mxu0 }
 0x109   : > { %v658_v14 = vadd.f32 %v657_v13, %v656_v12  ;;  %v528_v12 = vld [vmem:[%s212_s6 + $0x8] sm:$0xff] }
 0x10b   : > { %v370_v15 = vadd.f32 %v658_v14, %v273_v11  ;;  %v659_v16 = vpop.f32.mrb[2].mxu0 }
 0x10c   : > { %v660_v17 = vpop.f32.mrb[3].mxu0 }
 0x10d   : > { %v661_v19 = vadd.f32 %v660_v17, %v659_v16  ;;  %v455_v20 = vadd.f32 %v454_v8, %v370_v15  ;;  %v529_v16 = vld [vmem:[%s212_s6 + $0x10] sm:$0xff] }
 0x10f   : > { %v375_v21 = vadd.f32 %v661_v19, %v278_v18  ;;  %v662_v22 = vpop.f32.mrb[4].mxu0  ;;  %v474_v23 = vsel %vm473_vm1, %v455_v20, 0.0 }
 0x110   : > { %v663_v25 = vpop.f32.mrb[5].mxu0  ;;  %475 = vadd.xlane.f32.xlu0 %v474_v23 }
 0x111   : > { %v664_v26 = vadd.f32 %v663_v25, %v662_v22  ;;  %v460_v27 = vadd.f32 %v686_v7, %v375_v21  ;;  %v527_v7 = vld [vmem:[%s212_s6] sm:$0xff] }
 0x113   : > { %v665_v28 = vpop.f32.mrb[6].mxu0  ;;  %v380_v29 = vadd.f32 %v664_v26, %v283_v24  ;;  %v477_v30 = vsel %vm473_vm1, %v460_v27, 0.0 }
 0x114   : > { %v666_v31 = vpop.f32.mrb[7].mxu0  ;;  %478 = vadd.xlane.f32.xlu1 %v477_v30 }
 0x115   : > { %v465_v32 = vadd.f32 %v464_v10, %v380_v29  ;;  %v667_v33 = vadd.f32 %v666_v31, %v665_v28 }
 0x117   : > { %v385_v35 = vadd.f32 %v667_v33, %v288_v34  ;;  %v480_v36 = vsel %vm473_vm1, %v465_v32, 0.0 }
 0x118   : > { %481 = vadd.xlane.f32.xlu0 %v480_v36 }
 0x119   : > { %v470_v37 = vadd.f32 %v689_v9, %v385_v35 }
 0x11b   : > { %v483_v38 = vsel %vm473_vm1, %v470_v37, 0.0 }
 0x11c   : > { %484 = vadd.xlane.f32.xlu0 %v483_v38 }
 0x19d   : > { %v476_v39 = vpop.xlane.xlu0 %475 }
 0x19e   : > { %v487_v40 = vmul.f32 0.0625, %v476_v39 }
 0x1a0   : > { %v491_v41 = vsub.f32 %v455_v20, %v487_v40  ;;  %v530_v20 = vld [vmem:[%s212_s6 + $0x18] sm:$0xff] }
 0x1a1   : > { %v479_v42 = vpop.xlane.xlu1 %478 }
 0x1a2   : > { %v488_v43 = vmul.f32 0.0625, %v479_v42  ;;  %v495_v44 = vmul.f32 %v491_v41, %v491_v41 }
 0x1a4   : > { %v492_v45 = vsub.f32 %v460_v27, %v488_v43  ;;  %v499_v46 = vsel %vm473_vm1, %v495_v44, 0.0 }
 0x1a5   : > { %500 = vadd.xlane.f32.xlu1 %v499_v46  ;;  %v482_v47 = vpop.xlane.xlu0 %481 }
 0x1a6   : > { %v489_v48 = vmul.f32 0.0625, %v482_v47  ;;  %v496_v49 = vmul.f32 %v492_v45, %v492_v45 }
 0x1a8   : > { %v493_v50 = vsub.f32 %v465_v32, %v489_v48  ;;  %v502_v51 = vsel %vm473_vm1, %v496_v49, 0.0 }
 0x1a9   : > { %503 = vadd.xlane.f32.xlu0 %v502_v51  ;;  %v485_v52 = vpop.xlane.xlu0 %484 }
 0x1aa   : > { %v490_v53 = vmul.f32 0.0625, %v485_v52  ;;  %v497_v54 = vmul.f32 %v493_v50, %v493_v50 }
 0x1ac   : > { %v494_v55 = vsub.f32 %v470_v37, %v490_v53  ;;  %v505_v56 = vsel %vm473_vm1, %v497_v54, 0.0 }
 0x1ad   : > { %506 = vadd.xlane.f32.xlu1 %v505_v56 }
 0x1ae   : > { %v498_v57 = vmul.f32 %v494_v55, %v494_v55 }
 0x1b0   : > { %v508_v58 = vsel %vm473_vm1, %v498_v57, 0.0 }
 0x1b1   : > { %509 = vadd.xlane.f32.xlu0 %v508_v58 }
 0x232   : > { %v501_v59 = vpop.xlane.xlu1 %500 }
 0x233   : > { %v511_v60 = vmul.f32 0.0625, %v501_v59 }
 0x235   : > { %v515_v61 = vadd.f32 1e-05, %v511_v60 }
 0x236   : > { %v504_v62 = vpop.xlane.xlu0 %503 }
 0x237   : > { %742 = vrsqrt.f32 %v515_v61  ;;  %v512_v63 = vmul.f32 0.0625, %v504_v62 }
 0x239   : > { %v516_v0 = vadd.f32 1e-05, %v512_v63 }
 0x23a   : > { %v507_v1 = vpop.xlane.xlu1 %506 }
 0x23b   : > { %744 = vrsqrt.f32 %v516_v0  ;;  %v513_v2 = vmul.f32 0.0625, %v507_v1 }
 0x23d   : > { %v517_v3 = vadd.f32 1e-05, %v513_v2 }
 0x23e   : > { %v510_v4 = vpop.xlane.xlu0 %509 }
 0x23f   : > { %746 = vrsqrt.f32 %v517_v3  ;;  %v514_v5 = vmul.f32 0.0625, %v510_v4 }
 0x241   : > { %v743_v6 = vpop.eup %742  ;;  %v518_v8 = vadd.f32 1e-05, %v514_v5 }
 0x242   : > { %v523_v9 = vmul.f32 %v743_v6, %v491_v41 }
 0x243   : > { %748 = vrsqrt.f32 %v518_v8 }
 0x244   : > { %v531_v10 = vadd.f32 %v527_v7, %v523_v9 }
 0x245   : > { %v745_v11 = vpop.eup %744 }
 0x246   : > { %535 = vst.msk [vmem:[%s217_s9] sm:$0xff] %vm473_vm1, %v531_v10  ;;  %v524_v13 = vmul.f32 %v745_v11, %v492_v45 }
 0x248   : > { %v532_v14 = vadd.f32 %v528_v12, %v524_v13 }
 0x249   : > { %v747_v15 = vpop.eup %746 }
 0x24a   : > { %536 = vst.msk [vmem:[%s217_s9 + $0x8] sm:$0xff] %vm473_vm1, %v532_v14  ;;  %v525_v17 = vmul.f32 %v747_v15, %v493_v50 }
 0x24c   : > { %v533_v18 = vadd.f32 %v529_v16, %v525_v17 }
 0x24d   : > { %v749_v19 = vpop.eup %748 }
 0x24e   : > { %537 = vst.msk [vmem:[%s217_s9 + $0x10] sm:$0xff] %vm473_vm1, %v533_v18  ;;  %v526_v21 = vmul.f32 %v749_v19, %v494_v55 }
 0x250   : > { %v534_v22 = vadd.f32 %v530_v20, %v526_v21 }
 0x252   : > { %538 = vst.msk [vmem:[%s217_s9 + $0x18] sm:$0xff] %vm473_vm1, %v534_v22 }
 0x253 PF: > { %s14_s15 = sadd.s32 1, %s756_s15  }
 0x254   : > { %p11_p4 = scmp.ge.s32.totalorder %s14_s15, 4  }
 0x256   :  { %13 = sbr.rel (!%p11_p4) target bundleno = 1 (0x1), region = 69 }

// kernel: hit_forward.31
= control target key start
LH: loop header
LB: loop body
LE: loop exit
PB: predicated region body
PF: predicated region fallthrough
CT: control target
= control target key end

     0   :  { %s903_s18 = smov 0   ;;  %s1043_s0 = inlined_call_operand.vmem [shape: f32[2,288,16], index: 0, kind: input, shape index: {}]   ;;  %s1044_s1 = inlined_call_operand.vmem [shape: f32[32,288], index: 1, kind: input, shape index: {}]   ;;  %s1045_s2 = inlined_call_operand.vmem [shape: f32[32,1], index: 2, kind: input, shape index: {}]   ;;  %s1046_s3 = inlined_call_operand.vmem [shape: f32[2,32,1], index: 3, kind: input, shape index: {}]   ;;  %s1047_s4 = inlined_call_operand.vmem [shape: f32[2,32,1], index: 4, kind: input, shape index: {}]   ;;  %s1048_s5 = inlined_call_operand.vmem [shape: f32[2,32,16], index: 5, kind: output, shape index: {}]  }
   0x1 LB: > { %s717_s19 = sadd.s32 4294967295, %s870_s18   ;;  %p721_p0 = scmp.ge.s32.totalorder %s870_s18, 1  ;;  %s870_s18 = sphi %s903_s18, %s15_s18  }
   0x2   : > { %p207_p1 = scmp.lt.s32.totalorder %s870_s18, 3 }
   0x4   : > { %p208_p2 = pnand %p721_p0, %p207_p1 }
   0x5   : > { %p245_p3 = scmp.lt.s32.totalorder (!%p208_p2), %s717_s19, 1  ;;  %v266_v0 = vld [vmem:[%s1044_s1 + $0x8] sm:$0xff] (!%p208_p2)  ;;  %vm337_vm0 = vcmask (!%p208_p2), 261120   ;;  %v267_v1 = vld [vmem:[%s1044_s1 + $0x10] sm:$0xff] (!%p208_p2)  ;;  %v872_v2 = vmov (!%p208_p2), 0   ;;  %v313_v3 = vld [vmem:[%s1045_s2] sm:$0xff] (!%p208_p2) }
   0x6   : > { %211 = sbr.rel (%p208_p2) target bundleno = 599 (0x257), region = 40  ;;  %414 = vmatprep.mubr.f32.mxu0 (!%p208_p2), %v266_v0  ;;  %854 = vset.pattern.permute.xlu0 (!%p208_p2), %v872_v2  ;;  %v315_v4 = vld [vmem:[%s1045_s2 + $0x10] sm:$0xff] (!%p208_p2)  ;;  %v314_v5 = vld [vmem:[%s1045_s2 + $0x8] sm:$0xff] (!%p208_p2)  ;;  %v316_v6 = vld [vmem:[%s1045_s2 + $0x18] sm:$0xff] (!%p208_p2)  ;;  %vm520_vm1 = vcmask (!%p208_p2), 130048  }
   0x7   : > { %798 = vmatprep.mubr.msk.f32.mxu1 (!%p208_p2), %vm337_vm0, %v267_v1  ;;  %855 = vset.pattern.permute.xlu1 (!%p208_p2), %v872_v2  ;;  %v270_v50 = vld [vmem:[%s1044_s1 + $0x28] sm:$0xff] (!%p208_p2)  ;;  %v273_v51 = vld [vmem:[%s1044_s1 + $0x40] sm:$0xff] (!%p208_p2)  ;;  %v276_v58 = vld [vmem:[%s1044_s1 + $0x58] sm:$0xff] (!%p208_p2) }
   0x8   : > { %319 = vperm.xlu0 (!%p208_p2), %854, %v313_v3   ;;  %329 = vperm.xlu1 (!%p208_p2), %855, %v315_v4   ;;  %v265_v0 = vld [vmem:[%s1044_s1] sm:$0xff] (!%p208_p2)  ;;  %v268_v2 = vld [vmem:[%s1044_s1 + $0x18] sm:$0xff] (!%p208_p2)  ;;  %v271_v4 = vld [vmem:[%s1044_s1 + $0x30] sm:$0xff] (!%p208_p2) }
   0x9   : > { %v269_v1 = vld [vmem:[%s1044_s1 + $0x20] sm:$0xff] (!%p208_p2)  ;;  %v272_v3 = vld [vmem:[%s1044_s1 + $0x38] sm:$0xff] (!%p208_p2) }
   0xc   : > { %324 = vperm.xlu0 (!%p208_p2), %854, %v314_v5   ;;  %334 = vperm.xlu1 (!%p208_p2), %855, %v316_v6   ;;  %v275_v5 = vld [vmem:[%s1044_s1 + $0x50] sm:$0xff] (!%p208_p2)  ;;  %v274_v6 = vld [vmem:[%s1044_s1 + $0x48] sm:$0xff] (!%p208_p2) }
   0xd   : > { %s1050_s19 = smov (!%p245_p3, %s717_s19), 1 }
   0xe   : > { %s844_s24 = smul.u32 288, %s1050_s19  ;;  %s1012_s8 = sshll.u32 %s1050_s19, 5 }
   0xf   : > { %s254_s11 = scalar_lea.vmem %s1046_s3, %s1012_s8  ;;  %s1022_s14 = scalar_lea.vmem %s1047_s4, %s1012_s8 }
  0x10   : > { %s930_s6 = scalar_lea.vmem %s1043_s0, %s844_s24  ;;  %s264_s16 = scalar_lea.vmem %s1048_s5, %s1012_s8 }
  0x11   : > { %v293_v7 = vld [vmem:[%s930_s6 + $0x80] sm:$0xff]  ;;  %v294_v8 = vld [vmem:[%s930_s6 + $0x88] sm:$0xff]  ;;  %v295_v12 = vld [vmem:[%s930_s6 + $0x90] sm:$0xff] }
  0x12   : > { %v277_v9 = vld [vmem:[%s930_s6] sm:$0xff]  ;;  %v804_v10 = vpack.c.bf16 %v294_v8, %v293_v7  ;;  %v278_v11 = vld [vmem:[%s930_s6 + $0x8] sm:$0xff]  ;;  %v296_v13 = vld [vmem:[%s930_s6 + $0x98] sm:$0xff] }
  0x13   : > { %v806_v14 = vpack.c.bf16 %v278_v11, %v277_v9  ;;  %v808_v15 = vpack.c.bf16 %v296_v13, %v295_v12  ;;  %v279_v16 = vld [vmem:[%s930_s6 + $0x10] sm:$0xff]  ;;  %v280_v17 = vld [vmem:[%s930_s6 + $0x18] sm:$0xff]  ;;  %v297_v18 = vld [vmem:[%s930_s6 + $0xa0] sm:$0xff] }
  0x14   : > { %805 = vmatprep.subr.bf16.mxu0 %v804_v10  ;;  %v298_v19 = vld [vmem:[%s930_s6 + $0xa8] sm:$0xff]  ;;  %v810_v20 = vpack.c.bf16 %v280_v17, %v279_v16  ;;  %v281_v22 = vld [vmem:[%s930_s6 + $0x20] sm:$0xff]  ;;  %v299_v24 = vld [vmem:[%s930_s6 + $0xb0] sm:$0xff] }
  0x15   : > { %807 = vmatpush3.bf16.msra.mxu0 %v806_v14  ;;  %v812_v21 = vpack.c.bf16 %v298_v19, %v297_v18  ;;  %v282_v23 = vld [vmem:[%s930_s6 + $0x28] sm:$0xff]  ;;  %v300_v25 = vld [vmem:[%s930_s6 + $0xb8] sm:$0xff]  ;;  %v283_v28 = vld [vmem:[%s930_s6 + $0x30] sm:$0xff] }
  0x16   : > { %809 = vmatprep.subr.bf16.mxu0 %v808_v15  ;;  %v814_v26 = vpack.c.bf16 %v282_v23, %v281_v22  ;;  %v816_v27 = vpack.c.bf16 %v300_v25, %v299_v24  ;;  %v284_v29 = vld [vmem:[%s930_s6 + $0x38] sm:$0xff]  ;;  %v301_v30 = vld [vmem:[%s930_s6 + $0xc0] sm:$0xff]  ;;  %v302_v31 = vld [vmem:[%s930_s6 + $0xc8] sm:$0xff] }
  0x17   : > { %v309_v32 = vld [vmem:[%s930_s6 + $0x100] sm:$0xff]  ;;  %v310_v33 = vld [vmem:[%s930_s6 + $0x108] sm:$0xff]  ;;  %v311_v35 = vld [vmem:[%s930_s6 + $0x110] sm:$0xff]  ;;  %v818_v37 = vpack.c.bf16 %v284_v29, %v283_v28  ;;  %v820_v39 = vpack.c.bf16 %v302_v31, %v301_v30 }
  0x18   : > { %v836_v34 = vpack.c.bf16 %v310_v33, %v309_v32  ;;  %v312_v36 = vld [vmem:[%s930_s6 + $0x118] sm:$0xff]  ;;  %v285_v40 = vld [vmem:[%s930_s6 + $0x40] sm:$0xff]  ;;  %v286_v41 = vld [vmem:[%s930_s6 + $0x48] sm:$0xff] }
  0x19   : > { %811 = vmatpush3.bf16.msra.mxu0 %v810_v20  ;;  %v840_v38 = vpack.c.bf16 %v312_v36, %v311_v35  ;;  %v303_v42 = vld [vmem:[%s930_s6 + $0xd0] sm:$0xff]  ;;  %v304_v43 = vld [vmem:[%s930_s6 + $0xd8] sm:$0xff]  ;;  %v822_v44 = vpack.c.bf16 %v286_v41, %v285_v40  ;;  %v305_v48 = vld [vmem:[%s930_s6 + $0xe0] sm:$0xff] }
  0x1a   : > { %813 = vmatprep.subr.bf16.mxu0 %v812_v21  ;;  %837 = vmatprep.subr.bf16.mxu1 %v836_v34  ;;  %v824_v45 = vpack.c.bf16 %v304_v43, %v303_v42  ;;  %v287_v46 = vld [vmem:[%s930_s6 + $0x50] sm:$0xff]  ;;  %v288_v47 = vld [vmem:[%s930_s6 + $0x58] sm:$0xff]  ;;  %v306_v49 = vld [vmem:[%s930_s6 + $0xe8] sm:$0xff] }
  0x1b   : > { %839 = vmatpush3.bf16.msra.mxu1 %v836_v34  ;;  %v826_v52 = vpack.c.bf16 %v288_v47, %v287_v46  ;;  %v828_v53 = vpack.c.bf16 %v306_v49, %v305_v48  ;;  %v289_v54 = vld [vmem:[%s930_s6 + $0x60] sm:$0xff]  ;;  %v290_v55 = vld [vmem:[%s930_s6 + $0x68] sm:$0xff]  ;;  %v307_v56 = vld [vmem:[%s930_s6 + $0xf0] sm:$0xff] }
  0x1c   : > { %841 = vmatprep.subr.bf16.mxu1 %v840_v38  ;;  %v308_v57 = vld [vmem:[%s930_s6 + $0xf8] sm:$0xff]  ;;  %v830_v59 = vpack.c.bf16 %v290_v55, %v289_v54  ;;  %v291_v61 = vld [vmem:[%s930_s6 + $0x70] sm:$0xff]  ;;  %v603_v42 = vld [vmem:[%s1022_s14 + $0x8] sm:$0xff] }
  0x1d   : > { %815 = vmatpush3.bf16.msra.mxu0 %v814_v26  ;;  %v832_v60 = vpack.c.bf16 %v308_v57, %v307_v56  ;;  %v292_v62 = vld [vmem:[%s930_s6 + $0x78] sm:$0xff]  ;;  %v576_v40 = vld [vmem:[%s254_s11 + $0x10] sm:$0xff]  ;;  %v575_v43 = vld [vmem:[%s254_s11 + $0x8] sm:$0xff] }
  0x1e   : > { %817 = vmatprep.subr.bf16.mxu0 %v816_v27  ;;  %v834_v63 = vpack.c.bf16 %v292_v62, %v291_v61  ;;  %v577_v41 = vld [vmem:[%s254_s11 + $0x18] sm:$0xff] }
  0x1f   : > { %843 = vmatpush3.bf16.msra.mxu1 %v840_v38 }
  0x21   : > { %819 = vmatpush3.bf16.msra.mxu0 %v818_v37 }
  0x22   : > { %821 = vmatprep.subr.bf16.mxu0 %v820_v39  ;;  %799 = vmatmul.mubr.msk.f32.vlgmr.msra.gmra.mrb[0].mxu1 %vm337_vm0, %v270_v50  ;;  %v574_v39 = vld [vmem:[%s254_s11] sm:$0xff] }
  0x23   : > { %801 = vmatprep.mubr.msk.f32.mxu1 %vm337_vm0, %v273_v51 }
  0x25   : > { %823 = vmatpush3.bf16.msra.mxu0 %v822_v44  ;;  %v602_v44 = vld [vmem:[%s1022_s14] sm:$0xff] }
  0x26   : > { %825 = vmatprep.subr.bf16.mxu0 %v824_v45  ;;  %802 = vmatmul.mubr.msk.f32.gmra.mrb[2].mxu1 %vm337_vm0, %v276_v58 }
  0x29   : > { %827 = vmatpush3.bf16.msra.mxu0 %v826_v52 }
  0x2a   : > { %829 = vmatprep.subr.bf16.mxu0 %v828_v53 }
  0x2d   : > { %831 = vmatpush3.bf16.msra.mxu0 %v830_v59 }
  0x2e   : > { %833 = vmatprep.subr.bf16.mxu0 %v832_v60 }
  0x31   : > { %835 = vmatpush3.bf16.msra.mxu0 %v834_v63 }
  0x34   : > { %415 = vmatmul.mubr.f32.vlgmr.msra.gmra.mrb[0].mxu0 %v265_v0 }
  0x35   : > { %419 = vmatprep.mubr.f32.mxu0 %v269_v1  ;;  %v605_v1 = vld [vmem:[%s1022_s14 + $0x18] sm:$0xff] }
  0x38   : > { %420 = vmatmul.mubr.f32.gmra.mrb[2].mxu0 %v268_v2  ;;  %v604_v2 = vld [vmem:[%s1022_s14 + $0x10] sm:$0xff] }
  0x39   : > { %424 = vmatprep.mubr.f32.mxu0 %v272_v3 }
  0x3c   : > { %425 = vmatmul.mubr.f32.gmra.mrb[4].mxu0 %v271_v4 }
  0x3d   : > { %429 = vmatprep.mubr.f32.mxu0 %v275_v5 }
  0x40   : > { %430 = vmatmul.mubr.f32.gmra.mrb[6].mxu0 %v274_v6 }
  0x87   : > { %v320_v11 = vpop.permute.xlu0 %319  ;;  %v330_v24 = vpop.permute.xlu1 %329 }
  0x8b   : > { %v325_v18 = vpop.permute.xlu0 %324  ;;  %v335_v34 = vpop.permute.xlu1 %334 }
  0xf5   : > { %v800_v7 = vpop.f32.mrb[0].mxu1 }
  0xf6   : > { %v501_v8 = vpop.f32.mrb[1].mxu1 }
  0xf9   : > { %v803_v9 = vpop.f32.mrb[2].mxu1 }
  0xfa   : > { %v511_v10 = vpop.f32.mrb[3].mxu1 }
 0x107   : > { %v770_v12 = vpop.f32.mrb[0].mxu0 }
 0x108   : > { %v771_v13 = vpop.f32.mrb[1].mxu0 }
 0x109   : > { %v772_v14 = vadd.f32 %v771_v13, %v770_v12 }
 0x10b   : > { %v417_v15 = vadd.f32 %v772_v14, %v320_v11  ;;  %v773_v16 = vpop.f32.mrb[2].mxu0 }
 0x10c   : > { %v774_v17 = vpop.f32.mrb[3].mxu0 }
 0x10d   : > { %v775_v19 = vadd.f32 %v774_v17, %v773_v16  ;;  %v502_v20 = vadd.f32 %v501_v8, %v417_v15 }
 0x10f   : > { %v422_v21 = vadd.f32 %v775_v19, %v325_v18  ;;  %v776_v22 = vpop.f32.mrb[4].mxu0  ;;  %v521_v23 = vsel %vm520_vm1, %v502_v20, 0.0 }
 0x110   : > { %v777_v25 = vpop.f32.mrb[5].mxu0  ;;  %522 = vadd.xlane.f32.xlu0 %v521_v23 }
 0x111   : > { %v778_v26 = vadd.f32 %v777_v25, %v776_v22  ;;  %v507_v27 = vadd.f32 %v800_v7, %v422_v21 }
 0x113   : > { %v779_v28 = vpop.f32.mrb[6].mxu0  ;;  %v427_v29 = vadd.f32 %v778_v26, %v330_v24  ;;  %v524_v30 = vsel %vm520_vm1, %v507_v27, 0.0 }
 0x114   : > { %v780_v31 = vpop.f32.mrb[7].mxu0  ;;  %525 = vadd.xlane.f32.xlu1 %v524_v30 }
 0x115   : > { %v512_v32 = vadd.f32 %v511_v10, %v427_v29  ;;  %v781_v33 = vadd.f32 %v780_v31, %v779_v28 }
 0x117   : > { %v432_v35 = vadd.f32 %v781_v33, %v335_v34  ;;  %v527_v36 = vsel %vm520_vm1, %v512_v32, 0.0 }
 0x118   : > { %528 = vadd.xlane.f32.xlu0 %v527_v36 }
 0x119   : > { %v517_v37 = vadd.f32 %v803_v9, %v432_v35 }
 0x11b   : > { %v530_v38 = vsel %vm520_vm1, %v517_v37, 0.0 }
 0x11c   : > { %531 = vadd.xlane.f32.xlu0 %v530_v38 }
 0x125   : > { %580 = vperm.xlu1 %855, %v574_v39  }
 0x129   : > { %590 = vperm.xlu1 %855, %v576_v40  }
 0x12d   : > { %595 = vperm.xlu1 %855, %v577_v41  }
 0x131   : > { %613 = vperm.xlu1 %855, %v603_v42  }
 0x132   : > { %585 = vperm.xlu0 %854, %v575_v43  }
 0x136   : > { %608 = vperm.xlu0 %854, %v602_v44  }
 0x19d   : > { %v523_v45 = vpop.xlane.xlu0 %522 }
 0x19e   : > { %v534_v46 = vmul.f32 0.0625, %v523_v45 }
 0x1a0   : > { %v538_v47 = vsub.f32 %v502_v20, %v534_v46 }
 0x1a1   : > { %v526_v48 = vpop.xlane.xlu1 %525 }
 0x1a2   : > { %v535_v49 = vmul.f32 0.0625, %v526_v48  ;;  %v542_v50 = vmul.f32 %v538_v47, %v538_v47 }
 0x1a4   : > { %v539_v51 = vsub.f32 %v507_v27, %v535_v49  ;;  %v546_v52 = vsel %vm520_vm1, %v542_v50, 0.0 }
 0x1a5   : > { %547 = vadd.xlane.f32.xlu1 %v546_v52  ;;  %v529_v53 = vpop.xlane.xlu0 %528  ;;  %v581_v3 = vpop.permute.xlu1 %580 }
 0x1a6   : > { %v536_v54 = vmul.f32 0.0625, %v529_v53  ;;  %v543_v55 = vmul.f32 %v539_v51, %v539_v51 }
 0x1a8   : > { %v540_v56 = vsub.f32 %v512_v32, %v536_v54  ;;  %v549_v57 = vsel %vm520_vm1, %v543_v55, 0.0 }
 0x1a9   : > { %550 = vadd.xlane.f32.xlu0 %v549_v57  ;;  %v532_v58 = vpop.xlane.xlu0 %531  ;;  %v591_v4 = vpop.permute.xlu1 %590 }
 0x1aa   : > { %v537_v59 = vmul.f32 0.0625, %v532_v58  ;;  %v544_v60 = vmul.f32 %v540_v56, %v540_v56 }
 0x1ac   : > { %v541_v61 = vsub.f32 %v517_v37, %v537_v59  ;;  %v552_v62 = vsel %vm520_vm1, %v544_v60, 0.0 }
 0x1ad   : > { %553 = vadd.xlane.f32.xlu1 %v552_v62  ;;  %v596_v5 = vpop.permute.xlu1 %595 }
 0x1ae   : > { %v545_v63 = vmul.f32 %v541_v61, %v541_v61 }
 0x1b0   : > { %v555_v0 = vsel %vm520_vm1, %v545_v63, 0.0 }
 0x1b1   : > { %556 = vadd.xlane.f32.xlu0 %v555_v0  ;;  %v586_v6 = vpop.permute.xlu0 %585  ;;  %v614_v7 = vpop.permute.xlu1 %613 }
 0x1b5   : > { %v609_v8 = vpop.permute.xlu0 %608 }
 0x1be   : > { %623 = vperm.xlu1 %855, %v605_v1  }
 0x1c7   : > { %618 = vperm.xlu0 %854, %v604_v2  }
 0x232   : > { %v548_v9 = vpop.xlane.xlu1 %547 }
 0x233   : > { %v558_v10 = vmul.f32 0.0625, %v548_v9 }
 0x235   : > { %v562_v11 = vadd.f32 1e-05, %v558_v10 }
 0x236   : > { %v551_v12 = vpop.xlane.xlu0 %550 }
 0x237   : > { %856 = vrsqrt.f32 %v562_v11  ;;  %v559_v13 = vmul.f32 0.0625, %v551_v12 }
 0x239   : > { %v563_v14 = vadd.f32 1e-05, %v559_v13 }
 0x23a   : > { %v554_v15 = vpop.xlane.xlu1 %553 }
 0x23b   : > { %858 = vrsqrt.f32 %v563_v14  ;;  %v560_v16 = vmul.f32 0.0625, %v554_v15 }
 0x23d   : > { %v564_v17 = vadd.f32 1e-05, %v560_v16 }
 0x23e   : > { %v557_v18 = vpop.xlane.xlu0 %556  ;;  %v624_v40 = vpop.permute.xlu1 %623 }
 0x23f   : > { %860 = vrsqrt.f32 %v564_v17  ;;  %v561_v19 = vmul.f32 0.0625, %v557_v18 }
 0x241   : > { %v857_v20 = vpop.eup %856  ;;  %v565_v21 = vadd.f32 1e-05, %v561_v19 }
 0x242   : > { %v570_v22 = vmul.f32 %v857_v20, %v538_v47 }
 0x243   : > { %862 = vrsqrt.f32 %v565_v21 }
 0x244   : > { %v598_v23 = vmul.f32 %v581_v3, %v570_v22 }
 0x245   : > { %v859_v24 = vpop.eup %858 }
 0x246   : > { %v626_v25 = vadd.f32 %v609_v8, %v598_v23  ;;  %v571_v26 = vmul.f32 %v859_v24, %v539_v51  ;;  %v619_v35 = vpop.permute.xlu0 %618 }
 0x248   : > { %v630_v27 = vmax.f32 %v626_v25, 0.0  ;;  %v599_v28 = vmul.f32 %v586_v6, %v571_v26 }
 0x249   : > { %v861_v29 = vpop.eup %860 }
 0x24a   : > { %v627_v30 = vadd.f32 %v614_v7, %v599_v28  ;;  %v572_v31 = vmul.f32 %v861_v29, %v540_v56  ;;  %634 = vst.msk [vmem:[%s264_s16] sm:$0xff] %vm520_vm1, %v630_v27 }
 0x24c   : > { %v631_v32 = vmax.f32 %v627_v30, 0.0  ;;  %v600_v33 = vmul.f32 %v591_v4, %v572_v31 }
 0x24d   : > { %v863_v34 = vpop.eup %862 }
 0x24e   : > { %v573_v36 = vmul.f32 %v863_v34, %v541_v61  ;;  %635 = vst.msk [vmem:[%s264_s16 + $0x8] sm:$0xff] %vm520_vm1, %v631_v32  ;;  %v628_v37 = vadd.f32 %v619_v35, %v600_v33 }
 0x250   : > { %v601_v38 = vmul.f32 %v596_v5, %v573_v36  ;;  %v632_v39 = vmax.f32 %v628_v37, 0.0 }
 0x252   : > { %v629_v41 = vadd.f32 %v624_v40, %v601_v38  ;;  %636 = vst.msk [vmem:[%s264_s16 + $0x10] sm:$0xff] %vm520_vm1, %v632_v39 }
 0x254   : > { %v633_v42 = vmax.f32 %v629_v41, 0.0 }
 0x256   : > { %637 = vst.msk [vmem:[%s264_s16 + $0x18] sm:$0xff] %vm520_vm1, %v633_v42 }
 0x257 PF: > { %s15_s18 = sadd.s32 1, %s870_s18  }
 0x258   : > { %p12_p4 = scmp.ge.s32.totalorder %s15_s18, 4  }
 0x25a   :  { %14 = sbr.rel (!%p12_p4) target bundleno = 1 (0x1), region = 76 }

// kernel: hit_forward.32
= control target key start
LH: loop header
LB: loop body
LE: loop exit
PB: predicated region body
PF: predicated region fallthrough
CT: control target
= control target key end

     0   :  { %s974_s21 = smov 0   ;;  %s1118_s0 = inlined_call_operand.vmem [shape: f32[2,288,16], index: 0, kind: input, shape index: {}]   ;;  %s1119_s1 = inlined_call_operand.vmem [shape: f32[32,288], index: 1, kind: input, shape index: {}]   ;;  %s1120_s2 = inlined_call_operand.vmem [shape: f32[32,1], index: 2, kind: input, shape index: {}]   ;;  %s1121_s3 = inlined_call_operand.vmem [shape: f32[2,32,1], index: 3, kind: input, shape index: {}]   ;;  %s1122_s4 = inlined_call_operand.vmem [shape: f32[2,32,1], index: 4, kind: input, shape index: {}]   ;;  %s1123_s5 = inlined_call_operand.vmem [shape: f32[2,32,16], index: 5, kind: input, shape index: {}]   ;;  %s1124_s6 = inlined_call_operand.vmem [shape: f32[2,32,16], index: 6, kind: output, shape index: {}]  }
   0x1 LB: > { %s780_s22 = sadd.s32 4294967295, %s936_s21   ;;  %p784_p0 = scmp.ge.s32.totalorder %s936_s21, 1  ;;  %s936_s21 = sphi %s974_s21, %s16_s21  }
   0x2   : > { %p242_p1 = scmp.lt.s32.totalorder %s936_s21, 3 }
   0x4   : > { %p243_p2 = pnand %p784_p0, %p242_p1 }
   0x5   : > { %p287_p3 = scmp.lt.s32.totalorder (!%p243_p2), %s780_s22, 1  ;;  %v313_v0 = vld [vmem:[%s1119_s1 + $0x8] sm:$0xff] (!%p243_p2)  ;;  %vm384_vm0 = vcmask (!%p243_p2), 261120   ;;  %v314_v1 = vld [vmem:[%s1119_s1 + $0x10] sm:$0xff] (!%p243_p2)  ;;  %v938_v2 = vmov (!%p243_p2), 0   ;;  %v360_v3 = vld [vmem:[%s1120_s2] sm:$0xff] (!%p243_p2) }
   0x6   : > { %246 = sbr.rel (%p243_p2) target bundleno = 599 (0x257), region = 44  ;;  %461 = vmatprep.mubr.f32.mxu0 (!%p243_p2), %v313_v0  ;;  %920 = vset.pattern.permute.xlu0 (!%p243_p2), %v938_v2  ;;  %v362_v4 = vld [vmem:[%s1120_s2 + $0x10] sm:$0xff] (!%p243_p2)  ;;  %v361_v5 = vld [vmem:[%s1120_s2 + $0x8] sm:$0xff] (!%p243_p2)  ;;  %v363_v6 = vld [vmem:[%s1120_s2 + $0x18] sm:$0xff] (!%p243_p2)  ;;  %vm567_vm1 = vcmask (!%p243_p2), 130048  }
   0x7   : > { %864 = vmatprep.mubr.msk.f32.mxu1 (!%p243_p2), %vm384_vm0, %v314_v1  ;;  %921 = vset.pattern.permute.xlu1 (!%p243_p2), %v938_v2  ;;  %v317_v50 = vld [vmem:[%s1119_s1 + $0x28] sm:$0xff] (!%p243_p2)  ;;  %v320_v51 = vld [vmem:[%s1119_s1 + $0x40] sm:$0xff] (!%p243_p2)  ;;  %v323_v58 = vld [vmem:[%s1119_s1 + $0x58] sm:$0xff] (!%p243_p2) }
   0x8   : > { %366 = vperm.xlu0 (!%p243_p2), %920, %v360_v3   ;;  %376 = vperm.xlu1 (!%p243_p2), %921, %v362_v4   ;;  %v312_v0 = vld [vmem:[%s1119_s1] sm:$0xff] (!%p243_p2)  ;;  %v315_v2 = vld [vmem:[%s1119_s1 + $0x18] sm:$0xff] (!%p243_p2)  ;;  %v318_v4 = vld [vmem:[%s1119_s1 + $0x30] sm:$0xff] (!%p243_p2) }
   0x9   : > { %v316_v1 = vld [vmem:[%s1119_s1 + $0x20] sm:$0xff] (!%p243_p2)  ;;  %v319_v3 = vld [vmem:[%s1119_s1 + $0x38] sm:$0xff] (!%p243_p2) }
   0xc   : > { %371 = vperm.xlu0 (!%p243_p2), %920, %v361_v5   ;;  %381 = vperm.xlu1 (!%p243_p2), %921, %v363_v6   ;;  %v322_v5 = vld [vmem:[%s1119_s1 + $0x50] sm:$0xff] (!%p243_p2)  ;;  %v321_v6 = vld [vmem:[%s1119_s1 + $0x48] sm:$0xff] (!%p243_p2) }
   0xd   : > { %s1126_s22 = smov (!%p287_p3, %s780_s22), 1 }
   0xe   : > { %s910_s27 = smul.u32 288, %s1126_s22  ;;  %s1083_s13 = sshll.u32 %s1126_s22, 5 }
   0xf   : > { %s296_s16 = scalar_lea.vmem %s1121_s3, %s1083_s13  ;;  %s1093_s19 = scalar_lea.vmem %s1122_s4, %s1083_s13 }
  0x10   : > { %s1001_s10 = scalar_lea.vmem %s1118_s0, %s910_s27  ;;  %s306_s23 = scalar_lea.vmem %s1123_s5, %s1083_s13 }
  0x11   : > { %v340_v7 = vld [vmem:[%s1001_s10 + $0x80] sm:$0xff]  ;;  %v341_v8 = vld [vmem:[%s1001_s10 + $0x88] sm:$0xff]  ;;  %v342_v12 = vld [vmem:[%s1001_s10 + $0x90] sm:$0xff]  ;;  %s311_s26 = scalar_lea.vmem %s1124_s6, %s1083_s13 }
  0x12   : > { %v324_v9 = vld [vmem:[%s1001_s10] sm:$0xff]  ;;  %v870_v10 = vpack.c.bf16 %v341_v8, %v340_v7  ;;  %v325_v11 = vld [vmem:[%s1001_s10 + $0x8] sm:$0xff]  ;;  %v343_v13 = vld [vmem:[%s1001_s10 + $0x98] sm:$0xff] }
  0x13   : > { %v872_v14 = vpack.c.bf16 %v325_v11, %v324_v9  ;;  %v874_v15 = vpack.c.bf16 %v343_v13, %v342_v12  ;;  %v326_v16 = vld [vmem:[%s1001_s10 + $0x10] sm:$0xff]  ;;  %v327_v17 = vld [vmem:[%s1001_s10 + $0x18] sm:$0xff]  ;;  %v344_v18 = vld [vmem:[%s1001_s10 + $0xa0] sm:$0xff] }
  0x14   : > { %871 = vmatprep.subr.bf16.mxu0 %v870_v10  ;;  %v345_v19 = vld [vmem:[%s1001_s10 + $0xa8] sm:$0xff]  ;;  %v876_v20 = vpack.c.bf16 %v327_v17, %v326_v16  ;;  %v328_v22 = vld [vmem:[%s1001_s10 + $0x20] sm:$0xff]  ;;  %v346_v24 = vld [vmem:[%s1001_s10 + $0xb0] sm:$0xff] }
  0x15   : > { %873 = vmatpush3.bf16.msra.mxu0 %v872_v14  ;;  %v878_v21 = vpack.c.bf16 %v345_v19, %v344_v18  ;;  %v329_v23 = vld [vmem:[%s1001_s10 + $0x28] sm:$0xff]  ;;  %v347_v25 = vld [vmem:[%s1001_s10 + $0xb8] sm:$0xff]  ;;  %v330_v28 = vld [vmem:[%s1001_s10 + $0x30] sm:$0xff] }
  0x16   : > { %875 = vmatprep.subr.bf16.mxu0 %v874_v15  ;;  %v880_v26 = vpack.c.bf16 %v329_v23, %v328_v22  ;;  %v882_v27 = vpack.c.bf16 %v347_v25, %v346_v24  ;;  %v331_v29 = vld [vmem:[%s1001_s10 + $0x38] sm:$0xff]  ;;  %v348_v30 = vld [vmem:[%s1001_s10 + $0xc0] sm:$0xff]  ;;  %v349_v31 = vld [vmem:[%s1001_s10 + $0xc8] sm:$0xff] }
  0x17   : > { %v356_v32 = vld [vmem:[%s1001_s10 + $0x100] sm:$0xff]  ;;  %v357_v33 = vld [vmem:[%s1001_s10 + $0x108] sm:$0xff]  ;;  %v358_v35 = vld [vmem:[%s1001_s10 + $0x110] sm:$0xff]  ;;  %v884_v37 = vpack.c.bf16 %v331_v29, %v330_v28  ;;  %v886_v39 = vpack.c.bf16 %v349_v31, %v348_v30 }
  0x18   : > { %v902_v34 = vpack.c.bf16 %v357_v33, %v356_v32  ;;  %v359_v36 = vld [vmem:[%s1001_s10 + $0x118] sm:$0xff]  ;;  %v332_v40 = vld [vmem:[%s1001_s10 + $0x40] sm:$0xff]  ;;  %v333_v41 = vld [vmem:[%s1001_s10 + $0x48] sm:$0xff] }
  0x19   : > { %877 = vmatpush3.bf16.msra.mxu0 %v876_v20  ;;  %v906_v38 = vpack.c.bf16 %v359_v36, %v358_v35  ;;  %v350_v42 = vld [vmem:[%s1001_s10 + $0xd0] sm:$0xff]  ;;  %v351_v43 = vld [vmem:[%s1001_s10 + $0xd8] sm:$0xff]  ;;  %v888_v44 = vpack.c.bf16 %v333_v41, %v332_v40  ;;  %v352_v48 = vld [vmem:[%s1001_s10 + $0xe0] sm:$0xff] }
  0x1a   : > { %879 = vmatprep.subr.bf16.mxu0 %v878_v21  ;;  %903 = vmatprep.subr.bf16.mxu1 %v902_v34  ;;  %v890_v45 = vpack.c.bf16 %v351_v43, %v350_v42  ;;  %v334_v46 = vld [vmem:[%s1001_s10 + $0x50] sm:$0xff]  ;;  %v335_v47 = vld [vmem:[%s1001_s10 + $0x58] sm:$0xff]  ;;  %v353_v49 = vld [vmem:[%s1001_s10 + $0xe8] sm:$0xff] }
  0x1b   : > { %905 = vmatpush3.bf16.msra.mxu1 %v902_v34  ;;  %v892_v52 = vpack.c.bf16 %v335_v47, %v334_v46  ;;  %v894_v53 = vpack.c.bf16 %v353_v49, %v352_v48  ;;  %v336_v54 = vld [vmem:[%s1001_s10 + $0x60] sm:$0xff]  ;;  %v337_v55 = vld [vmem:[%s1001_s10 + $0x68] sm:$0xff]  ;;  %v354_v56 = vld [vmem:[%s1001_s10 + $0xf0] sm:$0xff] }
  0x1c   : > { %907 = vmatprep.subr.bf16.mxu1 %v906_v38  ;;  %v355_v57 = vld [vmem:[%s1001_s10 + $0xf8] sm:$0xff]  ;;  %v896_v59 = vpack.c.bf16 %v337_v55, %v336_v54  ;;  %v338_v61 = vld [vmem:[%s1001_s10 + $0x70] sm:$0xff]  ;;  %v650_v42 = vld [vmem:[%s1093_s19 + $0x8] sm:$0xff] }
  0x1d   : > { %881 = vmatpush3.bf16.msra.mxu0 %v880_v26  ;;  %v898_v60 = vpack.c.bf16 %v355_v57, %v354_v56  ;;  %v339_v62 = vld [vmem:[%s1001_s10 + $0x78] sm:$0xff]  ;;  %v623_v40 = vld [vmem:[%s296_s16 + $0x10] sm:$0xff]  ;;  %v622_v43 = vld [vmem:[%s296_s16 + $0x8] sm:$0xff] }
  0x1e   : > { %883 = vmatprep.subr.bf16.mxu0 %v882_v27  ;;  %v900_v63 = vpack.c.bf16 %v339_v62, %v338_v61  ;;  %v624_v41 = vld [vmem:[%s296_s16 + $0x18] sm:$0xff] }
  0x1f   : > { %909 = vmatpush3.bf16.msra.mxu1 %v906_v38 }
  0x21   : > { %885 = vmatpush3.bf16.msra.mxu0 %v884_v37 }
  0x22   : > { %887 = vmatprep.subr.bf16.mxu0 %v886_v39  ;;  %865 = vmatmul.mubr.msk.f32.vlgmr.msra.gmra.mrb[0].mxu1 %vm384_vm0, %v317_v50  ;;  %v621_v39 = vld [vmem:[%s296_s16] sm:$0xff] }
  0x23   : > { %867 = vmatprep.mubr.msk.f32.mxu1 %vm384_vm0, %v320_v51 }
  0x25   : > { %889 = vmatpush3.bf16.msra.mxu0 %v888_v44  ;;  %v649_v44 = vld [vmem:[%s1093_s19] sm:$0xff] }
  0x26   : > { %891 = vmatprep.subr.bf16.mxu0 %v890_v45  ;;  %868 = vmatmul.mubr.msk.f32.gmra.mrb[2].mxu1 %vm384_vm0, %v323_v58 }
  0x29   : > { %893 = vmatpush3.bf16.msra.mxu0 %v892_v52 }
  0x2a   : > { %895 = vmatprep.subr.bf16.mxu0 %v894_v53 }
  0x2d   : > { %897 = vmatpush3.bf16.msra.mxu0 %v896_v59 }
  0x2e   : > { %899 = vmatprep.subr.bf16.mxu0 %v898_v60 }
  0x31   : > { %901 = vmatpush3.bf16.msra.mxu0 %v900_v63 }
  0x34   : > { %462 = vmatmul.mubr.f32.vlgmr.msra.gmra.mrb[0].mxu0 %v312_v0 }
  0x35   : > { %466 = vmatprep.mubr.f32.mxu0 %v316_v1  ;;  %v652_v1 = vld [vmem:[%s1093_s19 + $0x18] sm:$0xff] }
  0x38   : > { %467 = vmatmul.mubr.f32.gmra.mrb[2].mxu0 %v315_v2  ;;  %v651_v2 = vld [vmem:[%s1093_s19 + $0x10] sm:$0xff] }
  0x39   : > { %471 = vmatprep.mubr.f32.mxu0 %v319_v3 }
  0x3c   : > { %472 = vmatmul.mubr.f32.gmra.mrb[4].mxu0 %v318_v4 }
  0x3d   : > { %476 = vmatprep.mubr.f32.mxu0 %v322_v5 }
  0x40   : > { %477 = vmatmul.mubr.f32.gmra.mrb[6].mxu0 %v321_v6 }
  0x87   : > { %v367_v11 = vpop.permute.xlu0 %366  ;;  %v377_v24 = vpop.permute.xlu1 %376 }
  0x8b   : > { %v372_v18 = vpop.permute.xlu0 %371  ;;  %v382_v34 = vpop.permute.xlu1 %381 }
  0xf5   : > { %v866_v7 = vpop.f32.mrb[0].mxu1 }
  0xf6   : > { %v548_v8 = vpop.f32.mrb[1].mxu1 }
  0xf9   : > { %v869_v9 = vpop.f32.mrb[2].mxu1 }
  0xfa   : > { %v558_v10 = vpop.f32.mrb[3].mxu1 }
 0x107   : > { %v836_v12 = vpop.f32.mrb[0].mxu0 }
 0x108   : > { %v837_v13 = vpop.f32.mrb[1].mxu0 }
 0x109   : > { %v838_v14 = vadd.f32 %v837_v13, %v836_v12 }
 0x10b   : > { %v464_v15 = vadd.f32 %v838_v14, %v367_v11  ;;  %v839_v16 = vpop.f32.mrb[2].mxu0 }
 0x10c   : > { %v840_v17 = vpop.f32.mrb[3].mxu0 }
 0x10d   : > { %v841_v19 = vadd.f32 %v840_v17, %v839_v16  ;;  %v549_v20 = vadd.f32 %v548_v8, %v464_v15 }
 0x10f   : > { %v469_v21 = vadd.f32 %v841_v19, %v372_v18  ;;  %v842_v22 = vpop.f32.mrb[4].mxu0  ;;  %v568_v23 = vsel %vm567_vm1, %v549_v20, 0.0 }
 0x110   : > { %v843_v25 = vpop.f32.mrb[5].mxu0  ;;  %569 = vadd.xlane.f32.xlu0 %v568_v23 }
 0x111   : > { %v844_v26 = vadd.f32 %v843_v25, %v842_v22  ;;  %v554_v27 = vadd.f32 %v866_v7, %v469_v21  ;;  %v677_v25 = vld [vmem:[%s306_s23] sm:$0xff] }
 0x113   : > { %v845_v28 = vpop.f32.mrb[6].mxu0  ;;  %v474_v29 = vadd.f32 %v844_v26, %v377_v24  ;;  %v571_v30 = vsel %vm567_vm1, %v554_v27, 0.0 }
 0x114   : > { %v846_v31 = vpop.f32.mrb[7].mxu0  ;;  %572 = vadd.xlane.f32.xlu1 %v571_v30 }
 0x115   : > { %v559_v32 = vadd.f32 %v558_v10, %v474_v29  ;;  %v847_v33 = vadd.f32 %v846_v31, %v845_v28  ;;  %v678_v31 = vld [vmem:[%s306_s23 + $0x8] sm:$0xff] }
 0x117   : > { %v479_v35 = vadd.f32 %v847_v33, %v382_v34  ;;  %v574_v36 = vsel %vm567_vm1, %v559_v32, 0.0 }
 0x118   : > { %575 = vadd.xlane.f32.xlu0 %v574_v36 }
 0x119   : > { %v564_v37 = vadd.f32 %v869_v9, %v479_v35 }
 0x11b   : > { %v577_v38 = vsel %vm567_vm1, %v564_v37, 0.0 }
 0x11c   : > { %578 = vadd.xlane.f32.xlu0 %v577_v38 }
 0x125   : > { %627 = vperm.xlu1 %921, %v621_v39  }
 0x129   : > { %637 = vperm.xlu1 %921, %v623_v40  }
 0x12d   : > { %642 = vperm.xlu1 %921, %v624_v41  }
 0x131   : > { %660 = vperm.xlu1 %921, %v650_v42  }
 0x132   : > { %632 = vperm.xlu0 %920, %v622_v43  }
 0x136   : > { %655 = vperm.xlu0 %920, %v649_v44   ;;  %v680_v44 = vld [vmem:[%s306_s23 + $0x18] sm:$0xff] }
 0x19d   : > { %v570_v45 = vpop.xlane.xlu0 %569 }
 0x19e   : > { %v581_v46 = vmul.f32 0.0625, %v570_v45 }
 0x1a0   : > { %v585_v47 = vsub.f32 %v549_v20, %v581_v46 }
 0x1a1   : > { %v573_v48 = vpop.xlane.xlu1 %572 }
 0x1a2   : > { %v582_v49 = vmul.f32 0.0625, %v573_v48  ;;  %v589_v50 = vmul.f32 %v585_v47, %v585_v47 }
 0x1a4   : > { %v586_v51 = vsub.f32 %v554_v27, %v582_v49  ;;  %v593_v52 = vsel %vm567_vm1, %v589_v50, 0.0 }
 0x1a5   : > { %594 = vadd.xlane.f32.xlu1 %v593_v52  ;;  %v576_v53 = vpop.xlane.xlu0 %575  ;;  %v628_v3 = vpop.permute.xlu1 %627 }
 0x1a6   : > { %v583_v54 = vmul.f32 0.0625, %v576_v53  ;;  %v590_v55 = vmul.f32 %v586_v51, %v586_v51 }
 0x1a8   : > { %v587_v56 = vsub.f32 %v559_v32, %v583_v54  ;;  %v596_v57 = vsel %vm567_vm1, %v590_v55, 0.0 }
 0x1a9   : > { %597 = vadd.xlane.f32.xlu0 %v596_v57  ;;  %v579_v58 = vpop.xlane.xlu0 %578  ;;  %v638_v4 = vpop.permute.xlu1 %637 }
 0x1aa   : > { %v584_v59 = vmul.f32 0.0625, %v579_v58  ;;  %v591_v60 = vmul.f32 %v587_v56, %v587_v56 }
 0x1ac   : > { %v588_v61 = vsub.f32 %v564_v37, %v584_v59  ;;  %v599_v62 = vsel %vm567_vm1, %v591_v60, 0.0  ;;  %v679_v37 = vld [vmem:[%s306_s23 + $0x10] sm:$0xff] }
 0x1ad   : > { %600 = vadd.xlane.f32.xlu1 %v599_v62  ;;  %v643_v5 = vpop.permute.xlu1 %642 }
 0x1ae   : > { %v592_v63 = vmul.f32 %v588_v61, %v588_v61 }
 0x1b0   : > { %v602_v0 = vsel %vm567_vm1, %v592_v63, 0.0 }
 0x1b1   : > { %603 = vadd.xlane.f32.xlu0 %v602_v0  ;;  %v633_v6 = vpop.permute.xlu0 %632  ;;  %v661_v7 = vpop.permute.xlu1 %660 }
 0x1b5   : > { %v656_v8 = vpop.permute.xlu0 %655 }
 0x1be   : > { %670 = vperm.xlu1 %921, %v652_v1  }
 0x1c7   : > { %665 = vperm.xlu0 %920, %v651_v2  }
 0x232   : > { %v595_v9 = vpop.xlane.xlu1 %594 }
 0x233   : > { %v605_v10 = vmul.f32 0.0625, %v595_v9 }
 0x235   : > { %v609_v11 = vadd.f32 1e-05, %v605_v10 }
 0x236   : > { %v598_v12 = vpop.xlane.xlu0 %597 }
 0x237   : > { %922 = vrsqrt.f32 %v609_v11  ;;  %v606_v13 = vmul.f32 0.0625, %v598_v12 }
 0x239   : > { %v610_v14 = vadd.f32 1e-05, %v606_v13 }
 0x23a   : > { %v601_v15 = vpop.xlane.xlu1 %600 }
 0x23b   : > { %924 = vrsqrt.f32 %v610_v14  ;;  %v607_v16 = vmul.f32 0.0625, %v601_v15 }
 0x23d   : > { %v611_v17 = vadd.f32 1e-05, %v607_v16 }
 0x23e   : > { %v604_v18 = vpop.xlane.xlu0 %603  ;;  %v671_v43 = vpop.permute.xlu1 %670 }
 0x23f   : > { %926 = vrsqrt.f32 %v611_v17  ;;  %v608_v19 = vmul.f32 0.0625, %v604_v18 }
 0x241   : > { %v923_v20 = vpop.eup %922  ;;  %v612_v21 = vadd.f32 1e-05, %v608_v19 }
 0x242   : > { %v617_v22 = vmul.f32 %v923_v20, %v585_v47 }
 0x243   : > { %928 = vrsqrt.f32 %v612_v21 }
 0x244   : > { %v645_v23 = vmul.f32 %v628_v3, %v617_v22 }
 0x245   : > { %v925_v24 = vpop.eup %924 }
 0x246   : > { %v618_v26 = vmul.f32 %v925_v24, %v586_v51  ;;  %v673_v27 = vadd.f32 %v656_v8, %v645_v23  ;;  %v666_v38 = vpop.permute.xlu0 %665 }
 0x248   : > { %v646_v28 = vmul.f32 %v633_v6, %v618_v26  ;;  %v681_v29 = vadd.f32 %v677_v25, %v673_v27 }
 0x249   : > { %v927_v30 = vpop.eup %926 }
 0x24a   : > { %v619_v32 = vmul.f32 %v927_v30, %v587_v56  ;;  %v674_v33 = vadd.f32 %v661_v7, %v646_v28  ;;  %685 = vst.msk [vmem:[%s311_s26] sm:$0xff] %vm567_vm1, %v681_v29 }
 0x24c   : > { %v647_v34 = vmul.f32 %v638_v4, %v619_v32  ;;  %v682_v35 = vadd.f32 %v678_v31, %v674_v33 }
 0x24d   : > { %v929_v36 = vpop.eup %928 }
 0x24e   : > { %v620_v39 = vmul.f32 %v929_v36, %v588_v61  ;;  %686 = vst.msk [vmem:[%s311_s26 + $0x8] sm:$0xff] %vm567_vm1, %v682_v35  ;;  %v675_v40 = vadd.f32 %v666_v38, %v647_v34 }
 0x250   : > { %v648_v41 = vmul.f32 %v643_v5, %v620_v39  ;;  %v683_v42 = vadd.f32 %v679_v37, %v675_v40 }
 0x252   : > { %v676_v45 = vadd.f32 %v671_v43, %v648_v41  ;;  %687 = vst.msk [vmem:[%s311_s26 + $0x10] sm:$0xff] %vm567_vm1, %v683_v42 }
 0x254   : > { %v684_v46 = vadd.f32 %v680_v44, %v676_v45 }
 0x256   : > { %688 = vst.msk [vmem:[%s311_s26 + $0x18] sm:$0xff] %vm567_vm1, %v684_v46 }
 0x257 PF: > { %s16_s21 = sadd.s32 1, %s936_s21  }
 0x258   : > { %p13_p4 = scmp.ge.s32.totalorder %s16_s21, 4  }
 0x25a   :  { %15 = sbr.rel (!%p13_p4) target bundleno = 1 (0x1), region = 83 }

// kernel: hit_forward.35
= control target key start
LH: loop header
LB: loop body
LE: loop exit
PB: predicated region body
PF: predicated region fallthrough
CT: control target
= control target key end

     0   :  { %s1098_s18 = smov 0   ;;  %s1289_s0 = inlined_call_operand.vmem [shape: f32[2,800,64], index: 0, kind: input, shape index: {}]   ;;  %s1290_s1 = inlined_call_operand.vmem [shape: f32[16,800], index: 1, kind: input, shape index: {}]   ;;  %s1291_s2 = inlined_call_operand.vmem [shape: f32[16,1], index: 2, kind: input, shape index: {}]   ;;  %s1292_s3 = inlined_call_operand.vmem [shape: f32[16,1], index: 3, kind: input, shape index: {}]   ;;  %s1293_s4 = inlined_call_operand.vmem [shape: f32[16,1], index: 4, kind: input, shape index: {}]   ;;  %s1294_s5 = inlined_call_operand.vmem [shape: f32[2,16,64], index: 5, kind: output, shape index: {}]  }
   0x1 LB: > { %s791_s19 = sadd.s32 4294967295, %s1065_s18   ;;  %p795_p0 = scmp.ge.s32.totalorder %s1065_s18, 1  ;;  %s1065_s18 = sphi %s1098_s18, %s15_s18  }
   0x2   : > { %p187_p1 = scmp.lt.s32.totalorder %s1065_s18, 3 }
   0x4   : > { %p188_p2 = pnand %p795_p0, %p187_p1 }
   0x5   : > { %p215_p3 = scmp.lt.s32.totalorder (!%p188_p2), %s791_s19, 1  ;;  %v226_v0 = vld [vmem:[%s1290_s1 + $0x8] sm:$0xff] (!%p188_p2)  ;;  %v228_v1 = vld [vmem:[%s1290_s1 + $0x18] sm:$0xff] (!%p188_p2)  ;;  %v1067_v2 = vmov (!%p188_p2), 0   ;;  %v339_v3 = vld [vmem:[%s1291_s2] sm:$0xff] (!%p188_p2)  ;;  %vm351_vm0 = vcmask (!%p188_p2), 261120  }
   0x6   : > { %191 = sbr.rel (%p188_p2) target bundleno = 768 (0x300), region = 40  ;;  %422 = vmatprep.mubr.f32.mxu0 (!%p188_p2), %v226_v0  ;;  %497 = vmatprep.mubr.f32.mxu1 (!%p188_p2), %v228_v1  ;;  %v340_v4 = vld [vmem:[%s1291_s2 + $0x8] sm:$0xff] (!%p188_p2)  ;;  %v704_v12 = vld [vmem:[%s1292_s3] sm:$0xff] (!%p188_p2)  ;;  %vm658_vm1 = vcmask (!%p188_p2), 523264  }
   0x7   : > { %1053 = vset.pattern.permute.xlu0 (!%p188_p2), %v1067_v2  ;;  %1054 = vset.pattern.permute.xlu1 (!%p188_p2), %v1067_v2  ;;  %v718_v31 = vld [vmem:[%s1293_s4] sm:$0xff] (!%p188_p2)  ;;  %v719_v55 = vld [vmem:[%s1293_s4 + $0x8] sm:$0xff] (!%p188_p2) }
   0x8   : > { %343 = vperm.xlu0 (!%p188_p2), %1053, %v339_v3  }
   0xc   : > { %348 = vperm.xlu0 (!%p188_p2), %1053, %v340_v4  }
   0xd   : > { %s1296_s19 = smov (!%p215_p3, %s791_s19), 1 }
   0xe   : > { %s1039_s24 = smul.u32 800, %s1296_s19  ;;  %s803_s20 = sshll.u32 %s1296_s19, 4 }
   0xf   : > { %s224_s23 = scalar_lea.vmem %s1294_s5, %s803_s20 }
  0x10   : > { %s1121_s29 = scalar_lea.vmem %s1289_s0, %s1039_s24  ;;  %708 = vperm.xlu0 %1053, %v704_v12  }
  0x11   : > { %v255_v5 = vld [vmem:[%s1121_s29 + $0x80] sm:$0xff]  ;;  %v256_v6 = vld [vmem:[%s1121_s29 + $0x88] sm:$0xff]  ;;  %v257_v17 = vld [vmem:[%s1121_s29 + $0x90] sm:$0xff] }
  0x12   : > { %v239_v7 = vld [vmem:[%s1121_s29] sm:$0xff]  ;;  %v935_v8 = vpack.c.bf16 %v256_v6, %v255_v5  ;;  %v240_v9 = vld [vmem:[%s1121_s29 + $0x8] sm:$0xff]  ;;  %v258_v19 = vld [vmem:[%s1121_s29 + $0x98] sm:$0xff] }
  0x13   : > { %v287_v10 = vld [vmem:[%s1121_s29 + $0x180] sm:$0xff]  ;;  %v288_v11 = vld [vmem:[%s1121_s29 + $0x188] sm:$0xff]  ;;  %v937_v13 = vpack.c.bf16 %v240_v9, %v239_v7  ;;  %v241_v20 = vld [vmem:[%s1121_s29 + $0x10] sm:$0xff]  ;;  %v939_v22 = vpack.c.bf16 %v258_v19, %v257_v17 }
  0x14   : > { %v967_v14 = vpack.c.bf16 %v288_v11, %v287_v10  ;;  %v271_v15 = vld [vmem:[%s1121_s29 + $0x100] sm:$0xff]  ;;  %v272_v16 = vld [vmem:[%s1121_s29 + $0x108] sm:$0xff]  ;;  %936 = vmatprep.subr.bf16.mxu0 %v935_v8  ;;  %v242_v21 = vld [vmem:[%s1121_s29 + $0x18] sm:$0xff]  ;;  %722 = vperm.xlu0 %1053, %v718_v31  }
  0x15   : > { %v969_v18 = vpack.c.bf16 %v272_v16, %v271_v15  ;;  %938 = vmatpush3.bf16.msra.mxu0 %v937_v13  ;;  %v941_v23 = vpack.c.bf16 %v242_v21, %v241_v20  ;;  %v289_v24 = vld [vmem:[%s1121_s29 + $0x190] sm:$0xff]  ;;  %v290_v25 = vld [vmem:[%s1121_s29 + $0x198] sm:$0xff]  ;;  %v259_v29 = vld [vmem:[%s1121_s29 + $0xa0] sm:$0xff] }
  0x16   : > { %968 = vmatprep.subr.bf16.mxu1 %v967_v14  ;;  %v273_v26 = vld [vmem:[%s1121_s29 + $0x110] sm:$0xff]  ;;  %v971_v27 = vpack.c.bf16 %v290_v25, %v289_v24  ;;  %v274_v28 = vld [vmem:[%s1121_s29 + $0x118] sm:$0xff]  ;;  %v260_v30 = vld [vmem:[%s1121_s29 + $0xa8] sm:$0xff]  ;;  %940 = vmatprep.subr.bf16.mxu0 %v939_v22 }
  0x17   : > { %970 = vmatpush3.bf16.msra.mxu1 %v969_v18  ;;  %v973_v32 = vpack.c.bf16 %v274_v28, %v273_v26  ;;  %v943_v33 = vpack.c.bf16 %v260_v30, %v259_v29  ;;  %v243_v34 = vld [vmem:[%s1121_s29 + $0x20] sm:$0xff]  ;;  %v244_v35 = vld [vmem:[%s1121_s29 + $0x28] sm:$0xff]  ;;  %v261_v42 = vld [vmem:[%s1121_s29 + $0xb0] sm:$0xff] }
  0x18   : > { %v291_v36 = vld [vmem:[%s1121_s29 + $0x1a0] sm:$0xff]  ;;  %972 = vmatprep.subr.bf16.mxu1 %v971_v27  ;;  %v292_v37 = vld [vmem:[%s1121_s29 + $0x1a8] sm:$0xff]  ;;  %v945_v40 = vpack.c.bf16 %v244_v35, %v243_v34  ;;  %v262_v43 = vld [vmem:[%s1121_s29 + $0xb8] sm:$0xff]  ;;  %727 = vperm.xlu0 %1053, %v719_v55  }
  0x19   : > { %v275_v38 = vld [vmem:[%s1121_s29 + $0x120] sm:$0xff]  ;;  %v276_v39 = vld [vmem:[%s1121_s29 + $0x128] sm:$0xff]  ;;  %942 = vmatpush3.bf16.msra.mxu0 %v941_v23  ;;  %v975_v41 = vpack.c.bf16 %v292_v37, %v291_v36  ;;  %v245_v44 = vld [vmem:[%s1121_s29 + $0x30] sm:$0xff]  ;;  %v947_v46 = vpack.c.bf16 %v262_v43, %v261_v42 }
  0x1a   : > { %944 = vmatprep.subr.bf16.mxu0 %v943_v33  ;;  %v977_v45 = vpack.c.bf16 %v276_v39, %v275_v38  ;;  %v246_v47 = vld [vmem:[%s1121_s29 + $0x38] sm:$0xff]  ;;  %v293_v48 = vld [vmem:[%s1121_s29 + $0x1b0] sm:$0xff]  ;;  %v263_v53 = vld [vmem:[%s1121_s29 + $0xc0] sm:$0xff] }
  0x1b   : > { %974 = vmatpush3.bf16.msra.mxu1 %v973_v32  ;;  %v294_v49 = vld [vmem:[%s1121_s29 + $0x1b8] sm:$0xff]  ;;  %v277_v51 = vld [vmem:[%s1121_s29 + $0x130] sm:$0xff]  ;;  %v264_v54 = vld [vmem:[%s1121_s29 + $0xc8] sm:$0xff]  ;;  %v949_v56 = vpack.c.bf16 %v246_v47, %v245_v44 }
  0x1c   : > { %976 = vmatprep.subr.bf16.mxu1 %v975_v41  ;;  %v979_v50 = vpack.c.bf16 %v294_v49, %v293_v48  ;;  %v278_v52 = vld [vmem:[%s1121_s29 + $0x138] sm:$0xff]  ;;  %v295_v57 = vld [vmem:[%s1121_s29 + $0x1c0] sm:$0xff]  ;;  %v296_v58 = vld [vmem:[%s1121_s29 + $0x1c8] sm:$0xff]  ;;  %v951_v60 = vpack.c.bf16 %v264_v54, %v263_v53 }
  0x1d   : > { %946 = vmatpush3.bf16.msra.mxu0 %v945_v40  ;;  %v981_v59 = vpack.c.bf16 %v278_v52, %v277_v51  ;;  %v247_v61 = vld [vmem:[%s1121_s29 + $0x40] sm:$0xff]  ;;  %v248_v62 = vld [vmem:[%s1121_s29 + $0x48] sm:$0xff]  ;;  %v983_v0 = vpack.c.bf16 %v296_v58, %v295_v57  ;;  %v265_v2 = vld [vmem:[%s1121_s29 + $0xd0] sm:$0xff] }
  0x1e   : > { %948 = vmatprep.subr.bf16.mxu0 %v947_v46  ;;  %v279_v63 = vld [vmem:[%s1121_s29 + $0x140] sm:$0xff]  ;;  %v280_v1 = vld [vmem:[%s1121_s29 + $0x148] sm:$0xff]  ;;  %v266_v3 = vld [vmem:[%s1121_s29 + $0xd8] sm:$0xff]  ;;  %v953_v6 = vpack.c.bf16 %v248_v62, %v247_v61 }
  0x1f   : > { %978 = vmatpush3.bf16.msra.mxu1 %v977_v45  ;;  %v297_v4 = vld [vmem:[%s1121_s29 + $0x1d0] sm:$0xff]  ;;  %v298_v5 = vld [vmem:[%s1121_s29 + $0x1d8] sm:$0xff]  ;;  %v985_v7 = vpack.c.bf16 %v280_v1, %v279_v63  ;;  %v955_v8 = vpack.c.bf16 %v266_v3, %v265_v2  ;;  %v267_v14 = vld [vmem:[%s1121_s29 + $0xe0] sm:$0xff] }
  0x20   : > { %980 = vmatprep.subr.bf16.mxu1 %v979_v50  ;;  %v249_v9 = vld [vmem:[%s1121_s29 + $0x50] sm:$0xff]  ;;  %v250_v10 = vld [vmem:[%s1121_s29 + $0x58] sm:$0xff]  ;;  %v987_v12 = vpack.c.bf16 %v298_v5, %v297_v4  ;;  %v268_v15 = vld [vmem:[%s1121_s29 + $0xe8] sm:$0xff] }
  0x21   : > { %950 = vmatpush3.bf16.msra.mxu0 %v949_v56  ;;  %v281_v11 = vld [vmem:[%s1121_s29 + $0x150] sm:$0xff]  ;;  %v282_v13 = vld [vmem:[%s1121_s29 + $0x158] sm:$0xff]  ;;  %v299_v16 = vld [vmem:[%s1121_s29 + $0x1e0] sm:$0xff]  ;;  %v957_v18 = vpack.c.bf16 %v250_v10, %v249_v9  ;;  %v959_v20 = vpack.c.bf16 %v268_v15, %v267_v14 }
  0x22   : > { %952 = vmatprep.subr.bf16.mxu0 %v951_v60  ;;  %v300_v17 = vld [vmem:[%s1121_s29 + $0x1e8] sm:$0xff]  ;;  %v989_v19 = vpack.c.bf16 %v282_v13, %v281_v11  ;;  %v251_v21 = vld [vmem:[%s1121_s29 + $0x60] sm:$0xff]  ;;  %v269_v26 = vld [vmem:[%s1121_s29 + $0xf0] sm:$0xff] }
  0x23   : > { %982 = vmatpush3.bf16.msra.mxu1 %v981_v59  ;;  %v252_v22 = vld [vmem:[%s1121_s29 + $0x68] sm:$0xff]  ;;  %v283_v23 = vld [vmem:[%s1121_s29 + $0x160] sm:$0xff]  ;;  %v991_v24 = vpack.c.bf16 %v300_v17, %v299_v16  ;;  %v270_v27 = vld [vmem:[%s1121_s29 + $0xf8] sm:$0xff] }
  0x24   : > { %984 = vmatprep.subr.bf16.mxu1 %v983_v0  ;;  %v284_v25 = vld [vmem:[%s1121_s29 + $0x168] sm:$0xff]  ;;  %v301_v28 = vld [vmem:[%s1121_s29 + $0x1f0] sm:$0xff]  ;;  %v302_v29 = vld [vmem:[%s1121_s29 + $0x1f8] sm:$0xff]  ;;  %v961_v30 = vpack.c.bf16 %v252_v22, %v251_v21  ;;  %v963_v32 = vpack.c.bf16 %v270_v27, %v269_v26 }
  0x25   : > { %954 = vmatpush3.bf16.msra.mxu0 %v953_v6  ;;  %v993_v31 = vpack.c.bf16 %v284_v25, %v283_v23  ;;  %v253_v33 = vld [vmem:[%s1121_s29 + $0x70] sm:$0xff]  ;;  %v254_v34 = vld [vmem:[%s1121_s29 + $0x78] sm:$0xff]  ;;  %v995_v36 = vpack.c.bf16 %v302_v29, %v301_v28  ;;  %v319_v38 = vld [vmem:[%s1121_s29 + $0x280] sm:$0xff] }
  0x26   : > { %956 = vmatprep.subr.bf16.mxu0 %v955_v8  ;;  %v285_v35 = vld [vmem:[%s1121_s29 + $0x170] sm:$0xff]  ;;  %v286_v37 = vld [vmem:[%s1121_s29 + $0x178] sm:$0xff]  ;;  %v320_v39 = vld [vmem:[%s1121_s29 + $0x288] sm:$0xff]  ;;  %v965_v40 = vpack.c.bf16 %v254_v34, %v253_v33 }
  0x27   : > { %986 = vmatpush3.bf16.msra.mxu1 %v985_v7  ;;  %v997_v41 = vpack.c.bf16 %v286_v37, %v285_v35  ;;  %v999_v42 = vpack.c.bf16 %v320_v39, %v319_v38  ;;  %v303_v43 = vld [vmem:[%s1121_s29 + $0x200] sm:$0xff]  ;;  %v304_v44 = vld [vmem:[%s1121_s29 + $0x208] sm:$0xff]  ;;  %v321_v45 = vld [vmem:[%s1121_s29 + $0x290] sm:$0xff] }
  0x28   : > { %988 = vmatprep.subr.bf16.mxu1 %v987_v12  ;;  %v322_v46 = vld [vmem:[%s1121_s29 + $0x298] sm:$0xff]  ;;  %v335_v47 = vld [vmem:[%s1121_s29 + $0x300] sm:$0xff]  ;;  %v336_v48 = vld [vmem:[%s1121_s29 + $0x308] sm:$0xff]  ;;  %v1001_v50 = vpack.c.bf16 %v304_v44, %v303_v43 }
  0x29   : > { %958 = vmatpush3.bf16.msra.mxu0 %v957_v18  ;;  %v225_v49 = vld [vmem:[%s1290_s1] sm:$0xff]  ;;  %v227_v51 = vld [vmem:[%s1290_s1 + $0x10] sm:$0xff]  ;;  %v1031_v52 = vpack.c.bf16 %v336_v48, %v335_v47  ;;  %v1003_v54 = vpack.c.bf16 %v322_v46, %v321_v45  ;;  %v306_v56 = vld [vmem:[%s1121_s29 + $0x218] sm:$0xff] }
  0x2a   : > { %960 = vmatprep.subr.bf16.mxu0 %v959_v20  ;;  %v337_v53 = vld [vmem:[%s1121_s29 + $0x310] sm:$0xff]  ;;  %v338_v57 = vld [vmem:[%s1121_s29 + $0x318] sm:$0xff]  ;;  %v323_v58 = vld [vmem:[%s1121_s29 + $0x2a0] sm:$0xff] }
  0x2b   : > { %990 = vmatpush3.bf16.msra.mxu1 %v989_v19  ;;  %v305_v55 = vld [vmem:[%s1121_s29 + $0x210] sm:$0xff]  ;;  %v324_v59 = vld [vmem:[%s1121_s29 + $0x2a8] sm:$0xff]  ;;  %v233_v60 = vld [vmem:[%s1290_s1 + $0x40] sm:$0xff]  ;;  %v1035_v62 = vpack.c.bf16 %v338_v57, %v337_v53 }
  0x2c   : > { %992 = vmatprep.subr.bf16.mxu1 %v991_v24  ;;  %v235_v61 = vld [vmem:[%s1290_s1 + $0x50] sm:$0xff]  ;;  %v1005_v63 = vpack.c.bf16 %v306_v56, %v305_v55  ;;  %v232_v0 = vld [vmem:[%s1290_s1 + $0x38] sm:$0xff]  ;;  %v1007_v1 = vpack.c.bf16 %v324_v59, %v323_v58  ;;  %v307_v2 = vld [vmem:[%s1121_s29 + $0x220] sm:$0xff] }
  0x2d   : > { %962 = vmatpush3.bf16.msra.mxu0 %v961_v30  ;;  %v308_v3 = vld [vmem:[%s1121_s29 + $0x228] sm:$0xff]  ;;  %v325_v5 = vld [vmem:[%s1121_s29 + $0x2b0] sm:$0xff]  ;;  %v326_v6 = vld [vmem:[%s1121_s29 + $0x2b8] sm:$0xff] }
  0x2e   : > { %964 = vmatprep.subr.bf16.mxu0 %v963_v32  ;;  %v234_v4 = vld [vmem:[%s1290_s1 + $0x48] sm:$0xff]  ;;  %v231_v8 = vld [vmem:[%s1290_s1 + $0x30] sm:$0xff]  ;;  %v1009_v9 = vpack.c.bf16 %v308_v3, %v307_v2  ;;  %v1011_v10 = vpack.c.bf16 %v326_v6, %v325_v5  ;;  %v310_v12 = vld [vmem:[%s1121_s29 + $0x238] sm:$0xff] }
  0x2f   : > { %994 = vmatpush3.bf16.msra.mxu1 %v993_v31  ;;  %v230_v7 = vld [vmem:[%s1290_s1 + $0x28] sm:$0xff]  ;;  %v309_v11 = vld [vmem:[%s1121_s29 + $0x230] sm:$0xff]  ;;  %v327_v13 = vld [vmem:[%s1121_s29 + $0x2c0] sm:$0xff] }
  0x30   : > { %996 = vmatprep.subr.bf16.mxu1 %v995_v36  ;;  %v328_v14 = vld [vmem:[%s1121_s29 + $0x2c8] sm:$0xff]  ;;  %v1013_v16 = vpack.c.bf16 %v310_v12, %v309_v11  ;;  %v311_v18 = vld [vmem:[%s1121_s29 + $0x240] sm:$0xff]  ;;  %v329_v20 = vld [vmem:[%s1121_s29 + $0x2d0] sm:$0xff] }
  0x31   : > { %966 = vmatpush3.bf16.msra.mxu0 %v965_v40  ;;  %v238_v15 = vld [vmem:[%s1290_s1 + $0x68] sm:$0xff]  ;;  %v1015_v17 = vpack.c.bf16 %v328_v14, %v327_v13  ;;  %v330_v21 = vld [vmem:[%s1121_s29 + $0x2d8] sm:$0xff]  ;;  %v313_v24 = vld [vmem:[%s1121_s29 + $0x250] sm:$0xff] }
  0x32   : > { %1000 = vmatprep.subr.bf16.mxu0 %v999_v42  ;;  %v312_v19 = vld [vmem:[%s1121_s29 + $0x248] sm:$0xff]  ;;  %v1019_v23 = vpack.c.bf16 %v330_v21, %v329_v20  ;;  %v314_v25 = vld [vmem:[%s1121_s29 + $0x258] sm:$0xff]  ;;  %v331_v26 = vld [vmem:[%s1121_s29 + $0x2e0] sm:$0xff] }
  0x33   : > { %998 = vmatpush3.bf16.msra.mxu1 %v997_v41  ;;  %v1017_v22 = vpack.c.bf16 %v312_v19, %v311_v18  ;;  %v332_v27 = vld [vmem:[%s1121_s29 + $0x2e8] sm:$0xff]  ;;  %v1021_v28 = vpack.c.bf16 %v314_v25, %v313_v24  ;;  %v315_v30 = vld [vmem:[%s1121_s29 + $0x260] sm:$0xff]  ;;  %v333_v32 = vld [vmem:[%s1121_s29 + $0x2f0] sm:$0xff] }
  0x34   : > { %1032 = vmatprep.subr.bf16.mxu1 %v1031_v52  ;;  %423 = vmatmul.mubr.f32.vlgmr.msra.gmra.mrb[0].mxu0 %v225_v49  ;;  %v1023_v29 = vpack.c.bf16 %v332_v27, %v331_v26  ;;  %v316_v31 = vld [vmem:[%s1121_s29 + $0x268] sm:$0xff]  ;;  %v334_v33 = vld [vmem:[%s1121_s29 + $0x2f8] sm:$0xff]  ;;  %v317_v36 = vld [vmem:[%s1121_s29 + $0x270] sm:$0xff] }
  0x35   : > { %1002 = vmatpush3.bf16.msra.mxu0 %v1001_v50  ;;  %427 = vmatprep.mubr.f32.mxu0 %v233_v60  ;;  %v1025_v34 = vpack.c.bf16 %v316_v31, %v315_v30  ;;  %v1027_v35 = vpack.c.bf16 %v334_v33, %v333_v32  ;;  %v318_v37 = vld [vmem:[%s1121_s29 + $0x278] sm:$0xff]  ;;  %v229_v39 = vld [vmem:[%s1290_s1 + $0x20] sm:$0xff]  ;;  %v705_v27 = vld [vmem:[%s1292_s3 + $0x8] sm:$0xff] }
  0x36   : > { %498 = vmatmul.mubr.f32.vlgmr.msra.gmra.mrb[0].mxu1 %v227_v51  ;;  %1004 = vmatprep.subr.bf16.mxu0 %v1003_v54  ;;  %v1029_v38 = vpack.c.bf16 %v318_v37, %v317_v36  ;;  %v237_v40 = vld [vmem:[%s1290_s1 + $0x60] sm:$0xff]  ;;  %v236_v41 = vld [vmem:[%s1290_s1 + $0x58] sm:$0xff] }
  0x37   : > { %502 = vmatprep.mubr.f32.mxu1 %v235_v61  ;;  %1034 = vmatpush3.bf16.msra.mxu1 %v1031_v52 }
  0x38   : > { %428 = vmatmul.mubr.f32.gmra.mrb[2].mxu0 %v232_v0  ;;  %1036 = vmatprep.subr.bf16.mxu1 %v1035_v62 }
  0x39   : > { %1006 = vmatpush3.bf16.msra.mxu0 %v1005_v63  ;;  %572 = vmatprep.mubr.f32.mxu0 %v230_v7 }
  0x3a   : > { %503 = vmatmul.mubr.f32.gmra.mrb[2].mxu1 %v234_v4  ;;  %1008 = vmatprep.subr.bf16.mxu0 %v1007_v1 }
  0x3b   : > { %1038 = vmatpush3.bf16.msra.mxu1 %v1035_v62  ;;  %932 = vmatprep.mubr.msk.f32.mxu1 %vm351_vm0, %v231_v8 }
  0x3d   : > { %1010 = vmatpush3.bf16.msra.mxu0 %v1009_v9 }
  0x3e   : > { %1012 = vmatprep.subr.bf16.mxu0 %v1011_v10  ;;  %933 = vmatmul.mubr.msk.f32.vlgmr.msra.gmra.mrb[4].mxu1 %vm351_vm0, %v238_v15 }
  0x41   : > { %1014 = vmatpush3.bf16.msra.mxu0 %v1013_v16 }
  0x42   : > { %1016 = vmatprep.subr.bf16.mxu0 %v1015_v17 }
  0x45   : > { %1018 = vmatpush3.bf16.msra.mxu0 %v1017_v22 }
  0x46   : > { %1020 = vmatprep.subr.bf16.mxu0 %v1019_v23 }
  0x49   : > { %1022 = vmatpush3.bf16.msra.mxu0 %v1021_v28 }
  0x4a   : > { %1024 = vmatprep.subr.bf16.mxu0 %v1023_v29 }
  0x4d   : > { %1026 = vmatpush3.bf16.msra.mxu0 %v1025_v34 }
  0x4e   : > { %1028 = vmatprep.subr.bf16.mxu0 %v1027_v35 }
  0x51   : > { %1030 = vmatpush3.bf16.msra.mxu0 %v1029_v38 }
  0x54   : > { %573 = vmatmul.mubr.f32.vlgmr.msra.gmra.mrb[4].mxu0 %v229_v39 }
  0x55   : > { %577 = vmatprep.mubr.f32.mxu0 %v237_v40 }
  0x58   : > { %578 = vmatmul.mubr.f32.gmra.mrb[6].mxu0 %v236_v41 }
  0x87   : > { %v344_v43 = vpop.permute.xlu0 %343 }
  0x8b   : > { %v349_v56 = vpop.permute.xlu0 %348 }
 0x107   : > { %v836_v42 = vpop.f32.mrb[0].mxu0 }
 0x108   : > { %v837_v44 = vpop.f32.mrb[1].mxu0 }
 0x109   : > { %v874_v45 = vpop.f32.mrb[0].mxu1  ;;  %v838_v46 = vadd.f32 %v837_v44, %v836_v42 }
 0x10a   : > { %v875_v47 = vpop.f32.mrb[1].mxu1 }
 0x10b   : > { %v876_v48 = vadd.f32 %v875_v47, %v874_v45  ;;  %v425_v49 = vadd.f32 %v838_v46, %v344_v43  ;;  %v839_v50 = vpop.f32.mrb[2].mxu0  ;;  %v709_v43 = vpop.permute.xlu0 %708 }
 0x10c   : > { %v840_v51 = vpop.f32.mrb[3].mxu0 }
 0x10d   : > { %v877_v52 = vpop.f32.mrb[2].mxu1  ;;  %v500_v53 = vadd.f32 %v876_v48, %v425_v49  ;;  %v841_v54 = vadd.f32 %v840_v51, %v839_v50 }
 0x10e   : > { %v878_v55 = vpop.f32.mrb[3].mxu1 }
 0x10f   : > { %v879_v57 = vadd.f32 %v878_v55, %v877_v52  ;;  %v430_v58 = vadd.f32 %v841_v54, %v349_v56  ;;  %v723_v44 = vpop.permute.xlu0 %722 }
 0x111   : > { %v505_v59 = vadd.f32 %v879_v57, %v430_v58  ;;  %v934_v60 = vpop.f32.mrb[4].mxu1 }
 0x112   : > { %v649_v61 = vpop.f32.mrb[5].mxu1 }
 0x113   : > { %v728_v51 = vpop.permute.xlu0 %727 }
 0x127   : > { %v912_v62 = vpop.f32.mrb[4].mxu0 }
 0x128   : > { %v913_v63 = vpop.f32.mrb[5].mxu0 }
 0x129   : > { %v914_v0 = vadd.f32 %v913_v63, %v912_v62 }
 0x12b   : > { %v915_v1 = vpop.f32.mrb[6].mxu0  ;;  %v575_v2 = vadd.f32 %v914_v0, %v500_v53 }
 0x12c   : > { %v916_v3 = vpop.f32.mrb[7].mxu0 }
 0x12d   : > { %v917_v4 = vadd.f32 %v916_v3, %v915_v1  ;;  %v650_v5 = vadd.f32 %v649_v61, %v575_v2 }
 0x12f   : > { %v580_v6 = vadd.f32 %v917_v4, %v505_v59  ;;  %v659_v8 = vsel %vm658_vm1, %v650_v5, 0.0 }
 0x131   : > { %v655_v7 = vadd.f32 %v934_v60, %v580_v6 }
 0x133   : > { %v660_v9 = vsel %vm658_vm1, %v655_v7, 0.0 }
 0x134   : > { %v661_v10 = vadd.f32 %v660_v9, %v659_v8 }
 0x136   : > { %662 = vadd.xlane.f32.xlu1 %v661_v10 }
 0x1c3   : > { %v663_v11 = vpop.xlane.xlu1 %662 }
 0x1c4   : > { %v664_v12 = vrot.slane %v663_v11, 4 }
 0x1c6   : > { %v665_v13 = vadd.f32 %v664_v12, %v663_v11 }
 0x1c8   : > { %v666_v14 = vrot.slane %v665_v13, 2 }
 0x1ca   : > { %v667_v15 = vadd.f32 %v666_v14, %v665_v13 }
 0x1cc   : > { %v668_v16 = vrot.slane %v667_v15, 1 }
 0x1ce   : > { %v669_v17 = vadd.f32 %v668_v16, %v667_v15 }
 0x1d0   : > { %1040 = vpush %v669_v17 }
 0x201   : > { %s1041_s29 = spop %1040 }
 0x202   : > { %v671_v18 = vstv %s1041_s29 }
 0x203   : > { %v673_v19 = vmul.f32 0.0009765625, %v671_v18 }
 0x205   : > { %v674_v20 = vsub.f32 %v650_v5, %v673_v19  ;;  %v675_v21 = vsub.f32 %v655_v7, %v673_v19 }
 0x207   : > { %v676_v22 = vmul.f32 %v674_v20, %v674_v20  ;;  %v677_v23 = vmul.f32 %v675_v21, %v675_v21 }
 0x209   : > { %v678_v24 = vsel %vm658_vm1, %v676_v22, 0.0  ;;  %v679_v25 = vsel %vm658_vm1, %v677_v23, 0.0 }
 0x20a   : > { %v680_v26 = vadd.f32 %v679_v25, %v678_v24 }
 0x20c   : > { %681 = vadd.xlane.f32.xlu1 %v680_v26 }
 0x21d   : > { %713 = vperm.xlu1 %1054, %v705_v27  }
 0x299   : > { %v682_v28 = vpop.xlane.xlu1 %681 }
 0x29a   : > { %v683_v29 = vrot.slane %v682_v28, 4 }
 0x29c   : > { %v684_v30 = vadd.f32 %v683_v29, %v682_v28 }
 0x29d   : > { %v714_v46 = vpop.permute.xlu1 %713 }
 0x29e   : > { %v685_v31 = vrot.slane %v684_v30, 2 }
 0x2a0   : > { %v686_v32 = vadd.f32 %v685_v31, %v684_v30 }
 0x2a2   : > { %v687_v33 = vrot.slane %v686_v32, 1 }
 0x2a4   : > { %v688_v34 = vadd.f32 %v687_v33, %v686_v32 }
 0x2a6   : > { %1042 = vpush %v688_v34 }
 0x2d7   : > { %s1043_s17 = spop %1042 }
 0x2d8   : > { %v690_v35 = vstv %s1043_s17 }
 0x2d9   : > { %v692_v36 = vmul.f32 0.0009775171, %v690_v35 }
 0x2db   : > { %1055 = vrsqrt.f32 %v692_v36  ;;  %vm695_vm2 = vcmp.eq.f32.partialorder %v692_v36, inf  ;;  %v698_v39 = vand.u32 2147483648, %v692_v36  ;;  %vm697_vm3 = vcmp.eq.f32.partialorder %v692_v36, 0.0 }
 0x2e5   : > { %v1056_v37 = vpop.eup %1055 }
 0x2e6   : > { %v694_v38 = vmul.f32 %v1056_v37, %v692_v36 }
 0x2e8   : > { %v696_v40 = vsel %vm695_vm2, %v692_v36, %v694_v38 }
 0x2e9   : > { %v699_v41 = vsel %vm697_vm3, %v698_v39, %v696_v40 }
 0x2ea   : > { %v700_v42 = vadd.f32 1e-05, %v699_v41 }
 0x2ec   : > { %1057 = vrcp.f32 %v700_v42 }
 0x2f6   : > { %v1058_v45 = vpop.eup %1057 }
 0x2f7   : > { %v702_v47 = vmul.f32 %v1058_v45, %v674_v20  ;;  %v703_v48 = vmul.f32 %v1058_v45, %v675_v21 }
 0x2f9   : > { %v716_v49 = vmul.f32 %v709_v43, %v702_v47  ;;  %v717_v50 = vmul.f32 %v714_v46, %v703_v48 }
 0x2fb   : > { %v730_v52 = vadd.f32 %v723_v44, %v716_v49  ;;  %v731_v53 = vadd.f32 %v728_v51, %v717_v50 }
 0x2fd   : > { %v732_v54 = vmax.f32 %v730_v52, 0.0  ;;  %v733_v55 = vmax.f32 %v731_v53, 0.0 }
 0x2ff   : > { %734 = vst.msk [vmem:[%s224_s23] sm:$0xff] %vm658_vm1, %v732_v54  ;;  %735 = vst.msk [vmem:[%s224_s23 + $0x8] sm:$0xff] %vm658_vm1, %v733_v55 }
 0x300 PF: > { %s15_s18 = sadd.s32 1, %s1065_s18  }
 0x301   : > { %p12_p4 = scmp.ge.s32.totalorder %s15_s18, 4  }
 0x303   :  { %14 = sbr.rel (!%p12_p4) target bundleno = 1 (0x1), region = 70 }

// kernel: hit_forward.36
= control target key start
LH: loop header
LB: loop body
LE: loop exit
PB: predicated region body
PF: predicated region fallthrough
CT: control target
= control target key end

     0   :  { %s772_s18 = smov 0   ;;  %s916_s0 = inlined_call_operand.vmem [shape: f32[2,400,256], index: 0, kind: input, shape index: {}]   ;;  %s917_s1 = inlined_call_operand.vmem [shape: f32[8,400], index: 1, kind: input, shape index: {}]   ;;  %s918_s2 = inlined_call_operand.vmem [shape: f32[8,1], index: 2, kind: input, shape index: {}]   ;;  %s919_s3 = inlined_call_operand.vmem [shape: f32[8,1], index: 3, kind: input, shape index: {}]   ;;  %s920_s4 = inlined_call_operand.vmem [shape: f32[8,1], index: 4, kind: input, shape index: {}]   ;;  %s921_s5 = inlined_call_operand.vmem [shape: f32[2,8,256], index: 5, kind: output, shape index: {}]  }
   0x1 LB: > { %s597_s19 = sadd.s32 4294967295, %s739_s18   ;;  %p601_p0 = scmp.ge.s32.totalorder %s739_s18, 1  ;;  %s739_s18 = sphi %s772_s18, %s15_s18  }
   0x2   : > { %p187_p1 = scmp.lt.s32.totalorder %s739_s18, 3 }
   0x4   : > { %p188_p2 = pnand %p601_p0, %p187_p1 }
   0x5   : > { %p215_p3 = scmp.lt.s32.totalorder (!%p188_p2), %s597_s19, 1  ;;  %v226_v0 = vld [vmem:[%s917_s1 + $0x8] sm:$0xff] (!%p188_p2)  ;;  %v228_v1 = vld [vmem:[%s917_s1 + $0x18] sm:$0xff] (!%p188_p2)  ;;  %vm335_vm0 = vcmask (!%p188_p2), 130048   ;;  %v329_v2 = vld [vmem:[%s918_s2] sm:$0xff] (!%p188_p2)  ;;  %v741_v3 = vmov (!%p188_p2), 0  }
   0x6   : > { %191 = sbr.rel (%p188_p2) target bundleno = 760 (0x2f8), region = 40  ;;  %403 = vmatprep.mubr.f32.mxu1 (!%p188_p2), %v226_v0  ;;  %605 = vmatprep.mubr.msk.f32.mxu0 (!%p188_p2), %vm335_vm0, %v228_v1 }
   0x7   : > { %727 = vset.pattern.permute.xlu0 (!%p188_p2), %v741_v3  ;;  %728 = vset.pattern.permute.xlu1 (!%p188_p2), %v741_v3 }
   0x8   : > { %332 = vperm.xlu0 (!%p188_p2), %727, %v329_v2  }
   0xd   : > { %s923_s19 = smov (!%p215_p3, %s597_s19), 1 }
   0xe   : > { %s713_s26 = smul.u32 800, %s923_s19  ;;  %s608_s15 = sshll.u32 %s923_s19, 4 }
   0xf   : > { %s224_s20 = scalar_lea.vmem %s921_s5, %s608_s15 }
  0x10   : > { %s795_s29 = scalar_lea.vmem %s916_s0, %s713_s26 }
  0x11   : > { %v230_v4 = vld [vmem:[%s795_s29 + $0x8] sm:$0xff]  ;;  %v232_v5 = vld [vmem:[%s795_s29 + $0x18] sm:$0xff]  ;;  %v229_v6 = vld [vmem:[%s795_s29] sm:$0xff] }
  0x12   : > { %v609_v7 = vpack.c.bf16 %v232_v5, %v230_v4  ;;  %v231_v8 = vld [vmem:[%s795_s29 + $0x10] sm:$0xff]  ;;  %v234_v9 = vld [vmem:[%s795_s29 + $0x28] sm:$0xff]  ;;  %v236_v10 = vld [vmem:[%s795_s29 + $0x38] sm:$0xff] }
  0x13   : > { %v611_v11 = vpack.c.bf16 %v231_v8, %v229_v6  ;;  %v613_v12 = vpack.c.bf16 %v236_v10, %v234_v9  ;;  %v233_v13 = vld [vmem:[%s795_s29 + $0x20] sm:$0xff]  ;;  %v235_v14 = vld [vmem:[%s795_s29 + $0x30] sm:$0xff]  ;;  %v238_v15 = vld [vmem:[%s795_s29 + $0x48] sm:$0xff] }
  0x14   : > { %610 = vmatprep.subr.bf16.mxu1 %v609_v7  ;;  %v240_v16 = vld [vmem:[%s795_s29 + $0x58] sm:$0xff]  ;;  %v615_v17 = vpack.c.bf16 %v235_v14, %v233_v13  ;;  %v237_v19 = vld [vmem:[%s795_s29 + $0x40] sm:$0xff]  ;;  %v239_v20 = vld [vmem:[%s795_s29 + $0x50] sm:$0xff] }
  0x15   : > { %612 = vmatpush1.bf16.msra.mxu1 %v611_v11  ;;  %v617_v18 = vpack.c.bf16 %v240_v16, %v238_v15  ;;  %v242_v21 = vld [vmem:[%s795_s29 + $0x68] sm:$0xff]  ;;  %v244_v22 = vld [vmem:[%s795_s29 + $0x78] sm:$0xff]  ;;  %v619_v23 = vpack.c.bf16 %v239_v20, %v237_v19  ;;  %v241_v25 = vld [vmem:[%s795_s29 + $0x60] sm:$0xff] }
  0x16   : > { %614 = vmatprep.subr.bf16.mxu1 %v613_v12  ;;  %v621_v24 = vpack.c.bf16 %v244_v22, %v242_v21  ;;  %v243_v26 = vld [vmem:[%s795_s29 + $0x70] sm:$0xff]  ;;  %v246_v27 = vld [vmem:[%s795_s29 + $0x88] sm:$0xff]  ;;  %v248_v28 = vld [vmem:[%s795_s29 + $0x98] sm:$0xff] }
  0x17   : > { %v294_v29 = vld [vmem:[%s795_s29 + $0x208] sm:$0xff]  ;;  %v296_v30 = vld [vmem:[%s795_s29 + $0x218] sm:$0xff]  ;;  %v293_v31 = vld [vmem:[%s795_s29 + $0x200] sm:$0xff]  ;;  %v623_v33 = vpack.c.bf16 %v243_v26, %v241_v25  ;;  %v625_v38 = vpack.c.bf16 %v248_v28, %v246_v27 }
  0x18   : > { %v295_v32 = vld [vmem:[%s795_s29 + $0x210] sm:$0xff]  ;;  %v245_v34 = vld [vmem:[%s795_s29 + $0x80] sm:$0xff]  ;;  %v673_v36 = vpack.c.bf16 %v296_v30, %v294_v29  ;;  %v250_v39 = vld [vmem:[%s795_s29 + $0xa8] sm:$0xff] }
  0x19   : > { %616 = vmatpush1.bf16.msra.mxu1 %v615_v17  ;;  %v247_v35 = vld [vmem:[%s795_s29 + $0x90] sm:$0xff]  ;;  %v675_v37 = vpack.c.bf16 %v295_v32, %v293_v31  ;;  %v298_v40 = vld [vmem:[%s795_s29 + $0x228] sm:$0xff]  ;;  %v300_v41 = vld [vmem:[%s795_s29 + $0x238] sm:$0xff] }
  0x1a   : > { %618 = vmatprep.subr.bf16.mxu1 %v617_v18  ;;  %v252_v42 = vld [vmem:[%s795_s29 + $0xb8] sm:$0xff]  ;;  %674 = vmatprep.subr.bf16.mxu0 %v673_v36  ;;  %v677_v43 = vpack.c.bf16 %v300_v41, %v298_v40  ;;  %v297_v44 = vld [vmem:[%s795_s29 + $0x220] sm:$0xff]  ;;  %v299_v45 = vld [vmem:[%s795_s29 + $0x230] sm:$0xff]  ;;  %v627_v47 = vpack.c.bf16 %v247_v35, %v245_v34 }
  0x1b   : > { %676 = vmatpush1.bf16.msra.mxu0 %v675_v37  ;;  %v679_v46 = vpack.c.bf16 %v299_v45, %v297_v44  ;;  %v302_v48 = vld [vmem:[%s795_s29 + $0x248] sm:$0xff]  ;;  %v304_v49 = vld [vmem:[%s795_s29 + $0x258] sm:$0xff]  ;;  %v301_v50 = vld [vmem:[%s795_s29 + $0x240] sm:$0xff]  ;;  %v629_v51 = vpack.c.bf16 %v252_v42, %v250_v39 }
  0x1c   : > { %678 = vmatprep.subr.bf16.mxu0 %v677_v43  ;;  %v249_v52 = vld [vmem:[%s795_s29 + $0xa0] sm:$0xff]  ;;  %v251_v53 = vld [vmem:[%s795_s29 + $0xb0] sm:$0xff]  ;;  %v681_v54 = vpack.c.bf16 %v304_v49, %v302_v48  ;;  %v254_v56 = vld [vmem:[%s795_s29 + $0xc8] sm:$0xff] }
  0x1d   : > { %620 = vmatpush1.bf16.msra.mxu1 %v619_v23  ;;  %v303_v55 = vld [vmem:[%s795_s29 + $0x250] sm:$0xff]  ;;  %v256_v57 = vld [vmem:[%s795_s29 + $0xd8] sm:$0xff]  ;;  %v306_v58 = vld [vmem:[%s795_s29 + $0x268] sm:$0xff]  ;;  %v631_v61 = vpack.c.bf16 %v251_v53, %v249_v52 }
  0x1e   : > { %622 = vmatprep.subr.bf16.mxu1 %v621_v24  ;;  %v683_v59 = vpack.c.bf16 %v303_v55, %v301_v50  ;;  %v308_v60 = vld [vmem:[%s795_s29 + $0x278] sm:$0xff]  ;;  %v253_v62 = vld [vmem:[%s795_s29 + $0xc0] sm:$0xff]  ;;  %v307_v1 = vld [vmem:[%s795_s29 + $0x270] sm:$0xff]  ;;  %v633_v2 = vpack.c.bf16 %v256_v57, %v254_v56 }
  0x1f   : > { %680 = vmatpush1.bf16.msra.mxu0 %v679_v46  ;;  %v685_v63 = vpack.c.bf16 %v308_v60, %v306_v58  ;;  %v305_v0 = vld [vmem:[%s795_s29 + $0x260] sm:$0xff]  ;;  %v255_v3 = vld [vmem:[%s795_s29 + $0xd0] sm:$0xff]  ;;  %v310_v4 = vld [vmem:[%s795_s29 + $0x288] sm:$0xff] }
  0x20   : > { %682 = vmatprep.subr.bf16.mxu0 %v681_v54  ;;  %v312_v5 = vld [vmem:[%s795_s29 + $0x298] sm:$0xff]  ;;  %v258_v6 = vld [vmem:[%s795_s29 + $0xe8] sm:$0xff]  ;;  %v687_v8 = vpack.c.bf16 %v307_v1, %v305_v0  ;;  %v635_v9 = vpack.c.bf16 %v255_v3, %v253_v62  ;;  %v257_v10 = vld [vmem:[%s795_s29 + $0xe0] sm:$0xff] }
  0x21   : > { %624 = vmatpush1.bf16.msra.mxu1 %v623_v33  ;;  %v260_v7 = vld [vmem:[%s795_s29 + $0xf8] sm:$0xff]  ;;  %v689_v11 = vpack.c.bf16 %v312_v5, %v310_v4  ;;  %v309_v12 = vld [vmem:[%s795_s29 + $0x280] sm:$0xff]  ;;  %v311_v13 = vld [vmem:[%s795_s29 + $0x290] sm:$0xff] }
  0x22   : > { %626 = vmatprep.subr.bf16.mxu1 %v625_v38  ;;  %v637_v14 = vpack.c.bf16 %v260_v7, %v258_v6  ;;  %v259_v15 = vld [vmem:[%s795_s29 + $0xf0] sm:$0xff]  ;;  %v314_v16 = vld [vmem:[%s795_s29 + $0x2a8] sm:$0xff]  ;;  %v316_v17 = vld [vmem:[%s795_s29 + $0x2b8] sm:$0xff]  ;;  %v691_v20 = vpack.c.bf16 %v311_v13, %v309_v12 }
  0x23   : > { %684 = vmatpush1.bf16.msra.mxu0 %v683_v59  ;;  %v262_v18 = vld [vmem:[%s795_s29 + $0x108] sm:$0xff]  ;;  %v264_v19 = vld [vmem:[%s795_s29 + $0x118] sm:$0xff]  ;;  %v639_v21 = vpack.c.bf16 %v259_v15, %v257_v10  ;;  %v261_v22 = vld [vmem:[%s795_s29 + $0x100] sm:$0xff]  ;;  %v693_v23 = vpack.c.bf16 %v316_v17, %v314_v16 }
  0x24   : > { %686 = vmatprep.subr.bf16.mxu0 %v685_v63  ;;  %v313_v24 = vld [vmem:[%s795_s29 + $0x2a0] sm:$0xff]  ;;  %v315_v25 = vld [vmem:[%s795_s29 + $0x2b0] sm:$0xff]  ;;  %v641_v26 = vpack.c.bf16 %v264_v19, %v262_v18  ;;  %v318_v28 = vld [vmem:[%s795_s29 + $0x2c8] sm:$0xff] }
  0x25   : > { %628 = vmatpush1.bf16.msra.mxu1 %v627_v47  ;;  %v263_v27 = vld [vmem:[%s795_s29 + $0x110] sm:$0xff]  ;;  %v320_v29 = vld [vmem:[%s795_s29 + $0x2d8] sm:$0xff]  ;;  %v266_v30 = vld [vmem:[%s795_s29 + $0x128] sm:$0xff]  ;;  %v695_v32 = vpack.c.bf16 %v315_v25, %v313_v24 }
  0x26   : > { %630 = vmatprep.subr.bf16.mxu1 %v629_v51  ;;  %v268_v31 = vld [vmem:[%s795_s29 + $0x138] sm:$0xff]  ;;  %v643_v33 = vpack.c.bf16 %v263_v27, %v261_v22  ;;  %v265_v34 = vld [vmem:[%s795_s29 + $0x120] sm:$0xff]  ;;  %v697_v35 = vpack.c.bf16 %v320_v29, %v318_v28  ;;  %v319_v37 = vld [vmem:[%s795_s29 + $0x2d0] sm:$0xff] }
  0x27   : > { %688 = vmatpush1.bf16.msra.mxu0 %v687_v8  ;;  %v317_v36 = vld [vmem:[%s795_s29 + $0x2c0] sm:$0xff]  ;;  %v645_v38 = vpack.c.bf16 %v268_v31, %v266_v30  ;;  %v267_v39 = vld [vmem:[%s795_s29 + $0x130] sm:$0xff]  ;;  %v322_v40 = vld [vmem:[%s795_s29 + $0x2e8] sm:$0xff] }
  0x28   : > { %690 = vmatprep.subr.bf16.mxu0 %v689_v11  ;;  %v324_v41 = vld [vmem:[%s795_s29 + $0x2f8] sm:$0xff]  ;;  %v270_v42 = vld [vmem:[%s795_s29 + $0x148] sm:$0xff]  ;;  %v699_v44 = vpack.c.bf16 %v319_v37, %v317_v36  ;;  %v647_v45 = vpack.c.bf16 %v267_v39, %v265_v34  ;;  %v269_v46 = vld [vmem:[%s795_s29 + $0x140] sm:$0xff] }
  0x29   : > { %632 = vmatpush1.bf16.msra.mxu1 %v631_v61  ;;  %v272_v43 = vld [vmem:[%s795_s29 + $0x158] sm:$0xff]  ;;  %v701_v47 = vpack.c.bf16 %v324_v41, %v322_v40  ;;  %v321_v48 = vld [vmem:[%s795_s29 + $0x2e0] sm:$0xff]  ;;  %v323_v49 = vld [vmem:[%s795_s29 + $0x2f0] sm:$0xff] }
  0x2a   : > { %634 = vmatprep.subr.bf16.mxu1 %v633_v2  ;;  %v649_v50 = vpack.c.bf16 %v272_v43, %v270_v42  ;;  %v271_v51 = vld [vmem:[%s795_s29 + $0x150] sm:$0xff]  ;;  %v326_v52 = vld [vmem:[%s795_s29 + $0x308] sm:$0xff]  ;;  %v328_v53 = vld [vmem:[%s795_s29 + $0x318] sm:$0xff]  ;;  %v703_v56 = vpack.c.bf16 %v323_v49, %v321_v48 }
  0x2b   : > { %692 = vmatpush1.bf16.msra.mxu0 %v691_v20  ;;  %v274_v54 = vld [vmem:[%s795_s29 + $0x168] sm:$0xff]  ;;  %v276_v55 = vld [vmem:[%s795_s29 + $0x178] sm:$0xff]  ;;  %v651_v57 = vpack.c.bf16 %v271_v51, %v269_v46  ;;  %v705_v58 = vpack.c.bf16 %v328_v53, %v326_v52  ;;  %v325_v59 = vld [vmem:[%s795_s29 + $0x300] sm:$0xff] }
  0x2c   : > { %694 = vmatprep.subr.bf16.mxu0 %v693_v23  ;;  %v327_v60 = vld [vmem:[%s795_s29 + $0x310] sm:$0xff]  ;;  %v653_v61 = vpack.c.bf16 %v276_v55, %v274_v54  ;;  %v273_v62 = vld [vmem:[%s795_s29 + $0x160] sm:$0xff]  ;;  %v278_v0 = vld [vmem:[%s795_s29 + $0x188] sm:$0xff] }
  0x2d   : > { %636 = vmatpush1.bf16.msra.mxu1 %v635_v9  ;;  %v275_v63 = vld [vmem:[%s795_s29 + $0x170] sm:$0xff]  ;;  %v280_v1 = vld [vmem:[%s795_s29 + $0x198] sm:$0xff]  ;;  %v707_v2 = vpack.c.bf16 %v327_v60, %v325_v59  ;;  %v277_v5 = vld [vmem:[%s795_s29 + $0x180] sm:$0xff] }
  0x2e   : > { %638 = vmatprep.subr.bf16.mxu1 %v637_v14  ;;  %v655_v3 = vpack.c.bf16 %v275_v63, %v273_v62  ;;  %v657_v4 = vpack.c.bf16 %v280_v1, %v278_v0  ;;  %v279_v6 = vld [vmem:[%s795_s29 + $0x190] sm:$0xff]  ;;  %v282_v7 = vld [vmem:[%s795_s29 + $0x1a8] sm:$0xff]  ;;  %v284_v8 = vld [vmem:[%s795_s29 + $0x1b8] sm:$0xff] }
  0x2f   : > { %696 = vmatpush1.bf16.msra.mxu0 %v695_v32  ;;  %v227_v9 = vld [vmem:[%s917_s1 + $0x10] sm:$0xff]  ;;  %v659_v10 = vpack.c.bf16 %v279_v6, %v277_v5  ;;  %v661_v11 = vpack.c.bf16 %v284_v8, %v282_v7  ;;  %v281_v12 = vld [vmem:[%s795_s29 + $0x1a0] sm:$0xff]  ;;  %v286_v14 = vld [vmem:[%s795_s29 + $0x1c8] sm:$0xff] }
  0x30   : > { %698 = vmatprep.subr.bf16.mxu0 %v697_v35  ;;  %v283_v13 = vld [vmem:[%s795_s29 + $0x1b0] sm:$0xff]  ;;  %v288_v15 = vld [vmem:[%s795_s29 + $0x1d8] sm:$0xff]  ;;  %v285_v18 = vld [vmem:[%s795_s29 + $0x1c0] sm:$0xff] }
  0x31   : > { %640 = vmatpush1.bf16.msra.mxu1 %v639_v21  ;;  %v663_v16 = vpack.c.bf16 %v283_v13, %v281_v12  ;;  %v665_v17 = vpack.c.bf16 %v288_v15, %v286_v14  ;;  %v287_v19 = vld [vmem:[%s795_s29 + $0x1d0] sm:$0xff]  ;;  %v290_v20 = vld [vmem:[%s795_s29 + $0x1e8] sm:$0xff]  ;;  %v292_v21 = vld [vmem:[%s795_s29 + $0x1f8] sm:$0xff] }
  0x32   : > { %642 = vmatprep.subr.bf16.mxu1 %v641_v26  ;;  %v667_v22 = vpack.c.bf16 %v287_v19, %v285_v18  ;;  %v669_v23 = vpack.c.bf16 %v292_v21, %v290_v20  ;;  %v289_v24 = vld [vmem:[%s795_s29 + $0x1e0] sm:$0xff]  ;;  %v291_v25 = vld [vmem:[%s795_s29 + $0x1f0] sm:$0xff] }
  0x33   : > { %700 = vmatpush1.bf16.msra.mxu0 %v699_v44  ;;  %v671_v26 = vpack.c.bf16 %v291_v25, %v289_v24  ;;  %v225_v27 = vld [vmem:[%s917_s1] sm:$0xff] }
  0x34   : > { %702 = vmatprep.subr.bf16.mxu0 %v701_v47  ;;  %v522_v52 = vld [vmem:[%s919_s3] sm:$0xff] }
  0x35   : > { %644 = vmatpush1.bf16.msra.mxu1 %v643_v33  ;;  %v530_v53 = vld [vmem:[%s920_s4] sm:$0xff] }
  0x36   : > { %646 = vmatprep.subr.bf16.mxu1 %v645_v38 }
  0x37   : > { %704 = vmatpush1.bf16.msra.mxu0 %v703_v56 }
  0x38   : > { %706 = vmatprep.subr.bf16.mxu0 %v705_v58 }
  0x39   : > { %648 = vmatpush1.bf16.msra.mxu1 %v647_v45 }
  0x3a   : > { %650 = vmatprep.subr.bf16.mxu1 %v649_v50 }
  0x3b   : > { %708 = vmatpush1.bf16.msra.mxu0 %v707_v2 }
  0x3d   : > { %652 = vmatpush1.bf16.msra.mxu1 %v651_v57 }
  0x3e   : > { %654 = vmatprep.subr.bf16.mxu1 %v653_v61  ;;  %475 = vmatmul.mubr.f32.vlgmr.msra.gmra.mrb[0].mxu0 %v227_v9 }
  0x41   : > { %656 = vmatpush1.bf16.msra.mxu1 %v655_v3 }
  0x42   : > { %658 = vmatprep.subr.bf16.mxu1 %v657_v4 }
  0x45   : > { %660 = vmatpush1.bf16.msra.mxu1 %v659_v10 }
  0x46   : > { %662 = vmatprep.subr.bf16.mxu1 %v661_v11 }
  0x49   : > { %664 = vmatpush1.bf16.msra.mxu1 %v663_v16 }
  0x4a   : > { %666 = vmatprep.subr.bf16.mxu1 %v665_v17 }
  0x4d   : > { %668 = vmatpush1.bf16.msra.mxu1 %v667_v22 }
  0x4e   : > { %670 = vmatprep.subr.bf16.mxu1 %v669_v23 }
  0x51   : > { %672 = vmatpush1.bf16.msra.mxu1 %v671_v26 }
  0x54   : > { %404 = vmatmul.mubr.f32.vlgmr.msra.gmra.mrb[0].mxu1 %v225_v27 }
  0x87   : > { %v333_v30 = vpop.permute.xlu0 %332 }
 0x111   : > { %v476_v28 = vpop.f32.mrb[0].mxu0 }
 0x112   : > { %v478_v29 = vpop.f32.mrb[1].mxu0 }
 0x127   : > { %v405_v31 = vpop.f32.mrb[0].mxu1 }
 0x128   : > { %v406_v32 = vadd.f32 %v405_v31, %v333_v30  ;;  %v407_v33 = vpop.f32.mrb[1].mxu1 }
 0x129   : > { %v408_v34 = vadd.f32 %v407_v33, %v333_v30 }
 0x12a   : > { %v477_v35 = vadd.f32 %v476_v28, %v406_v32 }
 0x12b   : > { %v479_v36 = vadd.f32 %v478_v29, %v408_v34 }
 0x12d   : > { %v481_v37 = vadd.f32 %v479_v36, %v477_v35 }
 0x12f   : > { %482 = vadd.xlane.f32.xlu0 %v481_v37 }
 0x1bc   : > { %v483_v38 = vpop.xlane.xlu0 %482 }
 0x1bd   : > { %v484_v39 = vrot.slane %v483_v38, 4 }
 0x1bf   : > { %v485_v40 = vadd.f32 %v484_v39, %v483_v38 }
 0x1c1   : > { %v486_v41 = vrot.slane %v485_v40, 2 }
 0x1c3   : > { %v487_v42 = vadd.f32 %v486_v41, %v485_v40 }
 0x1c5   : > { %v488_v43 = vrot.slane %v487_v42, 1 }
 0x1c7   : > { %v489_v44 = vadd.f32 %v488_v43, %v487_v42 }
 0x1c9   : > { %714 = vpush %v489_v44 }
 0x1fa   : > { %s715_s9 = spop %714 }
 0x1fb   : > { %v491_v45 = vstv %s715_s9 }
 0x1fc   : > { %v493_v46 = vmul.f32 0.00048828125, %v491_v45 }
 0x1fe   : > { %v494_v47 = vsub.f32 %v477_v35, %v493_v46  ;;  %v495_v48 = vsub.f32 %v479_v36, %v493_v46 }
 0x200   : > { %v496_v49 = vmul.f32 %v494_v47, %v494_v47  ;;  %v497_v50 = vmul.f32 %v495_v48, %v495_v48 }
 0x202   : > { %v498_v51 = vadd.f32 %v497_v50, %v496_v49 }
 0x204   : > { %499 = vadd.xlane.f32.xlu1 %v498_v51 }
 0x215   : > { %525 = vperm.xlu1 %728, %v522_v52  }
 0x219   : > { %533 = vperm.xlu1 %728, %v530_v53  }
 0x291   : > { %v500_v54 = vpop.xlane.xlu1 %499 }
 0x292   : > { %v501_v55 = vrot.slane %v500_v54, 4 }
 0x294   : > { %v502_v56 = vadd.f32 %v501_v55, %v500_v54 }
 0x295   : > { %v526_v5 = vpop.permute.xlu1 %525 }
 0x296   : > { %v503_v57 = vrot.slane %v502_v56, 2 }
 0x298   : > { %v504_v58 = vadd.f32 %v503_v57, %v502_v56 }
 0x299   : > { %v534_v11 = vpop.permute.xlu1 %533 }
 0x29a   : > { %v505_v59 = vrot.slane %v504_v58, 1 }
 0x29c   : > { %v506_v60 = vadd.f32 %v505_v59, %v504_v58 }
 0x29e   : > { %716 = vpush %v506_v60 }
 0x2cf   : > { %s717_s14 = spop %716 }
 0x2d0   : > { %v508_v61 = vstv %s717_s14 }
 0x2d1   : > { %v510_v62 = vmul.f32 0.0004885198, %v508_v61 }
 0x2d3   : > { %729 = vrsqrt.f32 %v510_v62  ;;  %vm513_vm1 = vcmp.eq.f32.partialorder %v510_v62, inf  ;;  %v516_v1 = vand.u32 2147483648, %v510_v62  ;;  %vm515_vm2 = vcmp.eq.f32.partialorder %v510_v62, 0.0 }
 0x2dd   : > { %v730_v63 = vpop.eup %729 }
 0x2de   : > { %v512_v0 = vmul.f32 %v730_v63, %v510_v62 }
 0x2e0   : > { %v514_v2 = vsel %vm513_vm1, %v510_v62, %v512_v0 }
 0x2e1   : > { %v517_v3 = vsel %vm515_vm2, %v516_v1, %v514_v2 }
 0x2e2   : > { %v518_v4 = vadd.f32 1e-05, %v517_v3 }
 0x2e4   : > { %731 = vrcp.f32 %v518_v4 }
 0x2ee   : > { %v732_v6 = vpop.eup %731 }
 0x2ef   : > { %v520_v7 = vmul.f32 %v732_v6, %v494_v47  ;;  %v521_v8 = vmul.f32 %v732_v6, %v495_v48 }
 0x2f1   : > { %v528_v9 = vmul.f32 %v526_v5, %v520_v7  ;;  %v529_v10 = vmul.f32 %v526_v5, %v521_v8 }
 0x2f3   : > { %v536_v12 = vadd.f32 %v534_v11, %v528_v9  ;;  %v537_v13 = vadd.f32 %v534_v11, %v529_v10 }
 0x2f5   : > { %v538_v14 = vmax.f32 %v536_v12, 0.0  ;;  %v539_v15 = vmax.f32 %v537_v13, 0.0 }
 0x2f7   : > { %540 = vst [vmem:[%s224_s20] sm:$0xff] %v538_v14  ;;  %541 = vst [vmem:[%s224_s20 + $0x8] sm:$0xff] %v539_v15 }
 0x2f8 PF: > { %s15_s18 = sadd.s32 1, %s739_s18  }
 0x2f9   : > { %p12_p4 = scmp.ge.s32.totalorder %s15_s18, 4  }
 0x2fb   :  { %14 = sbr.rel (!%p12_p4) target bundleno = 1 (0x1), region = 70 }

// kernel: hit_forward.37
= control target key start
LH: loop header
LB: loop body
LE: loop exit
PB: predicated region body
PF: predicated region fallthrough
CT: control target
= control target key end

     0   :  { %s647_s12 = smov 0   ;;  %s787_s0 = inlined_call_operand.vmem [shape: f32[2,392,256], index: 0, kind: input, shape index: {}]   ;;  %s788_s1 = inlined_call_operand.vmem [shape: f32[4,392], index: 1, kind: input, shape index: {}]   ;;  %s789_s2 = inlined_call_operand.vmem [shape: f32[4,1], index: 2, kind: input, shape index: {}]   ;;  %s790_s3 = inlined_call_operand.vmem [shape: f32[2,4,256], index: 3, kind: output, shape index: {}]  }
   0x1 LB: > { %s489_s13 = sadd.s32 4294967295, %s624_s12   ;;  %p493_p0 = scmp.ge.s32.totalorder %s624_s12, 1  ;;  %s624_s12 = sphi %s647_s12, %s13_s12  }
   0x2   : > { %p137_p1 = scmp.lt.s32.totalorder %s624_s12, 3 }
   0x4   : > { %p138_p2 = pnand %p493_p0, %p137_p1 }
   0x5   : > { %p161_p3 = scmp.lt.s32.totalorder (!%p138_p2), %s489_s13, 1  ;;  %v658_v0 = vld [vmem:[%s788_s1] sm:$0xff] (!%p138_p2)  ;;  %v663_v1 = vld [vmem:[%s788_s1 + $0x8] sm:$0xff] (!%p138_p2)  ;;  %vm282_vm0 = vcmask (!%p138_p2), 64512   ;;  %v626_v4 = vmov (!%p138_p2), 0  }
   0x6   : > { %141 = sbr.rel (%p138_p2) target bundleno = 315 (0x13b), region = 32  ;;  %v279_v2 = vcombine.high (!%p138_p2), %v658_v0, %v658_v0  ;;  %v280_v3 = vcombine.high (!%p138_p2), %v663_v1, %v663_v1  ;;  %611 = vset.pattern.permute.xlu0 (!%p138_p2), %v626_v4  ;;  %v271_v5 = vld [vmem:[%s789_s2] sm:$0xf] (!%p138_p2) }
   0x7   : > { %274 = vperm.xlu0 (!%p138_p2), %611, %v271_v5  }
   0x8   : > { %349 = vmatprep.mubr.f32.mxu1 (!%p138_p2), %v279_v2  ;;  %497 = vmatprep.mubr.msk.f32.mxu0 (!%p138_p2), %vm282_vm0, %v280_v3 }
   0xd   : > { %s792_s13 = smov (!%p161_p3, %s489_s13), 1 }
   0xe   : > { %s601_s20 = smul.u32 784, %s792_s13  ;;  %s500_s24 = sshll.u32 %s792_s13, 3 }
   0xf   : > { %s170_s27 = scalar_lea.vmem %s790_s3, %s500_s24 }
  0x10   : > { %s678_s23 = scalar_lea.vmem %s787_s0, %s601_s20 }
  0x11   : > { %v174_v6 = vld [vmem:[%s678_s23 + $0x8] sm:$0xff]  ;;  %v176_v7 = vld [vmem:[%s678_s23 + $0x18] sm:$0xff]  ;;  %v173_v8 = vld [vmem:[%s678_s23] sm:$0xff] }
  0x12   : > { %v501_v9 = vpack.c.bf16 %v176_v7, %v174_v6  ;;  %v175_v10 = vld [vmem:[%s678_s23 + $0x10] sm:$0xff]  ;;  %v178_v11 = vld [vmem:[%s678_s23 + $0x28] sm:$0xff]  ;;  %v180_v12 = vld [vmem:[%s678_s23 + $0x38] sm:$0xff] }
  0x13   : > { %v503_v13 = vpack.c.bf16 %v175_v10, %v173_v8  ;;  %v505_v14 = vpack.c.bf16 %v180_v12, %v178_v11  ;;  %v177_v15 = vld [vmem:[%s678_s23 + $0x20] sm:$0xff]  ;;  %v179_v16 = vld [vmem:[%s678_s23 + $0x30] sm:$0xff]  ;;  %v182_v17 = vld [vmem:[%s678_s23 + $0x48] sm:$0xff] }
  0x14   : > { %502 = vmatprep.subr.bf16.mxu1 %v501_v9  ;;  %v184_v18 = vld [vmem:[%s678_s23 + $0x58] sm:$0xff]  ;;  %v507_v19 = vpack.c.bf16 %v179_v16, %v177_v15  ;;  %v181_v21 = vld [vmem:[%s678_s23 + $0x40] sm:$0xff]  ;;  %v183_v22 = vld [vmem:[%s678_s23 + $0x50] sm:$0xff] }
  0x15   : > { %504 = vmatpush1.bf16.msra.mxu1 %v503_v13  ;;  %v509_v20 = vpack.c.bf16 %v184_v18, %v182_v17  ;;  %v186_v23 = vld [vmem:[%s678_s23 + $0x68] sm:$0xff]  ;;  %v188_v24 = vld [vmem:[%s678_s23 + $0x78] sm:$0xff]  ;;  %v511_v25 = vpack.c.bf16 %v183_v22, %v181_v21  ;;  %v185_v27 = vld [vmem:[%s678_s23 + $0x60] sm:$0xff] }
  0x16   : > { %506 = vmatprep.subr.bf16.mxu1 %v505_v14  ;;  %v513_v26 = vpack.c.bf16 %v188_v24, %v186_v23  ;;  %v187_v28 = vld [vmem:[%s678_s23 + $0x70] sm:$0xff]  ;;  %v190_v29 = vld [vmem:[%s678_s23 + $0x88] sm:$0xff]  ;;  %v192_v30 = vld [vmem:[%s678_s23 + $0x98] sm:$0xff] }
  0x17   : > { %v238_v31 = vld [vmem:[%s678_s23 + $0x208] sm:$0xff]  ;;  %v240_v32 = vld [vmem:[%s678_s23 + $0x218] sm:$0xff]  ;;  %v515_v33 = vpack.c.bf16 %v187_v28, %v185_v27  ;;  %v189_v34 = vld [vmem:[%s678_s23 + $0x80] sm:$0xff]  ;;  %v517_v38 = vpack.c.bf16 %v192_v30, %v190_v29 }
  0x18   : > { %v565_v35 = vpack.c.bf16 %v240_v32, %v238_v31  ;;  %v237_v36 = vld [vmem:[%s678_s23 + $0x200] sm:$0xff]  ;;  %v239_v37 = vld [vmem:[%s678_s23 + $0x210] sm:$0xff]  ;;  %v242_v41 = vld [vmem:[%s678_s23 + $0x228] sm:$0xff] }
  0x19   : > { %508 = vmatpush1.bf16.msra.mxu1 %v507_v19  ;;  %v191_v39 = vld [vmem:[%s678_s23 + $0x90] sm:$0xff]  ;;  %v567_v40 = vpack.c.bf16 %v239_v37, %v237_v36  ;;  %v244_v42 = vld [vmem:[%s678_s23 + $0x238] sm:$0xff]  ;;  %v194_v43 = vld [vmem:[%s678_s23 + $0xa8] sm:$0xff] }
  0x1a   : > { %510 = vmatprep.subr.bf16.mxu1 %v509_v20  ;;  %v196_v44 = vld [vmem:[%s678_s23 + $0xb8] sm:$0xff]  ;;  %566 = vmatprep.subr.bf16.mxu0 %v565_v35  ;;  %v569_v45 = vpack.c.bf16 %v244_v42, %v242_v41  ;;  %v241_v46 = vld [vmem:[%s678_s23 + $0x220] sm:$0xff]  ;;  %v243_v47 = vld [vmem:[%s678_s23 + $0x230] sm:$0xff]  ;;  %v519_v48 = vpack.c.bf16 %v191_v39, %v189_v34 }
  0x1b   : > { %568 = vmatpush1.bf16.msra.mxu0 %v567_v40  ;;  %v193_v49 = vld [vmem:[%s678_s23 + $0xa0] sm:$0xff]  ;;  %v571_v50 = vpack.c.bf16 %v243_v47, %v241_v46  ;;  %v246_v51 = vld [vmem:[%s678_s23 + $0x248] sm:$0xff]  ;;  %v248_v52 = vld [vmem:[%s678_s23 + $0x258] sm:$0xff]  ;;  %v521_v53 = vpack.c.bf16 %v196_v44, %v194_v43 }
  0x1c   : > { %570 = vmatprep.subr.bf16.mxu0 %v569_v45  ;;  %v195_v54 = vld [vmem:[%s678_s23 + $0xb0] sm:$0xff]  ;;  %v573_v55 = vpack.c.bf16 %v248_v52, %v246_v51  ;;  %v245_v56 = vld [vmem:[%s678_s23 + $0x240] sm:$0xff]  ;;  %v198_v58 = vld [vmem:[%s678_s23 + $0xc8] sm:$0xff] }
  0x1d   : > { %512 = vmatpush1.bf16.msra.mxu1 %v511_v25  ;;  %v247_v57 = vld [vmem:[%s678_s23 + $0x250] sm:$0xff]  ;;  %v200_v59 = vld [vmem:[%s678_s23 + $0xd8] sm:$0xff]  ;;  %v250_v60 = vld [vmem:[%s678_s23 + $0x268] sm:$0xff]  ;;  %v523_v63 = vpack.c.bf16 %v195_v54, %v193_v49 }
  0x1e   : > { %514 = vmatprep.subr.bf16.mxu1 %v513_v26  ;;  %v575_v61 = vpack.c.bf16 %v247_v57, %v245_v56  ;;  %v252_v62 = vld [vmem:[%s678_s23 + $0x278] sm:$0xff]  ;;  %v197_v2 = vld [vmem:[%s678_s23 + $0xc0] sm:$0xff]  ;;  %v251_v5 = vld [vmem:[%s678_s23 + $0x270] sm:$0xff]  ;;  %v525_v6 = vpack.c.bf16 %v200_v59, %v198_v58 }
  0x1f   : > { %572 = vmatpush1.bf16.msra.mxu0 %v571_v50  ;;  %v577_v3 = vpack.c.bf16 %v252_v62, %v250_v60  ;;  %v249_v4 = vld [vmem:[%s678_s23 + $0x260] sm:$0xff]  ;;  %v199_v7 = vld [vmem:[%s678_s23 + $0xd0] sm:$0xff]  ;;  %v254_v8 = vld [vmem:[%s678_s23 + $0x288] sm:$0xff] }
  0x20   : > { %574 = vmatprep.subr.bf16.mxu0 %v573_v55  ;;  %v256_v9 = vld [vmem:[%s678_s23 + $0x298] sm:$0xff]  ;;  %v202_v10 = vld [vmem:[%s678_s23 + $0xe8] sm:$0xff]  ;;  %v579_v12 = vpack.c.bf16 %v251_v5, %v249_v4  ;;  %v527_v13 = vpack.c.bf16 %v199_v7, %v197_v2  ;;  %v201_v14 = vld [vmem:[%s678_s23 + $0xe0] sm:$0xff] }
  0x21   : > { %516 = vmatpush1.bf16.msra.mxu1 %v515_v33  ;;  %v204_v11 = vld [vmem:[%s678_s23 + $0xf8] sm:$0xff]  ;;  %v581_v15 = vpack.c.bf16 %v256_v9, %v254_v8  ;;  %v253_v16 = vld [vmem:[%s678_s23 + $0x280] sm:$0xff]  ;;  %v255_v17 = vld [vmem:[%s678_s23 + $0x290] sm:$0xff] }
  0x22   : > { %518 = vmatprep.subr.bf16.mxu1 %v517_v38  ;;  %v529_v18 = vpack.c.bf16 %v204_v11, %v202_v10  ;;  %v203_v19 = vld [vmem:[%s678_s23 + $0xf0] sm:$0xff]  ;;  %v258_v20 = vld [vmem:[%s678_s23 + $0x2a8] sm:$0xff]  ;;  %v260_v21 = vld [vmem:[%s678_s23 + $0x2b8] sm:$0xff]  ;;  %v583_v24 = vpack.c.bf16 %v255_v17, %v253_v16 }
  0x23   : > { %576 = vmatpush1.bf16.msra.mxu0 %v575_v61  ;;  %v206_v22 = vld [vmem:[%s678_s23 + $0x108] sm:$0xff]  ;;  %v208_v23 = vld [vmem:[%s678_s23 + $0x118] sm:$0xff]  ;;  %v531_v25 = vpack.c.bf16 %v203_v19, %v201_v14  ;;  %v205_v26 = vld [vmem:[%s678_s23 + $0x100] sm:$0xff]  ;;  %v585_v27 = vpack.c.bf16 %v260_v21, %v258_v20 }
  0x24   : > { %578 = vmatprep.subr.bf16.mxu0 %v577_v3  ;;  %v257_v28 = vld [vmem:[%s678_s23 + $0x2a0] sm:$0xff]  ;;  %v259_v29 = vld [vmem:[%s678_s23 + $0x2b0] sm:$0xff]  ;;  %v533_v30 = vpack.c.bf16 %v208_v23, %v206_v22  ;;  %v262_v32 = vld [vmem:[%s678_s23 + $0x2c8] sm:$0xff] }
  0x25   : > { %520 = vmatpush1.bf16.msra.mxu1 %v519_v48  ;;  %v207_v31 = vld [vmem:[%s678_s23 + $0x110] sm:$0xff]  ;;  %v264_v33 = vld [vmem:[%s678_s23 + $0x2d8] sm:$0xff]  ;;  %v210_v34 = vld [vmem:[%s678_s23 + $0x128] sm:$0xff]  ;;  %v587_v36 = vpack.c.bf16 %v259_v29, %v257_v28 }
  0x26   : > { %522 = vmatprep.subr.bf16.mxu1 %v521_v53  ;;  %v212_v35 = vld [vmem:[%s678_s23 + $0x138] sm:$0xff]  ;;  %v535_v37 = vpack.c.bf16 %v207_v31, %v205_v26  ;;  %v209_v38 = vld [vmem:[%s678_s23 + $0x120] sm:$0xff]  ;;  %v589_v39 = vpack.c.bf16 %v264_v33, %v262_v32  ;;  %v263_v41 = vld [vmem:[%s678_s23 + $0x2d0] sm:$0xff] }
  0x27   : > { %580 = vmatpush1.bf16.msra.mxu0 %v579_v12  ;;  %v261_v40 = vld [vmem:[%s678_s23 + $0x2c0] sm:$0xff]  ;;  %v537_v42 = vpack.c.bf16 %v212_v35, %v210_v34  ;;  %v211_v43 = vld [vmem:[%s678_s23 + $0x130] sm:$0xff]  ;;  %v266_v44 = vld [vmem:[%s678_s23 + $0x2e8] sm:$0xff] }
  0x28   : > { %582 = vmatprep.subr.bf16.mxu0 %v581_v15  ;;  %v268_v45 = vld [vmem:[%s678_s23 + $0x2f8] sm:$0xff]  ;;  %v214_v46 = vld [vmem:[%s678_s23 + $0x148] sm:$0xff]  ;;  %v591_v48 = vpack.c.bf16 %v263_v41, %v261_v40  ;;  %v539_v49 = vpack.c.bf16 %v211_v43, %v209_v38  ;;  %v265_v51 = vld [vmem:[%s678_s23 + $0x2e0] sm:$0xff] }
  0x29   : > { %524 = vmatpush1.bf16.msra.mxu1 %v523_v63  ;;  %v216_v47 = vld [vmem:[%s678_s23 + $0x158] sm:$0xff]  ;;  %v593_v50 = vpack.c.bf16 %v268_v45, %v266_v44  ;;  %v267_v52 = vld [vmem:[%s678_s23 + $0x2f0] sm:$0xff]  ;;  %v213_v54 = vld [vmem:[%s678_s23 + $0x140] sm:$0xff] }
  0x2a   : > { %526 = vmatprep.subr.bf16.mxu1 %v525_v6  ;;  %v541_v53 = vpack.c.bf16 %v216_v47, %v214_v46  ;;  %v215_v55 = vld [vmem:[%s678_s23 + $0x150] sm:$0xff]  ;;  %v218_v56 = vld [vmem:[%s678_s23 + $0x168] sm:$0xff]  ;;  %v220_v57 = vld [vmem:[%s678_s23 + $0x178] sm:$0xff]  ;;  %v595_v58 = vpack.c.bf16 %v267_v52, %v265_v51 }
  0x2b   : > { %584 = vmatpush1.bf16.msra.mxu0 %v583_v24  ;;  %v543_v59 = vpack.c.bf16 %v215_v55, %v213_v54  ;;  %v545_v60 = vpack.c.bf16 %v220_v57, %v218_v56  ;;  %v217_v61 = vld [vmem:[%s678_s23 + $0x160] sm:$0xff]  ;;  %v219_v62 = vld [vmem:[%s678_s23 + $0x170] sm:$0xff]  ;;  %v270_v63 = vld [vmem:[%s678_s23 + $0x308] sm:$0xff] }
  0x2c   : > { %586 = vmatprep.subr.bf16.mxu0 %v585_v27  ;;  %v222_v2 = vld [vmem:[%s678_s23 + $0x188] sm:$0xff]  ;;  %v224_v3 = vld [vmem:[%s678_s23 + $0x198] sm:$0xff]  ;;  %v547_v4 = vpack.c.bf16 %v219_v62, %v217_v61  ;;  %v269_v5 = vld [vmem:[%s678_s23 + $0x300] sm:$0xff] }
  0x2d   : > { %528 = vmatpush1.bf16.msra.mxu1 %v527_v13  ;;  %v549_v6 = vpack.c.bf16 %v224_v3, %v222_v2  ;;  %v221_v7 = vld [vmem:[%s678_s23 + $0x180] sm:$0xff]  ;;  %v223_v8 = vld [vmem:[%s678_s23 + $0x190] sm:$0xff]  ;;  %v226_v9 = vld [vmem:[%s678_s23 + $0x1a8] sm:$0xff] }
  0x2e   : > { %530 = vmatprep.subr.bf16.mxu1 %v529_v18  ;;  %v228_v10 = vld [vmem:[%s678_s23 + $0x1b8] sm:$0xff]  ;;  %v551_v11 = vpack.c.bf16 %v223_v8, %v221_v7  ;;  %v225_v13 = vld [vmem:[%s678_s23 + $0x1a0] sm:$0xff]  ;;  %v227_v14 = vld [vmem:[%s678_s23 + $0x1b0] sm:$0xff] }
  0x2f   : > { %588 = vmatpush1.bf16.msra.mxu0 %v587_v36  ;;  %v553_v12 = vpack.c.bf16 %v228_v10, %v226_v9  ;;  %v230_v15 = vld [vmem:[%s678_s23 + $0x1c8] sm:$0xff]  ;;  %v232_v16 = vld [vmem:[%s678_s23 + $0x1d8] sm:$0xff]  ;;  %v555_v17 = vpack.c.bf16 %v227_v14, %v225_v13  ;;  %v229_v19 = vld [vmem:[%s678_s23 + $0x1c0] sm:$0xff] }
  0x30   : > { %590 = vmatprep.subr.bf16.mxu0 %v589_v39  ;;  %v557_v18 = vpack.c.bf16 %v232_v16, %v230_v15  ;;  %v231_v20 = vld [vmem:[%s678_s23 + $0x1d0] sm:$0xff]  ;;  %v234_v21 = vld [vmem:[%s678_s23 + $0x1e8] sm:$0xff]  ;;  %v236_v22 = vld [vmem:[%s678_s23 + $0x1f8] sm:$0xff] }
  0x31   : > { %532 = vmatpush1.bf16.msra.mxu1 %v531_v25  ;;  %v559_v23 = vpack.c.bf16 %v231_v20, %v229_v19  ;;  %v233_v24 = vld [vmem:[%s678_s23 + $0x1e0] sm:$0xff]  ;;  %v235_v25 = vld [vmem:[%s678_s23 + $0x1f0] sm:$0xff] }
  0x32   : > { %534 = vmatprep.subr.bf16.mxu1 %v533_v30  ;;  %v563_v26 = vpack.c.bf16 %v235_v25, %v233_v24 }
  0x33   : > { %592 = vmatpush1.bf16.msra.mxu0 %v591_v48 }
  0x34   : > { %594 = vmatprep.subr.bf16.mxu0 %v593_v50 }
  0x35   : > { %536 = vmatpush1.bf16.msra.mxu1 %v535_v37 }
  0x36   : > { %538 = vmatprep.subr.bf16.mxu1 %v537_v42 }
  0x37   : > { %596 = vmatpush1.bf16.msra.mxu0 %v595_v58 }
  0x38   : > { %388 = vmatprep.subr.mxu0 %v270_v63 }
  0x39   : > { %540 = vmatpush1.bf16.msra.mxu1 %v539_v49 }
  0x3a   : > { %542 = vmatprep.subr.bf16.mxu1 %v541_v53 }
  0x3b   : > { %389 = vmatpush1.msra.mxu0 %v269_v5 }
  0x3c   : > { %421 = vmatmul.mubr.f32.vlgmr.msra.gmra.mrb[0].mxu0 %v663_v1  ;;  %v561_v1 = vpack.c.bf16 %v236_v22, %v234_v21 }
  0x3d   : > { %544 = vmatpush1.bf16.msra.mxu1 %v543_v59 }
  0x3e   : > { %546 = vmatprep.subr.bf16.mxu1 %v545_v60 }
  0x41   : > { %548 = vmatpush1.bf16.msra.mxu1 %v547_v4 }
  0x42   : > { %550 = vmatprep.subr.bf16.mxu1 %v549_v6 }
  0x45   : > { %552 = vmatpush1.bf16.msra.mxu1 %v551_v11 }
  0x46   : > { %554 = vmatprep.subr.bf16.mxu1 %v553_v12 }
  0x49   : > { %556 = vmatpush1.bf16.msra.mxu1 %v555_v17 }
  0x4a   : > { %558 = vmatprep.subr.bf16.mxu1 %v557_v18 }
  0x4d   : > { %560 = vmatpush1.bf16.msra.mxu1 %v559_v23 }
  0x4e   : > { %562 = vmatprep.subr.bf16.mxu1 %v561_v1 }
  0x51   : > { %564 = vmatpush1.bf16.msra.mxu1 %v563_v26 }
  0x54   : > { %350 = vmatmul.mubr.f32.vlgmr.msra.gmra.mrb[0].mxu1 %v658_v0 }
  0x86   : > { %v275_v29 = vpop.permute.xlu0 %274 }
 0x10f   : > { %v422_v27 = vpop.f32.mrb[0].mxu0 }
 0x110   : > { %v424_v28 = vpop.f32.mrb[1].mxu0 }
 0x127   : > { %v351_v30 = vpop.f32.mrb[0].mxu1 }
 0x128   : > { %v352_v31 = vadd.f32 %v351_v30, %v275_v29  ;;  %v353_v32 = vpop.f32.mrb[1].mxu1 }
 0x129   : > { %v354_v33 = vadd.f32 %v353_v32, %v275_v29 }
 0x12a   : > { %v423_v34 = vadd.f32 %v422_v27, %v352_v31 }
 0x12b   : > { %v425_v35 = vadd.f32 %v424_v28, %v354_v33 }
 0x12c   : > { %614 = vtanh.f32 %v423_v34 }
 0x12d   : > { %616 = vtanh.f32 %v425_v35 }
 0x136   : > { %v615_v36 = vpop.eup %614 }
 0x137   : > { %v617_v37 = vpop.eup %616 }
 0x138   : > { %v431_v38 = vcombine.low %v615_v36, %v617_v37 }
 0x13a   : > { %433 = vst [vmem:[%s170_s27] sm:$0xff] %v431_v38 }
 0x13b PF: > { %s13_s12 = sadd.s32 1, %s624_s12  }
 0x13c   : > { %p10_p4 = scmp.ge.s32.totalorder %s13_s12, 4  }
 0x13e   :  { %12 = sbr.rel (!%p10_p4) target bundleno = 1 (0x1), region = 62 }

</bundles_post_ra>
